<compile_context>
chip_gen: v7x
topology: tpu7x:2x2x1
jax: 0.10.0
libtpu: 0.0.40
codegen_flags: <defaults>
</compile_context>

<pallas_src>
import functools
import math

import numpy as np
import jax
import jax.numpy as jnp
from jax.experimental import pallas as pl
from jax.experimental.pallas import tpu as pltpu

BF16 = jnp.bfloat16
F32 = jnp.float32

LANE = 128                       # TPU lane width; all padded dims are multiples of this
_VMEM_LIMIT = 32 * 1024 * 1024   # safe on v5e/v6e (128 MiB) and v7x (64 MiB); usage ~2 MiB


def _round_up(x, m):
    return ((x + m - 1) // m) * m


# ----------------------------- in-kernel helpers -----------------------------

def _add_layernorm(y, res, g, b, *, d_real, eps):
    """LayerNorm(y + res) over the first d_real lanes (padded lanes stay exactly zero)."""
    s = y + res                                   # (rows, DP); padded lanes are zero
    dp = s.shape[-1]
    inv_d = 1.0 / d_real
    if dp == d_real:
        mean = jnp.sum(s, axis=-1, keepdims=True) * inv_d
        c = s - mean
    else:
        lane = jax.lax.broadcasted_iota(jnp.int32, (1, dp), 1)
        lane_mask = (lane < d_real).astype(F32)   # 1.0 on real lanes, 0.0 on padding
        mean = jnp.sum(s, axis=-1, keepdims=True) * inv_d   # pads are zero -> exact
        c = (s - mean) * lane_mask
    var = jnp.sum(c * c, axis=-1, keepdims=True) * inv_d
    # g/b are zero on padded lanes, so the output keeps the zero-padding invariant.
    return c * jax.lax.rsqrt(var + eps) * g + b


def _head_masks(dp, n_head, dk):
    """Per-head lane masks (1, DP): 1.0 on lanes [h*dk, (h+1)*dk), 0.0 elsewhere."""
    lane = jax.lax.broadcasted_iota(jnp.int32, (1, dp), 1)
    return [jnp.logical_and(lane >= h * dk, lane < (h + 1) * dk).astype(F32)
            for h in range(n_head)]


def _mha(q_all, k_all, v_all, keep, wo, bo, head_masks, *, scale):
    """Multi-head attention on head-compact 128-lane activations + fused O-projection.

    q_all: (Sq, DP) f32, k_all/v_all: (Sk, DP) f32; head h occupies lanes [h*dk, (h+1)*dk).
    keep: bool, broadcastable to (Sq, Sk); False -> masked_fill(-10000) like the reference.
    wo: (DP, DP) bf16 (real d_model x d_model block); bo: (1, DP) f32.
    """
    k_bf = k_all.astype(BF16)
    scores = []
    for m in head_masks:                           # static loop; per-head score matmul
        qh = (q_all * m).astype(BF16)              # zero every lane outside head h
        s = jax.lax.dot_general(qh, k_bf, (((1,), (1,)), ((), ())),
                                preferred_element_type=F32)              # (Sq, Sk)
        scores.append(s * scale)
    s3 = jnp.stack(scores, axis=0)                 # (H, Sq, Sk)
    s3 = jnp.where(keep[None], s3, -10000.0)       # masked_fill(mask == 0, -10000)
    s3 = s3 - jnp.max(s3, axis=-1, keepdims=True)  # softmax batched over all heads at once
    p3 = jnp.exp(s3)
    p3 = p3 / jnp.sum(p3, axis=-1, keepdims=True)  # exact division (reference parity)
    ctx = None
    for h, m in enumerate(head_masks):
        vh = (v_all * m).astype(BF16)              # head-h lanes only
        c = jnp.dot(p3[h].astype(BF16), vh, preferred_element_type=F32)  # (Sq, DP)
        ctx = c if ctx is None else ctx + c        # disjoint lane support == concat(heads)
    # single fused O-projection over all heads
    return jnp.dot(ctx.astype(BF16), wo, preferred_element_type=F32) + bo


# ----------------------------- fused whole-stack kernels -----------------------------

def _encoder_stack_kernel(x_ref, keep_ref,
                          wqkv_ref, bqkv_ref, wo_ref, bo_ref, ln1g_ref, ln1b_ref,
                          fw1_ref, fb1_ref, fw2_ref, fb2_ref, ln2g_ref, ln2b_ref,
                          o_ref, *, n_layers, n_head, d_real, eps):
    """All encoder layers fused: (QKV -> MHA -> O -> LN) + (FFN -> LN) per layer."""
    dp = x_ref.shape[-1]
    dk = d_real // n_head
    scale = 1.0 / math.sqrt(dk)
    head_masks = _head_masks(dp, n_head, dk)
    x = x_ref[...]                                           # (S, DP) f32
    keep = keep_ref[...] > 0.5                               # (1, S) source key mask
    for l in range(n_layers):                                # static unroll over layers
        qkv = jnp.dot(x.astype(BF16), wqkv_ref[l],
                      preferred_element_type=F32) + bqkv_ref[l]          # (S, 3*DP)
        attn = _mha(qkv[:, 0:dp], qkv[:, dp:2 * dp], qkv[:, 2 * dp:3 * dp],
                    keep, wo_ref[l], bo_ref[l], head_masks, scale=scale)
        x = _add_layernorm(attn, x, ln1g_ref[l], ln1b_ref[l], d_real=d_real, eps=eps)
        h = jnp.dot(x.astype(BF16), fw1_ref[l], preferred_element_type=F32) + fb1_ref[l]
        h = jnp.maximum(h, 0.0)
        y = jnp.dot(h.astype(BF16), fw2_ref[l], preferred_element_type=F32) + fb2_ref[l]
        x = _add_layernorm(y, x, ln2g_ref[l], ln2b_ref[l], d_real=d_real, eps=eps)
    o_ref[...] = x.astype(o_ref.dtype)


def _decoder_stack_kernel(x_ref, enc_ref, tq_ref, sk_ref,
                          swqkv_ref, sbqkv_ref, swo_ref, sbo_ref, ln1g_ref, ln1b_ref,
                          cwq_ref, cbq_ref, cwkv_ref, cbkv_ref, cwo_ref, cbo_ref,
                          ln2g_ref, ln2b_ref,
                          fw1_ref, fb1_ref, fw2_ref, fb2_ref, ln3g_ref, ln3b_ref,
                          outw_ref, outb_ref,
                          o_ref, *, n_layers, n_head, d_real, eps):
    """All decoder layers + final vocab projection fused into one kernel."""
    dp = x_ref.shape[-1]
    st = x_ref.shape[0]
    dk = d_real // n_head
    scale = 1.0 / math.sqrt(dk)
    head_masks = _head_masks(dp, n_head, dk)
    x = x_ref[...]                                           # (St, DP) f32
    enc = enc_ref[...].astype(BF16)                          # (Ss, DP) bf16
    # decoder self-attn mask = query-pad keep & causal (padded KEYS intentionally not masked,
    # matching the reference make_trg_mask); cross-attn mask = source key keep.
    tq = tq_ref[...] > 0.5                                   # (St, 1)
    qi = jax.lax.broadcasted_iota(jnp.int32, (st, st), 0)
    ki = jax.lax.broadcasted_iota(jnp.int32, (st, st), 1)
    self_keep = jnp.logical_and(tq, ki <= qi)                # (St, St)
    cross_keep = sk_ref[...] > 0.5                           # (1, Ss)
    for l in range(n_layers):                                # static unroll over layers
        # masked self-attention + residual LN
        qkv = jnp.dot(x.astype(BF16), swqkv_ref[l],
                      preferred_element_type=F32) + sbqkv_ref[l]
        attn = _mha(qkv[:, 0:dp], qkv[:, dp:2 * dp], qkv[:, 2 * dp:3 * dp],
                    self_keep, swo_ref[l], sbo_ref[l], head_masks, scale=scale)
        x = _add_layernorm(attn, x, ln1g_ref[l], ln1b_ref[l], d_real=d_real, eps=eps)
        # encoder-decoder cross-attention + residual LN
        q = jnp.dot(x.astype(BF16), cwq_ref[l], preferred_element_type=F32) + cbq_ref[l]
        kv = jnp.dot(enc, cwkv_ref[l], preferred_element_type=F32) + cbkv_ref[l]
        attn = _mha(q, kv[:, 0:dp], kv[:, dp:2 * dp],
                    cross_keep, cwo_ref[l], cbo_ref[l], head_masks, scale=scale)
        x = _add_layernorm(attn, x, ln2g_ref[l], ln2b_ref[l], d_real=d_real, eps=eps)
        # position-wise FFN + residual LN
        h = jnp.dot(x.astype(BF16), fw1_ref[l], preferred_element_type=F32) + fb1_ref[l]
        h = jnp.maximum(h, 0.0)
        y = jnp.dot(h.astype(BF16), fw2_ref[l], preferred_element_type=F32) + fb2_ref[l]
        x = _add_layernorm(y, x, ln3g_ref[l], ln3b_ref[l], d_real=d_real, eps=eps)
    # fused final projection to (lane-padded) vocabulary
    o_ref[...] = jnp.dot(x.astype(BF16), outw_ref[...],
                         preferred_element_type=F32) + outb_ref[...]


# ----------------------------- pallas_call wrappers -----------------------------

def _resident_spec(a):
    """Full-array, constant-index BlockSpec: the weight stays VMEM-resident across the grid."""
    if a.ndim == 3:
        return pl.BlockSpec(a.shape, lambda b: (0, 0, 0))
    return pl.BlockSpec(a.shape, lambda b: (0, 0))


_ENC_W = ("wqkv", "bqkv", "wo", "bo", "ln1g", "ln1b",
          "fw1", "fb1", "fw2", "fb2", "ln2g", "ln2b")
_DEC_W = ("swqkv", "sbqkv", "swo", "sbo", "ln1g", "ln1b",
          "cwq", "cbq", "cwkv", "cbkv", "cwo", "cbo", "ln2g", "ln2b",
          "fw1", "fb1", "fw2", "fb2", "ln3g", "ln3b", "outw", "outb")


def encoder_stack(x, src_keep_k, w, *, n_layers, n_head, d_real, eps=1e-12):
    B, S, DP = x.shape
    weights = [w[k] for k in _ENC_W]
    kernel = functools.partial(_encoder_stack_kernel, n_layers=n_layers, n_head=n_head,
                               d_real=d_real, eps=eps)
    return pl.pallas_call(
        kernel,
        out_shape=jax.ShapeDtypeStruct((B, S, DP), BF16),
        grid=(B,),
        in_specs=[pl.BlockSpec((None, S, DP), lambda b: (b, 0, 0)),
                  pl.BlockSpec((None, 1, S), lambda b: (b, 0, 0))]
                 + [_resident_spec(a) for a in weights],
        out_specs=pl.BlockSpec((None, S, DP), lambda b: (b, 0, 0)),
        compiler_params=pltpu.CompilerParams(
            dimension_semantics=("parallel",), vmem_limit_bytes=_VMEM_LIMIT),
    )(x, src_keep_k, *weights)


def decoder_stack(x, enc, trg_keep_q, src_keep_k, w, *, n_layers, n_head, d_real, eps=1e-12):
    B, St, DP = x.shape
    Ss = enc.shape[1]
    VP = w["outw"].shape[1]
    weights = [w[k] for k in _DEC_W]
    kernel = functools.partial(_decoder_stack_kernel, n_layers=n_layers, n_head=n_head,
                               d_real=d_real, eps=eps)
    return pl.pallas_call(
        kernel,
        out_shape=jax.ShapeDtypeStruct((B, St, VP), F32),
        grid=(B,),
        in_specs=[pl.BlockSpec((None, St, DP), lambda b: (b, 0, 0)),
                  pl.BlockSpec((None, Ss, DP), lambda b: (b, 0, 0)),
                  pl.BlockSpec((None, St, 1), lambda b: (b, 0, 0)),
                  pl.BlockSpec((None, 1, Ss), lambda b: (b, 0, 0))]
                 + [_resident_spec(a) for a in weights],
        out_specs=pl.BlockSpec((None, St, VP), lambda b: (b, 0, 0)),
        compiler_params=pltpu.CompilerParams(
            dimension_semantics=("parallel",), vmem_limit_bytes=_VMEM_LIMIT),
    )(x, enc, trg_keep_q, src_keep_k, *weights)


# ----------------------------- model glue (plain JAX) -----------------------------

def sinusoid_pe(max_len, d_model):
    pos = np.arange(max_len)[:, None].astype(np.float32)
    _2i = np.arange(0, d_model, 2).astype(np.float32)
    pe = np.zeros((max_len, d_model), np.float32)
    pe[:, 0::2] = np.sin(pos / (10000.0 ** (_2i / d_model)))
    pe[:, 1::2] = np.cos(pos / (10000.0 ** (_2i / d_model)))
    return jnp.asarray(pe)


def transformer_forward(src, trg, params, cfg):
    B, Ss = src.shape
    St = trg.shape[1]
    # Compact keep vectors; the (Sq, Sk) masks are built inside the fused kernels.
    src_keep_k = (src != cfg["src_pad_idx"]).astype(F32).reshape(B, 1, Ss)   # key mask
    trg_keep_q = (trg != cfg["trg_pad_idx"]).astype(F32).reshape(B, St, 1)   # query mask (+tril)
    # TODO(synk): token-embedding gather + positional add stay in XLA (tiny vocab); dropout is
    # identity (eval mode), matching the reference in .eval().
    x_src = jnp.take(params["enc_emb"], src, axis=0) + params["pe"][:Ss][None, :, :]
    x_trg = jnp.take(params["dec_emb"], trg, axis=0) + params["pe"][:St][None, :, :]
    enc = encoder_stack(x_src, src_keep_k, params["enc"],
                        n_layers=cfg["n_layers"], n_head=cfg["n_head"], d_real=cfg["d_model"])
    logits = decoder_stack(x_trg, enc, trg_keep_q, src_keep_k, params["dec"],
                           n_layers=cfg["n_layers"], n_head=cfg["n_head"],
                           d_real=cfg["d_model"])
    return logits[:, :, :cfg["dec_voc_size"]]                # drop vocab lane padding


# ----------------------------- deterministic init (padded/stacked weights) -------------

def init_params(key, cfg):
    D = cfg["d_model"]
    F = cfg["ffn_hidden"]
    V = cfg["dec_voc_size"]
    L = cfg["n_layers"]
    DP = _round_up(D, LANE)
    FP = _round_up(F, LANE)
    VP = _round_up(V, LANE)

    state = {"k": key}

    def nkey():
        state["k"], sub = jax.random.split(state["k"])
        return sub

    def dense(din, dout):
        return (jax.random.normal(nkey(), (din, dout), F32) * 0.02,
                jnp.zeros((dout,), F32))

    def pad_w(wt, rows, cols):
        return jnp.zeros((rows, cols), F32).at[:wt.shape[0], :wt.shape[1]].set(wt)

    def pad_b(bt, cols):
        return jnp.zeros((1, cols), F32).at[0, :bt.shape[0]].set(bt)

    def self_attn_layer():
        wq, bq = dense(D, D); wk, bk = dense(D, D); wv, bv = dense(D, D); wo, bo = dense(D, D)
        wqkv = jnp.concatenate([pad_w(wq, DP, DP), pad_w(wk, DP, DP), pad_w(wv, DP, DP)], 1)
        bqkv = jnp.concatenate([pad_b(bq, DP), pad_b(bk, DP), pad_b(bv, DP)], 1)
        return (wqkv.astype(BF16), bqkv, pad_w(wo, DP, DP).astype(BF16), pad_b(bo, DP))

    def cross_attn_layer():
        wq, bq = dense(D, D); wk, bk = dense(D, D); wv, bv = dense(D, D); wo, bo = dense(D, D)
        wkv = jnp.concatenate([pad_w(wk, DP, DP), pad_w(wv, DP, DP)], 1)
        bkv = jnp.concatenate([pad_b(bk, DP), pad_b(bv, DP)], 1)
        return (pad_w(wq, DP, DP).astype(BF16), pad_b(bq, DP), wkv.astype(BF16), bkv,
                pad_w(wo, DP, DP).astype(BF16), pad_b(bo, DP))

    def ffn_layer():
        w1, b1 = dense(D, F); w2, b2 = dense(F, D)
        return (pad_w(w1, DP, FP).astype(BF16), pad_b(b1, FP),
                pad_w(w2, FP, DP).astype(BF16), pad_b(b2, DP))

    def ln_layer():
        return (jnp.zeros((1, DP), F32).at[0, :D].set(1.0), jnp.zeros((1, DP), F32))

    def stack(fn, n):
        return [jnp.stack(p, axis=0) for p in zip(*[fn() for _ in range(n)])]

    # encoder stack weights (stacked along a leading layer axis; VMEM-resident in the kernel)
    e_sa = stack(self_attn_layer, L)
    e_l1 = stack(ln_layer, L)
    e_ff = stack(ffn_layer, L)
    e_l2 = stack(ln_layer, L)
    enc_w = dict(wqkv=e_sa[0], bqkv=e_sa[1], wo=e_sa[2], bo=e_sa[3],
                 ln1g=e_l1[0], ln1b=e_l1[1],
                 fw1=e_ff[0], fb1=e_ff[1], fw2=e_ff[2], fb2=e_ff[3],
                 ln2g=e_l2[0], ln2b=e_l2[1])

    # decoder stack weights
    d_sa = stack(self_attn_layer, L)
    d_l1 = stack(ln_layer, L)
    d_ca = stack(cross_attn_layer, L)
    d_l2 = stack(ln_layer, L)
    d_ff = stack(ffn_layer, L)
    d_l3 = stack(ln_layer, L)
    out_w, out_b = dense(D, V)
    dec_w = dict(swqkv=d_sa[0], sbqkv=d_sa[1], swo=d_sa[2], sbo=d_sa[3],
                 ln1g=d_l1[0], ln1b=d_l1[1],
                 cwq=d_ca[0], cbq=d_ca[1], cwkv=d_ca[2], cbkv=d_ca[3],
                 cwo=d_ca[4], cbo=d_ca[5],
                 ln2g=d_l2[0], ln2b=d_l2[1],
                 fw1=d_ff[0], fb1=d_ff[1], fw2=d_ff[2], fb2=d_ff[3],
                 ln3g=d_l3[0], ln3b=d_l3[1],
                 outw=pad_w(out_w, DP, VP).astype(BF16), outb=pad_b(out_b, VP))

    # embeddings + sinusoidal PE (padding_idx row zeroed, lane-padded to DP)
    enc_emb = jax.random.normal(nkey(), (cfg["enc_voc_size"], D), F32) * 0.02
    enc_emb = enc_emb.at[cfg["src_pad_idx"]].set(0.0)
    dec_emb = jax.random.normal(nkey(), (cfg["dec_voc_size"], D), F32) * 0.02
    dec_emb = dec_emb.at[cfg["trg_pad_idx"]].set(0.0)
    enc_emb_p = jnp.zeros((cfg["enc_voc_size"], DP), F32).at[:, :D].set(enc_emb)
    dec_emb_p = jnp.zeros((cfg["dec_voc_size"], DP), F32).at[:, :D].set(dec_emb)
    pe_p = jnp.zeros((cfg["max_len"], DP), F32).at[:, :D].set(sinusoid_pe(cfg["max_len"], D))

    return {"enc_emb": enc_emb_p, "dec_emb": dec_emb_p, "pe": pe_p,
            "enc": enc_w, "dec": dec_w}


# ----------------------------- main -----------------------------

if __name__ == "__main__":
    cfg = dict(src_pad_idx=1, trg_pad_idx=1, trg_sos_idx=2,
               enc_voc_size=11, dec_voc_size=13,
               d_model=32, n_head=4, max_len=16,
               ffn_hidden=64, n_layers=2, drop_prob=0.1)

    key = jax.random.PRNGKey(0)
    kp, ks, kt = jax.random.split(key, 3)
    params = init_params(kp, cfg)

    B, Ss, St = 2, 8, 8
    src = jax.random.randint(ks, (B, Ss), 0, cfg["enc_voc_size"], dtype=jnp.int32)
    trg = jax.random.randint(kt, (B, St), 0, cfg["dec_voc_size"], dtype=jnp.int32)

    fwd = jax.jit(lambda s, t, p: transformer_forward(s, t, p, cfg))
    out = jax.block_until_ready(fwd(src, trg, params))

    assert out.shape == (B, St, cfg["dec_voc_size"]), out.shape
    assert bool(jnp.all(jnp.isfinite(out)))
    print("KERNEL_OK")
</pallas_src>

<mosaic_0001>
module attributes {stable_mosaic.version = 11 : i64} {
  func.func @_encoder_stack_kernel(%arg0: i32, %arg1: memref<1x8x128xf32, #tpu.memory_space<vmem>>, %arg2: memref<1x1x8xf32, #tpu.memory_space<vmem>>, %arg3: memref<2x128x384xbf16, #tpu.memory_space<vmem>>, %arg4: memref<2x1x384xf32, #tpu.memory_space<vmem>>, %arg5: memref<2x128x128xbf16, #tpu.memory_space<vmem>>, %arg6: memref<2x1x128xf32, #tpu.memory_space<vmem>>, %arg7: memref<2x1x128xf32, #tpu.memory_space<vmem>>, %arg8: memref<2x1x128xf32, #tpu.memory_space<vmem>>, %arg9: memref<2x128x128xbf16, #tpu.memory_space<vmem>>, %arg10: memref<2x1x128xf32, #tpu.memory_space<vmem>>, %arg11: memref<2x128x128xbf16, #tpu.memory_space<vmem>>, %arg12: memref<2x1x128xf32, #tpu.memory_space<vmem>>, %arg13: memref<2x1x128xf32, #tpu.memory_space<vmem>>, %arg14: memref<2x1x128xf32, #tpu.memory_space<vmem>>, %arg15: memref<1x8x128xbf16, #tpu.memory_space<vmem>>) attributes {dimension_semantics = [#tpu.dimension_semantics<parallel>], iteration_bounds = array<i64: 2>, scalar_prefetch = 0 : i64, scratch_operands = 0 : i64, tpu.core_type = #tpu.core_type<tc>, window_params = [{transform_indices = @transform_0, window_bounds = array<i64: 1, 8, 128>}, {transform_indices = @transform_1, window_bounds = array<i64: 1, 1, 8>}, {pipeline_mode = #tpu.pipeline_mode<synchronous>, transform_indices = @transform_2, window_bounds = array<i64: 2, 128, 384>}, {pipeline_mode = #tpu.pipeline_mode<synchronous>, transform_indices = @transform_3, window_bounds = array<i64: 2, 1, 384>}, {pipeline_mode = #tpu.pipeline_mode<synchronous>, transform_indices = @transform_4, window_bounds = array<i64: 2, 128, 128>}, {pipeline_mode = #tpu.pipeline_mode<synchronous>, transform_indices = @transform_5, window_bounds = array<i64: 2, 1, 128>}, {pipeline_mode = #tpu.pipeline_mode<synchronous>, transform_indices = @transform_6, window_bounds = array<i64: 2, 1, 128>}, {pipeline_mode = #tpu.pipeline_mode<synchronous>, transform_indices = @transform_7, window_bounds = array<i64: 2, 1, 128>}, {pipeline_mode = #tpu.pipeline_mode<synchronous>, transform_indices = @transform_8, window_bounds = array<i64: 2, 128, 128>}, {pipeline_mode = #tpu.pipeline_mode<synchronous>, transform_indices = @transform_9, window_bounds = array<i64: 2, 1, 128>}, {pipeline_mode = #tpu.pipeline_mode<synchronous>, transform_indices = @transform_10, window_bounds = array<i64: 2, 128, 128>}, {pipeline_mode = #tpu.pipeline_mode<synchronous>, transform_indices = @transform_11, window_bounds = array<i64: 2, 1, 128>}, {pipeline_mode = #tpu.pipeline_mode<synchronous>, transform_indices = @transform_12, window_bounds = array<i64: 2, 1, 128>}, {pipeline_mode = #tpu.pipeline_mode<synchronous>, transform_indices = @transform_13, window_bounds = array<i64: 2, 1, 128>}, {transform_indices = @transform_14, window_bounds = array<i64: 1, 8, 128>}]} {
    %0 = tpu.iota {dimensions = array<i32: 1>} : vector<1x128xi32>
    %c0_i32 = arith.constant 0 : i32
    %1 = vector.broadcast %c0_i32 : i32 to vector<1x128xi32>
    %2 = arith.cmpi sge, %0, %1 : vector<1x128xi32>
    %c8_i32 = arith.constant 8 : i32
    %3 = vector.broadcast %c8_i32 : i32 to vector<1x128xi32>
    %4 = arith.cmpi slt, %0, %3 : vector<1x128xi32>
    %5 = arith.andi %2, %4 : vector<1x128xi1>
    %6 = arith.extui %5 : vector<1x128xi1> to vector<1x128xi32>
    %7 = arith.sitofp %6 : vector<1x128xi32> to vector<1x128xf32>
    %c8_i32_0 = arith.constant 8 : i32
    %8 = vector.broadcast %c8_i32_0 : i32 to vector<1x128xi32>
    %9 = arith.cmpi sge, %0, %8 : vector<1x128xi32>
    %c16_i32 = arith.constant 16 : i32
    %10 = vector.broadcast %c16_i32 : i32 to vector<1x128xi32>
    %11 = arith.cmpi slt, %0, %10 : vector<1x128xi32>
    %12 = arith.andi %9, %11 : vector<1x128xi1>
    %13 = arith.extui %12 : vector<1x128xi1> to vector<1x128xi32>
    %14 = arith.sitofp %13 : vector<1x128xi32> to vector<1x128xf32>
    %c16_i32_1 = arith.constant 16 : i32
    %15 = vector.broadcast %c16_i32_1 : i32 to vector<1x128xi32>
    %16 = arith.cmpi sge, %0, %15 : vector<1x128xi32>
    %c24_i32 = arith.constant 24 : i32
    %17 = vector.broadcast %c24_i32 : i32 to vector<1x128xi32>
    %18 = arith.cmpi slt, %0, %17 : vector<1x128xi32>
    %19 = arith.andi %16, %18 : vector<1x128xi1>
    %20 = arith.extui %19 : vector<1x128xi1> to vector<1x128xi32>
    %21 = arith.sitofp %20 : vector<1x128xi32> to vector<1x128xf32>
    %c24_i32_2 = arith.constant 24 : i32
    %22 = vector.broadcast %c24_i32_2 : i32 to vector<1x128xi32>
    %23 = arith.cmpi sge, %0, %22 : vector<1x128xi32>
    %c32_i32 = arith.constant 32 : i32
    %24 = vector.broadcast %c32_i32 : i32 to vector<1x128xi32>
    %25 = arith.cmpi slt, %0, %24 : vector<1x128xi32>
    %26 = arith.andi %23, %25 : vector<1x128xi1>
    %27 = arith.extui %26 : vector<1x128xi1> to vector<1x128xi32>
    %28 = arith.sitofp %27 : vector<1x128xi32> to vector<1x128xf32>
    %c0 = arith.constant 0 : index
    %c0_3 = arith.constant 0 : index
    %c0_4 = arith.constant 0 : index
    %29 = vector.load %arg1[%c0, %c0_3, %c0_4] : memref<1x8x128xf32, #tpu.memory_space<vmem>>, vector<1x8x128xf32>
    %30 = vector.shape_cast %29 : vector<1x8x128xf32> to vector<8x128xf32>
    %c0_5 = arith.constant 0 : index
    %c0_6 = arith.constant 0 : index
    %c0_7 = arith.constant 0 : index
    %31 = vector.load %arg2[%c0_5, %c0_6, %c0_7] : memref<1x1x8xf32, #tpu.memory_space<vmem>>, vector<1x1x8xf32>
    %32 = vector.shape_cast %31 : vector<1x1x8xf32> to vector<1x8xf32>
    %cst = arith.constant 5.000000e-01 : f32
    %33 = vector.broadcast %cst : f32 to vector<1x8xf32>
    %34 = arith.cmpf ogt, %32, %33 : vector<1x8xf32>
    %35 = arith.truncf %30 : vector<8x128xf32> to vector<8x128xbf16>
    %c0_8 = arith.constant 0 : index
    %c0_9 = arith.constant 0 : index
    %c0_10 = arith.constant 0 : index
    %36 = vector.load %arg3[%c0_8, %c0_9, %c0_10] : memref<2x128x384xbf16, #tpu.memory_space<vmem>>, vector<1x128x384xbf16>
    %37 = vector.shape_cast %36 : vector<1x128x384xbf16> to vector<128x384xbf16>
    %cst_11 = arith.constant dense<0.000000e+00> : vector<8x384xf32>
    %38 = tpu.matmul %35, %37, %cst_11 {dimension_numbers = #tpu.dot_dimension_numbers<[1], [0], [0], [1], [0, 0, 1, 1], [], []>} : vector<8x128xbf16>, vector<128x384xbf16>, vector<8x384xf32> -> vector<8x384xf32>
    %c0_12 = arith.constant 0 : index
    %c0_13 = arith.constant 0 : index
    %c0_14 = arith.constant 0 : index
    %39 = vector.load %arg4[%c0_12, %c0_13, %c0_14] : memref<2x1x384xf32, #tpu.memory_space<vmem>>, vector<1x1x384xf32>
    %40 = vector.shape_cast %39 : vector<1x1x384xf32> to vector<1x384xf32>
    %41 = vector.broadcast %40 : vector<1x384xf32> to vector<8x384xf32>
    %42 = arith.addf %38, %41 : vector<8x384xf32>
    %43 = vector.extract_strided_slice %42 {offsets = [0, 0], sizes = [8, 128], strides = [1, 1]} : vector<8x384xf32> to vector<8x128xf32>
    %44 = vector.extract_strided_slice %42 {offsets = [0, 128], sizes = [8, 128], strides = [1, 1]} : vector<8x384xf32> to vector<8x128xf32>
    %45 = vector.extract_strided_slice %42 {offsets = [0, 256], sizes = [8, 128], strides = [1, 1]} : vector<8x384xf32> to vector<8x128xf32>
    %c0_15 = arith.constant 0 : index
    %c0_16 = arith.constant 0 : index
    %c0_17 = arith.constant 0 : index
    %46 = vector.load %arg5[%c0_15, %c0_16, %c0_17] : memref<2x128x128xbf16, #tpu.memory_space<vmem>>, vector<1x128x128xbf16>
    %47 = vector.shape_cast %46 : vector<1x128x128xbf16> to vector<128x128xbf16>
    %c0_18 = arith.constant 0 : index
    %c0_19 = arith.constant 0 : index
    %c0_20 = arith.constant 0 : index
    %48 = vector.load %arg6[%c0_18, %c0_19, %c0_20] : memref<2x1x128xf32, #tpu.memory_space<vmem>>, vector<1x1x128xf32>
    %49 = vector.shape_cast %48 : vector<1x1x128xf32> to vector<1x128xf32>
    %50 = arith.truncf %44 : vector<8x128xf32> to vector<8x128xbf16>
    %51 = vector.broadcast %7 : vector<1x128xf32> to vector<8x128xf32>
    %52 = arith.mulf %43, %51 : vector<8x128xf32>
    %53 = arith.truncf %52 : vector<8x128xf32> to vector<8x128xbf16>
    %cst_21 = arith.constant dense<0.000000e+00> : vector<8x8xf32>
    %54 = tpu.matmul %53, %50, %cst_21 {dimension_numbers = #tpu.dot_dimension_numbers<[1], [1], [0], [0], [0, 0, 1, 0], [], []>} : vector<8x128xbf16>, vector<8x128xbf16>, vector<8x8xf32> -> vector<8x8xf32>
    %cst_22 = arith.constant 0.353553385 : f32
    %55 = vector.broadcast %cst_22 : f32 to vector<8x8xf32>
    %56 = arith.mulf %54, %55 : vector<8x8xf32>
    %57 = vector.broadcast %14 : vector<1x128xf32> to vector<8x128xf32>
    %58 = arith.mulf %43, %57 : vector<8x128xf32>
    %59 = arith.truncf %58 : vector<8x128xf32> to vector<8x128xbf16>
    %cst_23 = arith.constant dense<0.000000e+00> : vector<8x8xf32>
    %60 = tpu.matmul %59, %50, %cst_23 {dimension_numbers = #tpu.dot_dimension_numbers<[1], [1], [0], [0], [0, 0, 1, 0], [], []>} : vector<8x128xbf16>, vector<8x128xbf16>, vector<8x8xf32> -> vector<8x8xf32>
    %cst_24 = arith.constant 0.353553385 : f32
    %61 = vector.broadcast %cst_24 : f32 to vector<8x8xf32>
    %62 = arith.mulf %60, %61 : vector<8x8xf32>
    %63 = vector.broadcast %21 : vector<1x128xf32> to vector<8x128xf32>
    %64 = arith.mulf %43, %63 : vector<8x128xf32>
    %65 = arith.truncf %64 : vector<8x128xf32> to vector<8x128xbf16>
    %cst_25 = arith.constant dense<0.000000e+00> : vector<8x8xf32>
    %66 = tpu.matmul %65, %50, %cst_25 {dimension_numbers = #tpu.dot_dimension_numbers<[1], [1], [0], [0], [0, 0, 1, 0], [], []>} : vector<8x128xbf16>, vector<8x128xbf16>, vector<8x8xf32> -> vector<8x8xf32>
    %cst_26 = arith.constant 0.353553385 : f32
    %67 = vector.broadcast %cst_26 : f32 to vector<8x8xf32>
    %68 = arith.mulf %66, %67 : vector<8x8xf32>
    %69 = vector.broadcast %28 : vector<1x128xf32> to vector<8x128xf32>
    %70 = arith.mulf %43, %69 : vector<8x128xf32>
    %71 = arith.truncf %70 : vector<8x128xf32> to vector<8x128xbf16>
    %cst_27 = arith.constant dense<0.000000e+00> : vector<8x8xf32>
    %72 = tpu.matmul %71, %50, %cst_27 {dimension_numbers = #tpu.dot_dimension_numbers<[1], [1], [0], [0], [0, 0, 1, 0], [], []>} : vector<8x128xbf16>, vector<8x128xbf16>, vector<8x8xf32> -> vector<8x8xf32>
    %cst_28 = arith.constant 0.353553385 : f32
    %73 = vector.broadcast %cst_28 : f32 to vector<8x8xf32>
    %74 = arith.mulf %72, %73 : vector<8x8xf32>
    %75 = vector.shape_cast %56 : vector<8x8xf32> to vector<1x8x8xf32>
    %76 = vector.shape_cast %62 : vector<8x8xf32> to vector<1x8x8xf32>
    %77 = vector.shape_cast %68 : vector<8x8xf32> to vector<1x8x8xf32>
    %78 = vector.shape_cast %74 : vector<8x8xf32> to vector<1x8x8xf32>
    %79 = tpu.concatenate %75, %76, %77, %78 in 0 : vector<1x8x8xf32>, vector<1x8x8xf32>, vector<1x8x8xf32>, vector<1x8x8xf32> -> vector<4x8x8xf32>
    %80 = vector.shape_cast %34 : vector<1x8xi1> to vector<1x1x8xi1>
    %cst_29 = arith.constant -1.000000e+04 : f32
    %81 = vector.shape_cast %80 : vector<1x1x8xi1> to vector<1x1x8xi1>
    %82 = vector.broadcast %81 : vector<1x1x8xi1> to vector<4x8x8xi1>
    %83 = vector.broadcast %cst_29 : f32 to vector<4x8x8xf32>
    %84 = arith.select %82, %79, %83 : vector<4x8x8xi1>, vector<4x8x8xf32>
    %cst_30 = arith.constant dense<0xFF800000> : vector<4x8xf32>
    %85 = vector.multi_reduction <maximumf>, %84, %cst_30 [2] : vector<4x8x8xf32> to vector<4x8xf32>
    %86 = vector.shape_cast %85 : vector<4x8xf32> to vector<4x8x1xf32>
    %87 = vector.broadcast %86 : vector<4x8x1xf32> to vector<4x8x8xf32>
    %88 = arith.subf %84, %87 : vector<4x8x8xf32>
    %89 = math.exp %88 : vector<4x8x8xf32>
    %cst_31 = arith.constant dense<0.000000e+00> : vector<4x8xf32>
    %90 = vector.multi_reduction <add>, %89, %cst_31 [2] : vector<4x8x8xf32> to vector<4x8xf32>
    %91 = vector.shape_cast %90 : vector<4x8xf32> to vector<4x8x1xf32>
    %92 = vector.broadcast %91 : vector<4x8x1xf32> to vector<4x8x8xf32>
    %93 = arith.divf %89, %92 : vector<4x8x8xf32>
    %94 = vector.broadcast %7 : vector<1x128xf32> to vector<8x128xf32>
    %95 = arith.mulf %45, %94 : vector<8x128xf32>
    %96 = arith.truncf %95 : vector<8x128xf32> to vector<8x128xbf16>
    %97 = vector.extract_strided_slice %93 {offsets = [0, 0, 0], sizes = [1, 8, 8], strides = [1, 1, 1]} : vector<4x8x8xf32> to vector<1x8x8xf32>
    %98 = vector.shape_cast %97 : vector<1x8x8xf32> to vector<8x8xf32>
    %99 = arith.truncf %98 : vector<8x8xf32> to vector<8x8xbf16>
    %cst_32 = arith.constant dense<0.000000e+00> : vector<8x128xf32>
    %100 = tpu.matmul %99, %96, %cst_32 {dimension_numbers = #tpu.dot_dimension_numbers<[1], [0], [0], [1], [0, 0, 1, 1], [], []>} : vector<8x8xbf16>, vector<8x128xbf16>, vector<8x128xf32> -> vector<8x128xf32>
    %101 = vector.broadcast %14 : vector<1x128xf32> to vector<8x128xf32>
    %102 = arith.mulf %45, %101 : vector<8x128xf32>
    %103 = arith.truncf %102 : vector<8x128xf32> to vector<8x128xbf16>
    %104 = vector.extract_strided_slice %93 {offsets = [1, 0, 0], sizes = [1, 8, 8], strides = [1, 1, 1]} : vector<4x8x8xf32> to vector<1x8x8xf32>
    %105 = vector.shape_cast %104 : vector<1x8x8xf32> to vector<8x8xf32>
    %106 = arith.truncf %105 : vector<8x8xf32> to vector<8x8xbf16>
    %cst_33 = arith.constant dense<0.000000e+00> : vector<8x128xf32>
    %107 = tpu.matmul %106, %103, %cst_33 {dimension_numbers = #tpu.dot_dimension_numbers<[1], [0], [0], [1], [0, 0, 1, 1], [], []>} : vector<8x8xbf16>, vector<8x128xbf16>, vector<8x128xf32> -> vector<8x128xf32>
    %108 = arith.addf %100, %107 : vector<8x128xf32>
    %109 = vector.broadcast %21 : vector<1x128xf32> to vector<8x128xf32>
    %110 = arith.mulf %45, %109 : vector<8x128xf32>
    %111 = arith.truncf %110 : vector<8x128xf32> to vector<8x128xbf16>
    %112 = vector.extract_strided_slice %93 {offsets = [2, 0, 0], sizes = [1, 8, 8], strides = [1, 1, 1]} : vector<4x8x8xf32> to vector<1x8x8xf32>
    %113 = vector.shape_cast %112 : vector<1x8x8xf32> to vector<8x8xf32>
    %114 = arith.truncf %113 : vector<8x8xf32> to vector<8x8xbf16>
    %cst_34 = arith.constant dense<0.000000e+00> : vector<8x128xf32>
    %115 = tpu.matmul %114, %111, %cst_34 {dimension_numbers = #tpu.dot_dimension_numbers<[1], [0], [0], [1], [0, 0, 1, 1], [], []>} : vector<8x8xbf16>, vector<8x128xbf16>, vector<8x128xf32> -> vector<8x128xf32>
    %116 = arith.addf %108, %115 : vector<8x128xf32>
    %117 = vector.broadcast %28 : vector<1x128xf32> to vector<8x128xf32>
    %118 = arith.mulf %45, %117 : vector<8x128xf32>
    %119 = arith.truncf %118 : vector<8x128xf32> to vector<8x128xbf16>
    %120 = vector.extract_strided_slice %93 {offsets = [3, 0, 0], sizes = [1, 8, 8], strides = [1, 1, 1]} : vector<4x8x8xf32> to vector<1x8x8xf32>
    %121 = vector.shape_cast %120 : vector<1x8x8xf32> to vector<8x8xf32>
    %122 = arith.truncf %121 : vector<8x8xf32> to vector<8x8xbf16>
    %cst_35 = arith.constant dense<0.000000e+00> : vector<8x128xf32>
    %123 = tpu.matmul %122, %119, %cst_35 {dimension_numbers = #tpu.dot_dimension_numbers<[1], [0], [0], [1], [0, 0, 1, 1], [], []>} : vector<8x8xbf16>, vector<8x128xbf16>, vector<8x128xf32> -> vector<8x128xf32>
    %124 = arith.addf %116, %123 : vector<8x128xf32>
    %125 = arith.truncf %124 : vector<8x128xf32> to vector<8x128xbf16>
    %cst_36 = arith.constant dense<0.000000e+00> : vector<8x128xf32>
    %126 = tpu.matmul %125, %47, %cst_36 {dimension_numbers = #tpu.dot_dimension_numbers<[1], [0], [0], [1], [0, 0, 1, 1], [], []>} : vector<8x128xbf16>, vector<128x128xbf16>, vector<8x128xf32> -> vector<8x128xf32>
    %127 = vector.broadcast %49 : vector<1x128xf32> to vector<8x128xf32>
    %128 = arith.addf %126, %127 : vector<8x128xf32>
    %c0_37 = arith.constant 0 : index
    %c0_38 = arith.constant 0 : index
    %c0_39 = arith.constant 0 : index
    %129 = vector.load %arg7[%c0_37, %c0_38, %c0_39] : memref<2x1x128xf32, #tpu.memory_space<vmem>>, vector<1x1x128xf32>
    %130 = vector.shape_cast %129 : vector<1x1x128xf32> to vector<1x128xf32>
    %c0_40 = arith.constant 0 : index
    %c0_41 = arith.constant 0 : index
    %c0_42 = arith.constant 0 : index
    %131 = vector.load %arg8[%c0_40, %c0_41, %c0_42] : memref<2x1x128xf32, #tpu.memory_space<vmem>>, vector<1x1x128xf32>
    %132 = vector.shape_cast %131 : vector<1x1x128xf32> to vector<1x128xf32>
    %133 = arith.addf %128, %30 : vector<8x128xf32>
    %134 = tpu.iota {dimensions = array<i32: 1>} : vector<1x128xi32>
    %c32_i32_43 = arith.constant 32 : i32
    %135 = vector.broadcast %c32_i32_43 : i32 to vector<1x128xi32>
    %136 = arith.cmpi slt, %134, %135 : vector<1x128xi32>
    %137 = arith.extui %136 : vector<1x128xi1> to vector<1x128xi32>
    %138 = arith.sitofp %137 : vector<1x128xi32> to vector<1x128xf32>
    %cst_44 = arith.constant dense<0.000000e+00> : vector<8xf32>
    %139 = vector.multi_reduction <add>, %133, %cst_44 [1] : vector<8x128xf32> to vector<8xf32>
    %140 = vector.shape_cast %139 : vector<8xf32> to vector<8x1xf32>
    %cst_45 = arith.constant 3.125000e-02 : f32
    %141 = vector.broadcast %cst_45 : f32 to vector<8x1xf32>
    %142 = arith.mulf %140, %141 : vector<8x1xf32>
    %143 = vector.broadcast %142 : vector<8x1xf32> to vector<8x128xf32>
    %144 = arith.subf %133, %143 : vector<8x128xf32>
    %145 = vector.broadcast %138 : vector<1x128xf32> to vector<8x128xf32>
    %146 = arith.mulf %144, %145 : vector<8x128xf32>
    %147 = arith.mulf %146, %146 : vector<8x128xf32>
    %cst_46 = arith.constant dense<0.000000e+00> : vector<8xf32>
    %148 = vector.multi_reduction <add>, %147, %cst_46 [1] : vector<8x128xf32> to vector<8xf32>
    %149 = vector.shape_cast %148 : vector<8xf32> to vector<8x1xf32>
    %cst_47 = arith.constant 3.125000e-02 : f32
    %150 = vector.broadcast %cst_47 : f32 to vector<8x1xf32>
    %151 = arith.mulf %149, %150 : vector<8x1xf32>
    %cst_48 = arith.constant 9.99999996E-13 : f32
    %152 = vector.broadcast %cst_48 : f32 to vector<8x1xf32>
    %153 = arith.addf %151, %152 : vector<8x1xf32>
    %154 = math.rsqrt %153 : vector<8x1xf32>
    %155 = vector.broadcast %154 : vector<8x1xf32> to vector<8x128xf32>
    %156 = arith.mulf %146, %155 : vector<8x128xf32>
    %157 = vector.broadcast %130 : vector<1x128xf32> to vector<8x128xf32>
    %158 = arith.mulf %156, %157 : vector<8x128xf32>
    %159 = vector.broadcast %132 : vector<1x128xf32> to vector<8x128xf32>
    %160 = arith.addf %158, %159 : vector<8x128xf32>
    %161 = arith.truncf %160 : vector<8x128xf32> to vector<8x128xbf16>
    %c0_49 = arith.constant 0 : index
    %c0_50 = arith.constant 0 : index
    %c0_51 = arith.constant 0 : index
    %162 = vector.load %arg9[%c0_49, %c0_50, %c0_51] : memref<2x128x128xbf16, #tpu.memory_space<vmem>>, vector<1x128x128xbf16>
    %163 = vector.shape_cast %162 : vector<1x128x128xbf16> to vector<128x128xbf16>
    %cst_52 = arith.constant dense<0.000000e+00> : vector<8x128xf32>
    %164 = tpu.matmul %161, %163, %cst_52 {dimension_numbers = #tpu.dot_dimension_numbers<[1], [0], [0], [1], [0, 0, 1, 1], [], []>} : vector<8x128xbf16>, vector<128x128xbf16>, vector<8x128xf32> -> vector<8x128xf32>
    %c0_53 = arith.constant 0 : index
    %c0_54 = arith.constant 0 : index
    %c0_55 = arith.constant 0 : index
    %165 = vector.load %arg10[%c0_53, %c0_54, %c0_55] : memref<2x1x128xf32, #tpu.memory_space<vmem>>, vector<1x1x128xf32>
    %166 = vector.shape_cast %165 : vector<1x1x128xf32> to vector<1x128xf32>
    %167 = vector.broadcast %166 : vector<1x128xf32> to vector<8x128xf32>
    %168 = arith.addf %164, %167 : vector<8x128xf32>
    %cst_56 = arith.constant 0.000000e+00 : f32
    %169 = vector.broadcast %cst_56 : f32 to vector<8x128xf32>
    %170 = arith.maximumf %168, %169 : vector<8x128xf32>
    %171 = arith.truncf %170 : vector<8x128xf32> to vector<8x128xbf16>
    %c0_57 = arith.constant 0 : index
    %c0_58 = arith.constant 0 : index
    %c0_59 = arith.constant 0 : index
    %172 = vector.load %arg11[%c0_57, %c0_58, %c0_59] : memref<2x128x128xbf16, #tpu.memory_space<vmem>>, vector<1x128x128xbf16>
    %173 = vector.shape_cast %172 : vector<1x128x128xbf16> to vector<128x128xbf16>
    %cst_60 = arith.constant dense<0.000000e+00> : vector<8x128xf32>
    %174 = tpu.matmul %171, %173, %cst_60 {dimension_numbers = #tpu.dot_dimension_numbers<[1], [0], [0], [1], [0, 0, 1, 1], [], []>} : vector<8x128xbf16>, vector<128x128xbf16>, vector<8x128xf32> -> vector<8x128xf32>
    %c0_61 = arith.constant 0 : index
    %c0_62 = arith.constant 0 : index
    %c0_63 = arith.constant 0 : index
    %175 = vector.load %arg12[%c0_61, %c0_62, %c0_63] : memref<2x1x128xf32, #tpu.memory_space<vmem>>, vector<1x1x128xf32>
    %176 = vector.shape_cast %175 : vector<1x1x128xf32> to vector<1x128xf32>
    %177 = vector.broadcast %176 : vector<1x128xf32> to vector<8x128xf32>
    %178 = arith.addf %174, %177 : vector<8x128xf32>
    %c0_64 = arith.constant 0 : index
    %c0_65 = arith.constant 0 : index
    %c0_66 = arith.constant 0 : index
    %179 = vector.load %arg13[%c0_64, %c0_65, %c0_66] : memref<2x1x128xf32, #tpu.memory_space<vmem>>, vector<1x1x128xf32>
    %180 = vector.shape_cast %179 : vector<1x1x128xf32> to vector<1x128xf32>
    %c0_67 = arith.constant 0 : index
    %c0_68 = arith.constant 0 : index
    %c0_69 = arith.constant 0 : index
    %181 = vector.load %arg14[%c0_67, %c0_68, %c0_69] : memref<2x1x128xf32, #tpu.memory_space<vmem>>, vector<1x1x128xf32>
    %182 = vector.shape_cast %181 : vector<1x1x128xf32> to vector<1x128xf32>
    %183 = arith.addf %178, %160 : vector<8x128xf32>
    %184 = tpu.iota {dimensions = array<i32: 1>} : vector<1x128xi32>
    %c32_i32_70 = arith.constant 32 : i32
    %185 = vector.broadcast %c32_i32_70 : i32 to vector<1x128xi32>
    %186 = arith.cmpi slt, %184, %185 : vector<1x128xi32>
    %187 = arith.extui %186 : vector<1x128xi1> to vector<1x128xi32>
    %188 = arith.sitofp %187 : vector<1x128xi32> to vector<1x128xf32>
    %cst_71 = arith.constant dense<0.000000e+00> : vector<8xf32>
    %189 = vector.multi_reduction <add>, %183, %cst_71 [1] : vector<8x128xf32> to vector<8xf32>
    %190 = vector.shape_cast %189 : vector<8xf32> to vector<8x1xf32>
    %cst_72 = arith.constant 3.125000e-02 : f32
    %191 = vector.broadcast %cst_72 : f32 to vector<8x1xf32>
    %192 = arith.mulf %190, %191 : vector<8x1xf32>
    %193 = vector.broadcast %192 : vector<8x1xf32> to vector<8x128xf32>
    %194 = arith.subf %183, %193 : vector<8x128xf32>
    %195 = vector.broadcast %188 : vector<1x128xf32> to vector<8x128xf32>
    %196 = arith.mulf %194, %195 : vector<8x128xf32>
    %197 = arith.mulf %196, %196 : vector<8x128xf32>
    %cst_73 = arith.constant dense<0.000000e+00> : vector<8xf32>
    %198 = vector.multi_reduction <add>, %197, %cst_73 [1] : vector<8x128xf32> to vector<8xf32>
    %199 = vector.shape_cast %198 : vector<8xf32> to vector<8x1xf32>
    %cst_74 = arith.constant 3.125000e-02 : f32
    %200 = vector.broadcast %cst_74 : f32 to vector<8x1xf32>
    %201 = arith.mulf %199, %200 : vector<8x1xf32>
    %cst_75 = arith.constant 9.99999996E-13 : f32
    %202 = vector.broadcast %cst_75 : f32 to vector<8x1xf32>
    %203 = arith.addf %201, %202 : vector<8x1xf32>
    %204 = math.rsqrt %203 : vector<8x1xf32>
    %205 = vector.broadcast %204 : vector<8x1xf32> to vector<8x128xf32>
    %206 = arith.mulf %196, %205 : vector<8x128xf32>
    %207 = vector.broadcast %180 : vector<1x128xf32> to vector<8x128xf32>
    %208 = arith.mulf %206, %207 : vector<8x128xf32>
    %209 = vector.broadcast %182 : vector<1x128xf32> to vector<8x128xf32>
    %210 = arith.addf %208, %209 : vector<8x128xf32>
    %211 = arith.truncf %210 : vector<8x128xf32> to vector<8x128xbf16>
    %c1 = arith.constant 1 : index
    %c0_76 = arith.constant 0 : index
    %c0_77 = arith.constant 0 : index
    %212 = vector.load %arg3[%c1, %c0_76, %c0_77] : memref<2x128x384xbf16, #tpu.memory_space<vmem>>, vector<1x128x384xbf16>
    %213 = vector.shape_cast %212 : vector<1x128x384xbf16> to vector<128x384xbf16>
    %cst_78 = arith.constant dense<0.000000e+00> : vector<8x384xf32>
    %214 = tpu.matmul %211, %213, %cst_78 {dimension_numbers = #tpu.dot_dimension_numbers<[1], [0], [0], [1], [0, 0, 1, 1], [], []>} : vector<8x128xbf16>, vector<128x384xbf16>, vector<8x384xf32> -> vector<8x384xf32>
    %c1_79 = arith.constant 1 : index
    %c0_80 = arith.constant 0 : index
    %c0_81 = arith.constant 0 : index
    %215 = vector.load %arg4[%c1_79, %c0_80, %c0_81] : memref<2x1x384xf32, #tpu.memory_space<vmem>>, vector<1x1x384xf32>
    %216 = vector.shape_cast %215 : vector<1x1x384xf32> to vector<1x384xf32>
    %217 = vector.broadcast %216 : vector<1x384xf32> to vector<8x384xf32>
    %218 = arith.addf %214, %217 : vector<8x384xf32>
    %219 = vector.extract_strided_slice %218 {offsets = [0, 0], sizes = [8, 128], strides = [1, 1]} : vector<8x384xf32> to vector<8x128xf32>
    %220 = vector.extract_strided_slice %218 {offsets = [0, 128], sizes = [8, 128], strides = [1, 1]} : vector<8x384xf32> to vector<8x128xf32>
    %221 = vector.extract_strided_slice %218 {offsets = [0, 256], sizes = [8, 128], strides = [1, 1]} : vector<8x384xf32> to vector<8x128xf32>
    %c1_82 = arith.constant 1 : index
    %c0_83 = arith.constant 0 : index
    %c0_84 = arith.constant 0 : index
    %222 = vector.load %arg5[%c1_82, %c0_83, %c0_84] : memref<2x128x128xbf16, #tpu.memory_space<vmem>>, vector<1x128x128xbf16>
    %223 = vector.shape_cast %222 : vector<1x128x128xbf16> to vector<128x128xbf16>
    %c1_85 = arith.constant 1 : index
    %c0_86 = arith.constant 0 : index
    %c0_87 = arith.constant 0 : index
    %224 = vector.load %arg6[%c1_85, %c0_86, %c0_87] : memref<2x1x128xf32, #tpu.memory_space<vmem>>, vector<1x1x128xf32>
    %225 = vector.shape_cast %224 : vector<1x1x128xf32> to vector<1x128xf32>
    %226 = arith.truncf %220 : vector<8x128xf32> to vector<8x128xbf16>
    %227 = vector.broadcast %7 : vector<1x128xf32> to vector<8x128xf32>
    %228 = arith.mulf %219, %227 : vector<8x128xf32>
    %229 = arith.truncf %228 : vector<8x128xf32> to vector<8x128xbf16>
    %cst_88 = arith.constant dense<0.000000e+00> : vector<8x8xf32>
    %230 = tpu.matmul %229, %226, %cst_88 {dimension_numbers = #tpu.dot_dimension_numbers<[1], [1], [0], [0], [0, 0, 1, 0], [], []>} : vector<8x128xbf16>, vector<8x128xbf16>, vector<8x8xf32> -> vector<8x8xf32>
    %cst_89 = arith.constant 0.353553385 : f32
    %231 = vector.broadcast %cst_89 : f32 to vector<8x8xf32>
    %232 = arith.mulf %230, %231 : vector<8x8xf32>
    %233 = vector.broadcast %14 : vector<1x128xf32> to vector<8x128xf32>
    %234 = arith.mulf %219, %233 : vector<8x128xf32>
    %235 = arith.truncf %234 : vector<8x128xf32> to vector<8x128xbf16>
    %cst_90 = arith.constant dense<0.000000e+00> : vector<8x8xf32>
    %236 = tpu.matmul %235, %226, %cst_90 {dimension_numbers = #tpu.dot_dimension_numbers<[1], [1], [0], [0], [0, 0, 1, 0], [], []>} : vector<8x128xbf16>, vector<8x128xbf16>, vector<8x8xf32> -> vector<8x8xf32>
    %cst_91 = arith.constant 0.353553385 : f32
    %237 = vector.broadcast %cst_91 : f32 to vector<8x8xf32>
    %238 = arith.mulf %236, %237 : vector<8x8xf32>
    %239 = vector.broadcast %21 : vector<1x128xf32> to vector<8x128xf32>
    %240 = arith.mulf %219, %239 : vector<8x128xf32>
    %241 = arith.truncf %240 : vector<8x128xf32> to vector<8x128xbf16>
    %cst_92 = arith.constant dense<0.000000e+00> : vector<8x8xf32>
    %242 = tpu.matmul %241, %226, %cst_92 {dimension_numbers = #tpu.dot_dimension_numbers<[1], [1], [0], [0], [0, 0, 1, 0], [], []>} : vector<8x128xbf16>, vector<8x128xbf16>, vector<8x8xf32> -> vector<8x8xf32>
    %cst_93 = arith.constant 0.353553385 : f32
    %243 = vector.broadcast %cst_93 : f32 to vector<8x8xf32>
    %244 = arith.mulf %242, %243 : vector<8x8xf32>
    %245 = vector.broadcast %28 : vector<1x128xf32> to vector<8x128xf32>
    %246 = arith.mulf %219, %245 : vector<8x128xf32>
    %247 = arith.truncf %246 : vector<8x128xf32> to vector<8x128xbf16>
    %cst_94 = arith.constant dense<0.000000e+00> : vector<8x8xf32>
    %248 = tpu.matmul %247, %226, %cst_94 {dimension_numbers = #tpu.dot_dimension_numbers<[1], [1], [0], [0], [0, 0, 1, 0], [], []>} : vector<8x128xbf16>, vector<8x128xbf16>, vector<8x8xf32> -> vector<8x8xf32>
    %cst_95 = arith.constant 0.353553385 : f32
    %249 = vector.broadcast %cst_95 : f32 to vector<8x8xf32>
    %250 = arith.mulf %248, %249 : vector<8x8xf32>
    %251 = vector.shape_cast %232 : vector<8x8xf32> to vector<1x8x8xf32>
    %252 = vector.shape_cast %238 : vector<8x8xf32> to vector<1x8x8xf32>
    %253 = vector.shape_cast %244 : vector<8x8xf32> to vector<1x8x8xf32>
    %254 = vector.shape_cast %250 : vector<8x8xf32> to vector<1x8x8xf32>
    %255 = tpu.concatenate %251, %252, %253, %254 in 0 : vector<1x8x8xf32>, vector<1x8x8xf32>, vector<1x8x8xf32>, vector<1x8x8xf32> -> vector<4x8x8xf32>
    %256 = vector.shape_cast %34 : vector<1x8xi1> to vector<1x1x8xi1>
    %cst_96 = arith.constant -1.000000e+04 : f32
    %257 = vector.shape_cast %256 : vector<1x1x8xi1> to vector<1x1x8xi1>
    %258 = vector.broadcast %257 : vector<1x1x8xi1> to vector<4x8x8xi1>
    %259 = vector.broadcast %cst_96 : f32 to vector<4x8x8xf32>
    %260 = arith.select %258, %255, %259 : vector<4x8x8xi1>, vector<4x8x8xf32>
    %cst_97 = arith.constant dense<0xFF800000> : vector<4x8xf32>
    %261 = vector.multi_reduction <maximumf>, %260, %cst_97 [2] : vector<4x8x8xf32> to vector<4x8xf32>
    %262 = vector.shape_cast %261 : vector<4x8xf32> to vector<4x8x1xf32>
    %263 = vector.broadcast %262 : vector<4x8x1xf32> to vector<4x8x8xf32>
    %264 = arith.subf %260, %263 : vector<4x8x8xf32>
    %265 = math.exp %264 : vector<4x8x8xf32>
    %cst_98 = arith.constant dense<0.000000e+00> : vector<4x8xf32>
    %266 = vector.multi_reduction <add>, %265, %cst_98 [2] : vector<4x8x8xf32> to vector<4x8xf32>
    %267 = vector.shape_cast %266 : vector<4x8xf32> to vector<4x8x1xf32>
    %268 = vector.broadcast %267 : vector<4x8x1xf32> to vector<4x8x8xf32>
    %269 = arith.divf %265, %268 : vector<4x8x8xf32>
    %270 = vector.broadcast %7 : vector<1x128xf32> to vector<8x128xf32>
    %271 = arith.mulf %221, %270 : vector<8x128xf32>
    %272 = arith.truncf %271 : vector<8x128xf32> to vector<8x128xbf16>
    %273 = vector.extract_strided_slice %269 {offsets = [0, 0, 0], sizes = [1, 8, 8], strides = [1, 1, 1]} : vector<4x8x8xf32> to vector<1x8x8xf32>
    %274 = vector.shape_cast %273 : vector<1x8x8xf32> to vector<8x8xf32>
    %275 = arith.truncf %274 : vector<8x8xf32> to vector<8x8xbf16>
    %cst_99 = arith.constant dense<0.000000e+00> : vector<8x128xf32>
    %276 = tpu.matmul %275, %272, %cst_99 {dimension_numbers = #tpu.dot_dimension_numbers<[1], [0], [0], [1], [0, 0, 1, 1], [], []>} : vector<8x8xbf16>, vector<8x128xbf16>, vector<8x128xf32> -> vector<8x128xf32>
    %277 = vector.broadcast %14 : vector<1x128xf32> to vector<8x128xf32>
    %278 = arith.mulf %221, %277 : vector<8x128xf32>
    %279 = arith.truncf %278 : vector<8x128xf32> to vector<8x128xbf16>
    %280 = vector.extract_strided_slice %269 {offsets = [1, 0, 0], sizes = [1, 8, 8], strides = [1, 1, 1]} : vector<4x8x8xf32> to vector<1x8x8xf32>
    %281 = vector.shape_cast %280 : vector<1x8x8xf32> to vector<8x8xf32>
    %282 = arith.truncf %281 : vector<8x8xf32> to vector<8x8xbf16>
    %cst_100 = arith.constant dense<0.000000e+00> : vector<8x128xf32>
    %283 = tpu.matmul %282, %279, %cst_100 {dimension_numbers = #tpu.dot_dimension_numbers<[1], [0], [0], [1], [0, 0, 1, 1], [], []>} : vector<8x8xbf16>, vector<8x128xbf16>, vector<8x128xf32> -> vector<8x128xf32>
    %284 = arith.addf %276, %283 : vector<8x128xf32>
    %285 = vector.broadcast %21 : vector<1x128xf32> to vector<8x128xf32>
    %286 = arith.mulf %221, %285 : vector<8x128xf32>
    %287 = arith.truncf %286 : vector<8x128xf32> to vector<8x128xbf16>
    %288 = vector.extract_strided_slice %269 {offsets = [2, 0, 0], sizes = [1, 8, 8], strides = [1, 1, 1]} : vector<4x8x8xf32> to vector<1x8x8xf32>
    %289 = vector.shape_cast %288 : vector<1x8x8xf32> to vector<8x8xf32>
    %290 = arith.truncf %289 : vector<8x8xf32> to vector<8x8xbf16>
    %cst_101 = arith.constant dense<0.000000e+00> : vector<8x128xf32>
    %291 = tpu.matmul %290, %287, %cst_101 {dimension_numbers = #tpu.dot_dimension_numbers<[1], [0], [0], [1], [0, 0, 1, 1], [], []>} : vector<8x8xbf16>, vector<8x128xbf16>, vector<8x128xf32> -> vector<8x128xf32>
    %292 = arith.addf %284, %291 : vector<8x128xf32>
    %293 = vector.broadcast %28 : vector<1x128xf32> to vector<8x128xf32>
    %294 = arith.mulf %221, %293 : vector<8x128xf32>
    %295 = arith.truncf %294 : vector<8x128xf32> to vector<8x128xbf16>
    %296 = vector.extract_strided_slice %269 {offsets = [3, 0, 0], sizes = [1, 8, 8], strides = [1, 1, 1]} : vector<4x8x8xf32> to vector<1x8x8xf32>
    %297 = vector.shape_cast %296 : vector<1x8x8xf32> to vector<8x8xf32>
    %298 = arith.truncf %297 : vector<8x8xf32> to vector<8x8xbf16>
    %cst_102 = arith.constant dense<0.000000e+00> : vector<8x128xf32>
    %299 = tpu.matmul %298, %295, %cst_102 {dimension_numbers = #tpu.dot_dimension_numbers<[1], [0], [0], [1], [0, 0, 1, 1], [], []>} : vector<8x8xbf16>, vector<8x128xbf16>, vector<8x128xf32> -> vector<8x128xf32>
    %300 = arith.addf %292, %299 : vector<8x128xf32>
    %301 = arith.truncf %300 : vector<8x128xf32> to vector<8x128xbf16>
    %cst_103 = arith.constant dense<0.000000e+00> : vector<8x128xf32>
    %302 = tpu.matmul %301, %223, %cst_103 {dimension_numbers = #tpu.dot_dimension_numbers<[1], [0], [0], [1], [0, 0, 1, 1], [], []>} : vector<8x128xbf16>, vector<128x128xbf16>, vector<8x128xf32> -> vector<8x128xf32>
    %303 = vector.broadcast %225 : vector<1x128xf32> to vector<8x128xf32>
    %304 = arith.addf %302, %303 : vector<8x128xf32>
    %c1_104 = arith.constant 1 : index
    %c0_105 = arith.constant 0 : index
    %c0_106 = arith.constant 0 : index
    %305 = vector.load %arg7[%c1_104, %c0_105, %c0_106] : memref<2x1x128xf32, #tpu.memory_space<vmem>>, vector<1x1x128xf32>
    %306 = vector.shape_cast %305 : vector<1x1x128xf32> to vector<1x128xf32>
    %c1_107 = arith.constant 1 : index
    %c0_108 = arith.constant 0 : index
    %c0_109 = arith.constant 0 : index
    %307 = vector.load %arg8[%c1_107, %c0_108, %c0_109] : memref<2x1x128xf32, #tpu.memory_space<vmem>>, vector<1x1x128xf32>
    %308 = vector.shape_cast %307 : vector<1x1x128xf32> to vector<1x128xf32>
    %309 = arith.addf %304, %210 : vector<8x128xf32>
    %310 = tpu.iota {dimensions = array<i32: 1>} : vector<1x128xi32>
    %c32_i32_110 = arith.constant 32 : i32
    %311 = vector.broadcast %c32_i32_110 : i32 to vector<1x128xi32>
    %312 = arith.cmpi slt, %310, %311 : vector<1x128xi32>
    %313 = arith.extui %312 : vector<1x128xi1> to vector<1x128xi32>
    %314 = arith.sitofp %313 : vector<1x128xi32> to vector<1x128xf32>
    %cst_111 = arith.constant dense<0.000000e+00> : vector<8xf32>
    %315 = vector.multi_reduction <add>, %309, %cst_111 [1] : vector<8x128xf32> to vector<8xf32>
    %316 = vector.shape_cast %315 : vector<8xf32> to vector<8x1xf32>
    %cst_112 = arith.constant 3.125000e-02 : f32
    %317 = vector.broadcast %cst_112 : f32 to vector<8x1xf32>
    %318 = arith.mulf %316, %317 : vector<8x1xf32>
    %319 = vector.broadcast %318 : vector<8x1xf32> to vector<8x128xf32>
    %320 = arith.subf %309, %319 : vector<8x128xf32>
    %321 = vector.broadcast %314 : vector<1x128xf32> to vector<8x128xf32>
    %322 = arith.mulf %320, %321 : vector<8x128xf32>
    %323 = arith.mulf %322, %322 : vector<8x128xf32>
    %cst_113 = arith.constant dense<0.000000e+00> : vector<8xf32>
    %324 = vector.multi_reduction <add>, %323, %cst_113 [1] : vector<8x128xf32> to vector<8xf32>
    %325 = vector.shape_cast %324 : vector<8xf32> to vector<8x1xf32>
    %cst_114 = arith.constant 3.125000e-02 : f32
    %326 = vector.broadcast %cst_114 : f32 to vector<8x1xf32>
    %327 = arith.mulf %325, %326 : vector<8x1xf32>
    %cst_115 = arith.constant 9.99999996E-13 : f32
    %328 = vector.broadcast %cst_115 : f32 to vector<8x1xf32>
    %329 = arith.addf %327, %328 : vector<8x1xf32>
    %330 = math.rsqrt %329 : vector<8x1xf32>
    %331 = vector.broadcast %330 : vector<8x1xf32> to vector<8x128xf32>
    %332 = arith.mulf %322, %331 : vector<8x128xf32>
    %333 = vector.broadcast %306 : vector<1x128xf32> to vector<8x128xf32>
    %334 = arith.mulf %332, %333 : vector<8x128xf32>
    %335 = vector.broadcast %308 : vector<1x128xf32> to vector<8x128xf32>
    %336 = arith.addf %334, %335 : vector<8x128xf32>
    %337 = arith.truncf %336 : vector<8x128xf32> to vector<8x128xbf16>
    %c1_116 = arith.constant 1 : index
    %c0_117 = arith.constant 0 : index
    %c0_118 = arith.constant 0 : index
    %338 = vector.load %arg9[%c1_116, %c0_117, %c0_118] : memref<2x128x128xbf16, #tpu.memory_space<vmem>>, vector<1x128x128xbf16>
    %339 = vector.shape_cast %338 : vector<1x128x128xbf16> to vector<128x128xbf16>
    %cst_119 = arith.constant dense<0.000000e+00> : vector<8x128xf32>
    %340 = tpu.matmul %337, %339, %cst_119 {dimension_numbers = #tpu.dot_dimension_numbers<[1], [0], [0], [1], [0, 0, 1, 1], [], []>} : vector<8x128xbf16>, vector<128x128xbf16>, vector<8x128xf32> -> vector<8x128xf32>
    %c1_120 = arith.constant 1 : index
    %c0_121 = arith.constant 0 : index
    %c0_122 = arith.constant 0 : index
    %341 = vector.load %arg10[%c1_120, %c0_121, %c0_122] : memref<2x1x128xf32, #tpu.memory_space<vmem>>, vector<1x1x128xf32>
    %342 = vector.shape_cast %341 : vector<1x1x128xf32> to vector<1x128xf32>
    %343 = vector.broadcast %342 : vector<1x128xf32> to vector<8x128xf32>
    %344 = arith.addf %340, %343 : vector<8x128xf32>
    %cst_123 = arith.constant 0.000000e+00 : f32
    %345 = vector.broadcast %cst_123 : f32 to vector<8x128xf32>
    %346 = arith.maximumf %344, %345 : vector<8x128xf32>
    %347 = arith.truncf %346 : vector<8x128xf32> to vector<8x128xbf16>
    %c1_124 = arith.constant 1 : index
    %c0_125 = arith.constant 0 : index
    %c0_126 = arith.constant 0 : index
    %348 = vector.load %arg11[%c1_124, %c0_125, %c0_126] : memref<2x128x128xbf16, #tpu.memory_space<vmem>>, vector<1x128x128xbf16>
    %349 = vector.shape_cast %348 : vector<1x128x128xbf16> to vector<128x128xbf16>
    %cst_127 = arith.constant dense<0.000000e+00> : vector<8x128xf32>
    %350 = tpu.matmul %347, %349, %cst_127 {dimension_numbers = #tpu.dot_dimension_numbers<[1], [0], [0], [1], [0, 0, 1, 1], [], []>} : vector<8x128xbf16>, vector<128x128xbf16>, vector<8x128xf32> -> vector<8x128xf32>
    %c1_128 = arith.constant 1 : index
    %c0_129 = arith.constant 0 : index
    %c0_130 = arith.constant 0 : index
    %351 = vector.load %arg12[%c1_128, %c0_129, %c0_130] : memref<2x1x128xf32, #tpu.memory_space<vmem>>, vector<1x1x128xf32>
    %352 = vector.shape_cast %351 : vector<1x1x128xf32> to vector<1x128xf32>
    %353 = vector.broadcast %352 : vector<1x128xf32> to vector<8x128xf32>
    %354 = arith.addf %350, %353 : vector<8x128xf32>
    %c1_131 = arith.constant 1 : index
    %c0_132 = arith.constant 0 : index
    %c0_133 = arith.constant 0 : index
    %355 = vector.load %arg13[%c1_131, %c0_132, %c0_133] : memref<2x1x128xf32, #tpu.memory_space<vmem>>, vector<1x1x128xf32>
    %356 = vector.shape_cast %355 : vector<1x1x128xf32> to vector<1x128xf32>
    %c1_134 = arith.constant 1 : index
    %c0_135 = arith.constant 0 : index
    %c0_136 = arith.constant 0 : index
    %357 = vector.load %arg14[%c1_134, %c0_135, %c0_136] : memref<2x1x128xf32, #tpu.memory_space<vmem>>, vector<1x1x128xf32>
    %358 = vector.shape_cast %357 : vector<1x1x128xf32> to vector<1x128xf32>
    %359 = arith.addf %354, %336 : vector<8x128xf32>
    %360 = tpu.iota {dimensions = array<i32: 1>} : vector<1x128xi32>
    %c32_i32_137 = arith.constant 32 : i32
    %361 = vector.broadcast %c32_i32_137 : i32 to vector<1x128xi32>
    %362 = arith.cmpi slt, %360, %361 : vector<1x128xi32>
    %363 = arith.extui %362 : vector<1x128xi1> to vector<1x128xi32>
    %364 = arith.sitofp %363 : vector<1x128xi32> to vector<1x128xf32>
    %cst_138 = arith.constant dense<0.000000e+00> : vector<8xf32>
    %365 = vector.multi_reduction <add>, %359, %cst_138 [1] : vector<8x128xf32> to vector<8xf32>
    %366 = vector.shape_cast %365 : vector<8xf32> to vector<8x1xf32>
    %cst_139 = arith.constant 3.125000e-02 : f32
    %367 = vector.broadcast %cst_139 : f32 to vector<8x1xf32>
    %368 = arith.mulf %366, %367 : vector<8x1xf32>
    %369 = vector.broadcast %368 : vector<8x1xf32> to vector<8x128xf32>
    %370 = arith.subf %359, %369 : vector<8x128xf32>
    %371 = vector.broadcast %364 : vector<1x128xf32> to vector<8x128xf32>
    %372 = arith.mulf %370, %371 : vector<8x128xf32>
    %373 = arith.mulf %372, %372 : vector<8x128xf32>
    %cst_140 = arith.constant dense<0.000000e+00> : vector<8xf32>
    %374 = vector.multi_reduction <add>, %373, %cst_140 [1] : vector<8x128xf32> to vector<8xf32>
    %375 = vector.shape_cast %374 : vector<8xf32> to vector<8x1xf32>
    %cst_141 = arith.constant 3.125000e-02 : f32
    %376 = vector.broadcast %cst_141 : f32 to vector<8x1xf32>
    %377 = arith.mulf %375, %376 : vector<8x1xf32>
    %cst_142 = arith.constant 9.99999996E-13 : f32
    %378 = vector.broadcast %cst_142 : f32 to vector<8x1xf32>
    %379 = arith.addf %377, %378 : vector<8x1xf32>
    %380 = math.rsqrt %379 : vector<8x1xf32>
    %381 = vector.broadcast %380 : vector<8x1xf32> to vector<8x128xf32>
    %382 = arith.mulf %372, %381 : vector<8x128xf32>
    %383 = vector.broadcast %356 : vector<1x128xf32> to vector<8x128xf32>
    %384 = arith.mulf %382, %383 : vector<8x128xf32>
    %385 = vector.broadcast %358 : vector<1x128xf32> to vector<8x128xf32>
    %386 = arith.addf %384, %385 : vector<8x128xf32>
    %387 = arith.truncf %386 : vector<8x128xf32> to vector<8x128xbf16>
    %c0_143 = arith.constant 0 : index
    %c0_144 = arith.constant 0 : index
    %c0_145 = arith.constant 0 : index
    %388 = vector.load %arg15[%c0_143, %c0_144, %c0_145] : memref<1x8x128xbf16, #tpu.memory_space<vmem>>, vector<1x8x128xbf16>
    %389 = vector.shape_cast %388 : vector<1x8x128xbf16> to vector<8x128xbf16>
    %390 = vector.shape_cast %387 : vector<8x128xbf16> to vector<1x8x128xbf16>
    tpu.vector_store %arg15[%c0_143, %c0_144, %c0_145], %390 {strides = array<i32>} : memref<1x8x128xbf16, #tpu.memory_space<vmem>>, vector<1x8x128xbf16>,
    return
  }
  func.func @transform_0(%arg0: i32) -> (i32, i32, i32) {
    %c0_i32 = arith.constant 0 : i32
    %c0_i32_0 = arith.constant 0 : i32
    %c0_i32_1 = arith.constant 0 : i32
    return %arg0, %c0_i32, %c0_i32_0 : i32, i32, i32
  }
  func.func @transform_1(%arg0: i32) -> (i32, i32, i32) {
    %c0_i32 = arith.constant 0 : i32
    %c0_i32_0 = arith.constant 0 : i32
    %c0_i32_1 = arith.constant 0 : i32
    return %arg0, %c0_i32, %c0_i32_0 : i32, i32, i32
  }
  func.func @transform_2(%arg0: i32) -> (i32, i32, i32) {
    %c0_i32 = arith.constant 0 : i32
    %c0_i32_0 = arith.constant 0 : i32
    %c0_i32_1 = arith.constant 0 : i32
    %c0_i32_2 = arith.constant 0 : i32
    return %c0_i32, %c0_i32_0, %c0_i32_1 : i32, i32, i32
  }
  func.func @transform_3(%arg0: i32) -> (i32, i32, i32) {
    %c0_i32 = arith.constant 0 : i32
    %c0_i32_0 = arith.constant 0 : i32
    %c0_i32_1 = arith.constant 0 : i32
    %c0_i32_2 = arith.constant 0 : i32
    return %c0_i32, %c0_i32_0, %c0_i32_1 : i32, i32, i32
  }
  func.func @transform_4(%arg0: i32) -> (i32, i32, i32) {
    %c0_i32 = arith.constant 0 : i32
    %c0_i32_0 = arith.constant 0 : i32
    %c0_i32_1 = arith.constant 0 : i32
    %c0_i32_2 = arith.constant 0 : i32
    return %c0_i32, %c0_i32_0, %c0_i32_1 : i32, i32, i32
  }
  func.func @transform_5(%arg0: i32) -> (i32, i32, i32) {
    %c0_i32 = arith.constant 0 : i32
    %c0_i32_0 = arith.constant 0 : i32
    %c0_i32_1 = arith.constant 0 : i32
    %c0_i32_2 = arith.constant 0 : i32
    return %c0_i32, %c0_i32_0, %c0_i32_1 : i32, i32, i32
  }
  func.func @transform_6(%arg0: i32) -> (i32, i32, i32) {
    %c0_i32 = arith.constant 0 : i32
    %c0_i32_0 = arith.constant 0 : i32
    %c0_i32_1 = arith.constant 0 : i32
    %c0_i32_2 = arith.constant 0 : i32
    return %c0_i32, %c0_i32_0, %c0_i32_1 : i32, i32, i32
  }
  func.func @transform_7(%arg0: i32) -> (i32, i32, i32) {
    %c0_i32 = arith.constant 0 : i32
    %c0_i32_0 = arith.constant 0 : i32
    %c0_i32_1 = arith.constant 0 : i32
    %c0_i32_2 = arith.constant 0 : i32
    return %c0_i32, %c0_i32_0, %c0_i32_1 : i32, i32, i32
  }
  func.func @transform_8(%arg0: i32) -> (i32, i32, i32) {
    %c0_i32 = arith.constant 0 : i32
    %c0_i32_0 = arith.constant 0 : i32
    %c0_i32_1 = arith.constant 0 : i32
    %c0_i32_2 = arith.constant 0 : i32
    return %c0_i32, %c0_i32_0, %c0_i32_1 : i32, i32, i32
  }
  func.func @transform_9(%arg0: i32) -> (i32, i32, i32) {
    %c0_i32 = arith.constant 0 : i32
    %c0_i32_0 = arith.constant 0 : i32
    %c0_i32_1 = arith.constant 0 : i32
    %c0_i32_2 = arith.constant 0 : i32
    return %c0_i32, %c0_i32_0, %c0_i32_1 : i32, i32, i32
  }
  func.func @transform_10(%arg0: i32) -> (i32, i32, i32) {
    %c0_i32 = arith.constant 0 : i32
    %c0_i32_0 = arith.constant 0 : i32
    %c0_i32_1 = arith.constant 0 : i32
    %c0_i32_2 = arith.constant 0 : i32
    return %c0_i32, %c0_i32_0, %c0_i32_1 : i32, i32, i32
  }
  func.func @transform_11(%arg0: i32) -> (i32, i32, i32) {
    %c0_i32 = arith.constant 0 : i32
    %c0_i32_0 = arith.constant 0 : i32
    %c0_i32_1 = arith.constant 0 : i32
    %c0_i32_2 = arith.constant 0 : i32
    return %c0_i32, %c0_i32_0, %c0_i32_1 : i32, i32, i32
  }
  func.func @transform_12(%arg0: i32) -> (i32, i32, i32) {
    %c0_i32 = arith.constant 0 : i32
    %c0_i32_0 = arith.constant 0 : i32
    %c0_i32_1 = arith.constant 0 : i32
    %c0_i32_2 = arith.constant 0 : i32
    return %c0_i32, %c0_i32_0, %c0_i32_1 : i32, i32, i32
  }
  func.func @transform_13(%arg0: i32) -> (i32, i32, i32) {
    %c0_i32 = arith.constant 0 : i32
    %c0_i32_0 = arith.constant 0 : i32
    %c0_i32_1 = arith.constant 0 : i32
    %c0_i32_2 = arith.constant 0 : i32
    return %c0_i32, %c0_i32_0, %c0_i32_1 : i32, i32, i32
  }
  func.func @transform_14(%arg0: i32) -> (i32, i32, i32) {
    %c0_i32 = arith.constant 0 : i32
    %c0_i32_0 = arith.constant 0 : i32
    %c0_i32_1 = arith.constant 0 : i32
    return %arg0, %c0_i32, %c0_i32_0 : i32, i32, i32
  }
}

module attributes {stable_mosaic.version = 11 : i64} {
  func.func @_decoder_stack_kernel(%arg0: i32, %arg1: memref<1x8x128xf32, #tpu.memory_space<vmem>>, %arg2: memref<1x8x128xbf16, #tpu.memory_space<vmem>>, %arg3: memref<1x8x1xf32, #tpu.memory_space<vmem>>, %arg4: memref<1x1x8xf32, #tpu.memory_space<vmem>>, %arg5: memref<2x128x384xbf16, #tpu.memory_space<vmem>>, %arg6: memref<2x1x384xf32, #tpu.memory_space<vmem>>, %arg7: memref<2x128x128xbf16, #tpu.memory_space<vmem>>, %arg8: memref<2x1x128xf32, #tpu.memory_space<vmem>>, %arg9: memref<2x1x128xf32, #tpu.memory_space<vmem>>, %arg10: memref<2x1x128xf32, #tpu.memory_space<vmem>>, %arg11: memref<2x128x128xbf16, #tpu.memory_space<vmem>>, %arg12: memref<2x1x128xf32, #tpu.memory_space<vmem>>, %arg13: memref<2x128x256xbf16, #tpu.memory_space<vmem>>, %arg14: memref<2x1x256xf32, #tpu.memory_space<vmem>>, %arg15: memref<2x128x128xbf16, #tpu.memory_space<vmem>>, %arg16: memref<2x1x128xf32, #tpu.memory_space<vmem>>, %arg17: memref<2x1x128xf32, #tpu.memory_space<vmem>>, %arg18: memref<2x1x128xf32, #tpu.memory_space<vmem>>, %arg19: memref<2x128x128xbf16, #tpu.memory_space<vmem>>, %arg20: memref<2x1x128xf32, #tpu.memory_space<vmem>>, %arg21: memref<2x128x128xbf16, #tpu.memory_space<vmem>>, %arg22: memref<2x1x128xf32, #tpu.memory_space<vmem>>, %arg23: memref<2x1x128xf32, #tpu.memory_space<vmem>>, %arg24: memref<2x1x128xf32, #tpu.memory_space<vmem>>, %arg25: memref<128x128xbf16, #tpu.memory_space<vmem>>, %arg26: memref<1x128xf32, #tpu.memory_space<vmem>>, %arg27: memref<1x8x128xf32, #tpu.memory_space<vmem>>) attributes {dimension_semantics = [#tpu.dimension_semantics<parallel>], iteration_bounds = array<i64: 2>, scalar_prefetch = 0 : i64, scratch_operands = 0 : i64, tpu.core_type = #tpu.core_type<tc>, window_params = [{transform_indices = @transform_0, window_bounds = array<i64: 1, 8, 128>}, {transform_indices = @transform_1, window_bounds = array<i64: 1, 8, 128>}, {transform_indices = @transform_2, window_bounds = array<i64: 1, 8, 1>}, {transform_indices = @transform_3, window_bounds = array<i64: 1, 1, 8>}, {pipeline_mode = #tpu.pipeline_mode<synchronous>, transform_indices = @transform_4, window_bounds = array<i64: 2, 128, 384>}, {pipeline_mode = #tpu.pipeline_mode<synchronous>, transform_indices = @transform_5, window_bounds = array<i64: 2, 1, 384>}, {pipeline_mode = #tpu.pipeline_mode<synchronous>, transform_indices = @transform_6, window_bounds = array<i64: 2, 128, 128>}, {pipeline_mode = #tpu.pipeline_mode<synchronous>, transform_indices = @transform_7, window_bounds = array<i64: 2, 1, 128>}, {pipeline_mode = #tpu.pipeline_mode<synchronous>, transform_indices = @transform_8, window_bounds = array<i64: 2, 1, 128>}, {pipeline_mode = #tpu.pipeline_mode<synchronous>, transform_indices = @transform_9, window_bounds = array<i64: 2, 1, 128>}, {pipeline_mode = #tpu.pipeline_mode<synchronous>, transform_indices = @transform_10, window_bounds = array<i64: 2, 128, 128>}, {pipeline_mode = #tpu.pipeline_mode<synchronous>, transform_indices = @transform_11, window_bounds = array<i64: 2, 1, 128>}, {pipeline_mode = #tpu.pipeline_mode<synchronous>, transform_indices = @transform_12, window_bounds = array<i64: 2, 128, 256>}, {pipeline_mode = #tpu.pipeline_mode<synchronous>, transform_indices = @transform_13, window_bounds = array<i64: 2, 1, 256>}, {pipeline_mode = #tpu.pipeline_mode<synchronous>, transform_indices = @transform_14, window_bounds = array<i64: 2, 128, 128>}, {pipeline_mode = #tpu.pipeline_mode<synchronous>, transform_indices = @transform_15, window_bounds = array<i64: 2, 1, 128>}, {pipeline_mode = #tpu.pipeline_mode<synchronous>, transform_indices = @transform_16, window_bounds = array<i64: 2, 1, 128>}, {pipeline_mode = #tpu.pipeline_mode<synchronous>, transform_indices = @transform_17, window_bounds = array<i64: 2, 1, 128>}, {pipeline_mode = #tpu.pipeline_mode<synchronous>, transform_indices = @transform_18, window_bounds = array<i64: 2, 128, 128>}, {pipeline_mode = #tpu.pipeline_mode<synchronous>, transform_indices = @transform_19, window_bounds = array<i64: 2, 1, 128>}, {pipeline_mode = #tpu.pipeline_mode<synchronous>, transform_indices = @transform_20, window_bounds = array<i64: 2, 128, 128>}, {pipeline_mode = #tpu.pipeline_mode<synchronous>, transform_indices = @transform_21, window_bounds = array<i64: 2, 1, 128>}, {pipeline_mode = #tpu.pipeline_mode<synchronous>, transform_indices = @transform_22, window_bounds = array<i64: 2, 1, 128>}, {pipeline_mode = #tpu.pipeline_mode<synchronous>, transform_indices = @transform_23, window_bounds = array<i64: 2, 1, 128>}, {pipeline_mode = #tpu.pipeline_mode<synchronous>, transform_indices = @transform_24, window_bounds = array<i64: 128, 128>}, {pipeline_mode = #tpu.pipeline_mode<synchronous>, transform_indices = @transform_25, window_bounds = array<i64: 1, 128>}, {transform_indices = @transform_26, window_bounds = array<i64: 1, 8, 128>}]} {
    %0 = tpu.iota {dimensions = array<i32: 1>} : vector<1x128xi32>
    %c0_i32 = arith.constant 0 : i32
    %1 = vector.broadcast %c0_i32 : i32 to vector<1x128xi32>
    %2 = arith.cmpi sge, %0, %1 : vector<1x128xi32>
    %c8_i32 = arith.constant 8 : i32
    %3 = vector.broadcast %c8_i32 : i32 to vector<1x128xi32>
    %4 = arith.cmpi slt, %0, %3 : vector<1x128xi32>
    %5 = arith.andi %2, %4 : vector<1x128xi1>
    %6 = arith.extui %5 : vector<1x128xi1> to vector<1x128xi32>
    %7 = arith.sitofp %6 : vector<1x128xi32> to vector<1x128xf32>
    %c8_i32_0 = arith.constant 8 : i32
    %8 = vector.broadcast %c8_i32_0 : i32 to vector<1x128xi32>
    %9 = arith.cmpi sge, %0, %8 : vector<1x128xi32>
    %c16_i32 = arith.constant 16 : i32
    %10 = vector.broadcast %c16_i32 : i32 to vector<1x128xi32>
    %11 = arith.cmpi slt, %0, %10 : vector<1x128xi32>
    %12 = arith.andi %9, %11 : vector<1x128xi1>
    %13 = arith.extui %12 : vector<1x128xi1> to vector<1x128xi32>
    %14 = arith.sitofp %13 : vector<1x128xi32> to vector<1x128xf32>
    %c16_i32_1 = arith.constant 16 : i32
    %15 = vector.broadcast %c16_i32_1 : i32 to vector<1x128xi32>
    %16 = arith.cmpi sge, %0, %15 : vector<1x128xi32>
    %c24_i32 = arith.constant 24 : i32
    %17 = vector.broadcast %c24_i32 : i32 to vector<1x128xi32>
    %18 = arith.cmpi slt, %0, %17 : vector<1x128xi32>
    %19 = arith.andi %16, %18 : vector<1x128xi1>
    %20 = arith.extui %19 : vector<1x128xi1> to vector<1x128xi32>
    %21 = arith.sitofp %20 : vector<1x128xi32> to vector<1x128xf32>
    %c24_i32_2 = arith.constant 24 : i32
    %22 = vector.broadcast %c24_i32_2 : i32 to vector<1x128xi32>
    %23 = arith.cmpi sge, %0, %22 : vector<1x128xi32>
    %c32_i32 = arith.constant 32 : i32
    %24 = vector.broadcast %c32_i32 : i32 to vector<1x128xi32>
    %25 = arith.cmpi slt, %0, %24 : vector<1x128xi32>
    %26 = arith.andi %23, %25 : vector<1x128xi1>
    %27 = arith.extui %26 : vector<1x128xi1> to vector<1x128xi32>
    %28 = arith.sitofp %27 : vector<1x128xi32> to vector<1x128xf32>
    %c0 = arith.constant 0 : index
    %c0_3 = arith.constant 0 : index
    %c0_4 = arith.constant 0 : index
    %29 = vector.load %arg1[%c0, %c0_3, %c0_4] : memref<1x8x128xf32, #tpu.memory_space<vmem>>, vector<1x8x128xf32>
    %30 = vector.shape_cast %29 : vector<1x8x128xf32> to vector<8x128xf32>
    %c0_5 = arith.constant 0 : index
    %c0_6 = arith.constant 0 : index
    %c0_7 = arith.constant 0 : index
    %31 = vector.load %arg2[%c0_5, %c0_6, %c0_7] : memref<1x8x128xbf16, #tpu.memory_space<vmem>>, vector<1x8x128xbf16>
    %32 = vector.shape_cast %31 : vector<1x8x128xbf16> to vector<8x128xbf16>
    %c0_8 = arith.constant 0 : index
    %c0_9 = arith.constant 0 : index
    %c0_10 = arith.constant 0 : index
    %33 = vector.load %arg3[%c0_8, %c0_9, %c0_10] : memref<1x8x1xf32, #tpu.memory_space<vmem>>, vector<1x8x1xf32>
    %34 = vector.shape_cast %33 : vector<1x8x1xf32> to vector<8x1xf32>
    %cst = arith.constant 5.000000e-01 : f32
    %35 = vector.broadcast %cst : f32 to vector<8x1xf32>
    %36 = arith.cmpf ogt, %34, %35 : vector<8x1xf32>
    %37 = tpu.iota {dimensions = array<i32: 0>} : vector<8x8xi32>
    %38 = tpu.iota {dimensions = array<i32: 1>} : vector<8x8xi32>
    %39 = arith.cmpi sle, %38, %37 : vector<8x8xi32>
    %40 = vector.broadcast %36 : vector<8x1xi1> to vector<8x8xi1>
    %41 = arith.andi %40, %39 : vector<8x8xi1>
    %c0_11 = arith.constant 0 : index
    %c0_12 = arith.constant 0 : index
    %c0_13 = arith.constant 0 : index
    %42 = vector.load %arg4[%c0_11, %c0_12, %c0_13] : memref<1x1x8xf32, #tpu.memory_space<vmem>>, vector<1x1x8xf32>
    %43 = vector.shape_cast %42 : vector<1x1x8xf32> to vector<1x8xf32>
    %cst_14 = arith.constant 5.000000e-01 : f32
    %44 = vector.broadcast %cst_14 : f32 to vector<1x8xf32>
    %45 = arith.cmpf ogt, %43, %44 : vector<1x8xf32>
    %46 = arith.truncf %30 : vector<8x128xf32> to vector<8x128xbf16>
    %c0_15 = arith.constant 0 : index
    %c0_16 = arith.constant 0 : index
    %c0_17 = arith.constant 0 : index
    %47 = vector.load %arg5[%c0_15, %c0_16, %c0_17] : memref<2x128x384xbf16, #tpu.memory_space<vmem>>, vector<1x128x384xbf16>
    %48 = vector.shape_cast %47 : vector<1x128x384xbf16> to vector<128x384xbf16>
    %cst_18 = arith.constant dense<0.000000e+00> : vector<8x384xf32>
    %49 = tpu.matmul %46, %48, %cst_18 {dimension_numbers = #tpu.dot_dimension_numbers<[1], [0], [0], [1], [0, 0, 1, 1], [], []>} : vector<8x128xbf16>, vector<128x384xbf16>, vector<8x384xf32> -> vector<8x384xf32>
    %c0_19 = arith.constant 0 : index
    %c0_20 = arith.constant 0 : index
    %c0_21 = arith.constant 0 : index
    %50 = vector.load %arg6[%c0_19, %c0_20, %c0_21] : memref<2x1x384xf32, #tpu.memory_space<vmem>>, vector<1x1x384xf32>
    %51 = vector.shape_cast %50 : vector<1x1x384xf32> to vector<1x384xf32>
    %52 = vector.broadcast %51 : vector<1x384xf32> to vector<8x384xf32>
    %53 = arith.addf %49, %52 : vector<8x384xf32>
    %54 = vector.extract_strided_slice %53 {offsets = [0, 0], sizes = [8, 128], strides = [1, 1]} : vector<8x384xf32> to vector<8x128xf32>
    %55 = vector.extract_strided_slice %53 {offsets = [0, 128], sizes = [8, 128], strides = [1, 1]} : vector<8x384xf32> to vector<8x128xf32>
    %56 = vector.extract_strided_slice %53 {offsets = [0, 256], sizes = [8, 128], strides = [1, 1]} : vector<8x384xf32> to vector<8x128xf32>
    %c0_22 = arith.constant 0 : index
    %c0_23 = arith.constant 0 : index
    %c0_24 = arith.constant 0 : index
    %57 = vector.load %arg7[%c0_22, %c0_23, %c0_24] : memref<2x128x128xbf16, #tpu.memory_space<vmem>>, vector<1x128x128xbf16>
    %58 = vector.shape_cast %57 : vector<1x128x128xbf16> to vector<128x128xbf16>
    %c0_25 = arith.constant 0 : index
    %c0_26 = arith.constant 0 : index
    %c0_27 = arith.constant 0 : index
    %59 = vector.load %arg8[%c0_25, %c0_26, %c0_27] : memref<2x1x128xf32, #tpu.memory_space<vmem>>, vector<1x1x128xf32>
    %60 = vector.shape_cast %59 : vector<1x1x128xf32> to vector<1x128xf32>
    %61 = arith.truncf %55 : vector<8x128xf32> to vector<8x128xbf16>
    %62 = vector.broadcast %7 : vector<1x128xf32> to vector<8x128xf32>
    %63 = arith.mulf %54, %62 : vector<8x128xf32>
    %64 = arith.truncf %63 : vector<8x128xf32> to vector<8x128xbf16>
    %cst_28 = arith.constant dense<0.000000e+00> : vector<8x8xf32>
    %65 = tpu.matmul %64, %61, %cst_28 {dimension_numbers = #tpu.dot_dimension_numbers<[1], [1], [0], [0], [0, 0, 1, 0], [], []>} : vector<8x128xbf16>, vector<8x128xbf16>, vector<8x8xf32> -> vector<8x8xf32>
    %cst_29 = arith.constant 0.353553385 : f32
    %66 = vector.broadcast %cst_29 : f32 to vector<8x8xf32>
    %67 = arith.mulf %65, %66 : vector<8x8xf32>
    %68 = vector.broadcast %14 : vector<1x128xf32> to vector<8x128xf32>
    %69 = arith.mulf %54, %68 : vector<8x128xf32>
    %70 = arith.truncf %69 : vector<8x128xf32> to vector<8x128xbf16>
    %cst_30 = arith.constant dense<0.000000e+00> : vector<8x8xf32>
    %71 = tpu.matmul %70, %61, %cst_30 {dimension_numbers = #tpu.dot_dimension_numbers<[1], [1], [0], [0], [0, 0, 1, 0], [], []>} : vector<8x128xbf16>, vector<8x128xbf16>, vector<8x8xf32> -> vector<8x8xf32>
    %cst_31 = arith.constant 0.353553385 : f32
    %72 = vector.broadcast %cst_31 : f32 to vector<8x8xf32>
    %73 = arith.mulf %71, %72 : vector<8x8xf32>
    %74 = vector.broadcast %21 : vector<1x128xf32> to vector<8x128xf32>
    %75 = arith.mulf %54, %74 : vector<8x128xf32>
    %76 = arith.truncf %75 : vector<8x128xf32> to vector<8x128xbf16>
    %cst_32 = arith.constant dense<0.000000e+00> : vector<8x8xf32>
    %77 = tpu.matmul %76, %61, %cst_32 {dimension_numbers = #tpu.dot_dimension_numbers<[1], [1], [0], [0], [0, 0, 1, 0], [], []>} : vector<8x128xbf16>, vector<8x128xbf16>, vector<8x8xf32> -> vector<8x8xf32>
    %cst_33 = arith.constant 0.353553385 : f32
    %78 = vector.broadcast %cst_33 : f32 to vector<8x8xf32>
    %79 = arith.mulf %77, %78 : vector<8x8xf32>
    %80 = vector.broadcast %28 : vector<1x128xf32> to vector<8x128xf32>
    %81 = arith.mulf %54, %80 : vector<8x128xf32>
    %82 = arith.truncf %81 : vector<8x128xf32> to vector<8x128xbf16>
    %cst_34 = arith.constant dense<0.000000e+00> : vector<8x8xf32>
    %83 = tpu.matmul %82, %61, %cst_34 {dimension_numbers = #tpu.dot_dimension_numbers<[1], [1], [0], [0], [0, 0, 1, 0], [], []>} : vector<8x128xbf16>, vector<8x128xbf16>, vector<8x8xf32> -> vector<8x8xf32>
    %cst_35 = arith.constant 0.353553385 : f32
    %84 = vector.broadcast %cst_35 : f32 to vector<8x8xf32>
    %85 = arith.mulf %83, %84 : vector<8x8xf32>
    %86 = vector.shape_cast %67 : vector<8x8xf32> to vector<1x8x8xf32>
    %87 = vector.shape_cast %73 : vector<8x8xf32> to vector<1x8x8xf32>
    %88 = vector.shape_cast %79 : vector<8x8xf32> to vector<1x8x8xf32>
    %89 = vector.shape_cast %85 : vector<8x8xf32> to vector<1x8x8xf32>
    %90 = tpu.concatenate %86, %87, %88, %89 in 0 : vector<1x8x8xf32>, vector<1x8x8xf32>, vector<1x8x8xf32>, vector<1x8x8xf32> -> vector<4x8x8xf32>
    %91 = vector.shape_cast %41 : vector<8x8xi1> to vector<1x8x8xi1>
    %cst_36 = arith.constant -1.000000e+04 : f32
    %92 = vector.shape_cast %91 : vector<1x8x8xi1> to vector<1x8x8xi1>
    %93 = vector.broadcast %92 : vector<1x8x8xi1> to vector<4x8x8xi1>
    %94 = vector.broadcast %cst_36 : f32 to vector<4x8x8xf32>
    %95 = arith.select %93, %90, %94 : vector<4x8x8xi1>, vector<4x8x8xf32>
    %cst_37 = arith.constant dense<0xFF800000> : vector<4x8xf32>
    %96 = vector.multi_reduction <maximumf>, %95, %cst_37 [2] : vector<4x8x8xf32> to vector<4x8xf32>
    %97 = vector.shape_cast %96 : vector<4x8xf32> to vector<4x8x1xf32>
    %98 = vector.broadcast %97 : vector<4x8x1xf32> to vector<4x8x8xf32>
    %99 = arith.subf %95, %98 : vector<4x8x8xf32>
    %100 = math.exp %99 : vector<4x8x8xf32>
    %cst_38 = arith.constant dense<0.000000e+00> : vector<4x8xf32>
    %101 = vector.multi_reduction <add>, %100, %cst_38 [2] : vector<4x8x8xf32> to vector<4x8xf32>
    %102 = vector.shape_cast %101 : vector<4x8xf32> to vector<4x8x1xf32>
    %103 = vector.broadcast %102 : vector<4x8x1xf32> to vector<4x8x8xf32>
    %104 = arith.divf %100, %103 : vector<4x8x8xf32>
    %105 = vector.broadcast %7 : vector<1x128xf32> to vector<8x128xf32>
    %106 = arith.mulf %56, %105 : vector<8x128xf32>
    %107 = arith.truncf %106 : vector<8x128xf32> to vector<8x128xbf16>
    %108 = vector.extract_strided_slice %104 {offsets = [0, 0, 0], sizes = [1, 8, 8], strides = [1, 1, 1]} : vector<4x8x8xf32> to vector<1x8x8xf32>
    %109 = vector.shape_cast %108 : vector<1x8x8xf32> to vector<8x8xf32>
    %110 = arith.truncf %109 : vector<8x8xf32> to vector<8x8xbf16>
    %cst_39 = arith.constant dense<0.000000e+00> : vector<8x128xf32>
    %111 = tpu.matmul %110, %107, %cst_39 {dimension_numbers = #tpu.dot_dimension_numbers<[1], [0], [0], [1], [0, 0, 1, 1], [], []>} : vector<8x8xbf16>, vector<8x128xbf16>, vector<8x128xf32> -> vector<8x128xf32>
    %112 = vector.broadcast %14 : vector<1x128xf32> to vector<8x128xf32>
    %113 = arith.mulf %56, %112 : vector<8x128xf32>
    %114 = arith.truncf %113 : vector<8x128xf32> to vector<8x128xbf16>
    %115 = vector.extract_strided_slice %104 {offsets = [1, 0, 0], sizes = [1, 8, 8], strides = [1, 1, 1]} : vector<4x8x8xf32> to vector<1x8x8xf32>
    %116 = vector.shape_cast %115 : vector<1x8x8xf32> to vector<8x8xf32>
    %117 = arith.truncf %116 : vector<8x8xf32> to vector<8x8xbf16>
    %cst_40 = arith.constant dense<0.000000e+00> : vector<8x128xf32>
    %118 = tpu.matmul %117, %114, %cst_40 {dimension_numbers = #tpu.dot_dimension_numbers<[1], [0], [0], [1], [0, 0, 1, 1], [], []>} : vector<8x8xbf16>, vector<8x128xbf16>, vector<8x128xf32> -> vector<8x128xf32>
    %119 = arith.addf %111, %118 : vector<8x128xf32>
    %120 = vector.broadcast %21 : vector<1x128xf32> to vector<8x128xf32>
    %121 = arith.mulf %56, %120 : vector<8x128xf32>
    %122 = arith.truncf %121 : vector<8x128xf32> to vector<8x128xbf16>
    %123 = vector.extract_strided_slice %104 {offsets = [2, 0, 0], sizes = [1, 8, 8], strides = [1, 1, 1]} : vector<4x8x8xf32> to vector<1x8x8xf32>
    %124 = vector.shape_cast %123 : vector<1x8x8xf32> to vector<8x8xf32>
    %125 = arith.truncf %124 : vector<8x8xf32> to vector<8x8xbf16>
    %cst_41 = arith.constant dense<0.000000e+00> : vector<8x128xf32>
    %126 = tpu.matmul %125, %122, %cst_41 {dimension_numbers = #tpu.dot_dimension_numbers<[1], [0], [0], [1], [0, 0, 1, 1], [], []>} : vector<8x8xbf16>, vector<8x128xbf16>, vector<8x128xf32> -> vector<8x128xf32>
    %127 = arith.addf %119, %126 : vector<8x128xf32>
    %128 = vector.broadcast %28 : vector<1x128xf32> to vector<8x128xf32>
    %129 = arith.mulf %56, %128 : vector<8x128xf32>
    %130 = arith.truncf %129 : vector<8x128xf32> to vector<8x128xbf16>
    %131 = vector.extract_strided_slice %104 {offsets = [3, 0, 0], sizes = [1, 8, 8], strides = [1, 1, 1]} : vector<4x8x8xf32> to vector<1x8x8xf32>
    %132 = vector.shape_cast %131 : vector<1x8x8xf32> to vector<8x8xf32>
    %133 = arith.truncf %132 : vector<8x8xf32> to vector<8x8xbf16>
    %cst_42 = arith.constant dense<0.000000e+00> : vector<8x128xf32>
    %134 = tpu.matmul %133, %130, %cst_42 {dimension_numbers = #tpu.dot_dimension_numbers<[1], [0], [0], [1], [0, 0, 1, 1], [], []>} : vector<8x8xbf16>, vector<8x128xbf16>, vector<8x128xf32> -> vector<8x128xf32>
    %135 = arith.addf %127, %134 : vector<8x128xf32>
    %136 = arith.truncf %135 : vector<8x128xf32> to vector<8x128xbf16>
    %cst_43 = arith.constant dense<0.000000e+00> : vector<8x128xf32>
    %137 = tpu.matmul %136, %58, %cst_43 {dimension_numbers = #tpu.dot_dimension_numbers<[1], [0], [0], [1], [0, 0, 1, 1], [], []>} : vector<8x128xbf16>, vector<128x128xbf16>, vector<8x128xf32> -> vector<8x128xf32>
    %138 = vector.broadcast %60 : vector<1x128xf32> to vector<8x128xf32>
    %139 = arith.addf %137, %138 : vector<8x128xf32>
    %c0_44 = arith.constant 0 : index
    %c0_45 = arith.constant 0 : index
    %c0_46 = arith.constant 0 : index
    %140 = vector.load %arg9[%c0_44, %c0_45, %c0_46] : memref<2x1x128xf32, #tpu.memory_space<vmem>>, vector<1x1x128xf32>
    %141 = vector.shape_cast %140 : vector<1x1x128xf32> to vector<1x128xf32>
    %c0_47 = arith.constant 0 : index
    %c0_48 = arith.constant 0 : index
    %c0_49 = arith.constant 0 : index
    %142 = vector.load %arg10[%c0_47, %c0_48, %c0_49] : memref<2x1x128xf32, #tpu.memory_space<vmem>>, vector<1x1x128xf32>
    %143 = vector.shape_cast %142 : vector<1x1x128xf32> to vector<1x128xf32>
    %144 = arith.addf %139, %30 : vector<8x128xf32>
    %145 = tpu.iota {dimensions = array<i32: 1>} : vector<1x128xi32>
    %c32_i32_50 = arith.constant 32 : i32
    %146 = vector.broadcast %c32_i32_50 : i32 to vector<1x128xi32>
    %147 = arith.cmpi slt, %145, %146 : vector<1x128xi32>
    %148 = arith.extui %147 : vector<1x128xi1> to vector<1x128xi32>
    %149 = arith.sitofp %148 : vector<1x128xi32> to vector<1x128xf32>
    %cst_51 = arith.constant dense<0.000000e+00> : vector<8xf32>
    %150 = vector.multi_reduction <add>, %144, %cst_51 [1] : vector<8x128xf32> to vector<8xf32>
    %151 = vector.shape_cast %150 : vector<8xf32> to vector<8x1xf32>
    %cst_52 = arith.constant 3.125000e-02 : f32
    %152 = vector.broadcast %cst_52 : f32 to vector<8x1xf32>
    %153 = arith.mulf %151, %152 : vector<8x1xf32>
    %154 = vector.broadcast %153 : vector<8x1xf32> to vector<8x128xf32>
    %155 = arith.subf %144, %154 : vector<8x128xf32>
    %156 = vector.broadcast %149 : vector<1x128xf32> to vector<8x128xf32>
    %157 = arith.mulf %155, %156 : vector<8x128xf32>
    %158 = arith.mulf %157, %157 : vector<8x128xf32>
    %cst_53 = arith.constant dense<0.000000e+00> : vector<8xf32>
    %159 = vector.multi_reduction <add>, %158, %cst_53 [1] : vector<8x128xf32> to vector<8xf32>
    %160 = vector.shape_cast %159 : vector<8xf32> to vector<8x1xf32>
    %cst_54 = arith.constant 3.125000e-02 : f32
    %161 = vector.broadcast %cst_54 : f32 to vector<8x1xf32>
    %162 = arith.mulf %160, %161 : vector<8x1xf32>
    %cst_55 = arith.constant 9.99999996E-13 : f32
    %163 = vector.broadcast %cst_55 : f32 to vector<8x1xf32>
    %164 = arith.addf %162, %163 : vector<8x1xf32>
    %165 = math.rsqrt %164 : vector<8x1xf32>
    %166 = vector.broadcast %165 : vector<8x1xf32> to vector<8x128xf32>
    %167 = arith.mulf %157, %166 : vector<8x128xf32>
    %168 = vector.broadcast %141 : vector<1x128xf32> to vector<8x128xf32>
    %169 = arith.mulf %167, %168 : vector<8x128xf32>
    %170 = vector.broadcast %143 : vector<1x128xf32> to vector<8x128xf32>
    %171 = arith.addf %169, %170 : vector<8x128xf32>
    %172 = arith.truncf %171 : vector<8x128xf32> to vector<8x128xbf16>
    %c0_56 = arith.constant 0 : index
    %c0_57 = arith.constant 0 : index
    %c0_58 = arith.constant 0 : index
    %173 = vector.load %arg11[%c0_56, %c0_57, %c0_58] : memref<2x128x128xbf16, #tpu.memory_space<vmem>>, vector<1x128x128xbf16>
    %174 = vector.shape_cast %173 : vector<1x128x128xbf16> to vector<128x128xbf16>
    %cst_59 = arith.constant dense<0.000000e+00> : vector<8x128xf32>
    %175 = tpu.matmul %172, %174, %cst_59 {dimension_numbers = #tpu.dot_dimension_numbers<[1], [0], [0], [1], [0, 0, 1, 1], [], []>} : vector<8x128xbf16>, vector<128x128xbf16>, vector<8x128xf32> -> vector<8x128xf32>
    %c0_60 = arith.constant 0 : index
    %c0_61 = arith.constant 0 : index
    %c0_62 = arith.constant 0 : index
    %176 = vector.load %arg12[%c0_60, %c0_61, %c0_62] : memref<2x1x128xf32, #tpu.memory_space<vmem>>, vector<1x1x128xf32>
    %177 = vector.shape_cast %176 : vector<1x1x128xf32> to vector<1x128xf32>
    %178 = vector.broadcast %177 : vector<1x128xf32> to vector<8x128xf32>
    %179 = arith.addf %175, %178 : vector<8x128xf32>
    %c0_63 = arith.constant 0 : index
    %c0_64 = arith.constant 0 : index
    %c0_65 = arith.constant 0 : index
    %180 = vector.load %arg13[%c0_63, %c0_64, %c0_65] : memref<2x128x256xbf16, #tpu.memory_space<vmem>>, vector<1x128x256xbf16>
    %181 = vector.shape_cast %180 : vector<1x128x256xbf16> to vector<128x256xbf16>
    %cst_66 = arith.constant dense<0.000000e+00> : vector<8x256xf32>
    %182 = tpu.matmul %32, %181, %cst_66 {dimension_numbers = #tpu.dot_dimension_numbers<[1], [0], [0], [1], [0, 0, 1, 1], [], []>} : vector<8x128xbf16>, vector<128x256xbf16>, vector<8x256xf32> -> vector<8x256xf32>
    %c0_67 = arith.constant 0 : index
    %c0_68 = arith.constant 0 : index
    %c0_69 = arith.constant 0 : index
    %183 = vector.load %arg14[%c0_67, %c0_68, %c0_69] : memref<2x1x256xf32, #tpu.memory_space<vmem>>, vector<1x1x256xf32>
    %184 = vector.shape_cast %183 : vector<1x1x256xf32> to vector<1x256xf32>
    %185 = vector.broadcast %184 : vector<1x256xf32> to vector<8x256xf32>
    %186 = arith.addf %182, %185 : vector<8x256xf32>
    %187 = vector.extract_strided_slice %186 {offsets = [0, 0], sizes = [8, 128], strides = [1, 1]} : vector<8x256xf32> to vector<8x128xf32>
    %188 = vector.extract_strided_slice %186 {offsets = [0, 128], sizes = [8, 128], strides = [1, 1]} : vector<8x256xf32> to vector<8x128xf32>
    %c0_70 = arith.constant 0 : index
    %c0_71 = arith.constant 0 : index
    %c0_72 = arith.constant 0 : index
    %189 = vector.load %arg15[%c0_70, %c0_71, %c0_72] : memref<2x128x128xbf16, #tpu.memory_space<vmem>>, vector<1x128x128xbf16>
    %190 = vector.shape_cast %189 : vector<1x128x128xbf16> to vector<128x128xbf16>
    %c0_73 = arith.constant 0 : index
    %c0_74 = arith.constant 0 : index
    %c0_75 = arith.constant 0 : index
    %191 = vector.load %arg16[%c0_73, %c0_74, %c0_75] : memref<2x1x128xf32, #tpu.memory_space<vmem>>, vector<1x1x128xf32>
    %192 = vector.shape_cast %191 : vector<1x1x128xf32> to vector<1x128xf32>
    %193 = arith.truncf %187 : vector<8x128xf32> to vector<8x128xbf16>
    %194 = vector.broadcast %7 : vector<1x128xf32> to vector<8x128xf32>
    %195 = arith.mulf %179, %194 : vector<8x128xf32>
    %196 = arith.truncf %195 : vector<8x128xf32> to vector<8x128xbf16>
    %cst_76 = arith.constant dense<0.000000e+00> : vector<8x8xf32>
    %197 = tpu.matmul %196, %193, %cst_76 {dimension_numbers = #tpu.dot_dimension_numbers<[1], [1], [0], [0], [0, 0, 1, 0], [], []>} : vector<8x128xbf16>, vector<8x128xbf16>, vector<8x8xf32> -> vector<8x8xf32>
    %cst_77 = arith.constant 0.353553385 : f32
    %198 = vector.broadcast %cst_77 : f32 to vector<8x8xf32>
    %199 = arith.mulf %197, %198 : vector<8x8xf32>
    %200 = vector.broadcast %14 : vector<1x128xf32> to vector<8x128xf32>
    %201 = arith.mulf %179, %200 : vector<8x128xf32>
    %202 = arith.truncf %201 : vector<8x128xf32> to vector<8x128xbf16>
    %cst_78 = arith.constant dense<0.000000e+00> : vector<8x8xf32>
    %203 = tpu.matmul %202, %193, %cst_78 {dimension_numbers = #tpu.dot_dimension_numbers<[1], [1], [0], [0], [0, 0, 1, 0], [], []>} : vector<8x128xbf16>, vector<8x128xbf16>, vector<8x8xf32> -> vector<8x8xf32>
    %cst_79 = arith.constant 0.353553385 : f32
    %204 = vector.broadcast %cst_79 : f32 to vector<8x8xf32>
    %205 = arith.mulf %203, %204 : vector<8x8xf32>
    %206 = vector.broadcast %21 : vector<1x128xf32> to vector<8x128xf32>
    %207 = arith.mulf %179, %206 : vector<8x128xf32>
    %208 = arith.truncf %207 : vector<8x128xf32> to vector<8x128xbf16>
    %cst_80 = arith.constant dense<0.000000e+00> : vector<8x8xf32>
    %209 = tpu.matmul %208, %193, %cst_80 {dimension_numbers = #tpu.dot_dimension_numbers<[1], [1], [0], [0], [0, 0, 1, 0], [], []>} : vector<8x128xbf16>, vector<8x128xbf16>, vector<8x8xf32> -> vector<8x8xf32>
    %cst_81 = arith.constant 0.353553385 : f32
    %210 = vector.broadcast %cst_81 : f32 to vector<8x8xf32>
    %211 = arith.mulf %209, %210 : vector<8x8xf32>
    %212 = vector.broadcast %28 : vector<1x128xf32> to vector<8x128xf32>
    %213 = arith.mulf %179, %212 : vector<8x128xf32>
    %214 = arith.truncf %213 : vector<8x128xf32> to vector<8x128xbf16>
    %cst_82 = arith.constant dense<0.000000e+00> : vector<8x8xf32>
    %215 = tpu.matmul %214, %193, %cst_82 {dimension_numbers = #tpu.dot_dimension_numbers<[1], [1], [0], [0], [0, 0, 1, 0], [], []>} : vector<8x128xbf16>, vector<8x128xbf16>, vector<8x8xf32> -> vector<8x8xf32>
    %cst_83 = arith.constant 0.353553385 : f32
    %216 = vector.broadcast %cst_83 : f32 to vector<8x8xf32>
    %217 = arith.mulf %215, %216 : vector<8x8xf32>
    %218 = vector.shape_cast %199 : vector<8x8xf32> to vector<1x8x8xf32>
    %219 = vector.shape_cast %205 : vector<8x8xf32> to vector<1x8x8xf32>
    %220 = vector.shape_cast %211 : vector<8x8xf32> to vector<1x8x8xf32>
    %221 = vector.shape_cast %217 : vector<8x8xf32> to vector<1x8x8xf32>
    %222 = tpu.concatenate %218, %219, %220, %221 in 0 : vector<1x8x8xf32>, vector<1x8x8xf32>, vector<1x8x8xf32>, vector<1x8x8xf32> -> vector<4x8x8xf32>
    %223 = vector.shape_cast %45 : vector<1x8xi1> to vector<1x1x8xi1>
    %cst_84 = arith.constant -1.000000e+04 : f32
    %224 = vector.shape_cast %223 : vector<1x1x8xi1> to vector<1x1x8xi1>
    %225 = vector.broadcast %224 : vector<1x1x8xi1> to vector<4x8x8xi1>
    %226 = vector.broadcast %cst_84 : f32 to vector<4x8x8xf32>
    %227 = arith.select %225, %222, %226 : vector<4x8x8xi1>, vector<4x8x8xf32>
    %cst_85 = arith.constant dense<0xFF800000> : vector<4x8xf32>
    %228 = vector.multi_reduction <maximumf>, %227, %cst_85 [2] : vector<4x8x8xf32> to vector<4x8xf32>
    %229 = vector.shape_cast %228 : vector<4x8xf32> to vector<4x8x1xf32>
    %230 = vector.broadcast %229 : vector<4x8x1xf32> to vector<4x8x8xf32>
    %231 = arith.subf %227, %230 : vector<4x8x8xf32>
    %232 = math.exp %231 : vector<4x8x8xf32>
    %cst_86 = arith.constant dense<0.000000e+00> : vector<4x8xf32>
    %233 = vector.multi_reduction <add>, %232, %cst_86 [2] : vector<4x8x8xf32> to vector<4x8xf32>
    %234 = vector.shape_cast %233 : vector<4x8xf32> to vector<4x8x1xf32>
    %235 = vector.broadcast %234 : vector<4x8x1xf32> to vector<4x8x8xf32>
    %236 = arith.divf %232, %235 : vector<4x8x8xf32>
    %237 = vector.broadcast %7 : vector<1x128xf32> to vector<8x128xf32>
    %238 = arith.mulf %188, %237 : vector<8x128xf32>
    %239 = arith.truncf %238 : vector<8x128xf32> to vector<8x128xbf16>
    %240 = vector.extract_strided_slice %236 {offsets = [0, 0, 0], sizes = [1, 8, 8], strides = [1, 1, 1]} : vector<4x8x8xf32> to vector<1x8x8xf32>
    %241 = vector.shape_cast %240 : vector<1x8x8xf32> to vector<8x8xf32>
    %242 = arith.truncf %241 : vector<8x8xf32> to vector<8x8xbf16>
    %cst_87 = arith.constant dense<0.000000e+00> : vector<8x128xf32>
    %243 = tpu.matmul %242, %239, %cst_87 {dimension_numbers = #tpu.dot_dimension_numbers<[1], [0], [0], [1], [0, 0, 1, 1], [], []>} : vector<8x8xbf16>, vector<8x128xbf16>, vector<8x128xf32> -> vector<8x128xf32>
    %244 = vector.broadcast %14 : vector<1x128xf32> to vector<8x128xf32>
    %245 = arith.mulf %188, %244 : vector<8x128xf32>
    %246 = arith.truncf %245 : vector<8x128xf32> to vector<8x128xbf16>
    %247 = vector.extract_strided_slice %236 {offsets = [1, 0, 0], sizes = [1, 8, 8], strides = [1, 1, 1]} : vector<4x8x8xf32> to vector<1x8x8xf32>
    %248 = vector.shape_cast %247 : vector<1x8x8xf32> to vector<8x8xf32>
    %249 = arith.truncf %248 : vector<8x8xf32> to vector<8x8xbf16>
    %cst_88 = arith.constant dense<0.000000e+00> : vector<8x128xf32>
    %250 = tpu.matmul %249, %246, %cst_88 {dimension_numbers = #tpu.dot_dimension_numbers<[1], [0], [0], [1], [0, 0, 1, 1], [], []>} : vector<8x8xbf16>, vector<8x128xbf16>, vector<8x128xf32> -> vector<8x128xf32>
    %251 = arith.addf %243, %250 : vector<8x128xf32>
    %252 = vector.broadcast %21 : vector<1x128xf32> to vector<8x128xf32>
    %253 = arith.mulf %188, %252 : vector<8x128xf32>
    %254 = arith.truncf %253 : vector<8x128xf32> to vector<8x128xbf16>
    %255 = vector.extract_strided_slice %236 {offsets = [2, 0, 0], sizes = [1, 8, 8], strides = [1, 1, 1]} : vector<4x8x8xf32> to vector<1x8x8xf32>
    %256 = vector.shape_cast %255 : vector<1x8x8xf32> to vector<8x8xf32>
    %257 = arith.truncf %256 : vector<8x8xf32> to vector<8x8xbf16>
    %cst_89 = arith.constant dense<0.000000e+00> : vector<8x128xf32>
    %258 = tpu.matmul %257, %254, %cst_89 {dimension_numbers = #tpu.dot_dimension_numbers<[1], [0], [0], [1], [0, 0, 1, 1], [], []>} : vector<8x8xbf16>, vector<8x128xbf16>, vector<8x128xf32> -> vector<8x128xf32>
    %259 = arith.addf %251, %258 : vector<8x128xf32>
    %260 = vector.broadcast %28 : vector<1x128xf32> to vector<8x128xf32>
    %261 = arith.mulf %188, %260 : vector<8x128xf32>
    %262 = arith.truncf %261 : vector<8x128xf32> to vector<8x128xbf16>
    %263 = vector.extract_strided_slice %236 {offsets = [3, 0, 0], sizes = [1, 8, 8], strides = [1, 1, 1]} : vector<4x8x8xf32> to vector<1x8x8xf32>
    %264 = vector.shape_cast %263 : vector<1x8x8xf32> to vector<8x8xf32>
    %265 = arith.truncf %264 : vector<8x8xf32> to vector<8x8xbf16>
    %cst_90 = arith.constant dense<0.000000e+00> : vector<8x128xf32>
    %266 = tpu.matmul %265, %262, %cst_90 {dimension_numbers = #tpu.dot_dimension_numbers<[1], [0], [0], [1], [0, 0, 1, 1], [], []>} : vector<8x8xbf16>, vector<8x128xbf16>, vector<8x128xf32> -> vector<8x128xf32>
    %267 = arith.addf %259, %266 : vector<8x128xf32>
    %268 = arith.truncf %267 : vector<8x128xf32> to vector<8x128xbf16>
    %cst_91 = arith.constant dense<0.000000e+00> : vector<8x128xf32>
    %269 = tpu.matmul %268, %190, %cst_91 {dimension_numbers = #tpu.dot_dimension_numbers<[1], [0], [0], [1], [0, 0, 1, 1], [], []>} : vector<8x128xbf16>, vector<128x128xbf16>, vector<8x128xf32> -> vector<8x128xf32>
    %270 = vector.broadcast %192 : vector<1x128xf32> to vector<8x128xf32>
    %271 = arith.addf %269, %270 : vector<8x128xf32>
    %c0_92 = arith.constant 0 : index
    %c0_93 = arith.constant 0 : index
    %c0_94 = arith.constant 0 : index
    %272 = vector.load %arg17[%c0_92, %c0_93, %c0_94] : memref<2x1x128xf32, #tpu.memory_space<vmem>>, vector<1x1x128xf32>
    %273 = vector.shape_cast %272 : vector<1x1x128xf32> to vector<1x128xf32>
    %c0_95 = arith.constant 0 : index
    %c0_96 = arith.constant 0 : index
    %c0_97 = arith.constant 0 : index
    %274 = vector.load %arg18[%c0_95, %c0_96, %c0_97] : memref<2x1x128xf32, #tpu.memory_space<vmem>>, vector<1x1x128xf32>
    %275 = vector.shape_cast %274 : vector<1x1x128xf32> to vector<1x128xf32>
    %276 = arith.addf %271, %171 : vector<8x128xf32>
    %277 = tpu.iota {dimensions = array<i32: 1>} : vector<1x128xi32>
    %c32_i32_98 = arith.constant 32 : i32
    %278 = vector.broadcast %c32_i32_98 : i32 to vector<1x128xi32>
    %279 = arith.cmpi slt, %277, %278 : vector<1x128xi32>
    %280 = arith.extui %279 : vector<1x128xi1> to vector<1x128xi32>
    %281 = arith.sitofp %280 : vector<1x128xi32> to vector<1x128xf32>
    %cst_99 = arith.constant dense<0.000000e+00> : vector<8xf32>
    %282 = vector.multi_reduction <add>, %276, %cst_99 [1] : vector<8x128xf32> to vector<8xf32>
    %283 = vector.shape_cast %282 : vector<8xf32> to vector<8x1xf32>
    %cst_100 = arith.constant 3.125000e-02 : f32
    %284 = vector.broadcast %cst_100 : f32 to vector<8x1xf32>
    %285 = arith.mulf %283, %284 : vector<8x1xf32>
    %286 = vector.broadcast %285 : vector<8x1xf32> to vector<8x128xf32>
    %287 = arith.subf %276, %286 : vector<8x128xf32>
    %288 = vector.broadcast %281 : vector<1x128xf32> to vector<8x128xf32>
    %289 = arith.mulf %287, %288 : vector<8x128xf32>
    %290 = arith.mulf %289, %289 : vector<8x128xf32>
    %cst_101 = arith.constant dense<0.000000e+00> : vector<8xf32>
    %291 = vector.multi_reduction <add>, %290, %cst_101 [1] : vector<8x128xf32> to vector<8xf32>
    %292 = vector.shape_cast %291 : vector<8xf32> to vector<8x1xf32>
    %cst_102 = arith.constant 3.125000e-02 : f32
    %293 = vector.broadcast %cst_102 : f32 to vector<8x1xf32>
    %294 = arith.mulf %292, %293 : vector<8x1xf32>
    %cst_103 = arith.constant 9.99999996E-13 : f32
    %295 = vector.broadcast %cst_103 : f32 to vector<8x1xf32>
    %296 = arith.addf %294, %295 : vector<8x1xf32>
    %297 = math.rsqrt %296 : vector<8x1xf32>
    %298 = vector.broadcast %297 : vector<8x1xf32> to vector<8x128xf32>
    %299 = arith.mulf %289, %298 : vector<8x128xf32>
    %300 = vector.broadcast %273 : vector<1x128xf32> to vector<8x128xf32>
    %301 = arith.mulf %299, %300 : vector<8x128xf32>
    %302 = vector.broadcast %275 : vector<1x128xf32> to vector<8x128xf32>
    %303 = arith.addf %301, %302 : vector<8x128xf32>
    %304 = arith.truncf %303 : vector<8x128xf32> to vector<8x128xbf16>
    %c0_104 = arith.constant 0 : index
    %c0_105 = arith.constant 0 : index
    %c0_106 = arith.constant 0 : index
    %305 = vector.load %arg19[%c0_104, %c0_105, %c0_106] : memref<2x128x128xbf16, #tpu.memory_space<vmem>>, vector<1x128x128xbf16>
    %306 = vector.shape_cast %305 : vector<1x128x128xbf16> to vector<128x128xbf16>
    %cst_107 = arith.constant dense<0.000000e+00> : vector<8x128xf32>
    %307 = tpu.matmul %304, %306, %cst_107 {dimension_numbers = #tpu.dot_dimension_numbers<[1], [0], [0], [1], [0, 0, 1, 1], [], []>} : vector<8x128xbf16>, vector<128x128xbf16>, vector<8x128xf32> -> vector<8x128xf32>
    %c0_108 = arith.constant 0 : index
    %c0_109 = arith.constant 0 : index
    %c0_110 = arith.constant 0 : index
    %308 = vector.load %arg20[%c0_108, %c0_109, %c0_110] : memref<2x1x128xf32, #tpu.memory_space<vmem>>, vector<1x1x128xf32>
    %309 = vector.shape_cast %308 : vector<1x1x128xf32> to vector<1x128xf32>
    %310 = vector.broadcast %309 : vector<1x128xf32> to vector<8x128xf32>
    %311 = arith.addf %307, %310 : vector<8x128xf32>
    %cst_111 = arith.constant 0.000000e+00 : f32
    %312 = vector.broadcast %cst_111 : f32 to vector<8x128xf32>
    %313 = arith.maximumf %311, %312 : vector<8x128xf32>
    %314 = arith.truncf %313 : vector<8x128xf32> to vector<8x128xbf16>
    %c0_112 = arith.constant 0 : index
    %c0_113 = arith.constant 0 : index
    %c0_114 = arith.constant 0 : index
    %315 = vector.load %arg21[%c0_112, %c0_113, %c0_114] : memref<2x128x128xbf16, #tpu.memory_space<vmem>>, vector<1x128x128xbf16>
    %316 = vector.shape_cast %315 : vector<1x128x128xbf16> to vector<128x128xbf16>
    %cst_115 = arith.constant dense<0.000000e+00> : vector<8x128xf32>
    %317 = tpu.matmul %314, %316, %cst_115 {dimension_numbers = #tpu.dot_dimension_numbers<[1], [0], [0], [1], [0, 0, 1, 1], [], []>} : vector<8x128xbf16>, vector<128x128xbf16>, vector<8x128xf32> -> vector<8x128xf32>
    %c0_116 = arith.constant 0 : index
    %c0_117 = arith.constant 0 : index
    %c0_118 = arith.constant 0 : index
    %318 = vector.load %arg22[%c0_116, %c0_117, %c0_118] : memref<2x1x128xf32, #tpu.memory_space<vmem>>, vector<1x1x128xf32>
    %319 = vector.shape_cast %318 : vector<1x1x128xf32> to vector<1x128xf32>
    %320 = vector.broadcast %319 : vector<1x128xf32> to vector<8x128xf32>
    %321 = arith.addf %317, %320 : vector<8x128xf32>
    %c0_119 = arith.constant 0 : index
    %c0_120 = arith.constant 0 : index
    %c0_121 = arith.constant 0 : index
    %322 = vector.load %arg23[%c0_119, %c0_120, %c0_121] : memref<2x1x128xf32, #tpu.memory_space<vmem>>, vector<1x1x128xf32>
    %323 = vector.shape_cast %322 : vector<1x1x128xf32> to vector<1x128xf32>
    %c0_122 = arith.constant 0 : index
    %c0_123 = arith.constant 0 : index
    %c0_124 = arith.constant 0 : index
    %324 = vector.load %arg24[%c0_122, %c0_123, %c0_124] : memref<2x1x128xf32, #tpu.memory_space<vmem>>, vector<1x1x128xf32>
    %325 = vector.shape_cast %324 : vector<1x1x128xf32> to vector<1x128xf32>
    %326 = arith.addf %321, %303 : vector<8x128xf32>
    %327 = tpu.iota {dimensions = array<i32: 1>} : vector<1x128xi32>
    %c32_i32_125 = arith.constant 32 : i32
    %328 = vector.broadcast %c32_i32_125 : i32 to vector<1x128xi32>
    %329 = arith.cmpi slt, %327, %328 : vector<1x128xi32>
    %330 = arith.extui %329 : vector<1x128xi1> to vector<1x128xi32>
    %331 = arith.sitofp %330 : vector<1x128xi32> to vector<1x128xf32>
    %cst_126 = arith.constant dense<0.000000e+00> : vector<8xf32>
    %332 = vector.multi_reduction <add>, %326, %cst_126 [1] : vector<8x128xf32> to vector<8xf32>
    %333 = vector.shape_cast %332 : vector<8xf32> to vector<8x1xf32>
    %cst_127 = arith.constant 3.125000e-02 : f32
    %334 = vector.broadcast %cst_127 : f32 to vector<8x1xf32>
    %335 = arith.mulf %333, %334 : vector<8x1xf32>
    %336 = vector.broadcast %335 : vector<8x1xf32> to vector<8x128xf32>
    %337 = arith.subf %326, %336 : vector<8x128xf32>
    %338 = vector.broadcast %331 : vector<1x128xf32> to vector<8x128xf32>
    %339 = arith.mulf %337, %338 : vector<8x128xf32>
    %340 = arith.mulf %339, %339 : vector<8x128xf32>
    %cst_128 = arith.constant dense<0.000000e+00> : vector<8xf32>
    %341 = vector.multi_reduction <add>, %340, %cst_128 [1] : vector<8x128xf32> to vector<8xf32>
    %342 = vector.shape_cast %341 : vector<8xf32> to vector<8x1xf32>
    %cst_129 = arith.constant 3.125000e-02 : f32
    %343 = vector.broadcast %cst_129 : f32 to vector<8x1xf32>
    %344 = arith.mulf %342, %343 : vector<8x1xf32>
    %cst_130 = arith.constant 9.99999996E-13 : f32
    %345 = vector.broadcast %cst_130 : f32 to vector<8x1xf32>
    %346 = arith.addf %344, %345 : vector<8x1xf32>
    %347 = math.rsqrt %346 : vector<8x1xf32>
    %348 = vector.broadcast %347 : vector<8x1xf32> to vector<8x128xf32>
    %349 = arith.mulf %339, %348 : vector<8x128xf32>
    %350 = vector.broadcast %323 : vector<1x128xf32> to vector<8x128xf32>
    %351 = arith.mulf %349, %350 : vector<8x128xf32>
    %352 = vector.broadcast %325 : vector<1x128xf32> to vector<8x128xf32>
    %353 = arith.addf %351, %352 : vector<8x128xf32>
    %354 = arith.truncf %353 : vector<8x128xf32> to vector<8x128xbf16>
    %c1 = arith.constant 1 : index
    %c0_131 = arith.constant 0 : index
    %c0_132 = arith.constant 0 : index
    %355 = vector.load %arg5[%c1, %c0_131, %c0_132] : memref<2x128x384xbf16, #tpu.memory_space<vmem>>, vector<1x128x384xbf16>
    %356 = vector.shape_cast %355 : vector<1x128x384xbf16> to vector<128x384xbf16>
    %cst_133 = arith.constant dense<0.000000e+00> : vector<8x384xf32>
    %357 = tpu.matmul %354, %356, %cst_133 {dimension_numbers = #tpu.dot_dimension_numbers<[1], [0], [0], [1], [0, 0, 1, 1], [], []>} : vector<8x128xbf16>, vector<128x384xbf16>, vector<8x384xf32> -> vector<8x384xf32>
    %c1_134 = arith.constant 1 : index
    %c0_135 = arith.constant 0 : index
    %c0_136 = arith.constant 0 : index
    %358 = vector.load %arg6[%c1_134, %c0_135, %c0_136] : memref<2x1x384xf32, #tpu.memory_space<vmem>>, vector<1x1x384xf32>
    %359 = vector.shape_cast %358 : vector<1x1x384xf32> to vector<1x384xf32>
    %360 = vector.broadcast %359 : vector<1x384xf32> to vector<8x384xf32>
    %361 = arith.addf %357, %360 : vector<8x384xf32>
    %362 = vector.extract_strided_slice %361 {offsets = [0, 0], sizes = [8, 128], strides = [1, 1]} : vector<8x384xf32> to vector<8x128xf32>
    %363 = vector.extract_strided_slice %361 {offsets = [0, 128], sizes = [8, 128], strides = [1, 1]} : vector<8x384xf32> to vector<8x128xf32>
    %364 = vector.extract_strided_slice %361 {offsets = [0, 256], sizes = [8, 128], strides = [1, 1]} : vector<8x384xf32> to vector<8x128xf32>
    %c1_137 = arith.constant 1 : index
    %c0_138 = arith.constant 0 : index
    %c0_139 = arith.constant 0 : index
    %365 = vector.load %arg7[%c1_137, %c0_138, %c0_139] : memref<2x128x128xbf16, #tpu.memory_space<vmem>>, vector<1x128x128xbf16>
    %366 = vector.shape_cast %365 : vector<1x128x128xbf16> to vector<128x128xbf16>
    %c1_140 = arith.constant 1 : index
    %c0_141 = arith.constant 0 : index
    %c0_142 = arith.constant 0 : index
    %367 = vector.load %arg8[%c1_140, %c0_141, %c0_142] : memref<2x1x128xf32, #tpu.memory_space<vmem>>, vector<1x1x128xf32>
    %368 = vector.shape_cast %367 : vector<1x1x128xf32> to vector<1x128xf32>
    %369 = arith.truncf %363 : vector<8x128xf32> to vector<8x128xbf16>
    %370 = vector.broadcast %7 : vector<1x128xf32> to vector<8x128xf32>
    %371 = arith.mulf %362, %370 : vector<8x128xf32>
    %372 = arith.truncf %371 : vector<8x128xf32> to vector<8x128xbf16>
    %cst_143 = arith.constant dense<0.000000e+00> : vector<8x8xf32>
    %373 = tpu.matmul %372, %369, %cst_143 {dimension_numbers = #tpu.dot_dimension_numbers<[1], [1], [0], [0], [0, 0, 1, 0], [], []>} : vector<8x128xbf16>, vector<8x128xbf16>, vector<8x8xf32> -> vector<8x8xf32>
    %cst_144 = arith.constant 0.353553385 : f32
    %374 = vector.broadcast %cst_144 : f32 to vector<8x8xf32>
    %375 = arith.mulf %373, %374 : vector<8x8xf32>
    %376 = vector.broadcast %14 : vector<1x128xf32> to vector<8x128xf32>
    %377 = arith.mulf %362, %376 : vector<8x128xf32>
    %378 = arith.truncf %377 : vector<8x128xf32> to vector<8x128xbf16>
    %cst_145 = arith.constant dense<0.000000e+00> : vector<8x8xf32>
    %379 = tpu.matmul %378, %369, %cst_145 {dimension_numbers = #tpu.dot_dimension_numbers<[1], [1], [0], [0], [0, 0, 1, 0], [], []>} : vector<8x128xbf16>, vector<8x128xbf16>, vector<8x8xf32> -> vector<8x8xf32>
    %cst_146 = arith.constant 0.353553385 : f32
    %380 = vector.broadcast %cst_146 : f32 to vector<8x8xf32>
    %381 = arith.mulf %379, %380 : vector<8x8xf32>
    %382 = vector.broadcast %21 : vector<1x128xf32> to vector<8x128xf32>
    %383 = arith.mulf %362, %382 : vector<8x128xf32>
    %384 = arith.truncf %383 : vector<8x128xf32> to vector<8x128xbf16>
    %cst_147 = arith.constant dense<0.000000e+00> : vector<8x8xf32>
    %385 = tpu.matmul %384, %369, %cst_147 {dimension_numbers = #tpu.dot_dimension_numbers<[1], [1], [0], [0], [0, 0, 1, 0], [], []>} : vector<8x128xbf16>, vector<8x128xbf16>, vector<8x8xf32> -> vector<8x8xf32>
    %cst_148 = arith.constant 0.353553385 : f32
    %386 = vector.broadcast %cst_148 : f32 to vector<8x8xf32>
    %387 = arith.mulf %385, %386 : vector<8x8xf32>
    %388 = vector.broadcast %28 : vector<1x128xf32> to vector<8x128xf32>
    %389 = arith.mulf %362, %388 : vector<8x128xf32>
    %390 = arith.truncf %389 : vector<8x128xf32> to vector<8x128xbf16>
    %cst_149 = arith.constant dense<0.000000e+00> : vector<8x8xf32>
    %391 = tpu.matmul %390, %369, %cst_149 {dimension_numbers = #tpu.dot_dimension_numbers<[1], [1], [0], [0], [0, 0, 1, 0], [], []>} : vector<8x128xbf16>, vector<8x128xbf16>, vector<8x8xf32> -> vector<8x8xf32>
    %cst_150 = arith.constant 0.353553385 : f32
    %392 = vector.broadcast %cst_150 : f32 to vector<8x8xf32>
    %393 = arith.mulf %391, %392 : vector<8x8xf32>
    %394 = vector.shape_cast %375 : vector<8x8xf32> to vector<1x8x8xf32>
    %395 = vector.shape_cast %381 : vector<8x8xf32> to vector<1x8x8xf32>
    %396 = vector.shape_cast %387 : vector<8x8xf32> to vector<1x8x8xf32>
    %397 = vector.shape_cast %393 : vector<8x8xf32> to vector<1x8x8xf32>
    %398 = tpu.concatenate %394, %395, %396, %397 in 0 : vector<1x8x8xf32>, vector<1x8x8xf32>, vector<1x8x8xf32>, vector<1x8x8xf32> -> vector<4x8x8xf32>
    %399 = vector.shape_cast %41 : vector<8x8xi1> to vector<1x8x8xi1>
    %cst_151 = arith.constant -1.000000e+04 : f32
    %400 = vector.shape_cast %399 : vector<1x8x8xi1> to vector<1x8x8xi1>
    %401 = vector.broadcast %400 : vector<1x8x8xi1> to vector<4x8x8xi1>
    %402 = vector.broadcast %cst_151 : f32 to vector<4x8x8xf32>
    %403 = arith.select %401, %398, %402 : vector<4x8x8xi1>, vector<4x8x8xf32>
    %cst_152 = arith.constant dense<0xFF800000> : vector<4x8xf32>
    %404 = vector.multi_reduction <maximumf>, %403, %cst_152 [2] : vector<4x8x8xf32> to vector<4x8xf32>
    %405 = vector.shape_cast %404 : vector<4x8xf32> to vector<4x8x1xf32>
    %406 = vector.broadcast %405 : vector<4x8x1xf32> to vector<4x8x8xf32>
    %407 = arith.subf %403, %406 : vector<4x8x8xf32>
    %408 = math.exp %407 : vector<4x8x8xf32>
    %cst_153 = arith.constant dense<0.000000e+00> : vector<4x8xf32>
    %409 = vector.multi_reduction <add>, %408, %cst_153 [2] : vector<4x8x8xf32> to vector<4x8xf32>
    %410 = vector.shape_cast %409 : vector<4x8xf32> to vector<4x8x1xf32>
    %411 = vector.broadcast %410 : vector<4x8x1xf32> to vector<4x8x8xf32>
    %412 = arith.divf %408, %411 : vector<4x8x8xf32>
    %413 = vector.broadcast %7 : vector<1x128xf32> to vector<8x128xf32>
    %414 = arith.mulf %364, %413 : vector<8x128xf32>
    %415 = arith.truncf %414 : vector<8x128xf32> to vector<8x128xbf16>
    %416 = vector.extract_strided_slice %412 {offsets = [0, 0, 0], sizes = [1, 8, 8], strides = [1, 1, 1]} : vector<4x8x8xf32> to vector<1x8x8xf32>
    %417 = vector.shape_cast %416 : vector<1x8x8xf32> to vector<8x8xf32>
    %418 = arith.truncf %417 : vector<8x8xf32> to vector<8x8xbf16>
    %cst_154 = arith.constant dense<0.000000e+00> : vector<8x128xf32>
    %419 = tpu.matmul %418, %415, %cst_154 {dimension_numbers = #tpu.dot_dimension_numbers<[1], [0], [0], [1], [0, 0, 1, 1], [], []>} : vector<8x8xbf16>, vector<8x128xbf16>, vector<8x128xf32> -> vector<8x128xf32>
    %420 = vector.broadcast %14 : vector<1x128xf32> to vector<8x128xf32>
    %421 = arith.mulf %364, %420 : vector<8x128xf32>
    %422 = arith.truncf %421 : vector<8x128xf32> to vector<8x128xbf16>
    %423 = vector.extract_strided_slice %412 {offsets = [1, 0, 0], sizes = [1, 8, 8], strides = [1, 1, 1]} : vector<4x8x8xf32> to vector<1x8x8xf32>
    %424 = vector.shape_cast %423 : vector<1x8x8xf32> to vector<8x8xf32>
    %425 = arith.truncf %424 : vector<8x8xf32> to vector<8x8xbf16>
    %cst_155 = arith.constant dense<0.000000e+00> : vector<8x128xf32>
    %426 = tpu.matmul %425, %422, %cst_155 {dimension_numbers = #tpu.dot_dimension_numbers<[1], [0], [0], [1], [0, 0, 1, 1], [], []>} : vector<8x8xbf16>, vector<8x128xbf16>, vector<8x128xf32> -> vector<8x128xf32>
    %427 = arith.addf %419, %426 : vector<8x128xf32>
    %428 = vector.broadcast %21 : vector<1x128xf32> to vector<8x128xf32>
    %429 = arith.mulf %364, %428 : vector<8x128xf32>
    %430 = arith.truncf %429 : vector<8x128xf32> to vector<8x128xbf16>
    %431 = vector.extract_strided_slice %412 {offsets = [2, 0, 0], sizes = [1, 8, 8], strides = [1, 1, 1]} : vector<4x8x8xf32> to vector<1x8x8xf32>
    %432 = vector.shape_cast %431 : vector<1x8x8xf32> to vector<8x8xf32>
    %433 = arith.truncf %432 : vector<8x8xf32> to vector<8x8xbf16>
    %cst_156 = arith.constant dense<0.000000e+00> : vector<8x128xf32>
    %434 = tpu.matmul %433, %430, %cst_156 {dimension_numbers = #tpu.dot_dimension_numbers<[1], [0], [0], [1], [0, 0, 1, 1], [], []>} : vector<8x8xbf16>, vector<8x128xbf16>, vector<8x128xf32> -> vector<8x128xf32>
    %435 = arith.addf %427, %434 : vector<8x128xf32>
    %436 = vector.broadcast %28 : vector<1x128xf32> to vector<8x128xf32>
    %437 = arith.mulf %364, %436 : vector<8x128xf32>
    %438 = arith.truncf %437 : vector<8x128xf32> to vector<8x128xbf16>
    %439 = vector.extract_strided_slice %412 {offsets = [3, 0, 0], sizes = [1, 8, 8], strides = [1, 1, 1]} : vector<4x8x8xf32> to vector<1x8x8xf32>
    %440 = vector.shape_cast %439 : vector<1x8x8xf32> to vector<8x8xf32>
    %441 = arith.truncf %440 : vector<8x8xf32> to vector<8x8xbf16>
    %cst_157 = arith.constant dense<0.000000e+00> : vector<8x128xf32>
    %442 = tpu.matmul %441, %438, %cst_157 {dimension_numbers = #tpu.dot_dimension_numbers<[1], [0], [0], [1], [0, 0, 1, 1], [], []>} : vector<8x8xbf16>, vector<8x128xbf16>, vector<8x128xf32> -> vector<8x128xf32>
    %443 = arith.addf %435, %442 : vector<8x128xf32>
    %444 = arith.truncf %443 : vector<8x128xf32> to vector<8x128xbf16>
    %cst_158 = arith.constant dense<0.000000e+00> : vector<8x128xf32>
    %445 = tpu.matmul %444, %366, %cst_158 {dimension_numbers = #tpu.dot_dimension_numbers<[1], [0], [0], [1], [0, 0, 1, 1], [], []>} : vector<8x128xbf16>, vector<128x128xbf16>, vector<8x128xf32> -> vector<8x128xf32>
    %446 = vector.broadcast %368 : vector<1x128xf32> to vector<8x128xf32>
    %447 = arith.addf %445, %446 : vector<8x128xf32>
    %c1_159 = arith.constant 1 : index
    %c0_160 = arith.constant 0 : index
    %c0_161 = arith.constant 0 : index
    %448 = vector.load %arg9[%c1_159, %c0_160, %c0_161] : memref<2x1x128xf32, #tpu.memory_space<vmem>>, vector<1x1x128xf32>
    %449 = vector.shape_cast %448 : vector<1x1x128xf32> to vector<1x128xf32>
    %c1_162 = arith.constant 1 : index
    %c0_163 = arith.constant 0 : index
    %c0_164 = arith.constant 0 : index
    %450 = vector.load %arg10[%c1_162, %c0_163, %c0_164] : memref<2x1x128xf32, #tpu.memory_space<vmem>>, vector<1x1x128xf32>
    %451 = vector.shape_cast %450 : vector<1x1x128xf32> to vector<1x128xf32>
    %452 = arith.addf %447, %353 : vector<8x128xf32>
    %453 = tpu.iota {dimensions = array<i32: 1>} : vector<1x128xi32>
    %c32_i32_165 = arith.constant 32 : i32
    %454 = vector.broadcast %c32_i32_165 : i32 to vector<1x128xi32>
    %455 = arith.cmpi slt, %453, %454 : vector<1x128xi32>
    %456 = arith.extui %455 : vector<1x128xi1> to vector<1x128xi32>
    %457 = arith.sitofp %456 : vector<1x128xi32> to vector<1x128xf32>
    %cst_166 = arith.constant dense<0.000000e+00> : vector<8xf32>
    %458 = vector.multi_reduction <add>, %452, %cst_166 [1] : vector<8x128xf32> to vector<8xf32>
    %459 = vector.shape_cast %458 : vector<8xf32> to vector<8x1xf32>
    %cst_167 = arith.constant 3.125000e-02 : f32
    %460 = vector.broadcast %cst_167 : f32 to vector<8x1xf32>
    %461 = arith.mulf %459, %460 : vector<8x1xf32>
    %462 = vector.broadcast %461 : vector<8x1xf32> to vector<8x128xf32>
    %463 = arith.subf %452, %462 : vector<8x128xf32>
    %464 = vector.broadcast %457 : vector<1x128xf32> to vector<8x128xf32>
    %465 = arith.mulf %463, %464 : vector<8x128xf32>
    %466 = arith.mulf %465, %465 : vector<8x128xf32>
    %cst_168 = arith.constant dense<0.000000e+00> : vector<8xf32>
    %467 = vector.multi_reduction <add>, %466, %cst_168 [1] : vector<8x128xf32> to vector<8xf32>
    %468 = vector.shape_cast %467 : vector<8xf32> to vector<8x1xf32>
    %cst_169 = arith.constant 3.125000e-02 : f32
    %469 = vector.broadcast %cst_169 : f32 to vector<8x1xf32>
    %470 = arith.mulf %468, %469 : vector<8x1xf32>
    %cst_170 = arith.constant 9.99999996E-13 : f32
    %471 = vector.broadcast %cst_170 : f32 to vector<8x1xf32>
    %472 = arith.addf %470, %471 : vector<8x1xf32>
    %473 = math.rsqrt %472 : vector<8x1xf32>
    %474 = vector.broadcast %473 : vector<8x1xf32> to vector<8x128xf32>
    %475 = arith.mulf %465, %474 : vector<8x128xf32>
    %476 = vector.broadcast %449 : vector<1x128xf32> to vector<8x128xf32>
    %477 = arith.mulf %475, %476 : vector<8x128xf32>
    %478 = vector.broadcast %451 : vector<1x128xf32> to vector<8x128xf32>
    %479 = arith.addf %477, %478 : vector<8x128xf32>
    %480 = arith.truncf %479 : vector<8x128xf32> to vector<8x128xbf16>
    %c1_171 = arith.constant 1 : index
    %c0_172 = arith.constant 0 : index
    %c0_173 = arith.constant 0 : index
    %481 = vector.load %arg11[%c1_171, %c0_172, %c0_173] : memref<2x128x128xbf16, #tpu.memory_space<vmem>>, vector<1x128x128xbf16>
    %482 = vector.shape_cast %481 : vector<1x128x128xbf16> to vector<128x128xbf16>
    %cst_174 = arith.constant dense<0.000000e+00> : vector<8x128xf32>
    %483 = tpu.matmul %480, %482, %cst_174 {dimension_numbers = #tpu.dot_dimension_numbers<[1], [0], [0], [1], [0, 0, 1, 1], [], []>} : vector<8x128xbf16>, vector<128x128xbf16>, vector<8x128xf32> -> vector<8x128xf32>
    %c1_175 = arith.constant 1 : index
    %c0_176 = arith.constant 0 : index
    %c0_177 = arith.constant 0 : index
    %484 = vector.load %arg12[%c1_175, %c0_176, %c0_177] : memref<2x1x128xf32, #tpu.memory_space<vmem>>, vector<1x1x128xf32>
    %485 = vector.shape_cast %484 : vector<1x1x128xf32> to vector<1x128xf32>
    %486 = vector.broadcast %485 : vector<1x128xf32> to vector<8x128xf32>
    %487 = arith.addf %483, %486 : vector<8x128xf32>
    %c1_178 = arith.constant 1 : index
    %c0_179 = arith.constant 0 : index
    %c0_180 = arith.constant 0 : index
    %488 = vector.load %arg13[%c1_178, %c0_179, %c0_180] : memref<2x128x256xbf16, #tpu.memory_space<vmem>>, vector<1x128x256xbf16>
    %489 = vector.shape_cast %488 : vector<1x128x256xbf16> to vector<128x256xbf16>
    %cst_181 = arith.constant dense<0.000000e+00> : vector<8x256xf32>
    %490 = tpu.matmul %32, %489, %cst_181 {dimension_numbers = #tpu.dot_dimension_numbers<[1], [0], [0], [1], [0, 0, 1, 1], [], []>} : vector<8x128xbf16>, vector<128x256xbf16>, vector<8x256xf32> -> vector<8x256xf32>
    %c1_182 = arith.constant 1 : index
    %c0_183 = arith.constant 0 : index
    %c0_184 = arith.constant 0 : index
    %491 = vector.load %arg14[%c1_182, %c0_183, %c0_184] : memref<2x1x256xf32, #tpu.memory_space<vmem>>, vector<1x1x256xf32>
    %492 = vector.shape_cast %491 : vector<1x1x256xf32> to vector<1x256xf32>
    %493 = vector.broadcast %492 : vector<1x256xf32> to vector<8x256xf32>
    %494 = arith.addf %490, %493 : vector<8x256xf32>
    %495 = vector.extract_strided_slice %494 {offsets = [0, 0], sizes = [8, 128], strides = [1, 1]} : vector<8x256xf32> to vector<8x128xf32>
    %496 = vector.extract_strided_slice %494 {offsets = [0, 128], sizes = [8, 128], strides = [1, 1]} : vector<8x256xf32> to vector<8x128xf32>
    %c1_185 = arith.constant 1 : index
    %c0_186 = arith.constant 0 : index
    %c0_187 = arith.constant 0 : index
    %497 = vector.load %arg15[%c1_185, %c0_186, %c0_187] : memref<2x128x128xbf16, #tpu.memory_space<vmem>>, vector<1x128x128xbf16>
    %498 = vector.shape_cast %497 : vector<1x128x128xbf16> to vector<128x128xbf16>
    %c1_188 = arith.constant 1 : index
    %c0_189 = arith.constant 0 : index
    %c0_190 = arith.constant 0 : index
    %499 = vector.load %arg16[%c1_188, %c0_189, %c0_190] : memref<2x1x128xf32, #tpu.memory_space<vmem>>, vector<1x1x128xf32>
    %500 = vector.shape_cast %499 : vector<1x1x128xf32> to vector<1x128xf32>
    %501 = arith.truncf %495 : vector<8x128xf32> to vector<8x128xbf16>
    %502 = vector.broadcast %7 : vector<1x128xf32> to vector<8x128xf32>
    %503 = arith.mulf %487, %502 : vector<8x128xf32>
    %504 = arith.truncf %503 : vector<8x128xf32> to vector<8x128xbf16>
    %cst_191 = arith.constant dense<0.000000e+00> : vector<8x8xf32>
    %505 = tpu.matmul %504, %501, %cst_191 {dimension_numbers = #tpu.dot_dimension_numbers<[1], [1], [0], [0], [0, 0, 1, 0], [], []>} : vector<8x128xbf16>, vector<8x128xbf16>, vector<8x8xf32> -> vector<8x8xf32>
    %cst_192 = arith.constant 0.353553385 : f32
    %506 = vector.broadcast %cst_192 : f32 to vector<8x8xf32>
    %507 = arith.mulf %505, %506 : vector<8x8xf32>
    %508 = vector.broadcast %14 : vector<1x128xf32> to vector<8x128xf32>
    %509 = arith.mulf %487, %508 : vector<8x128xf32>
    %510 = arith.truncf %509 : vector<8x128xf32> to vector<8x128xbf16>
    %cst_193 = arith.constant dense<0.000000e+00> : vector<8x8xf32>
    %511 = tpu.matmul %510, %501, %cst_193 {dimension_numbers = #tpu.dot_dimension_numbers<[1], [1], [0], [0], [0, 0, 1, 0], [], []>} : vector<8x128xbf16>, vector<8x128xbf16>, vector<8x8xf32> -> vector<8x8xf32>
    %cst_194 = arith.constant 0.353553385 : f32
    %512 = vector.broadcast %cst_194 : f32 to vector<8x8xf32>
    %513 = arith.mulf %511, %512 : vector<8x8xf32>
    %514 = vector.broadcast %21 : vector<1x128xf32> to vector<8x128xf32>
    %515 = arith.mulf %487, %514 : vector<8x128xf32>
    %516 = arith.truncf %515 : vector<8x128xf32> to vector<8x128xbf16>
    %cst_195 = arith.constant dense<0.000000e+00> : vector<8x8xf32>
    %517 = tpu.matmul %516, %501, %cst_195 {dimension_numbers = #tpu.dot_dimension_numbers<[1], [1], [0], [0], [0, 0, 1, 0], [], []>} : vector<8x128xbf16>, vector<8x128xbf16>, vector<8x8xf32> -> vector<8x8xf32>
    %cst_196 = arith.constant 0.353553385 : f32
    %518 = vector.broadcast %cst_196 : f32 to vector<8x8xf32>
    %519 = arith.mulf %517, %518 : vector<8x8xf32>
    %520 = vector.broadcast %28 : vector<1x128xf32> to vector<8x128xf32>
    %521 = arith.mulf %487, %520 : vector<8x128xf32>
    %522 = arith.truncf %521 : vector<8x128xf32> to vector<8x128xbf16>
    %cst_197 = arith.constant dense<0.000000e+00> : vector<8x8xf32>
    %523 = tpu.matmul %522, %501, %cst_197 {dimension_numbers = #tpu.dot_dimension_numbers<[1], [1], [0], [0], [0, 0, 1, 0], [], []>} : vector<8x128xbf16>, vector<8x128xbf16>, vector<8x8xf32> -> vector<8x8xf32>
    %cst_198 = arith.constant 0.353553385 : f32
    %524 = vector.broadcast %cst_198 : f32 to vector<8x8xf32>
    %525 = arith.mulf %523, %524 : vector<8x8xf32>
    %526 = vector.shape_cast %507 : vector<8x8xf32> to vector<1x8x8xf32>
    %527 = vector.shape_cast %513 : vector<8x8xf32> to vector<1x8x8xf32>
    %528 = vector.shape_cast %519 : vector<8x8xf32> to vector<1x8x8xf32>
    %529 = vector.shape_cast %525 : vector<8x8xf32> to vector<1x8x8xf32>
    %530 = tpu.concatenate %526, %527, %528, %529 in 0 : vector<1x8x8xf32>, vector<1x8x8xf32>, vector<1x8x8xf32>, vector<1x8x8xf32> -> vector<4x8x8xf32>
    %531 = vector.shape_cast %45 : vector<1x8xi1> to vector<1x1x8xi1>
    %cst_199 = arith.constant -1.000000e+04 : f32
    %532 = vector.shape_cast %531 : vector<1x1x8xi1> to vector<1x1x8xi1>
    %533 = vector.broadcast %532 : vector<1x1x8xi1> to vector<4x8x8xi1>
    %534 = vector.broadcast %cst_199 : f32 to vector<4x8x8xf32>
    %535 = arith.select %533, %530, %534 : vector<4x8x8xi1>, vector<4x8x8xf32>
    %cst_200 = arith.constant dense<0xFF800000> : vector<4x8xf32>
    %536 = vector.multi_reduction <maximumf>, %535, %cst_200 [2] : vector<4x8x8xf32> to vector<4x8xf32>
    %537 = vector.shape_cast %536 : vector<4x8xf32> to vector<4x8x1xf32>
    %538 = vector.broadcast %537 : vector<4x8x1xf32> to vector<4x8x8xf32>
    %539 = arith.subf %535, %538 : vector<4x8x8xf32>
    %540 = math.exp %539 : vector<4x8x8xf32>
    %cst_201 = arith.constant dense<0.000000e+00> : vector<4x8xf32>
    %541 = vector.multi_reduction <add>, %540, %cst_201 [2] : vector<4x8x8xf32> to vector<4x8xf32>
    %542 = vector.shape_cast %541 : vector<4x8xf32> to vector<4x8x1xf32>
    %543 = vector.broadcast %542 : vector<4x8x1xf32> to vector<4x8x8xf32>
    %544 = arith.divf %540, %543 : vector<4x8x8xf32>
    %545 = vector.broadcast %7 : vector<1x128xf32> to vector<8x128xf32>
    %546 = arith.mulf %496, %545 : vector<8x128xf32>
    %547 = arith.truncf %546 : vector<8x128xf32> to vector<8x128xbf16>
    %548 = vector.extract_strided_slice %544 {offsets = [0, 0, 0], sizes = [1, 8, 8], strides = [1, 1, 1]} : vector<4x8x8xf32> to vector<1x8x8xf32>
    %549 = vector.shape_cast %548 : vector<1x8x8xf32> to vector<8x8xf32>
    %550 = arith.truncf %549 : vector<8x8xf32> to vector<8x8xbf16>
    %cst_202 = arith.constant dense<0.000000e+00> : vector<8x128xf32>
    %551 = tpu.matmul %550, %547, %cst_202 {dimension_numbers = #tpu.dot_dimension_numbers<[1], [0], [0], [1], [0, 0, 1, 1], [], []>} : vector<8x8xbf16>, vector<8x128xbf16>, vector<8x128xf32> -> vector<8x128xf32>
    %552 = vector.broadcast %14 : vector<1x128xf32> to vector<8x128xf32>
    %553 = arith.mulf %496, %552 : vector<8x128xf32>
    %554 = arith.truncf %553 : vector<8x128xf32> to vector<8x128xbf16>
    %555 = vector.extract_strided_slice %544 {offsets = [1, 0, 0], sizes = [1, 8, 8], strides = [1, 1, 1]} : vector<4x8x8xf32> to vector<1x8x8xf32>
    %556 = vector.shape_cast %555 : vector<1x8x8xf32> to vector<8x8xf32>
    %557 = arith.truncf %556 : vector<8x8xf32> to vector<8x8xbf16>
    %cst_203 = arith.constant dense<0.000000e+00> : vector<8x128xf32>
    %558 = tpu.matmul %557, %554, %cst_203 {dimension_numbers = #tpu.dot_dimension_numbers<[1], [0], [0], [1], [0, 0, 1, 1], [], []>} : vector<8x8xbf16>, vector<8x128xbf16>, vector<8x128xf32> -> vector<8x128xf32>
    %559 = arith.addf %551, %558 : vector<8x128xf32>
    %560 = vector.broadcast %21 : vector<1x128xf32> to vector<8x128xf32>
    %561 = arith.mulf %496, %560 : vector<8x128xf32>
    %562 = arith.truncf %561 : vector<8x128xf32> to vector<8x128xbf16>
    %563 = vector.extract_strided_slice %544 {offsets = [2, 0, 0], sizes = [1, 8, 8], strides = [1, 1, 1]} : vector<4x8x8xf32> to vector<1x8x8xf32>
    %564 = vector.shape_cast %563 : vector<1x8x8xf32> to vector<8x8xf32>
    %565 = arith.truncf %564 : vector<8x8xf32> to vector<8x8xbf16>
    %cst_204 = arith.constant dense<0.000000e+00> : vector<8x128xf32>
    %566 = tpu.matmul %565, %562, %cst_204 {dimension_numbers = #tpu.dot_dimension_numbers<[1], [0], [0], [1], [0, 0, 1, 1], [], []>} : vector<8x8xbf16>, vector<8x128xbf16>, vector<8x128xf32> -> vector<8x128xf32>
    %567 = arith.addf %559, %566 : vector<8x128xf32>
    %568 = vector.broadcast %28 : vector<1x128xf32> to vector<8x128xf32>
    %569 = arith.mulf %496, %568 : vector<8x128xf32>
    %570 = arith.truncf %569 : vector<8x128xf32> to vector<8x128xbf16>
    %571 = vector.extract_strided_slice %544 {offsets = [3, 0, 0], sizes = [1, 8, 8], strides = [1, 1, 1]} : vector<4x8x8xf32> to vector<1x8x8xf32>
    %572 = vector.shape_cast %571 : vector<1x8x8xf32> to vector<8x8xf32>
    %573 = arith.truncf %572 : vector<8x8xf32> to vector<8x8xbf16>
    %cst_205 = arith.constant dense<0.000000e+00> : vector<8x128xf32>
    %574 = tpu.matmul %573, %570, %cst_205 {dimension_numbers = #tpu.dot_dimension_numbers<[1], [0], [0], [1], [0, 0, 1, 1], [], []>} : vector<8x8xbf16>, vector<8x128xbf16>, vector<8x128xf32> -> vector<8x128xf32>
    %575 = arith.addf %567, %574 : vector<8x128xf32>
    %576 = arith.truncf %575 : vector<8x128xf32> to vector<8x128xbf16>
    %cst_206 = arith.constant dense<0.000000e+00> : vector<8x128xf32>
    %577 = tpu.matmul %576, %498, %cst_206 {dimension_numbers = #tpu.dot_dimension_numbers<[1], [0], [0], [1], [0, 0, 1, 1], [], []>} : vector<8x128xbf16>, vector<128x128xbf16>, vector<8x128xf32> -> vector<8x128xf32>
    %578 = vector.broadcast %500 : vector<1x128xf32> to vector<8x128xf32>
    %579 = arith.addf %577, %578 : vector<8x128xf32>
    %c1_207 = arith.constant 1 : index
    %c0_208 = arith.constant 0 : index
    %c0_209 = arith.constant 0 : index
    %580 = vector.load %arg17[%c1_207, %c0_208, %c0_209] : memref<2x1x128xf32, #tpu.memory_space<vmem>>, vector<1x1x128xf32>
    %581 = vector.shape_cast %580 : vector<1x1x128xf32> to vector<1x128xf32>
    %c1_210 = arith.constant 1 : index
    %c0_211 = arith.constant 0 : index
    %c0_212 = arith.constant 0 : index
    %582 = vector.load %arg18[%c1_210, %c0_211, %c0_212] : memref<2x1x128xf32, #tpu.memory_space<vmem>>, vector<1x1x128xf32>
    %583 = vector.shape_cast %582 : vector<1x1x128xf32> to vector<1x128xf32>
    %584 = arith.addf %579, %479 : vector<8x128xf32>
    %585 = tpu.iota {dimensions = array<i32: 1>} : vector<1x128xi32>
    %c32_i32_213 = arith.constant 32 : i32
    %586 = vector.broadcast %c32_i32_213 : i32 to vector<1x128xi32>
    %587 = arith.cmpi slt, %585, %586 : vector<1x128xi32>
    %588 = arith.extui %587 : vector<1x128xi1> to vector<1x128xi32>
    %589 = arith.sitofp %588 : vector<1x128xi32> to vector<1x128xf32>
    %cst_214 = arith.constant dense<0.000000e+00> : vector<8xf32>
    %590 = vector.multi_reduction <add>, %584, %cst_214 [1] : vector<8x128xf32> to vector<8xf32>
    %591 = vector.shape_cast %590 : vector<8xf32> to vector<8x1xf32>
    %cst_215 = arith.constant 3.125000e-02 : f32
    %592 = vector.broadcast %cst_215 : f32 to vector<8x1xf32>
    %593 = arith.mulf %591, %592 : vector<8x1xf32>
    %594 = vector.broadcast %593 : vector<8x1xf32> to vector<8x128xf32>
    %595 = arith.subf %584, %594 : vector<8x128xf32>
    %596 = vector.broadcast %589 : vector<1x128xf32> to vector<8x128xf32>
    %597 = arith.mulf %595, %596 : vector<8x128xf32>
    %598 = arith.mulf %597, %597 : vector<8x128xf32>
    %cst_216 = arith.constant dense<0.000000e+00> : vector<8xf32>
    %599 = vector.multi_reduction <add>, %598, %cst_216 [1] : vector<8x128xf32> to vector<8xf32>
    %600 = vector.shape_cast %599 : vector<8xf32> to vector<8x1xf32>
    %cst_217 = arith.constant 3.125000e-02 : f32
    %601 = vector.broadcast %cst_217 : f32 to vector<8x1xf32>
    %602 = arith.mulf %600, %601 : vector<8x1xf32>
    %cst_218 = arith.constant 9.99999996E-13 : f32
    %603 = vector.broadcast %cst_218 : f32 to vector<8x1xf32>
    %604 = arith.addf %602, %603 : vector<8x1xf32>
    %605 = math.rsqrt %604 : vector<8x1xf32>
    %606 = vector.broadcast %605 : vector<8x1xf32> to vector<8x128xf32>
    %607 = arith.mulf %597, %606 : vector<8x128xf32>
    %608 = vector.broadcast %581 : vector<1x128xf32> to vector<8x128xf32>
    %609 = arith.mulf %607, %608 : vector<8x128xf32>
    %610 = vector.broadcast %583 : vector<1x128xf32> to vector<8x128xf32>
    %611 = arith.addf %609, %610 : vector<8x128xf32>
    %612 = arith.truncf %611 : vector<8x128xf32> to vector<8x128xbf16>
    %c1_219 = arith.constant 1 : index
    %c0_220 = arith.constant 0 : index
    %c0_221 = arith.constant 0 : index
    %613 = vector.load %arg19[%c1_219, %c0_220, %c0_221] : memref<2x128x128xbf16, #tpu.memory_space<vmem>>, vector<1x128x128xbf16>
    %614 = vector.shape_cast %613 : vector<1x128x128xbf16> to vector<128x128xbf16>
    %cst_222 = arith.constant dense<0.000000e+00> : vector<8x128xf32>
    %615 = tpu.matmul %612, %614, %cst_222 {dimension_numbers = #tpu.dot_dimension_numbers<[1], [0], [0], [1], [0, 0, 1, 1], [], []>} : vector<8x128xbf16>, vector<128x128xbf16>, vector<8x128xf32> -> vector<8x128xf32>
    %c1_223 = arith.constant 1 : index
    %c0_224 = arith.constant 0 : index
    %c0_225 = arith.constant 0 : index
    %616 = vector.load %arg20[%c1_223, %c0_224, %c0_225] : memref<2x1x128xf32, #tpu.memory_space<vmem>>, vector<1x1x128xf32>
    %617 = vector.shape_cast %616 : vector<1x1x128xf32> to vector<1x128xf32>
    %618 = vector.broadcast %617 : vector<1x128xf32> to vector<8x128xf32>
    %619 = arith.addf %615, %618 : vector<8x128xf32>
    %cst_226 = arith.constant 0.000000e+00 : f32
    %620 = vector.broadcast %cst_226 : f32 to vector<8x128xf32>
    %621 = arith.maximumf %619, %620 : vector<8x128xf32>
    %622 = arith.truncf %621 : vector<8x128xf32> to vector<8x128xbf16>
    %c1_227 = arith.constant 1 : index
    %c0_228 = arith.constant 0 : index
    %c0_229 = arith.constant 0 : index
    %623 = vector.load %arg21[%c1_227, %c0_228, %c0_229] : memref<2x128x128xbf16, #tpu.memory_space<vmem>>, vector<1x128x128xbf16>
    %624 = vector.shape_cast %623 : vector<1x128x128xbf16> to vector<128x128xbf16>
    %cst_230 = arith.constant dense<0.000000e+00> : vector<8x128xf32>
    %625 = tpu.matmul %622, %624, %cst_230 {dimension_numbers = #tpu.dot_dimension_numbers<[1], [0], [0], [1], [0, 0, 1, 1], [], []>} : vector<8x128xbf16>, vector<128x128xbf16>, vector<8x128xf32> -> vector<8x128xf32>
    %c1_231 = arith.constant 1 : index
    %c0_232 = arith.constant 0 : index
    %c0_233 = arith.constant 0 : index
    %626 = vector.load %arg22[%c1_231, %c0_232, %c0_233] : memref<2x1x128xf32, #tpu.memory_space<vmem>>, vector<1x1x128xf32>
    %627 = vector.shape_cast %626 : vector<1x1x128xf32> to vector<1x128xf32>
    %628 = vector.broadcast %627 : vector<1x128xf32> to vector<8x128xf32>
    %629 = arith.addf %625, %628 : vector<8x128xf32>
    %c1_234 = arith.constant 1 : index
    %c0_235 = arith.constant 0 : index
    %c0_236 = arith.constant 0 : index
    %630 = vector.load %arg23[%c1_234, %c0_235, %c0_236] : memref<2x1x128xf32, #tpu.memory_space<vmem>>, vector<1x1x128xf32>
    %631 = vector.shape_cast %630 : vector<1x1x128xf32> to vector<1x128xf32>
    %c1_237 = arith.constant 1 : index
    %c0_238 = arith.constant 0 : index
    %c0_239 = arith.constant 0 : index
    %632 = vector.load %arg24[%c1_237, %c0_238, %c0_239] : memref<2x1x128xf32, #tpu.memory_space<vmem>>, vector<1x1x128xf32>
    %633 = vector.shape_cast %632 : vector<1x1x128xf32> to vector<1x128xf32>
    %634 = arith.addf %629, %611 : vector<8x128xf32>
    %635 = tpu.iota {dimensions = array<i32: 1>} : vector<1x128xi32>
    %c32_i32_240 = arith.constant 32 : i32
    %636 = vector.broadcast %c32_i32_240 : i32 to vector<1x128xi32>
    %637 = arith.cmpi slt, %635, %636 : vector<1x128xi32>
    %638 = arith.extui %637 : vector<1x128xi1> to vector<1x128xi32>
    %639 = arith.sitofp %638 : vector<1x128xi32> to vector<1x128xf32>
    %cst_241 = arith.constant dense<0.000000e+00> : vector<8xf32>
    %640 = vector.multi_reduction <add>, %634, %cst_241 [1] : vector<8x128xf32> to vector<8xf32>
    %641 = vector.shape_cast %640 : vector<8xf32> to vector<8x1xf32>
    %cst_242 = arith.constant 3.125000e-02 : f32
    %642 = vector.broadcast %cst_242 : f32 to vector<8x1xf32>
    %643 = arith.mulf %641, %642 : vector<8x1xf32>
    %644 = vector.broadcast %643 : vector<8x1xf32> to vector<8x128xf32>
    %645 = arith.subf %634, %644 : vector<8x128xf32>
    %646 = vector.broadcast %639 : vector<1x128xf32> to vector<8x128xf32>
    %647 = arith.mulf %645, %646 : vector<8x128xf32>
    %648 = arith.mulf %647, %647 : vector<8x128xf32>
    %cst_243 = arith.constant dense<0.000000e+00> : vector<8xf32>
    %649 = vector.multi_reduction <add>, %648, %cst_243 [1] : vector<8x128xf32> to vector<8xf32>
    %650 = vector.shape_cast %649 : vector<8xf32> to vector<8x1xf32>
    %cst_244 = arith.constant 3.125000e-02 : f32
    %651 = vector.broadcast %cst_244 : f32 to vector<8x1xf32>
    %652 = arith.mulf %650, %651 : vector<8x1xf32>
    %cst_245 = arith.constant 9.99999996E-13 : f32
    %653 = vector.broadcast %cst_245 : f32 to vector<8x1xf32>
    %654 = arith.addf %652, %653 : vector<8x1xf32>
    %655 = math.rsqrt %654 : vector<8x1xf32>
    %656 = vector.broadcast %655 : vector<8x1xf32> to vector<8x128xf32>
    %657 = arith.mulf %647, %656 : vector<8x128xf32>
    %658 = vector.broadcast %631 : vector<1x128xf32> to vector<8x128xf32>
    %659 = arith.mulf %657, %658 : vector<8x128xf32>
    %660 = vector.broadcast %633 : vector<1x128xf32> to vector<8x128xf32>
    %661 = arith.addf %659, %660 : vector<8x128xf32>
    %662 = arith.truncf %661 : vector<8x128xf32> to vector<8x128xbf16>
    %c0_246 = arith.constant 0 : index
    %c0_247 = arith.constant 0 : index
    %663 = vector.load %arg25[%c0_246, %c0_247] : memref<128x128xbf16, #tpu.memory_space<vmem>>, vector<128x128xbf16>
    %cst_248 = arith.constant dense<0.000000e+00> : vector<8x128xf32>
    %664 = tpu.matmul %662, %663, %cst_248 {dimension_numbers = #tpu.dot_dimension_numbers<[1], [0], [0], [1], [0, 0, 1, 1], [], []>} : vector<8x128xbf16>, vector<128x128xbf16>, vector<8x128xf32> -> vector<8x128xf32>
    %c0_249 = arith.constant 0 : index
    %c0_250 = arith.constant 0 : index
    %665 = vector.load %arg26[%c0_249, %c0_250] : memref<1x128xf32, #tpu.memory_space<vmem>>, vector<1x128xf32>
    %666 = vector.broadcast %665 : vector<1x128xf32> to vector<8x128xf32>
    %667 = arith.addf %664, %666 : vector<8x128xf32>
    %c0_251 = arith.constant 0 : index
    %c0_252 = arith.constant 0 : index
    %c0_253 = arith.constant 0 : index
    %668 = vector.load %arg27[%c0_251, %c0_252, %c0_253] : memref<1x8x128xf32, #tpu.memory_space<vmem>>, vector<1x8x128xf32>
    %669 = vector.shape_cast %668 : vector<1x8x128xf32> to vector<8x128xf32>
    %670 = vector.shape_cast %667 : vector<8x128xf32> to vector<1x8x128xf32>
    tpu.vector_store %arg27[%c0_251, %c0_252, %c0_253], %670 {strides = array<i32>} : memref<1x8x128xf32, #tpu.memory_space<vmem>>, vector<1x8x128xf32>,
    return
  }
  func.func @transform_0(%arg0: i32) -> (i32, i32, i32) {
    %c0_i32 = arith.constant 0 : i32
    %c0_i32_0 = arith.constant 0 : i32
    %c0_i32_1 = arith.constant 0 : i32
    return %arg0, %c0_i32, %c0_i32_0 : i32, i32, i32
  }
  func.func @transform_1(%arg0: i32) -> (i32, i32, i32) {
    %c0_i32 = arith.constant 0 : i32
    %c0_i32_0 = arith.constant 0 : i32
    %c0_i32_1 = arith.constant 0 : i32
    return %arg0, %c0_i32, %c0_i32_0 : i32, i32, i32
  }
  func.func @transform_2(%arg0: i32) -> (i32, i32, i32) {
    %c0_i32 = arith.constant 0 : i32
    %c0_i32_0 = arith.constant 0 : i32
    %c0_i32_1 = arith.constant 0 : i32
    return %arg0, %c0_i32, %c0_i32_0 : i32, i32, i32
  }
  func.func @transform_3(%arg0: i32) -> (i32, i32, i32) {
    %c0_i32 = arith.constant 0 : i32
    %c0_i32_0 = arith.constant 0 : i32
    %c0_i32_1 = arith.constant 0 : i32
    return %arg0, %c0_i32, %c0_i32_0 : i32, i32, i32
  }
  func.func @transform_4(%arg0: i32) -> (i32, i32, i32) {
    %c0_i32 = arith.constant 0 : i32
    %c0_i32_0 = arith.constant 0 : i32
    %c0_i32_1 = arith.constant 0 : i32
    %c0_i32_2 = arith.constant 0 : i32
    return %c0_i32, %c0_i32_0, %c0_i32_1 : i32, i32, i32
  }
  func.func @transform_5(%arg0: i32) -> (i32, i32, i32) {
    %c0_i32 = arith.constant 0 : i32
    %c0_i32_0 = arith.constant 0 : i32
    %c0_i32_1 = arith.constant 0 : i32
    %c0_i32_2 = arith.constant 0 : i32
    return %c0_i32, %c0_i32_0, %c0_i32_1 : i32, i32, i32
  }
  func.func @transform_6(%arg0: i32) -> (i32, i32, i32) {
    %c0_i32 = arith.constant 0 : i32
    %c0_i32_0 = arith.constant 0 : i32
    %c0_i32_1 = arith.constant 0 : i32
    %c0_i32_2 = arith.constant 0 : i32
    return %c0_i32, %c0_i32_0, %c0_i32_1 : i32, i32, i32
  }
  func.func @transform_7(%arg0: i32) -> (i32, i32, i32) {
    %c0_i32 = arith.constant 0 : i32
    %c0_i32_0 = arith.constant 0 : i32
    %c0_i32_1 = arith.constant 0 : i32
    %c0_i32_2 = arith.constant 0 : i32
    return %c0_i32, %c0_i32_0, %c0_i32_1 : i32, i32, i32
  }
  func.func @transform_8(%arg0: i32) -> (i32, i32, i32) {
    %c0_i32 = arith.constant 0 : i32
    %c0_i32_0 = arith.constant 0 : i32
    %c0_i32_1 = arith.constant 0 : i32
    %c0_i32_2 = arith.constant 0 : i32
    return %c0_i32, %c0_i32_0, %c0_i32_1 : i32, i32, i32
  }
  func.func @transform_9(%arg0: i32) -> (i32, i32, i32) {
    %c0_i32 = arith.constant 0 : i32
    %c0_i32_0 = arith.constant 0 : i32
    %c0_i32_1 = arith.constant 0 : i32
    %c0_i32_2 = arith.constant 0 : i32
    return %c0_i32, %c0_i32_0, %c0_i32_1 : i32, i32, i32
  }
  func.func @transform_10(%arg0: i32) -> (i32, i32, i32) {
    %c0_i32 = arith.constant 0 : i32
    %c0_i32_0 = arith.constant 0 : i32
    %c0_i32_1 = arith.constant 0 : i32
    %c0_i32_2 = arith.constant 0 : i32
    return %c0_i32, %c0_i32_0, %c0_i32_1 : i32, i32, i32
  }
  func.func @transform_11(%arg0: i32) -> (i32, i32, i32) {
    %c0_i32 = arith.constant 0 : i32
    %c0_i32_0 = arith.constant 0 : i32
    %c0_i32_1 = arith.constant 0 : i32
    %c0_i32_2 = arith.constant 0 : i32
    return %c0_i32, %c0_i32_0, %c0_i32_1 : i32, i32, i32
  }
  func.func @transform_12(%arg0: i32) -> (i32, i32, i32) {
    %c0_i32 = arith.constant 0 : i32
    %c0_i32_0 = arith.constant 0 : i32
    %c0_i32_1 = arith.constant 0 : i32
    %c0_i32_2 = arith.constant 0 : i32
    return %c0_i32, %c0_i32_0, %c0_i32_1 : i32, i32, i32
  }
  func.func @transform_13(%arg0: i32) -> (i32, i32, i32) {
    %c0_i32 = arith.constant 0 : i32
    %c0_i32_0 = arith.constant 0 : i32
    %c0_i32_1 = arith.constant 0 : i32
    %c0_i32_2 = arith.constant 0 : i32
    return %c0_i32, %c0_i32_0, %c0_i32_1 : i32, i32, i32
  }
  func.func @transform_14(%arg0: i32) -> (i32, i32, i32) {
    %c0_i32 = arith.constant 0 : i32
    %c0_i32_0 = arith.constant 0 : i32
    %c0_i32_1 = arith.constant 0 : i32
    %c0_i32_2 = arith.constant 0 : i32
    return %c0_i32, %c0_i32_0, %c0_i32_1 : i32, i32, i32
  }
  func.func @transform_15(%arg0: i32) -> (i32, i32, i32) {
    %c0_i32 = arith.constant 0 : i32
    %c0_i32_0 = arith.constant 0 : i32
    %c0_i32_1 = arith.constant 0 : i32
    %c0_i32_2 = arith.constant 0 : i32
    return %c0_i32, %c0_i32_0, %c0_i32_1 : i32, i32, i32
  }
  func.func @transform_16(%arg0: i32) -> (i32, i32, i32) {
    %c0_i32 = arith.constant 0 : i32
    %c0_i32_0 = arith.constant 0 : i32
    %c0_i32_1 = arith.constant 0 : i32
    %c0_i32_2 = arith.constant 0 : i32
    return %c0_i32, %c0_i32_0, %c0_i32_1 : i32, i32, i32
  }
  func.func @transform_17(%arg0: i32) -> (i32, i32, i32) {
    %c0_i32 = arith.constant 0 : i32
    %c0_i32_0 = arith.constant 0 : i32
    %c0_i32_1 = arith.constant 0 : i32
    %c0_i32_2 = arith.constant 0 : i32
    return %c0_i32, %c0_i32_0, %c0_i32_1 : i32, i32, i32
  }
  func.func @transform_18(%arg0: i32) -> (i32, i32, i32) {
    %c0_i32 = arith.constant 0 : i32
    %c0_i32_0 = arith.constant 0 : i32
    %c0_i32_1 = arith.constant 0 : i32
    %c0_i32_2 = arith.constant 0 : i32
    return %c0_i32, %c0_i32_0, %c0_i32_1 : i32, i32, i32
  }
  func.func @transform_19(%arg0: i32) -> (i32, i32, i32) {
    %c0_i32 = arith.constant 0 : i32
    %c0_i32_0 = arith.constant 0 : i32
    %c0_i32_1 = arith.constant 0 : i32
    %c0_i32_2 = arith.constant 0 : i32
    return %c0_i32, %c0_i32_0, %c0_i32_1 : i32, i32, i32
  }
  func.func @transform_20(%arg0: i32) -> (i32, i32, i32) {
    %c0_i32 = arith.constant 0 : i32
    %c0_i32_0 = arith.constant 0 : i32
    %c0_i32_1 = arith.constant 0 : i32
    %c0_i32_2 = arith.constant 0 : i32
    return %c0_i32, %c0_i32_0, %c0_i32_1 : i32, i32, i32
  }
  func.func @transform_21(%arg0: i32) -> (i32, i32, i32) {
    %c0_i32 = arith.constant 0 : i32
    %c0_i32_0 = arith.constant 0 : i32
    %c0_i32_1 = arith.constant 0 : i32
    %c0_i32_2 = arith.constant 0 : i32
    return %c0_i32, %c0_i32_0, %c0_i32_1 : i32, i32, i32
  }
  func.func @transform_22(%arg0: i32) -> (i32, i32, i32) {
    %c0_i32 = arith.constant 0 : i32
    %c0_i32_0 = arith.constant 0 : i32
    %c0_i32_1 = arith.constant 0 : i32
    %c0_i32_2 = arith.constant 0 : i32
    return %c0_i32, %c0_i32_0, %c0_i32_1 : i32, i32, i32
  }
  func.func @transform_23(%arg0: i32) -> (i32, i32, i32) {
    %c0_i32 = arith.constant 0 : i32
    %c0_i32_0 = arith.constant 0 : i32
    %c0_i32_1 = arith.constant 0 : i32
    %c0_i32_2 = arith.constant 0 : i32
    return %c0_i32, %c0_i32_0, %c0_i32_1 : i32, i32, i32
  }
  func.func @transform_24(%arg0: i32) -> (i32, i32) {
    %c0_i32 = arith.constant 0 : i32
    %c0_i32_0 = arith.constant 0 : i32
    %c0_i32_1 = arith.constant 0 : i32
    return %c0_i32, %c0_i32_0 : i32, i32
  }
  func.func @transform_25(%arg0: i32) -> (i32, i32) {
    %c0_i32 = arith.constant 0 : i32
    %c0_i32_0 = arith.constant 0 : i32
    %c0_i32_1 = arith.constant 0 : i32
    return %c0_i32, %c0_i32_0 : i32, i32
  }
  func.func @transform_26(%arg0: i32) -> (i32, i32, i32) {
    %c0_i32 = arith.constant 0 : i32
    %c0_i32_0 = arith.constant 0 : i32
    %c0_i32_1 = arith.constant 0 : i32
    return %arg0, %c0_i32, %c0_i32_0 : i32, i32, i32
  }
}

</mosaic_0001>

<bundles_post_ra>
// kernel: _lambda_.2
= control target key start
LH: loop header
LB: loop body
LE: loop exit
PB: predicated region body
PF: predicated region fallthrough
CT: control target
= control target key end

     0   :  { %19 = vsyncpa [#allocation3], 0  ;;  %s3633_s29 = smov 0   ;;  %s4168_s0 = inlined_call_operand.vmem [shape: f32[2,8,128], index: 0, kind: input, shape index: {}]   ;;  %s4169_s1 = inlined_call_operand.vmem [shape: f32[2,1,8], index: 1, kind: input, shape index: {}]   ;;  %s4170_s2 = inlined_call_operand.hbm [shape: bf16[2,128,384], index: 2, kind: input, shape index: {}]   ;;  %s4171_s3 = inlined_call_operand.vmem [shape: f32[2,1,384], index: 3, kind: input, shape index: {}]   ;;  %s4172_s4 = inlined_call_operand.vmem [shape: bf16[2,128,128], index: 4, kind: input, shape index: {}]   ;;  %s4173_s5 = inlined_call_operand.vmem [shape: f32[2,1,128], index: 5, kind: input, shape index: {}]   ;;  %s4174_s6 = inlined_call_operand.vmem [shape: f32[2,1,128], index: 6, kind: input, shape index: {}]   ;;  %s4175_s7 = inlined_call_operand.vmem [shape: f32[2,1,128], index: 7, kind: input, shape index: {}]   ;;  %s4176_s8 = inlined_call_operand.vmem [shape: bf16[2,128,128], index: 8, kind: input, shape index: {}]   ;;  %s4177_s9 = inlined_call_operand.vmem [shape: f32[2,1,128], index: 9, kind: input, shape index: {}]   ;;  %s4178_s10 = inlined_call_operand.vmem [shape: bf16[2,128,128], index: 10, kind: input, shape index: {}]   ;;  %s4179_s11 = inlined_call_operand.vmem [shape: f32[2,1,128], index: 11, kind: input, shape index: {}]   ;;  %s4180_s12 = inlined_call_operand.vmem [shape: f32[2,1,128], index: 12, kind: input, shape index: {}]   ;;  %s4181_s13 = inlined_call_operand.vmem [shape: f32[2,1,128], index: 13, kind: input, shape index: {}]   ;;  %s4182_s14 = inlined_call_operand.vmem [shape: bf16[2,8,128], index: 14, kind: output, shape index: {}]  }
   0x1 LB: > { %s3639_s30 = sadd.s32 4294967295, %s3550_s29   ;;  %p2764_p0 = scmp.ge.s32.totalorder %s3550_s29, 1  ;;  %s3550_s29 = sphi %s3633_s29, %s25_s29  }
   0x2   : > { %p360_p1 = scmp.lt.s32.totalorder %s3550_s29, 3  ;;  %s3552_s15 = smov [#allocation2]  }
   0x3   : > { %s372_s16 = sshll.u32 %s3552_s15, 4  ;;  %p4183_p3 = scmp.eq.s32.totalorder %s3639_s30, 0  ;;  %s373_s16 = int_to_ptr.vmem [resolvable:$true] %s372_s16 }
   0x4   : > { %p3643_p2 = pnand %p2764_p0, %p360_p1  ;;  %s3512_s21 = scalar_lea.hbm %s4170_s2, 6144 }
   0x5   : > { %p3513_p6 = scmp.ne.s32.totalorder %s4170_s2, %s3512_s21  ;;  %p3519_p10 = scmp.lt.u32.totalorder %s3512_s21, %s4170_s2 }
   0x6   : > { %s4185_s17 = scalar_select %p3643_p2, 1, 0 }
   0x7   : > { %p3340_p4 = pneg %p3643_p2 }
   0x9   : > { %p3652_p5 = pnand %p4183_p3, %p3340_p4 }
   0xb   : > { %p3514_p7 = pneg %p3652_p5 }
   0xd   : > { %p3515_p8 = pnand %p3514_p7, %p3513_p6 }
   0xf   : > { %p3516_p9 = pneg %p3515_p8 }
  0x11   : > { %p3521_p11 = pnand %p3519_p10, %p3516_p9 }
  0x13   : > { %3524 = shalt.err (!%p3521_p11)
}
  0x14   : > { %s3525_s26 = scalar_lea.vmem %s373_s16, 6144  ;;  %p3533_p1 = scmp.lt.s32.totalorder %s373_s16, %s373_s16 }
  0x15   : > { %p3526_p12 = scmp.ne.s32.totalorder %s373_s16, %s3525_s26  ;;  %p3534_p4 = scmp.lt.s32.totalorder %s3525_s26, %s3525_s26 }
  0x17   : > { %p3528_p13 = pnand %p3526_p12, %p3514_p7  ;;  %p3535_p3 = por %p3534_p4, %p3533_p1 }
  0x19   : > { %p3529_p0 = pneg %p3528_p13 }
  0x1b   : > { %p3536_p2 = pnand %p3535_p3, %p3529_p0 }
  0x1d   : > { %3539 = shalt.err (!%p3536_p2)
}
  0x1e   : > { %s3553_s27 = smov 192   ;;  %s3554_s28 = smov 12  }
  0x1f   : > { %3343 = dma.hbm_to_vmem [thread:$0]  (!%p3652_p5), %s4170_s2, 6144, %s373_s16, [#allocation3], %s3553_s27, %s3553_s27, %s3554_s28  }
  0x20   : > { %p4187_p6 = scmp.ne.s32.totalorder %s4185_s17, 0 }
  0x21   : > { %p4188_p8 = scmp.eq.s32.totalorder (!%p4187_p6), %s3639_s30, 0 }
  0x22   : > { %434 = sbr.rel (%p4187_p6) target bundleno = 4647 (0x1227), region = 76 }
  0x29   : > { %3545 = dma.done.wait (%p4188_p8), [#allocation3], 6144   ;;  %p4189_p7 = pmov %p4188_p8 }
  0x2a   : > { %v3555_v0 = vmov 0   ;;  %v3556_v1 = vmov 0.0   ;;  %v3360_v2 = vld [vmem:[#allocation2 + $0x4] ss:$12 sps:$4 sm:$0xff]   ;;  %v3362_v3 = vld [vmem:[#allocation2] ss:$12 sps:$4 sm:$0xff]   ;;  %v493_v28 = vlaneseq }
  0x2b   : > { %3547 = vsyncadd (%p4189_p7), [#allocation3], 4294961152  ;;  %728 = vmatprep.mubr.bf16.mxu0 %v3555_v0  ;;  %3056 = vmatprep.subr.bf16.mxu1 %v3556_v1  ;;  %v3363_v4 = vld [vmem:[#allocation2 + $0x1c] ss:$12 sps:$4 sm:$0xff]   ;;  %v3365_v5 = vld [vmem:[#allocation2 + $0x18] ss:$12 sps:$4 sm:$0xff]  }
  0x2c   : > { %696 = vmatprep.subr.bf16.mxu0 %v3360_v2  ;;  %v3366_v6 = vld [vmem:[#allocation2 + $0x34] ss:$12 sps:$4 sm:$0xff]   ;;  %p481_p2 = scmp.lt.s32.totalorder %s3639_s30, 1  ;;  %v3368_v7 = vld [vmem:[#allocation2 + $0x30] ss:$12 sps:$4 sm:$0xff]   ;;  %vm3557_vm0 = vmmov 0  }
  0x2d   : > { %697 = vmatpush1.bf16.msra.mxu0 %v3362_v3  ;;  %v3369_v8 = vld [vmem:[#allocation2 + $0x4c] ss:$12 sps:$4 sm:$0xff]   ;;  %v3371_v9 = vld [vmem:[#allocation2 + $0x48] ss:$12 sps:$4 sm:$0xff]   ;;  %v3372_v10 = vld [vmem:[#allocation2 + $0x64] ss:$12 sps:$4 sm:$0xff]   ;;  %3072 = vmatprep.mubr.msk.bf16.mxu1 %vm3557_vm0, %v3556_v1 }
  0x2e   : > { %698 = vmatprep.subr.bf16.mxu0 %v3363_v4  ;;  %s4193_s30 = smov (!%p481_p2, %s3639_s30), 1  ;;  %v3384_v11 = vld [vmem:[#allocation2 + $0x8] ss:$12 sps:$4 sm:$0xff]   ;;  %v3385_v12 = vld [vmem:[#allocation2 + $0x20] ss:$12 sps:$4 sm:$0xff]   ;;  %v3707_v29 = vshrl.u32 %v493_v28, 7 }
  0x2f   : > { %3057 = vmatpush3.bf16.msra.mxu1 %v3384_v11  ;;  %v3374_v13 = vld [vmem:[#allocation2 + $0x60] ss:$12 sps:$4 sm:$0xff]   ;;  %s2769_s16 = sshll.u32 %s4193_s30, 3  ;;  %v3375_v14 = vld [vmem:[#allocation2 + $0x7c] ss:$12 sps:$4 sm:$0xff]   ;;  %v3709_v30 = vand.u32 127, %v493_v28  ;;  %s487_s25 = scalar_lea.vmem %s4169_s1, %s4193_s30 }
  0x30   : > { %3058 = vmatprep.subr.bf16.mxu1 %v3556_v1  ;;  %v3377_v15 = vld [vmem:[#allocation2 + $0x78] ss:$12 sps:$4 sm:$0xff]   ;;  %v3378_v17 = vld [vmem:[#allocation2 + $0x94] ss:$12 sps:$4 sm:$0xff]   ;;  %v3387_v18 = vld [vmem:[#allocation2 + $0x50] ss:$12 sps:$4 sm:$0xff]   ;;  %s484_s20 = scalar_lea.vmem %s4168_s0, %s2769_s16 }
  0x31   : > { %699 = vmatpush1.bf16.msra.mxu0 %v3365_v5  ;;  %v3386_v16 = vld [vmem:[#allocation2 + $0x38] ss:$12 sps:$4 sm:$0xff]   ;;  %v3380_v19 = vld [vmem:[#allocation2 + $0x90] ss:$12 sps:$4 sm:$0xff]   ;;  %v3388_v21 = vld [vmem:[#allocation2 + $0x68] ss:$12 sps:$4 sm:$0xff]  }
  0x32   : > { %700 = vmatprep.subr.bf16.mxu0 %v3366_v6  ;;  %v3381_v20 = vld [vmem:[#allocation2 + $0xac] ss:$12 sps:$4 sm:$0xff]   ;;  %v3383_v22 = vld [vmem:[#allocation2 + $0xa8] ss:$12 sps:$4 sm:$0xff]   ;;  %v3691_v23 = vld [vmem:[%s484_s20] sm:$0xff]  ;;  %v559_v31 = vsub.s32 1, %v3707_v29 }
  0x33   : > { %3059 = vmatpush3.bf16.msra.mxu1 %v3385_v12  ;;  %v3389_v24 = vld [vmem:[#allocation2 + $0x80] ss:$12 sps:$4 sm:$0xff]   ;;  %v518_v25 = vpack.c.bf16 %v3691_v23, %v3691_v23  ;;  %v3390_v26 = vld [vmem:[#allocation2 + $0x98] ss:$12 sps:$4 sm:$0xff]   ;;  %v3391_v27 = vld [vmem:[#allocation2 + $0xb0] ss:$12 sps:$4 sm:$0xff]  }
  0x34   : > { %3060 = vmatprep.subr.bf16.mxu1 %v3556_v1  ;;  %v3713_v32 = vsub.s32 0, %v3707_v29  ;;  %v551_v33 = vld [vmem:[%s4171_s3] sm:$0x7]  ;;  %vm500_vm1 = vcmp.ge.s32.totalorder %v3709_v30, 8  ;;  %vm501_vm2 = vcmp.lt.s32.totalorder %v3709_v30, 16  ;;  %vm496_vm3 = vcmp.lt.s32.totalorder %v3709_v30, 8 }
  0x35   : > { %701 = vmatpush1.bf16.msra.mxu0 %v3368_v7  ;;  %v560_v34 = vrot.slane %v551_v33, %v559_v31  ;;  %vm502_vm4 = vmand %vm500_vm1, %vm501_vm2  ;;  %v3725_v43 = vsel %vm496_vm3, 1.0, %v3556_v1  ;;  %vm505_vm5 = vcmp.ge.s32.totalorder %v3709_v30, 16  ;;  %vm506_vm6 = vcmp.lt.s32.totalorder %v3709_v30, 24  ;;  %v516_v3 = vld [vmem:[%s487_s25] sm:$0x1]  ;;  %s2770_s26 = sshll.u32 %s4193_s30, 2 }
  0x36   : > { %702 = vmatprep.subr.bf16.mxu0 %v3369_v8  ;;  %v556_v35 = vrot.slane %v551_v33, %v3713_v32  ;;  %v3728_v44 = vsel %vm502_vm4, 1.0, %v3556_v1  ;;  %vm510_vm7 = vcmp.ge.s32.totalorder %v3709_v30, 24  ;;  %vm511_vm8 = vcmp.lt.s32.totalorder %v3709_v30, 32  ;;  %vm507_vm9 = vmand %vm505_vm5, %vm506_vm6  ;;  %v3404_v30 = vld [vmem:[%s4176_s8 + $0x20] sm:$0xff]   ;;  %s491_s15 = scalar_lea.vmem %s4182_s14, %s2770_s26 }
  0x37   : > { %3061 = vmatpush3.bf16.msra.mxu1 %v3386_v16  ;;  %vm512_vm10 = vmand %vm510_vm7, %vm511_vm8  ;;  %v3741_v49 = vsel %vm507_vm9, 1.0, %v3556_v1  ;;  %v563_v55 = vsub.s32 2, %v3707_v29  ;;  %vm1031_vm11 = vcmask 1043456   ;;  %vm517_vm12 = vcmp.gt.f32.partialorder %v516_v3, 0.5 }
  0x38   : > { %3062 = vmatprep.subr.bf16.mxu1 %v3556_v1  ;;  %v3744_v50 = vsel %vm512_vm10, 1.0, %v3556_v1  ;;  %v967_v4 = vsel %vm517_vm12, 1, %v3555_v0  ;;  %vm977_vm14 = vcmask 64512  }
  0x39   : > { %703 = vmatpush1.bf16.msra.mxu0 %v3371_v9  ;;  %v564_v56 = vrot.slane %v551_v33, %v563_v55  ;;  %v971_v5 = vrot.slane %v967_v4, %v3713_v32  ;;  %v3392_v4 = vld [vmem:[%s4172_s4] sm:$0xff]  }
  0x3a   : > { %704 = vmatprep.subr.bf16.mxu0 %v3372_v10 }
  0x3b   : > { %3063 = vmatpush3.bf16.msra.mxu1 %v3387_v18  ;;  %vm3773_vm13 = vcmp.eq.s32.totalorder %v971_v5, 1  ;;  %v3393_v5 = vld [vmem:[%s4172_s4 + $0x8] sm:$0xff]  }
  0x3c   : > { %3064 = vmatprep.subr.bf16.mxu1 %v3556_v1 }
  0x3d   : > { %705 = vmatpush1.bf16.msra.mxu0 %v3374_v13 }
  0x3e   : > { %706 = vmatprep.subr.bf16.mxu0 %v3375_v14 }
  0x3f   : > { %3065 = vmatpush3.bf16.msra.mxu1 %v3388_v21 }
  0x40   : > { %3066 = vmatprep.subr.bf16.mxu1 %v3556_v1 }
  0x41   : > { %707 = vmatpush1.bf16.msra.mxu0 %v3377_v15 }
  0x42   : > { %708 = vmatprep.subr.bf16.mxu0 %v3378_v17 }
  0x43   : > { %3067 = vmatpush3.bf16.msra.mxu1 %v3389_v24 }
  0x44   : > { %3068 = vmatprep.subr.bf16.mxu1 %v3556_v1 }
  0x45   : > { %709 = vmatpush1.bf16.msra.mxu0 %v3380_v19 }
  0x46   : > { %710 = vmatprep.subr.bf16.mxu0 %v3381_v20 }
  0x47   : > { %3069 = vmatpush3.bf16.msra.mxu1 %v3390_v26 }
  0x48   : > { %3070 = vmatprep.subr.bf16.mxu1 %v3556_v1 }
  0x49   : > { %711 = vmatpush1.bf16.msra.mxu0 %v3383_v22 }
  0x4a   : > { %3076 = vmatprep.subr.bf16.mxu0 %v3556_v1 }
  0x4b   : > { %3071 = vmatpush3.bf16.msra.mxu1 %v3391_v27 }
  0x4c   : > { %729 = vmatmul.mubr.bf16.vlgmr.msra.gmra.mrb[0].mxu0 %v518_v25  ;;  %3082 = vmatprep.subr.bf16.mxu1 %v3556_v1 }
  0x4d   : > { %3078 = vmatprep.mubr.msk.bf16.mxu0 %vm3557_vm0, %v3556_v1 }
  0x4e   : > { %3073 = vmatmul.mubr.bf16.vlgmr.msra.gmra.mrb[0].mxu1 %v518_v25 }
  0x4f   : > { %3084 = vmatprep.mubr.msk.bf16.mxu1 %vm3557_vm0, %v3556_v1 }
 0x11f   : > { %v730_v36 = vpop.f32.mrb[0].mxu0 }
 0x120   : > { %v732_v37 = vpop.f32.mrb[1].mxu0  ;;  %v731_v40 = vadd.f32 %v730_v36, %v556_v35 }
 0x121   : > { %v733_v38 = vadd.f32 %v732_v37, %v560_v34  ;;  %v734_v39 = vpop.f32.mrb[2].mxu0  ;;  %v771_v57 = vpop.f32.mrb[0].mxu1 }
 0x122   : > { %v735_v41 = vpop.f32.mrb[3].mxu0  ;;  %v795_v45 = vmul.f32 %v3725_v43, %v731_v40  ;;  %v838_v46 = vmul.f32 %v3728_v44, %v731_v40  ;;  %v881_v51 = vmul.f32 %v3741_v49, %v731_v40  ;;  %v924_v52 = vmul.f32 %v3744_v50, %v731_v40  ;;  %v3074_v58 = vpop.f32.mrb[1].mxu1 }
 0x123   : > { %v794_v42 = vpack.c.bf16 %v733_v38, %v733_v38  ;;  %v3761_v59 = vadd.f32 %v771_v57, %v564_v56  ;;  %v774_v60 = vpop.f32.mrb[2].mxu1 }
 0x124   : > { %v796_v47 = vpack.c.bf16 %v795_v45, %v795_v45  ;;  %v839_v48 = vpack.c.bf16 %v838_v46, %v838_v46  ;;  %v882_v53 = vpack.c.bf16 %v881_v51, %v881_v51  ;;  %v925_v54 = vpack.c.bf16 %v924_v52, %v924_v52  ;;  %v3075_v61 = vpop.f32.mrb[3].mxu1 }
 0x125   : > { %3077 = vmatpush3.bf16.xpose.msra.mxu0 %v794_v42  ;;  %3083 = vmatpush3.bf16.xpose.msra.mxu1 %v794_v42  ;;  %v1025_v62 = vmul.f32 %v3728_v44, %v3761_v59 }
 0x126   : > { %3088 = vmatprep.subr.bf16.mxu0 %v3556_v1  ;;  %3094 = vmatprep.subr.bf16.mxu1 %v3556_v1 }
 0x127   : > { %v1026_v63 = vpack.c.bf16 %v1025_v62, %v1025_v62 }
 0x129   : > { %v1033_v2 = vsel %vm1031_vm11, %v1026_v63, 0 }
 0x12c   : > { %3079 = vmatmul.mubr.bf16.vlgmr.msra.gmra.mrb[4].mxu0 %v796_v47  ;;  %3085 = vmatmul.mubr.bf16.vlgmr.msra.gmra.mrb[4].mxu1 %v839_v48 }
 0x12d   : > { %3089 = vmatpush3.bf16.xpose.msra.mxu0 %v794_v42  ;;  %3095 = vmatpush3.bf16.xpose.msra.mxu1 %v794_v42 }
 0x12e   : > { %3090 = vmatprep.mubr.msk.bf16.mxu0 %vm3557_vm0, %v3556_v1  ;;  %3096 = vmatprep.mubr.msk.bf16.mxu1 %vm3557_vm0, %v3556_v1 }
 0x12f   : > { %3100 = vmatprep.subr.bf16.mxu0 %v3556_v1  ;;  %3124 = vmatprep.subr.bf16.mxu1 %v3556_v1 }
 0x134   : > { %3091 = vmatmul.mubr.bf16.vlgmr.msra.gmra.mrb[8].mxu0 %v882_v53  ;;  %3097 = vmatmul.mubr.bf16.vlgmr.msra.gmra.mrb[8].mxu1 %v925_v54 }
 0x135   : > { %3102 = vmatprep.mubr.msk.bf16.mxu0 %vm3557_vm0, %v3556_v1  ;;  %3140 = vmatprep.mubr.msk.bf16.mxu1 %vm3557_vm0, %v3556_v1 }
 0x136   : > { %3101 = vmatpush3.bf16.msra.mxu0 %v1033_v2  ;;  %3125 = vmatpush3.bf16.msra.mxu1 %v3392_v4 }
 0x137   : > { %3106 = vmatprep.subr.bf16.mxu0 %v3556_v1  ;;  %3126 = vmatprep.subr.bf16.mxu1 %v3556_v1 }
 0x13a   : > { %3127 = vmatpush3.bf16.msra.mxu1 %v3393_v5  ;;  %v3402_v5 = vld [vmem:[%s4176_s8 + $0x10] sm:$0xff]  }
 0x13b   : > { %3128 = vmatprep.subr.bf16.mxu1 %v3556_v1 }
 0x1ff   : > { %v831_v7 = vpop.f32.mrb[4].mxu0  ;;  %v874_v8 = vpop.f32.mrb[4].mxu1 }
 0x200   : > { %v837_v9 = vmul.f32 0.35355338, %v831_v7  ;;  %v880_v10 = vmul.f32 0.35355338, %v874_v8  ;;  %v3080_v11 = vpop.f32.mrb[5].mxu0  ;;  %v3086_v12 = vpop.f32.mrb[5].mxu1 }
 0x201   : > { %v834_v13 = vpop.f32.mrb[6].mxu0  ;;  %v877_v14 = vpop.f32.mrb[6].mxu1  ;;  %v3394_v7 = vld [vmem:[%s4172_s4 + $0x10] sm:$0xff]   ;;  %v3395_v8 = vld [vmem:[%s4172_s4 + $0x18] sm:$0xff]  }
 0x202   : > { %v3081_v15 = vpop.f32.mrb[7].mxu0  ;;  %v3087_v16 = vpop.f32.mrb[7].mxu1  ;;  %v974_v17 = vsel %vm3773_vm13, %v880_v10, -10000.0  ;;  %v973_v19 = vsel %vm3773_vm13, %v837_v9, -10000.0  ;;  %3129 = vmatpush3.bf16.msra.mxu1 %v3394_v7  ;;  %v3396_v9 = vld [vmem:[%s4172_s4 + $0x20] sm:$0xff]   ;;  %v3397_v10 = vld [vmem:[%s4172_s4 + $0x28] sm:$0xff]   ;;  %v1022_v14 = vmul.f32 %v3725_v43, %v3761_v59 }
 0x203   : > { %v981_v18 = vsel %vm977_vm14, %v974_v17, -inf  ;;  %v978_v22 = vsel %vm977_vm14, %v973_v19, -inf  ;;  %3130 = vmatprep.subr.bf16.mxu1 %v3556_v1  ;;  %v3398_v11 = vld [vmem:[%s4172_s4 + $0x30] sm:$0xff]   ;;  %v3403_v7 = vld [vmem:[%s4176_s8 + $0x18] sm:$0xff]  }
 0x204   : > { %982 = vmax.xlane.f32.xlu0 %v981_v18 }
 0x206   : > { %3131 = vmatpush3.bf16.msra.mxu1 %v3395_v8  ;;  %v3405_v8 = vld [vmem:[%s4176_s8 + $0x28] sm:$0xff]  }
 0x207   : > { %v917_v20 = vpop.f32.mrb[8].mxu0  ;;  %v960_v21 = vpop.f32.mrb[8].mxu1  ;;  %3132 = vmatprep.subr.bf16.mxu1 %v3556_v1 }
 0x208   : > { %v923_v24 = vmul.f32 0.35355338, %v917_v20  ;;  %v966_v25 = vmul.f32 0.35355338, %v960_v21  ;;  %v3098_v26 = vpop.f32.mrb[9].mxu1  ;;  %979 = vmax.xlane.f32.xlu0 %v978_v22  ;;  %v3092_v27 = vpop.f32.mrb[9].mxu0  ;;  %v1121_v22 = vmul.f32 %v3741_v49, %v3761_v59 }
 0x209   : > { %v920_v28 = vpop.f32.mrb[10].mxu0  ;;  %v963_v33 = vpop.f32.mrb[10].mxu1 }
 0x20a   : > { %v3093_v34 = vpop.f32.mrb[11].mxu0  ;;  %v3099_v35 = vpop.f32.mrb[11].mxu1  ;;  %v975_v36 = vsel %vm3773_vm13, %v923_v24, -10000.0  ;;  %v976_v38 = vsel %vm3773_vm13, %v966_v25, -10000.0  ;;  %3133 = vmatpush3.bf16.msra.mxu1 %v3396_v9  ;;  %v1122_v25 = vpack.c.bf16 %v1121_v22, %v1121_v22  ;;  %v3406_v9 = vld [vmem:[%s4176_s8 + $0x30] sm:$0xff]  }
 0x20b   : > { %v984_v37 = vsel %vm977_vm14, %v975_v36, -inf  ;;  %v987_v39 = vsel %vm977_vm14, %v976_v38, -inf  ;;  %3134 = vmatprep.subr.bf16.mxu1 %v3556_v1  ;;  %v1171_v34 = vmul.f32 %v3744_v50, %v3761_v59  ;;  %v3399_v59 = vld [vmem:[%s4172_s4 + $0x38] sm:$0xff]  }
 0x20c   : > { %985 = vmax.xlane.f32.xlu1 %v984_v37  ;;  %v1128_v27 = vsel %vm1031_vm11, %v1122_v25, 0 }
 0x20e   : > { %3135 = vmatpush3.bf16.msra.mxu1 %v3397_v10  ;;  %v3407_v10 = vld [vmem:[%s4176_s8 + $0x38] sm:$0xff]  }
 0x20f   : > { %3136 = vmatprep.subr.bf16.mxu1 %v3556_v1 }
 0x210   : > { %988 = vmax.xlane.f32.xlu1 %v987_v39 }
 0x212   : > { %3137 = vmatpush3.bf16.msra.mxu1 %v3398_v11  ;;  %v3408_v11 = vld [vmem:[%s4178_s10] sm:$0xff]  }
 0x213   : > { %3138 = vmatprep.subr.bf16.mxu1 %v3556_v1 }
 0x216   : > { %3139 = vmatpush3.bf16.msra.mxu1 %v3399_v59 }
 0x217   : > { %3164 = vmatprep.subr.bf16.mxu1 %v3556_v1 }
 0x291   : > { %v983_v40 = vpop.xlane.xlu0 %982 }
 0x292   : > { %v991_v41 = vsub.f32 %v974_v17, %v983_v40  ;;  %v1023_v17 = vpack.c.bf16 %v1022_v14, %v1022_v14  ;;  %v3411_v14 = vld [vmem:[%s4178_s10 + $0x18] sm:$0xff]  }
 0x294   : > { %v996_v42 = vmul.f32 1.442695, %v991_v41 }
 0x295   : > { %v980_v45 = vpop.xlane.xlu0 %979 }
 0x296   : > { %3472 = vpow2.f32 %v996_v42  ;;  %v990_v46 = vsub.f32 %v973_v19, %v980_v45  ;;  %v1079_v19 = vsel %vm1031_vm11, %v1023_v17, 0 }
 0x298   : > { %v994_v47 = vmul.f32 1.442695, %v990_v46 }
 0x299   : > { %v986_v48 = vpop.xlane.xlu1 %985 }
 0x29a   : > { %3474 = vpow2.f32 %v994_v47  ;;  %v992_v51 = vsub.f32 %v975_v36, %v986_v48  ;;  %v1172_v36 = vpack.c.bf16 %v1171_v34, %v1171_v34  ;;  %v2815_v34 = vld [vmem:[%s4177_s9] ss:$0 sm:$0xff] }
 0x29c   : > { %v998_v52 = vmul.f32 1.442695, %v992_v51  ;;  %v2803_v51 = vld [vmem:[%s4173_s5] ss:$0 sm:$0xff] }
 0x29d   : > { %v989_v53 = vpop.xlane.xlu1 %988 }
 0x29e   : > { %3476 = vpow2.f32 %v998_v52  ;;  %v993_v54 = vsub.f32 %v976_v38, %v989_v53  ;;  %v1178_v38 = vsel %vm1031_vm11, %v1172_v36, 0 }
 0x2a0   : > { %v3473_v56 = vpop.eup %3472  ;;  %v1000_v57 = vmul.f32 1.442695, %v993_v54 }
 0x2a1   : > { %v1005_v58 = vsel %vm977_vm14, %v3473_v56, 0.0 }
 0x2a2   : > { %3478 = vpow2.f32 %v1000_v57  ;;  %1006 = vadd.xlane.f32.xlu0 %v1005_v58 }
 0x2a4   : > { %v3475_v60 = vpop.eup %3474 }
 0x2a5   : > { %v1002_v61 = vsel %vm977_vm14, %v3475_v60, 0.0 }
 0x2a6   : > { %1003 = vadd.xlane.f32.xlu1 %v1002_v61  ;;  %v3401_v61 = vld [vmem:[%s4176_s8 + $0x8] sm:$0xff]  }
 0x2a8   : > { %v3477_v62 = vpop.eup %3476 }
 0x2a9   : > { %v1008_v63 = vsel %vm977_vm14, %v3477_v62, 0.0 }
 0x2aa   : > { %1009 = vadd.xlane.f32.xlu0 %v1008_v63 }
 0x2ac   : > { %v3792_v2 = vpop.eup %3478 }
 0x2ad   : > { %v1011_v3 = vsel %vm977_vm14, %v3792_v2, 0.0 }
 0x2ae   : > { %1012 = vadd.xlane.f32.xlu1 %v1011_v3 }
 0x32f   : > { %v1007_v12 = vpop.xlane.xlu0 %1006 }
 0x330   : > { %3480 = vrcp.f32 %v1007_v12  ;;  %v3409_v12 = vld [vmem:[%s4178_s10 + $0x8] sm:$0xff]  }
 0x333   : > { %v1004_v13 = vpop.xlane.xlu1 %1003 }
 0x334   : > { %3482 = vrcp.f32 %v1004_v13  ;;  %v3410_v13 = vld [vmem:[%s4178_s10 + $0x10] sm:$0xff]  }
 0x337   : > { %v1010_v20 = vpop.xlane.xlu0 %1009 }
 0x338   : > { %3484 = vrcp.f32 %v1010_v20 }
 0x33a   : > { %v3481_v15 = vpop.eup %3480 }
 0x33b   : > { %v1017_v16 = vmul.f32 %v3481_v15, %v3473_v56  ;;  %v1013_v28 = vpop.xlane.xlu1 %1012  ;;  %v3412_v15 = vld [vmem:[%s4178_s10 + $0x20] sm:$0xff]  }
 0x33c   : > { %3486 = vrcp.f32 %v1013_v28  ;;  %v3414_v28 = vld [vmem:[%s4178_s10 + $0x30] sm:$0xff]  }
 0x33d   : > { %v1027_v18 = vpack.c.bf16 %v1017_v16, %v1017_v16  ;;  %v3413_v16 = vld [vmem:[%s4178_s10 + $0x28] sm:$0xff]  }
 0x33e   : > { %v3483_v21 = vpop.eup %3482 }
 0x33f   : > { %3103 = vmatmul.mubr.msk.bf16.vlgmr.msra.gmra.mrb[12].mxu0 %vm977_vm14, %v1027_v18  ;;  %v1015_v24 = vmul.f32 %v3483_v21, %v3475_v60  ;;  %v3400_v60 = vld [vmem:[%s4176_s8] sm:$0xff]  }
 0x340   : > { %3107 = vmatpush3.bf16.msra.mxu0 %v1079_v19  ;;  %3108 = vmatprep.mubr.msk.bf16.mxu0 %vm3557_vm0, %v3556_v1  ;;  %v2813_v21 = vld [vmem:[%s4174_s6] ss:$0 sm:$0xff] }
 0x341   : > { %3112 = vmatprep.subr.bf16.mxu0 %v3556_v1  ;;  %v1024_v26 = vpack.c.bf16 %v1015_v24, %v1015_v24  ;;  %v2814_v24 = vld [vmem:[%s4175_s7] ss:$0 sm:$0xff] }
 0x342   : > { %v3485_v33 = vpop.eup %3484 }
 0x343   : > { %v1019_v35 = vmul.f32 %v3485_v33, %v3477_v62  ;;  %v3415_v33 = vld [vmem:[%s4178_s10 + $0x38] sm:$0xff]  }
 0x345   : > { %v1123_v37 = vpack.c.bf16 %v1019_v35, %v1019_v35 }
 0x346   : > { %v3487_v39 = vpop.eup %3486 }
 0x347   : > { %v1021_v40 = vmul.f32 %v3487_v39, %v3792_v2 }
 0x349   : > { %v1173_v41 = vpack.c.bf16 %v1021_v40, %v1021_v40 }
 0x34b   : > { %3109 = vmatmul.mubr.msk.bf16.vlgmr.msra.gmra.mrb[12].mxu0 %vm977_vm14, %v1024_v26 }
 0x34c   : > { %3113 = vmatpush3.bf16.msra.mxu0 %v1128_v27  ;;  %3114 = vmatprep.mubr.msk.bf16.mxu0 %vm3557_vm0, %v3556_v1 }
 0x34d   : > { %3118 = vmatprep.subr.bf16.mxu0 %v3556_v1 }
 0x357   : > { %3115 = vmatmul.mubr.msk.bf16.vlgmr.msra.gmra.mrb[12].mxu0 %vm977_vm14, %v1123_v37 }
 0x358   : > { %3119 = vmatpush3.bf16.msra.mxu0 %v1178_v38  ;;  %3120 = vmatprep.mubr.msk.bf16.mxu0 %vm3557_vm0, %v3556_v1 }
 0x359   : > { %3144 = vmatprep.subr.bf16.mxu0 %v3556_v1 }
 0x363   : > { %3121 = vmatmul.mubr.msk.bf16.vlgmr.msra.gmra.mrb[12].mxu0 %vm977_vm14, %v1173_v41  ;;  %v2824_v41 = vld [vmem:[%s4179_s11] ss:$0 sm:$0xff] }
 0x364   : > { %3160 = vmatprep.mubr.msk.bf16.mxu0 %vm3557_vm0, %v3556_v1  ;;  %3145 = vmatpush3.bf16.msra.mxu0 %v3400_v60  ;;  %v3424_v60 = vld [vmem:[#allocation2 + $0xf0] ss:$12 sps:$4 sm:$0xff]  }
 0x365   : > { %3146 = vmatprep.subr.bf16.mxu0 %v3556_v1 }
 0x368   : > { %3147 = vmatpush3.bf16.msra.mxu0 %v3401_v61 }
 0x369   : > { %3148 = vmatprep.subr.bf16.mxu0 %v3556_v1 }
 0x36c   : > { %3149 = vmatpush3.bf16.msra.mxu0 %v3402_v5  ;;  %v3430_v5 = vld [vmem:[#allocation2 + $0x10c] ss:$12 sps:$4 sm:$0xff]  }
 0x36d   : > { %3150 = vmatprep.subr.bf16.mxu0 %v3556_v1 }
 0x370   : > { %3151 = vmatpush3.bf16.msra.mxu0 %v3403_v7  ;;  %v3428_v7 = vld [vmem:[#allocation2 + $0x108] ss:$12 sps:$4 sm:$0xff]  }
 0x371   : > { %3152 = vmatprep.subr.bf16.mxu0 %v3556_v1 }
 0x374   : > { %3153 = vmatpush3.bf16.msra.mxu0 %v3404_v30  ;;  %v3431_v30 = vld [vmem:[#allocation2 + $0x110] ss:$12 sps:$4 sm:$0xff]  }
 0x375   : > { %3154 = vmatprep.subr.bf16.mxu0 %v3556_v1 }
 0x378   : > { %3155 = vmatpush3.bf16.msra.mxu0 %v3405_v8  ;;  %v3434_v8 = vld [vmem:[#allocation2 + $0x124] ss:$12 sps:$4 sm:$0xff]  }
 0x379   : > { %3156 = vmatprep.subr.bf16.mxu0 %v3556_v1 }
 0x37c   : > { %3157 = vmatpush3.bf16.msra.mxu0 %v3406_v9  ;;  %v3432_v9 = vld [vmem:[#allocation2 + $0x120] ss:$12 sps:$4 sm:$0xff]  }
 0x37d   : > { %3158 = vmatprep.subr.bf16.mxu0 %v3556_v1 }
 0x380   : > { %3159 = vmatpush3.bf16.msra.mxu0 %v3407_v10  ;;  %v3435_v10 = vld [vmem:[#allocation2 + $0x128] ss:$12 sps:$4 sm:$0xff]  }
 0x436   : > { %v1214_v42 = vpop.f32.mrb[12].mxu0 }
 0x437   : > { %v1221_v45 = vpack.c.bf16 %v1214_v42, %v1214_v42  ;;  %v3122_v46 = vpop.f32.mrb[13].mxu0 }
 0x438   : > { %v1217_v47 = vpop.f32.mrb[14].mxu0 }
 0x439   : > { %v3123_v48 = vpop.f32.mrb[15].mxu0  ;;  %3141 = vmatmul.mubr.bf16.vlgmr.msra.gmra.mrb[12].mxu1 %v1221_v45 }
 0x43a   : > { %3180 = vmatprep.mubr.msk.bf16.mxu1 %vm3557_vm0, %v3556_v1  ;;  %3165 = vmatpush3.bf16.msra.mxu1 %v3408_v11  ;;  %v3438_v11 = vld [vmem:[#allocation2 + $0x13c] ss:$12 sps:$4 sm:$0xff]  }
 0x43b   : > { %3166 = vmatprep.subr.bf16.mxu1 %v3556_v1 }
 0x43e   : > { %3167 = vmatpush3.bf16.msra.mxu1 %v3409_v12  ;;  %v3436_v12 = vld [vmem:[#allocation2 + $0x138] ss:$12 sps:$4 sm:$0xff]  }
 0x43f   : > { %3168 = vmatprep.subr.bf16.mxu1 %v3556_v1 }
 0x442   : > { %3169 = vmatpush3.bf16.msra.mxu1 %v3410_v13  ;;  %v3439_v13 = vld [vmem:[#allocation2 + $0x140] ss:$12 sps:$4 sm:$0xff]  }
 0x443   : > { %3170 = vmatprep.subr.bf16.mxu1 %v3556_v1 }
 0x446   : > { %3171 = vmatpush3.bf16.msra.mxu1 %v3411_v14  ;;  %v3442_v14 = vld [vmem:[#allocation2 + $0x154] ss:$12 sps:$4 sm:$0xff]  }
 0x447   : > { %3172 = vmatprep.subr.bf16.mxu1 %v3556_v1 }
 0x44a   : > { %3173 = vmatpush3.bf16.msra.mxu1 %v3412_v15  ;;  %v3440_v15 = vld [vmem:[#allocation2 + $0x150] ss:$12 sps:$4 sm:$0xff]  }
 0x44b   : > { %3174 = vmatprep.subr.bf16.mxu1 %v3556_v1 }
 0x44e   : > { %3175 = vmatpush3.bf16.msra.mxu1 %v3413_v16  ;;  %v3443_v16 = vld [vmem:[#allocation2 + $0x158] ss:$12 sps:$4 sm:$0xff]  }
 0x44f   : > { %3176 = vmatprep.subr.bf16.mxu1 %v3556_v1 }
 0x452   : > { %3177 = vmatpush3.bf16.msra.mxu1 %v3414_v28 }
 0x453   : > { %3178 = vmatprep.subr.bf16.mxu1 %v3556_v1 }
 0x456   : > { %3179 = vmatpush3.bf16.msra.mxu1 %v3415_v33 }
 0x457   : > { %3184 = vmatprep.subr.bf16.mxu1 %v3556_v1 }
 0x50c   : > { %v1310_v52 = vpop.f32.mrb[12].mxu1 }
 0x50d   : > { %v1311_v53 = vadd.f32 %v2803_v51, %v1310_v52  ;;  %v3142_v54 = vpop.f32.mrb[13].mxu1  ;;  %v3416_v51 = vld [vmem:[#allocation2 + $0xc0] ss:$12 sps:$4 sm:$0xff]   ;;  %v3418_v52 = vld [vmem:[#allocation2 + $0xc4] ss:$12 sps:$4 sm:$0xff]  }
 0x50e   : > { %v1313_v56 = vpop.f32.mrb[14].mxu1  ;;  %v3422_v54 = vld [vmem:[#allocation2 + $0xdc] ss:$12 sps:$4 sm:$0xff]   ;;  %1781 = vmatprep.subr.bf16.mxu0 %v3418_v52 }
 0x50f   : > { %v3143_v57 = vpop.f32.mrb[15].mxu1  ;;  %v1318_v58 = vadd.f32 %v1311_v53, %v3691_v23  ;;  %v3870_v23 = vsel %vm511_vm8, 1.0, %v3556_v1  ;;  %v3419_v53 = vld [vmem:[#allocation2 + $0xc8] ss:$12 sps:$4 sm:$0xff]   ;;  %v3423_v56 = vld [vmem:[#allocation2 + $0xe0] ss:$12 sps:$4 sm:$0xff]  }
 0x510   : > { %v3420_v57 = vld [vmem:[#allocation2 + $0xd8] ss:$12 sps:$4 sm:$0xff]  }
 0x511   : > { %1321 = vadd.xlane.f32.xlu0 %v1318_v58 }
 0x59e   : > { %v1322_v62 = vpop.xlane.xlu0 %1321 }
 0x59f   : > { %v1323_v63 = vmul.f32 0.03125, %v1322_v62 }
 0x5a1   : > { %v1324_v2 = vsub.f32 %v1318_v58, %v1323_v63  ;;  %v3426_v58 = vld [vmem:[#allocation2 + $0xf4] ss:$12 sps:$4 sm:$0xff]  }
 0x5a3   : > { %v1325_v3 = vmul.f32 %v3870_v23, %v1324_v2 }
 0x5a5   : > { %v1326_v4 = vmul.f32 %v1325_v3, %v1325_v3 }
 0x5a7   : > { %1327 = vadd.xlane.f32.xlu1 %v1326_v4  ;;  %v3427_v4 = vld [vmem:[#allocation2 + $0xf8] ss:$12 sps:$4 sm:$0xff]  }
 0x634   : > { %v1328_v17 = vpop.xlane.xlu1 %1327 }
 0x635   : > { %v1329_v18 = vmul.f32 0.03125, %v1328_v17  ;;  %v3446_v17 = vld [vmem:[#allocation2 + $0x16c] ss:$12 sps:$4 sm:$0xff]  }
 0x637   : > { %v1330_v19 = vadd.f32 1e-12, %v1329_v18  ;;  %v3444_v18 = vld [vmem:[#allocation2 + $0x168] ss:$12 sps:$4 sm:$0xff]  }
 0x639   : > { %3488 = vrsqrt.f32 %v1330_v19  ;;  %v3447_v19 = vld [vmem:[#allocation2 + $0x170] ss:$12 sps:$4 sm:$0xff]  }
 0x643   : > { %v3489_v20 = vpop.eup %3488 }
 0x644   : > { %v1332_v22 = vmul.f32 %v3489_v20, %v1325_v3 }
 0x646   : > { %v1339_v25 = vmul.f32 %v2813_v21, %v1332_v22 }
 0x648   : > { %v1346_v26 = vadd.f32 %v2814_v24, %v1339_v25  ;;  %v2833_v25 = vld [vmem:[%s4180_s12] ss:$0 sm:$0xff] }
 0x64a   : > { %v1347_v27 = vpack.c.bf16 %v1346_v26, %v1346_v26 }
 0x64c   : > { %3161 = vmatmul.mubr.bf16.vlgmr.msra.gmra.mrb[16].mxu0 %v1347_v27  ;;  %v2834_v27 = vld [vmem:[%s4181_s13] ss:$0 sm:$0xff] }
 0x64d   : > { %1813 = vmatprep.mubr.bf16.mxu0 %v3555_v0  ;;  %1782 = vmatpush1.bf16.msra.mxu0 %v3416_v51 }
 0x64e   : > { %1783 = vmatprep.subr.bf16.mxu0 %v3422_v54 }
 0x651   : > { %1784 = vmatpush1.bf16.msra.mxu0 %v3420_v57 }
 0x652   : > { %1785 = vmatprep.subr.bf16.mxu0 %v3426_v58 }
 0x655   : > { %1786 = vmatpush1.bf16.msra.mxu0 %v3424_v60 }
 0x656   : > { %1787 = vmatprep.subr.bf16.mxu0 %v3430_v5 }
 0x659   : > { %1788 = vmatpush1.bf16.msra.mxu0 %v3428_v7 }
 0x65a   : > { %1789 = vmatprep.subr.bf16.mxu0 %v3434_v8 }
 0x65d   : > { %1790 = vmatpush1.bf16.msra.mxu0 %v3432_v9 }
 0x65e   : > { %1791 = vmatprep.subr.bf16.mxu0 %v3438_v11 }
 0x661   : > { %1792 = vmatpush1.bf16.msra.mxu0 %v3436_v12 }
 0x662   : > { %1793 = vmatprep.subr.bf16.mxu0 %v3442_v14 }
 0x665   : > { %1794 = vmatpush1.bf16.msra.mxu0 %v3440_v15 }
 0x666   : > { %1795 = vmatprep.subr.bf16.mxu0 %v3446_v17 }
 0x669   : > { %1796 = vmatpush1.bf16.msra.mxu0 %v3444_v18 }
 0x66a   : > { %3204 = vmatprep.subr.bf16.mxu0 %v3556_v1 }
 0x71f   : > { %v1453_v35 = vpop.f32.mrb[16].mxu0 }
 0x720   : > { %v1454_v0 = vadd.f32 %v2815_v34, %v1453_v35  ;;  %v3162_v36 = vpop.f32.mrb[17].mxu0  ;;  %v2835_v35 = vld [vmem:[%s4171_s3 + $0x3] sm:$0x7] }
 0x721   : > { %v1456_v37 = vpop.f32.mrb[18].mxu0  ;;  %v1641_v36 = vrot.slane %v2835_v35, %v3713_v32  ;;  %v1649_v51 = vrot.slane %v2835_v35, %v563_v55 }
 0x722   : > { %v1459_v38 = vmax.f32 %v1454_v0, 0.0  ;;  %v3163_v39 = vpop.f32.mrb[19].mxu0  ;;  %v1645_v0 = vrot.slane %v2835_v35, %v559_v31 }
 0x724   : > { %v1460_v40 = vpack.c.bf16 %v1459_v38, %v1459_v38 }
 0x726   : > { %3181 = vmatmul.mubr.bf16.vlgmr.msra.gmra.mrb[16].mxu1 %v1460_v40 }
 0x727   : > { %3200 = vmatprep.mubr.msk.bf16.mxu1 %vm3557_vm0, %v3556_v1  ;;  %3185 = vmatpush3.bf16.msra.mxu1 %v3419_v53 }
 0x728   : > { %3186 = vmatprep.subr.bf16.mxu1 %v3556_v1 }
 0x72b   : > { %3187 = vmatpush3.bf16.msra.mxu1 %v3423_v56 }
 0x72c   : > { %3188 = vmatprep.subr.bf16.mxu1 %v3556_v1 }
 0x72f   : > { %3189 = vmatpush3.bf16.msra.mxu1 %v3427_v4 }
 0x730   : > { %3190 = vmatprep.subr.bf16.mxu1 %v3556_v1 }
 0x733   : > { %3191 = vmatpush3.bf16.msra.mxu1 %v3431_v30 }
 0x734   : > { %3192 = vmatprep.subr.bf16.mxu1 %v3556_v1 }
 0x737   : > { %3193 = vmatpush3.bf16.msra.mxu1 %v3435_v10 }
 0x738   : > { %3194 = vmatprep.subr.bf16.mxu1 %v3556_v1 }
 0x73b   : > { %3195 = vmatpush3.bf16.msra.mxu1 %v3439_v13 }
 0x73c   : > { %3196 = vmatprep.subr.bf16.mxu1 %v3556_v1 }
 0x73f   : > { %3197 = vmatpush3.bf16.msra.mxu1 %v3443_v16 }
 0x740   : > { %3198 = vmatprep.subr.bf16.mxu1 %v3556_v1 }
 0x743   : > { %3199 = vmatpush3.bf16.msra.mxu1 %v3447_v19 }
 0x744   : > { %3210 = vmatprep.subr.bf16.mxu1 %v3556_v1 }
 0x7f9   : > { %v1566_v59 = vpop.f32.mrb[16].mxu1 }
 0x7fa   : > { %v1567_v42 = vadd.f32 %v2824_v41, %v1566_v59  ;;  %v3182_v45 = vpop.f32.mrb[17].mxu1 }
 0x7fb   : > { %v1569_v46 = vpop.f32.mrb[18].mxu1 }
 0x7fc   : > { %v3183_v47 = vpop.f32.mrb[19].mxu1  ;;  %v1574_v48 = vadd.f32 %v1567_v42, %v1346_v26 }
 0x7fe   : > { %1575 = vadd.xlane.f32.xlu0 %v1574_v48 }
 0x88b   : > { %v1576_v61 = vpop.xlane.xlu0 %1575 }
 0x88c   : > { %v1577_v62 = vmul.f32 0.03125, %v1576_v61 }
 0x88e   : > { %v1578_v63 = vsub.f32 %v1574_v48, %v1577_v62 }
 0x890   : > { %v1579_v2 = vmul.f32 %v3870_v23, %v1578_v63 }
 0x892   : > { %v1580_v3 = vmul.f32 %v1579_v2, %v1579_v2 }
 0x894   : > { %1581 = vadd.xlane.f32.xlu1 %v1580_v3 }
 0x921   : > { %v1582_v20 = vpop.xlane.xlu1 %1581 }
 0x922   : > { %v1583_v21 = vmul.f32 0.03125, %v1582_v20 }
 0x924   : > { %v1584_v22 = vadd.f32 1e-12, %v1583_v21 }
 0x926   : > { %3490 = vrsqrt.f32 %v1584_v22 }
 0x930   : > { %v3491_v24 = vpop.eup %3490 }
 0x931   : > { %v1586_v26 = vmul.f32 %v3491_v24, %v1579_v2 }
 0x933   : > { %v1593_v28 = vmul.f32 %v2833_v25, %v1586_v26 }
 0x935   : > { %v3959_v33 = vadd.f32 %v2834_v27, %v1593_v28 }
 0x937   : > { %v1601_v34 = vpack.c.bf16 %v3959_v33, %v3959_v33 }
 0x939   : > { %1814 = vmatmul.mubr.bf16.vlgmr.msra.gmra.mrb[20].mxu0 %v1601_v34  ;;  %3201 = vmatmul.mubr.bf16.vlgmr.msra.gmra.mrb[20].mxu1 %v1601_v34 }
 0x93a   : > { %3206 = vmatprep.mubr.msk.bf16.mxu0 %vm3557_vm0, %v3556_v1  ;;  %3212 = vmatprep.mubr.msk.bf16.mxu1 %vm3557_vm0, %v3556_v1 }
 0xa0c   : > { %v1815_v37 = vpop.f32.mrb[20].mxu0  ;;  %v1856_v38 = vpop.f32.mrb[20].mxu1 }
 0xa0d   : > { %v1817_v39 = vpop.f32.mrb[21].mxu0  ;;  %v3202_v40 = vpop.f32.mrb[21].mxu1  ;;  %v1816_v45 = vadd.f32 %v1815_v37, %v1641_v36  ;;  %v3979_v52 = vadd.f32 %v1856_v38, %v1649_v51 }
 0xa0e   : > { %v1818_v41 = vadd.f32 %v1817_v39, %v1645_v0  ;;  %v1819_v59 = vpop.f32.mrb[22].mxu0  ;;  %v1859_v42 = vpop.f32.mrb[22].mxu1 }
 0xa0f   : > { %v1820_v46 = vpop.f32.mrb[23].mxu0  ;;  %v3203_v47 = vpop.f32.mrb[23].mxu1  ;;  %v1882_v31 = vmul.f32 %v3725_v43, %v1816_v45  ;;  %v1925_v32 = vmul.f32 %v3728_v44, %v1816_v45  ;;  %v2105_v29 = vmul.f32 %v3728_v44, %v3979_v52  ;;  %v1968_v55 = vmul.f32 %v3741_v49, %v1816_v45 }
 0xa10   : > { %v1881_v48 = vpack.c.bf16 %v1818_v41, %v1818_v41  ;;  %v2011_v56 = vmul.f32 %v3744_v50, %v1816_v45 }
 0xa11   : > { %v1883_v53 = vpack.c.bf16 %v1882_v31, %v1882_v31  ;;  %v1926_v54 = vpack.c.bf16 %v1925_v32, %v1925_v32  ;;  %v2106_v57 = vpack.c.bf16 %v2105_v29, %v2105_v29  ;;  %v1969_v58 = vpack.c.bf16 %v1968_v55, %v1968_v55  ;;  %v3450_v29 = vld [vmem:[%s4172_s4 + $0x50] sm:$0xff]   ;;  %v3451_v55 = vld [vmem:[%s4172_s4 + $0x58] sm:$0xff]  }
 0xa12   : > { %3205 = vmatpush3.bf16.xpose.msra.mxu0 %v1881_v48  ;;  %3211 = vmatpush3.bf16.xpose.msra.mxu1 %v1881_v48  ;;  %v2012_v60 = vpack.c.bf16 %v2011_v56, %v2011_v56  ;;  %v3452_v56 = vld [vmem:[%s4172_s4 + $0x60] sm:$0xff]  }
 0xa13   : > { %3216 = vmatprep.subr.bf16.mxu0 %v3556_v1  ;;  %3222 = vmatprep.subr.bf16.mxu1 %v3556_v1  ;;  %v2112_v44 = vsel %vm1031_vm11, %v2106_v57, 0  ;;  %v3453_v57 = vld [vmem:[%s4172_s4 + $0x68] sm:$0xff]  }
 0xa19   : > { %3207 = vmatmul.mubr.bf16.vlgmr.msra.gmra.mrb[24].mxu0 %v1883_v53  ;;  %3213 = vmatmul.mubr.bf16.vlgmr.msra.gmra.mrb[24].mxu1 %v1926_v54  ;;  %v3448_v53 = vld [vmem:[%s4172_s4 + $0x40] sm:$0xff]   ;;  %v3449_v54 = vld [vmem:[%s4172_s4 + $0x48] sm:$0xff]  }
 0xa1a   : > { %3217 = vmatpush3.bf16.xpose.msra.mxu0 %v1881_v48  ;;  %3223 = vmatpush3.bf16.xpose.msra.mxu1 %v1881_v48 }
 0xa1b   : > { %3218 = vmatprep.mubr.msk.bf16.mxu0 %vm3557_vm0, %v3556_v1  ;;  %3224 = vmatprep.mubr.msk.bf16.mxu1 %vm3557_vm0, %v3556_v1 }
 0xa1c   : > { %3228 = vmatprep.subr.bf16.mxu0 %v3556_v1  ;;  %3252 = vmatprep.subr.bf16.mxu1 %v3556_v1 }
 0xa21   : > { %3219 = vmatmul.mubr.bf16.vlgmr.msra.gmra.mrb[28].mxu0 %v1969_v58  ;;  %3225 = vmatmul.mubr.bf16.vlgmr.msra.gmra.mrb[28].mxu1 %v2012_v60  ;;  %v3454_v58 = vld [vmem:[%s4172_s4 + $0x70] sm:$0xff]  }
 0xa22   : > { %3229 = vmatpush3.bf16.msra.mxu0 %v2112_v44  ;;  %3230 = vmatprep.mubr.msk.bf16.mxu0 %vm3557_vm0, %v3556_v1 }
 0xa23   : > { %3234 = vmatprep.subr.bf16.mxu0 %v3556_v1  ;;  %3268 = vmatprep.mubr.msk.bf16.mxu1 %vm3557_vm0, %v3556_v1 }
 0xa24   : > { %3253 = vmatpush3.bf16.msra.mxu1 %v3448_v53  ;;  %v3468_v53 = vld [vmem:[%s4178_s10 + $0x60] sm:$0xff]  }
 0xa25   : > { %3254 = vmatprep.subr.bf16.mxu1 %v3556_v1 }
 0xa28   : > { %3255 = vmatpush3.bf16.msra.mxu1 %v3449_v54  ;;  %v3469_v54 = vld [vmem:[%s4178_s10 + $0x68] sm:$0xff]  }
 0xa29   : > { %3256 = vmatprep.subr.bf16.mxu1 %v3556_v1 }
 0xa2c   : > { %3257 = vmatpush3.bf16.msra.mxu1 %v3450_v29 }
 0xa2d   : > { %3258 = vmatprep.subr.bf16.mxu1 %v3556_v1 }
 0xa30   : > { %3259 = vmatpush3.bf16.msra.mxu1 %v3451_v55 }
 0xa31   : > { %3260 = vmatprep.subr.bf16.mxu1 %v3556_v1 }
 0xa34   : > { %3261 = vmatpush3.bf16.msra.mxu1 %v3452_v56 }
 0xa35   : > { %3262 = vmatprep.subr.bf16.mxu1 %v3556_v1 }
 0xa38   : > { %3263 = vmatpush3.bf16.msra.mxu1 %v3453_v57 }
 0xa39   : > { %3264 = vmatprep.subr.bf16.mxu1 %v3556_v1 }
 0xa3c   : > { %3265 = vmatpush3.bf16.msra.mxu1 %v3454_v58  ;;  %v2892_v58 = vld [vmem:[%s4174_s6 + $0x1] ss:$0 sm:$0xff] }
 0xa3d   : > { %3266 = vmatprep.subr.bf16.mxu1 %v3556_v1 }
 0xaec   : > { %v1918_v61 = vpop.f32.mrb[24].mxu0  ;;  %v1961_v62 = vpop.f32.mrb[24].mxu1 }
 0xaed   : > { %v1924_v63 = vmul.f32 0.35355338, %v1918_v61  ;;  %v1967_v2 = vmul.f32 0.35355338, %v1961_v62  ;;  %v3208_v3 = vpop.f32.mrb[25].mxu0  ;;  %v3214_v4 = vpop.f32.mrb[25].mxu1  ;;  %v2102_v61 = vmul.f32 %v3725_v43, %v3979_v52  ;;  %v2200_v43 = vmul.f32 %v3741_v49, %v3979_v52 }
 0xaee   : > { %v1921_v5 = vpop.f32.mrb[26].mxu0  ;;  %v1964_v7 = vpop.f32.mrb[26].mxu1 }
 0xaef   : > { %v3209_v30 = vpop.f32.mrb[27].mxu0  ;;  %v3215_v8 = vpop.f32.mrb[27].mxu1  ;;  %v2055_v9 = vsel %vm3773_vm13, %v1967_v2, -10000.0  ;;  %v2054_v10 = vsel %vm3773_vm13, %v1924_v63, -10000.0  ;;  %v2103_v2 = vpack.c.bf16 %v2102_v61, %v2102_v61 }
 0xaf0   : > { %v2061_v11 = vsel %vm977_vm14, %v2055_v9, -inf  ;;  %v2058_v12 = vsel %vm977_vm14, %v2054_v10, -inf  ;;  %v2201_v8 = vpack.c.bf16 %v2200_v43, %v2200_v43 }
 0xaf1   : > { %2062 = vmax.xlane.f32.xlu0 %v2061_v11  ;;  %2059 = vmax.xlane.f32.xlu1 %v2058_v12  ;;  %v2158_v4 = vsel %vm1031_vm11, %v2103_v2, 0  ;;  %v3470_v2 = vld [vmem:[%s4178_s10 + $0x70] sm:$0xff]  }
 0xaf4   : > { %v2004_v13 = vpop.f32.mrb[28].mxu0  ;;  %v2047_v14 = vpop.f32.mrb[28].mxu1 }
 0xaf5   : > { %v2010_v15 = vmul.f32 0.35355338, %v2004_v13  ;;  %v2053_v16 = vmul.f32 0.35355338, %v2047_v14  ;;  %v3220_v17 = vpop.f32.mrb[29].mxu0  ;;  %v3226_v18 = vpop.f32.mrb[29].mxu1  ;;  %v2250_v13 = vmul.f32 %v3744_v50, %v3979_v52 }
 0xaf6   : > { %v2007_v19 = vpop.f32.mrb[30].mxu0  ;;  %v2050_v20 = vpop.f32.mrb[30].mxu1  ;;  %v3455_v50 = vld [vmem:[%s4172_s4 + $0x78] sm:$0xff]  }
 0xaf7   : > { %v3221_v21 = vpop.f32.mrb[31].mxu0  ;;  %v3227_v22 = vpop.f32.mrb[31].mxu1  ;;  %v2057_v24 = vsel %vm3773_vm13, %v2053_v16, -10000.0  ;;  %v2056_v25 = vsel %vm3773_vm13, %v2010_v15, -10000.0  ;;  %v2251_v14 = vpack.c.bf16 %v2250_v13, %v2250_v13  ;;  %3267 = vmatpush3.bf16.msra.mxu1 %v3455_v50 }
 0xaf8   : > { %v2067_v26 = vsel %vm977_vm14, %v2057_v24, -inf  ;;  %v2064_v27 = vsel %vm977_vm14, %v2056_v25, -inf  ;;  %3292 = vmatprep.subr.bf16.mxu1 %v3556_v1 }
 0xaf9   : > { %2068 = vmax.xlane.f32.xlu1 %v2067_v26  ;;  %2065 = vmax.xlane.f32.xlu0 %v2064_v27  ;;  %v2257_v16 = vsel %vm1031_vm11, %v2251_v14, 0 }
 0xb7e   : > { %v2063_v28 = vpop.xlane.xlu0 %2062  ;;  %v2060_v34 = vpop.xlane.xlu1 %2059 }
 0xb7f   : > { %v2071_v35 = vsub.f32 %v2055_v9, %v2063_v28  ;;  %v2070_v0 = vsub.f32 %v2054_v10, %v2060_v34  ;;  %v2207_v10 = vsel %vm1031_vm11, %v2201_v8, 0 }
 0xb81   : > { %v2076_v36 = vmul.f32 1.442695, %v2071_v35  ;;  %v2074_v37 = vmul.f32 1.442695, %v2070_v0 }
 0xb83   : > { %3492 = vpow2.f32 %v2076_v36  ;;  %v3456_v36 = vld [vmem:[%s4176_s8 + $0x40] sm:$0xff]  }
 0xb84   : > { %3494 = vpow2.f32 %v2074_v37  ;;  %v3457_v37 = vld [vmem:[%s4176_s8 + $0x48] sm:$0xff]  }
 0xb86   : > { %v2069_v38 = vpop.xlane.xlu1 %2068  ;;  %v2066_v39 = vpop.xlane.xlu0 %2065 }
 0xb87   : > { %v2073_v40 = vsub.f32 %v2057_v24, %v2069_v38  ;;  %v2072_v41 = vsub.f32 %v2056_v25, %v2066_v39  ;;  %v2881_v25 = vld [vmem:[%s4173_s5 + $0x1] ss:$0 sm:$0xff] }
 0xb89   : > { %v2080_v6 = vmul.f32 1.442695, %v2073_v40  ;;  %v2078_v59 = vmul.f32 1.442695, %v2072_v41 }
 0xb8b   : > { %3496 = vpow2.f32 %v2080_v6  ;;  %v3458_v6 = vld [vmem:[%s4176_s8 + $0x50] sm:$0xff]  }
 0xb8c   : > { %3498 = vpow2.f32 %v2078_v59  ;;  %v3459_v59 = vld [vmem:[%s4176_s8 + $0x58] sm:$0xff]  }
 0xb8d   : > { %v3493_v42 = vpop.eup %3492 }
 0xb8e   : > { %v3495_v45 = vpop.eup %3494  ;;  %v2085_v46 = vsel %vm977_vm14, %v3493_v42, 0.0 }
 0xb8f   : > { %v2082_v47 = vsel %vm977_vm14, %v3495_v45, 0.0  ;;  %2086 = vadd.xlane.f32.xlu0 %v2085_v46  ;;  %v3462_v46 = vld [vmem:[%s4176_s8 + $0x70] sm:$0xff]  }
 0xb90   : > { %2083 = vadd.xlane.f32.xlu1 %v2082_v47  ;;  %v3463_v47 = vld [vmem:[%s4176_s8 + $0x78] sm:$0xff]  }
 0xb95   : > { %v4011_v48 = vpop.eup %3496 }
 0xb96   : > { %v3499_v51 = vpop.eup %3498  ;;  %v2091_v31 = vsel %vm977_vm14, %v4011_v48, 0.0 }
 0xb97   : > { %2092 = vadd.xlane.f32.xlu1 %v2091_v31  ;;  %v2088_v32 = vsel %vm977_vm14, %v3499_v51, 0.0  ;;  %v3466_v31 = vld [vmem:[%s4178_s10 + $0x50] sm:$0xff]  }
 0xb98   : > { %2089 = vadd.xlane.f32.xlu0 %v2088_v32  ;;  %v3467_v32 = vld [vmem:[%s4178_s10 + $0x58] sm:$0xff]  }
 0xc1c   : > { %v2087_v60 = vpop.xlane.xlu0 %2086 }
 0xc1d   : > { %3500 = vrcp.f32 %v2087_v60  ;;  %v2084_v44 = vpop.xlane.xlu1 %2083 }
 0xc1e   : > { %3502 = vrcp.f32 %v2084_v44  ;;  %v2893_v44 = vld [vmem:[%s4175_s7 + $0x1] ss:$0 sm:$0xff] }
 0xc24   : > { %v2093_v11 = vpop.xlane.xlu1 %2092 }
 0xc25   : > { %v2090_v5 = vpop.xlane.xlu0 %2089 }
 0xc26   : > { %3504 = vrcp.f32 %v2090_v5 }
 0xc27   : > { %v3501_v62 = vpop.eup %3500  ;;  %3506 = vrcp.f32 %v2093_v11 }
 0xc28   : > { %v2097_v63 = vmul.f32 %v3501_v62, %v3493_v42  ;;  %v3503_v7 = vpop.eup %3502  ;;  %v3460_v42 = vld [vmem:[%s4176_s8 + $0x60] sm:$0xff]  }
 0xc29   : > { %v2095_v30 = vmul.f32 %v3503_v7, %v3495_v45  ;;  %v3461_v45 = vld [vmem:[%s4176_s8 + $0x68] sm:$0xff]  }
 0xc2a   : > { %v2107_v3 = vpack.c.bf16 %v2097_v63, %v2097_v63 }
 0xc2b   : > { %v2104_v9 = vpack.c.bf16 %v2095_v30, %v2095_v30 }
 0xc2c   : > { %3231 = vmatmul.mubr.msk.bf16.vlgmr.msra.gmra.mrb[32].mxu0 %vm977_vm14, %v2107_v3  ;;  %v3471_v3 = vld [vmem:[%s4178_s10 + $0x78] sm:$0xff]  }
 0xc2d   : > { %3235 = vmatpush3.bf16.msra.mxu0 %v2158_v4  ;;  %3236 = vmatprep.mubr.msk.bf16.mxu0 %vm3557_vm0, %v3556_v1  ;;  %v2911_v4 = vld [vmem:[%s4177_s9 + $0x1] ss:$0 sm:$0xff] }
 0xc2e   : > { %3240 = vmatprep.subr.bf16.mxu0 %v3556_v1 }
 0xc30   : > { %v3505_v12 = vpop.eup %3504 }
 0xc31   : > { %v2099_v49 = vmul.f32 %v3505_v12, %v3499_v51  ;;  %v3507_v17 = vpop.eup %3506  ;;  %v3465_v51 = vld [vmem:[%s4178_s10 + $0x48] sm:$0xff]  }
 0xc32   : > { %v2101_v18 = vmul.f32 %v3507_v17, %v4011_v48  ;;  %v3464_v48 = vld [vmem:[%s4178_s10 + $0x40] sm:$0xff]  }
 0xc33   : > { %v2202_v15 = vpack.c.bf16 %v2099_v49, %v2099_v49 }
 0xc34   : > { %v2252_v19 = vpack.c.bf16 %v2101_v18, %v2101_v18 }
 0xc38   : > { %3237 = vmatmul.mubr.msk.bf16.vlgmr.msra.gmra.mrb[32].mxu0 %vm977_vm14, %v2104_v9 }
 0xc39   : > { %3241 = vmatpush3.bf16.msra.mxu0 %v2207_v10  ;;  %3242 = vmatprep.mubr.msk.bf16.mxu0 %vm3557_vm0, %v3556_v1 }
 0xc3a   : > { %3246 = vmatprep.subr.bf16.mxu0 %v3556_v1 }
 0xc44   : > { %3243 = vmatmul.mubr.msk.bf16.vlgmr.msra.gmra.mrb[32].mxu0 %vm977_vm14, %v2202_v15 }
 0xc45   : > { %3247 = vmatpush3.bf16.msra.mxu0 %v2257_v16  ;;  %3248 = vmatprep.mubr.msk.bf16.mxu0 %vm3557_vm0, %v3556_v1 }
 0xc46   : > { %3272 = vmatprep.subr.bf16.mxu0 %v3556_v1 }
 0xc50   : > { %3249 = vmatmul.mubr.msk.bf16.vlgmr.msra.gmra.mrb[32].mxu0 %vm977_vm14, %v2252_v19 }
 0xc51   : > { %3288 = vmatprep.mubr.msk.bf16.mxu0 %vm3557_vm0, %v3556_v1  ;;  %3273 = vmatpush3.bf16.msra.mxu0 %v3456_v36 }
 0xc52   : > { %3274 = vmatprep.subr.bf16.mxu0 %v3556_v1 }
 0xc55   : > { %3275 = vmatpush3.bf16.msra.mxu0 %v3457_v37 }
 0xc56   : > { %3276 = vmatprep.subr.bf16.mxu0 %v3556_v1 }
 0xc59   : > { %3277 = vmatpush3.bf16.msra.mxu0 %v3458_v6 }
 0xc5a   : > { %3278 = vmatprep.subr.bf16.mxu0 %v3556_v1 }
 0xc5d   : > { %3279 = vmatpush3.bf16.msra.mxu0 %v3459_v59 }
 0xc5e   : > { %3280 = vmatprep.subr.bf16.mxu0 %v3556_v1 }
 0xc61   : > { %3281 = vmatpush3.bf16.msra.mxu0 %v3460_v42 }
 0xc62   : > { %3282 = vmatprep.subr.bf16.mxu0 %v3556_v1 }
 0xc65   : > { %3283 = vmatpush3.bf16.msra.mxu0 %v3461_v45 }
 0xc66   : > { %3284 = vmatprep.subr.bf16.mxu0 %v3556_v1 }
 0xc69   : > { %3285 = vmatpush3.bf16.msra.mxu0 %v3462_v46 }
 0xc6a   : > { %3286 = vmatprep.subr.bf16.mxu0 %v3556_v1 }
 0xc6d   : > { %3287 = vmatpush3.bf16.msra.mxu0 %v3463_v47 }
 0xd23   : > { %v2293_v52 = vpop.f32.mrb[32].mxu0 }
 0xd24   : > { %v2300_v20 = vpack.c.bf16 %v2293_v52, %v2293_v52  ;;  %v3250_v21 = vpop.f32.mrb[33].mxu0 }
 0xd25   : > { %v2296_v22 = vpop.f32.mrb[34].mxu0 }
 0xd26   : > { %v3251_v24 = vpop.f32.mrb[35].mxu0  ;;  %3269 = vmatmul.mubr.bf16.vlgmr.msra.gmra.mrb[32].mxu1 %v2300_v20 }
 0xd27   : > { %3308 = vmatprep.mubr.msk.bf16.mxu1 %vm3557_vm0, %v3556_v1  ;;  %3293 = vmatpush3.bf16.msra.mxu1 %v3464_v48  ;;  %v2948_v24 = vld [vmem:[%s4180_s12 + $0x1] ss:$0 sm:$0xff] }
 0xd28   : > { %3294 = vmatprep.subr.bf16.mxu1 %v3556_v1 }
 0xd2b   : > { %3295 = vmatpush3.bf16.msra.mxu1 %v3465_v51 }
 0xd2c   : > { %3296 = vmatprep.subr.bf16.mxu1 %v3556_v1 }
 0xd2f   : > { %3297 = vmatpush3.bf16.msra.mxu1 %v3466_v31 }
 0xd30   : > { %3298 = vmatprep.subr.bf16.mxu1 %v3556_v1 }
 0xd33   : > { %3299 = vmatpush3.bf16.msra.mxu1 %v3467_v32 }
 0xd34   : > { %3300 = vmatprep.subr.bf16.mxu1 %v3556_v1 }
 0xd37   : > { %3301 = vmatpush3.bf16.msra.mxu1 %v3468_v53 }
 0xd38   : > { %3302 = vmatprep.subr.bf16.mxu1 %v3556_v1 }
 0xd3b   : > { %3303 = vmatpush3.bf16.msra.mxu1 %v3469_v54 }
 0xd3c   : > { %3304 = vmatprep.subr.bf16.mxu1 %v3556_v1 }
 0xd3f   : > { %3305 = vmatpush3.bf16.msra.mxu1 %v3470_v2 }
 0xd40   : > { %3306 = vmatprep.subr.bf16.mxu1 %v3556_v1  ;;  %v2937_v1 = vld [vmem:[%s4179_s11 + $0x1] ss:$0 sm:$0xff] }
 0xd43   : > { %3307 = vmatpush3.bf16.msra.mxu1 %v3471_v3 }
 0xdf9   : > { %v2389_v26 = vpop.f32.mrb[32].mxu1 }
 0xdfa   : > { %v2390_v27 = vadd.f32 %v2881_v25, %v2389_v26  ;;  %v3270_v28 = vpop.f32.mrb[33].mxu1  ;;  %v2949_v26 = vld [vmem:[%s4181_s13 + $0x1] ss:$0 sm:$0xff] }
 0xdfb   : > { %v2392_v34 = vpop.f32.mrb[34].mxu1 }
 0xdfc   : > { %v3271_v35 = vpop.f32.mrb[35].mxu1  ;;  %v2399_v0 = vadd.f32 %v2390_v27, %v3959_v33 }
 0xdfe   : > { %2400 = vadd.xlane.f32.xlu0 %v2399_v0 }
 0xe8b   : > { %v2401_v38 = vpop.xlane.xlu0 %2400 }
 0xe8c   : > { %v2402_v39 = vmul.f32 0.03125, %v2401_v38 }
 0xe8e   : > { %v2403_v40 = vsub.f32 %v2399_v0, %v2402_v39 }
 0xe90   : > { %v2404_v33 = vmul.f32 %v3870_v23, %v2403_v40 }
 0xe92   : > { %v2405_v41 = vmul.f32 %v2404_v33, %v2404_v33 }
 0xe94   : > { %2406 = vadd.xlane.f32.xlu1 %v2405_v41 }
 0xf21   : > { %v2407_v29 = vpop.xlane.xlu1 %2406 }
 0xf22   : > { %v2408_v55 = vmul.f32 0.03125, %v2407_v29 }
 0xf24   : > { %v2409_v56 = vadd.f32 1e-12, %v2408_v55 }
 0xf26   : > { %3508 = vrsqrt.f32 %v2409_v56 }
 0xf30   : > { %v3509_v57 = vpop.eup %3508 }
 0xf31   : > { %v2411_v60 = vmul.f32 %v3509_v57, %v2404_v33 }
 0xf33   : > { %v2418_v61 = vmul.f32 %v2892_v58, %v2411_v60 }
 0xf35   : > { %v2425_v62 = vadd.f32 %v2893_v44, %v2418_v61 }
 0xf37   : > { %v2426_v63 = vpack.c.bf16 %v2425_v62, %v2425_v62 }
 0xf39   : > { %3289 = vmatmul.mubr.bf16.vlgmr.msra.gmra.mrb[36].mxu0 %v2426_v63 }
0x100c   : > { %v2534_v5 = vpop.f32.mrb[36].mxu0 }
0x100d   : > { %v2535_v7 = vadd.f32 %v2911_v4, %v2534_v5  ;;  %v3290_v43 = vpop.f32.mrb[37].mxu0 }
0x100e   : > { %v2537_v30 = vpop.f32.mrb[38].mxu0 }
0x100f   : > { %v2540_v8 = vmax.f32 %v2535_v7, 0.0  ;;  %v3291_v9 = vpop.f32.mrb[39].mxu0 }
0x1011   : > { %v2541_v10 = vpack.c.bf16 %v2540_v8, %v2540_v8 }
0x1013   : > { %3309 = vmatmul.mubr.bf16.vlgmr.msra.gmra.mrb[36].mxu1 %v2541_v10 }
0x10e6   : > { %v2649_v11 = vpop.f32.mrb[36].mxu1 }
0x10e7   : > { %v2650_v12 = vadd.f32 %v2937_v1, %v2649_v11  ;;  %v3310_v13 = vpop.f32.mrb[37].mxu1 }
0x10e8   : > { %v2652_v49 = vpop.f32.mrb[38].mxu1 }
0x10e9   : > { %v3311_v14 = vpop.f32.mrb[39].mxu1  ;;  %v2659_v15 = vadd.f32 %v2650_v12, %v2425_v62 }
0x10eb   : > { %2660 = vadd.xlane.f32.xlu0 %v2659_v15 }
0x1178   : > { %v2661_v16 = vpop.xlane.xlu0 %2660 }
0x1179   : > { %v2662_v17 = vmul.f32 0.03125, %v2661_v16 }
0x117b   : > { %v2663_v18 = vsub.f32 %v2659_v15, %v2662_v17 }
0x117d   : > { %v2664_v19 = vmul.f32 %v3870_v23, %v2663_v18 }
0x117f   : > { %v2665_v50 = vmul.f32 %v2664_v19, %v2664_v19 }
0x1181   : > { %2666 = vadd.xlane.f32.xlu1 %v2665_v50 }
0x120e   : > { %v2667_v52 = vpop.xlane.xlu1 %2666 }
0x120f   : > { %v2668_v20 = vmul.f32 0.03125, %v2667_v52 }
0x1211   : > { %v2669_v21 = vadd.f32 1e-12, %v2668_v20 }
0x1213   : > { %3510 = vrsqrt.f32 %v2669_v21 }
0x121d   : > { %v3511_v22 = vpop.eup %3510 }
0x121e   : > { %v2671_v25 = vmul.f32 %v3511_v22, %v2664_v19 }
0x1220   : > { %v2678_v27 = vmul.f32 %v2948_v24, %v2671_v25 }
0x1222   : > { %v2685_v28 = vadd.f32 %v2949_v26, %v2678_v27 }
0x1224   : > { %v2686_v23 = vpack.c.bf16 %v2685_v28, %v2685_v28 }
0x1226   : > { %2687 = vst [vmem:[%s491_s15] sm:$0xf] %v2686_v23 }
0x1227 PF: > { %s25_s29 = sadd.s32 1, %s3550_s29  }
0x1228   : > { %p22_p3 = scmp.ge.s32.totalorder %s25_s29, 4  }
0x122a   :  { %24 = sbr.rel (!%p22_p3) target bundleno = 1 (0x1), region = 126 }
0x1231   :  { %2707 = vsyncpa [#allocation3], 1 }
0x1232   :  { %2709 = vsyncpa [#allocation3 + $0x1], 1 }

// kernel: _lambda_.3
= control target key start
LH: loop header
LB: loop body
LE: loop exit
PB: predicated region body
PF: predicated region fallthrough
CT: control target
= control target key end

     0   :  { %s7998_s0 = inlined_call_operand.vmem [shape: f32[2,8,128], index: 0, kind: input, shape index: {}]   ;;  %s7999_s1 = inlined_call_operand.vmem [shape: bf16[2,8,128], index: 1, kind: input, shape index: {}]   ;;  %s8000_s2 = inlined_call_operand.vmem [shape: f32[2,8,1], index: 2, kind: input, shape index: {}]   ;;  %s8001_s3 = inlined_call_operand.vmem [shape: f32[2,1,8], index: 3, kind: input, shape index: {}]   ;;  %s8002_s4 = inlined_call_operand.vmem [shape: bf16[2,128,384], index: 4, kind: input, shape index: {}]   ;;  %s8003_s5 = inlined_call_operand.vmem [shape: f32[2,1,384], index: 5, kind: input, shape index: {}]   ;;  %s8004_s6 = inlined_call_operand.vmem [shape: bf16[2,128,128], index: 6, kind: input, shape index: {}]   ;;  %s8005_s7 = inlined_call_operand.vmem [shape: f32[2,1,128], index: 7, kind: input, shape index: {}]   ;;  %s8006_s8 = inlined_call_operand.vmem [shape: f32[2,1,128], index: 8, kind: input, shape index: {}]   ;;  %s8007_s9 = inlined_call_operand.vmem [shape: f32[2,1,128], index: 9, kind: input, shape index: {}]   ;;  %s8008_s10 = inlined_call_operand.hbm [shape: bf16[2,128,128], index: 10, kind: input, shape index: {}]   ;;  %s8009_s11 = inlined_call_operand.hbm [shape: f32[2,1,128], index: 11, kind: input, shape index: {}]   ;;  %s8010_s12 = inlined_call_operand.vmem [shape: bf16[2,128,256], index: 12, kind: input, shape index: {}]   ;;  %s8011_s13 = inlined_call_operand.vmem [shape: f32[2,1,256], index: 13, kind: input, shape index: {}]   ;;  %s8012_s14 = inlined_call_operand.hbm [shape: bf16[2,128,128], index: 14, kind: input, shape index: {}]   ;;  %s8013_s15 = inlined_call_operand.hbm [shape: f32[2,1,128], index: 15, kind: input, shape index: {}]   ;;  %s8014_s16 = inlined_call_operand.vmem [shape: f32[2,1,128], index: 16, kind: input, shape index: {}]   ;;  %s8015_s17 = inlined_call_operand.vmem [shape: f32[2,1,128], index: 17, kind: input, shape index: {}]   ;;  %s8016_s18 = inlined_call_operand.hbm [shape: bf16[2,128,128], index: 18, kind: input, shape index: {}]   ;;  %s8017_s19 = inlined_call_operand.vmem [shape: f32[2,1,128], index: 19, kind: input, shape index: {}]   ;;  %s8018_s20 = inlined_call_operand.hbm [shape: bf16[2,128,128], index: 20, kind: input, shape index: {}]   ;;  %s8019_s21 = inlined_call_operand.vmem [shape: f32[2,1,128], index: 21, kind: input, shape index: {}]   ;;  %s8020_s22 = inlined_call_operand.vmem [shape: f32[2,1,128], index: 22, kind: input, shape index: {}]   ;;  %s8021_s23 = inlined_call_operand.vmem [shape: f32[2,1,128], index: 23, kind: input, shape index: {}]   ;;  %s8022_s24 = inlined_call_operand.vmem [shape: bf16[128,128], index: 24, kind: input, shape index: {}]   ;;  %s8023_s25 = inlined_call_operand.vmem [shape: f32[1,128], index: 25, kind: input, shape index: {}]   ;;  %s8024_s26 = inlined_call_operand.hbm [shape: f32[2,8,128], index: 26, kind: output, shape index: {}]  }
   0x1   :  { %8050 = sst [smem:[#allocation27_spill]] %s7998_s0 }
   0x2   :  { %8051 = sst [smem:[#allocation28_spill]] %s7999_s1 }
   0x3   :  { %8052 = sst [smem:[#allocation29_spill]] %s8000_s2 }
   0x4   :  { %8053 = sst [smem:[#allocation30_spill]] %s8001_s3 }
   0x5   :  { %8054 = sst [smem:[#allocation31_spill]] %s8002_s4 }
   0x6   :  { %8055 = sst [smem:[#allocation32_spill]] %s8003_s5 }
   0x7   :  { %8056 = sst [smem:[#allocation33_spill]] %s8004_s6 }
   0x8   :  { %8057 = sst [smem:[#allocation34_spill]] %s8005_s7 }
   0x9   :  { %8058 = sst [smem:[#allocation35_spill]] %s8006_s8 }
   0xa   :  { %8059 = sst [smem:[#allocation36_spill]] %s8007_s9 }
   0xb   :  { %8060 = sst [smem:[#allocation37_spill]] %s8008_s10 }
   0xc   :  { %8061 = sst [smem:[#allocation38_spill]] %s8009_s11 }
   0xd   :  { %8062 = sst [smem:[#allocation39_spill]] %s8013_s15 }
   0xe   :  { %8063 = sst [smem:[#allocation40_spill]] %s8021_s23 }
   0xf   :  { %8064 = sst [smem:[#allocation41_spill]] %s8022_s24 }
  0x10   :  { %8065 = sst [smem:[#allocation42_spill]] %s8023_s25 }
  0x11   :  { %8066 = sst [smem:[#allocation43_spill]] %s8024_s26 }
  0x12   :  { %31 = vsyncpa [#allocation3], 0 }
  0x13   :  { %32 = vsyncpa [#allocation6], 0 }
  0x14   :  { %33 = vsyncpa [#allocation9], 0 }
  0x15   :  { %34 = vsyncpa [#allocation12], 0 }
  0x16   :  { %35 = vsyncpa [#allocation4], 0 }
  0x17   :  { %37 = vsyncpa [#allocation4 + $0x1], 0  ;;  %s6834_s27 = smov 0   ;;  %s6836_s3 = smov 0  }
  0x18   :  { %s6838_s7 = smov 0   ;;  %s6840_s28 = smov 0  }
  0x19 LB: > { %8067 = sst [smem:[#allocation19_spill]] %s6671_s27  ;;  %s6855_s8 = sadd.s32 4294967295, %s6683_s28   ;;  %s6683_s28 = sphi %s6840_s28, %s8121_s28   ;;  %s6679_s7 = sphi %s6838_s7, %s8124_s7   ;;  %s6675_s3 = sphi %s6836_s3, %s8123_s3   ;;  %s6671_s27 = sphi %s6834_s27, %s8122_s27  }
  0x1a   : > { %8068 = sst [smem:[#allocation20_spill]] %s6675_s3  ;;  %s5060_s4 = sadd.s32 4294967294, %s6683_s28  }
  0x1b   : > { %8069 = sst [smem:[#allocation21_spill]] %s6679_s7  ;;  %s6859_s29 = sadd.s32 1, %s6683_s28  }
  0x1c   : > { %8070 = sst [smem:[#allocation22_spill]] %s6683_s28  ;;  %s616_s0 = sadd.s32 1, %s6679_s7 }
  0x1d   : > { %8071 = sst [smem:[#allocation23_spill]] %s6859_s29  ;;  %s613_s9 = ssub.s32 %s6683_s28, %s6859_s29 }
  0x1e   : > { %p626_p0 = scmp.ne.s32.totalorder %s6679_s7, %s6675_s3  ;;  %p614_p1 = scmp.eq.s32.totalorder %s613_s9, 0 }
  0x1f   : > { %p627_p2 = scmp.eq.s32.totalorder %s6855_s8, 1  ;;  %p632_p3 = scmp.ne.s32.totalorder %s6675_s3, %s6671_s27 }
  0x20   : > { %p633_p4 = scmp.eq.s32.totalorder %s5060_s4, 1  ;;  %p5061_p7 = scmp.ge.s32.totalorder %s6683_s28, 1 }
  0x21   : > { %s6870_s30 = scalar_select %p614_p1, %s6679_s7, %s616_s0  }
  0x22   : > { %p6872_p5 = por %p627_p2, %p626_p0  ;;  %p6876_p6 = por %p633_p4, %p632_p3 }
  0x23   : > { %8072 = sst [smem:[#allocation24_spill]] %s6870_s30  ;;  %p640_p8 = scmp.lt.s32.totalorder %s6683_s28, 3 }
  0x24   : > { %s8073_s2 = scalar_select %p6872_p5, 1, 0 }
  0x25   : > { %s8075_s5 = scalar_select %p6876_p6, 1, 0 }
  0x26   : > { %8074 = sst [smem:[#allocation25_spill]] %s8073_s2  ;;  %p8039_p9 = scmp.eq.s32.totalorder %s6855_s8, 0 }
  0x27   : > { %8076 = sst [smem:[#allocation26_spill]] %s8075_s5  ;;  %p6883_p10 = pnand %p5061_p7, %p640_p8 }
  0x28   : > { %s6685_s6 = smov [#allocation5]   ;;  %s6686_s0 = smov [#allocation8]  }
  0x29   : > { %s8077_s10 = scalar_select %p6883_p10, 1, 0 }
  0x2a   : > { %s683_s1 = sshll.u32 %s6685_s6, 4  ;;  %p6078_p11 = pneg %p6883_p10  ;;  %s6889_s1 = int_to_ptr.vmem [resolvable:$true] %s683_s1 }
  0x2b   : > { %s715_s9 = sshll.u32 %s6686_s0, 4  ;;  %s6687_s30 = smov [#allocation2]   ;;  %s6897_s9 = int_to_ptr.vmem [resolvable:$true] %s715_s9 }
  0x2c   : > { %p6893_p12 = pnand %p8039_p9, %p6078_p11  ;;  %s6899_s7 = sshll.u32 %s6687_s30, 4  ;;  %s671_s7 = int_to_ptr.vmem [resolvable:$true] %s6899_s7 }
  0x2d   : > { %s8079_s11 = sld [smem:[#allocation38_spill]] }
  0x2e   : > { %p6909_p0 = pneg %p6893_p12 }
  0x33   : > { %s6437_s6 = scalar_lea.hbm %s8079_s11, 32 }
  0x34   : > { %p6438_p13 = scmp.ne.s32.totalorder %s8079_s11, %s6437_s6  ;;  %p6444_p3 = scmp.lt.u32.totalorder %s6437_s6, %s8079_s11 }
  0x36   : > { %p6440_p1 = pnand %p6909_p0, %p6438_p13 }
  0x38   : > { %p6441_p2 = pneg %p6440_p1 }
  0x3a   : > { %p6446_p4 = pnand %p6444_p3, %p6441_p2 }
  0x3c   : > { %6449 = shalt.err (!%p6446_p4)
}
  0x3d   : > { %s6450_s27 = scalar_lea.vmem %s6889_s1, 32  ;;  %p6458_p9 = scmp.lt.s32.totalorder %s6889_s1, %s6889_s1 }
  0x3e   : > { %p6451_p7 = scmp.ne.s32.totalorder %s6889_s1, %s6450_s27  ;;  %p6459_p6 = scmp.lt.s32.totalorder %s6450_s27, %s6450_s27 }
  0x40   : > { %p6453_p8 = pnand %p6451_p7, %p6909_p0  ;;  %p6460_p13 = por %p6459_p6, %p6458_p9 }
  0x42   : > { %p6454_p11 = pneg %p6453_p8 }
  0x44   : > { %p6461_p1 = pnand %p6460_p13, %p6454_p11 }
  0x46   : > { %6464 = shalt.err (!%p6461_p1)
}
  0x47   : > { %s6688_s28 = smov 16   ;;  %s6689_s29 = smov 1  }
  0x48   : > { %6084 = dma.hbm_to_vmem [thread:$0]  (!%p6893_p12), %s8079_s11, 32, %s6889_s1, [#allocation6], %s6688_s28, %s6688_s28, %s6689_s29  }
  0x49   : > { %s8081_s15 = sld [smem:[#allocation39_spill]] }
  0x4f   : > { %s6465_s2 = scalar_lea.hbm %s8081_s15, 32 }
  0x50   : > { %p6466_p6 = scmp.ne.s32.totalorder %s8081_s15, %s6465_s2  ;;  %p6472_p3 = scmp.lt.u32.totalorder %s6465_s2, %s8081_s15 }
  0x52   : > { %p6468_p9 = pnand %p6466_p6, %p6909_p0 }
  0x54   : > { %p6469_p2 = pneg %p6468_p9 }
  0x56   : > { %p6474_p4 = pnand %p6472_p3, %p6469_p2 }
  0x58   : > { %6477 = shalt.err (!%p6474_p4)
}
  0x59   : > { %s6478_s1 = scalar_lea.vmem %s6897_s9, 32  ;;  %p6486_p13 = scmp.lt.s32.totalorder %s6897_s9, %s6897_s9 }
  0x5a   : > { %p6479_p7 = scmp.ne.s32.totalorder %s6897_s9, %s6478_s1  ;;  %p6487_p1 = scmp.lt.s32.totalorder %s6478_s1, %s6478_s1 }
  0x5c   : > { %p6481_p8 = pnand %p6479_p7, %p6909_p0  ;;  %p6488_p6 = por %p6487_p1, %p6486_p13 }
  0x5e   : > { %p6482_p11 = pneg %p6481_p8 }
  0x60   : > { %p6489_p9 = pnand %p6488_p6, %p6482_p11 }
  0x62   : > { %6492 = shalt.err (!%p6489_p9)
}
  0x63   : > { %6090 = dma.hbm_to_vmem [thread:$0]  (!%p6893_p12), %s8081_s15, 32, %s6897_s9, [#allocation9], %s6688_s28, %s6688_s28, %s6689_s29  }
  0x64   : > { %s8082_s5 = sld [smem:[#allocation37_spill]] }
  0x6a   : > { %s6493_s6 = scalar_lea.hbm %s8082_s5, 2048 }
  0x6b   : > { %p6494_p2 = scmp.ne.s32.totalorder %s8082_s5, %s6493_s6  ;;  %p6500_p7 = scmp.lt.u32.totalorder %s6493_s6, %s8082_s5 }
  0x6d   : > { %p6496_p3 = pnand %p6494_p2, %p6909_p0 }
  0x6f   : > { %p6497_p4 = pneg %p6496_p3 }
  0x71   : > { %p6502_p8 = pnand %p6500_p7, %p6497_p4 }
  0x73   : > { %6505 = shalt.err (!%p6502_p8)
}
  0x74   : > { %s6506_s24 = scalar_lea.vmem %s671_s7, 2048  ;;  %p6514_p6 = scmp.lt.s32.totalorder %s671_s7, %s671_s7 }
  0x75   : > { %p6507_p11 = scmp.ne.s32.totalorder %s671_s7, %s6506_s24  ;;  %p6515_p9 = scmp.lt.s32.totalorder %s6506_s24, %s6506_s24 }
  0x77   : > { %p6509_p13 = pnand %p6507_p11, %p6909_p0  ;;  %p6516_p5 = por %p6515_p9, %p6514_p6 }
  0x79   : > { %p6510_p1 = pneg %p6509_p13 }
  0x7b   : > { %p6517_p10 = pnand %p6516_p5, %p6510_p1 }
  0x7d   : > { %6520 = shalt.err (!%p6517_p10)
}
  0x7e   : > { %s6690_s9 = smov 64   ;;  %s6691_s28 = smov 4  }
  0x7f   : > { %6081 = dma.hbm_to_vmem [thread:$0]  (!%p6893_p12), %s8082_s5, 2048, %s671_s7, [#allocation3], %s6690_s9, %s6690_s9, %s6691_s28  }
  0x80   : > { %s6692_s3 = smov [#allocation7]   ;;  %s6693_s6 = smov [#allocation10]  }
  0x81   : > { %s702_s2 = sshll.u32 %s6692_s3, 4  ;;  %s734_s0 = sshll.u32 %s6693_s6, 4  ;;  %s703_s2 = int_to_ptr.vmem [resolvable:$true] %s702_s2  ;;  %s735_s0 = int_to_ptr.vmem [resolvable:$true] %s734_s0 }
  0x82   : > { %s6521_s1 = scalar_lea.hbm %s8012_s14, 2048 }
  0x83   : > { %p6522_p5 = scmp.ne.s32.totalorder %s8012_s14, %s6521_s1  ;;  %p6528_p3 = scmp.lt.u32.totalorder %s6521_s1, %s8012_s14 }
  0x85   : > { %p6524_p10 = pnand %p6522_p5, %p6909_p0 }
  0x87   : > { %p6525_p2 = pneg %p6524_p10 }
  0x89   : > { %p6530_p4 = pnand %p6528_p3, %p6525_p2 }
  0x8b   : > { %6533 = shalt.err (!%p6530_p4)
}
  0x8c   : > { %s6534_s7 = scalar_lea.vmem %s703_s2, 2048  ;;  %p6542_p13 = scmp.lt.s32.totalorder %s703_s2, %s703_s2 }
  0x8d   : > { %p6535_p7 = scmp.ne.s32.totalorder %s703_s2, %s6534_s7  ;;  %p6543_p1 = scmp.lt.s32.totalorder %s6534_s7, %s6534_s7 }
  0x8f   : > { %p6537_p8 = pnand %p6535_p7, %p6909_p0  ;;  %p6544_p6 = por %p6543_p1, %p6542_p13 }
  0x91   : > { %p6538_p11 = pneg %p6537_p8 }
  0x93   : > { %p6545_p9 = pnand %p6544_p6, %p6538_p11 }
  0x95   : > { %6548 = shalt.err (!%p6545_p9)
}
  0x96   : > { %6087 = dma.hbm_to_vmem [thread:$0]  (!%p6893_p12), %s8012_s14, 2048, %s703_s2, [#allocation6], %s6690_s9, %s6690_s9, %s6691_s28  }
  0x97   : > { %s6549_s25 = scalar_lea.hbm %s8016_s18, 2048 }
  0x98   : > { %p6550_p5 = scmp.ne.s32.totalorder %s8016_s18, %s6549_s25  ;;  %p6556_p3 = scmp.lt.u32.totalorder %s6549_s25, %s8016_s18 }
  0x9a   : > { %p6552_p10 = pnand %p6550_p5, %p6909_p0 }
  0x9c   : > { %p6553_p2 = pneg %p6552_p10 }
  0x9e   : > { %p6558_p4 = pnand %p6556_p3, %p6553_p2 }
  0xa0   : > { %6561 = shalt.err (!%p6558_p4)
}
  0xa1   : > { %s6562_s1 = scalar_lea.vmem %s735_s0, 2048  ;;  %p6570_p13 = scmp.lt.s32.totalorder %s735_s0, %s735_s0 }
  0xa2   : > { %p6563_p7 = scmp.ne.s32.totalorder %s735_s0, %s6562_s1  ;;  %p6571_p1 = scmp.lt.s32.totalorder %s6562_s1, %s6562_s1 }
  0xa4   : > { %p6565_p8 = pnand %p6563_p7, %p6909_p0  ;;  %p6572_p6 = por %p6571_p1, %p6570_p13 }
  0xa6   : > { %p6566_p11 = pneg %p6565_p8 }
  0xa8   : > { %p6573_p9 = pnand %p6572_p6, %p6566_p11 }
  0xaa   : > { %6576 = shalt.err (!%p6573_p9)
}
  0xab   : > { %6093 = dma.hbm_to_vmem [thread:$0]  (!%p6893_p12), %s8016_s18, 2048, %s735_s0, [#allocation9], %s6690_s9, %s6690_s9, %s6691_s28  }
  0xac   : > { %s6694_s7 = smov [#allocation11]   ;;  %s6577_s29 = scalar_lea.hbm %s8018_s20, 2048 }
  0xad   : > { %s750_s11 = sshll.u32 %s6694_s7, 4  ;;  %p6578_p5 = scmp.ne.s32.totalorder %s8018_s20, %s6577_s29  ;;  %s751_s11 = int_to_ptr.vmem [resolvable:$true] %s750_s11 }
  0xae   : > { %p6584_p3 = scmp.lt.u32.totalorder %s6577_s29, %s8018_s20 }
  0xaf   : > { %p6580_p10 = pnand %p6578_p5, %p6909_p0 }
  0xb1   : > { %p6581_p2 = pneg %p6580_p10 }
  0xb3   : > { %p6586_p4 = pnand %p6584_p3, %p6581_p2 }
  0xb5   : > { %6589 = shalt.err (!%p6586_p4)
}
  0xb6   : > { %s6590_s0 = scalar_lea.vmem %s751_s11, 2048  ;;  %p6598_p13 = scmp.lt.s32.totalorder %s751_s11, %s751_s11 }
  0xb7   : > { %p6591_p7 = scmp.ne.s32.totalorder %s751_s11, %s6590_s0  ;;  %p6599_p1 = scmp.lt.s32.totalorder %s6590_s0, %s6590_s0 }
  0xb9   : > { %p6593_p8 = pnand %p6591_p7, %p6909_p0  ;;  %p6600_p6 = por %p6599_p1, %p6598_p13 }
  0xbb   : > { %p6594_p11 = pneg %p6593_p8 }
  0xbd   : > { %p6601_p9 = pnand %p6600_p6, %p6594_p11 }
  0xbf   : > { %6604 = shalt.err (!%p6601_p9)
}
  0xc0   : > { %6096 = dma.hbm_to_vmem [thread:$0]  (!%p6893_p12), %s8018_s20, 2048, %s751_s11, [#allocation12], %s6690_s9, %s6690_s9, %s6691_s28  }
  0xc1   : > { %p8083_p5 = scmp.ne.s32.totalorder %s8077_s10, 0 }
  0xc2   : > { %p8084_p0 = scmp.eq.s32.totalorder (!%p8083_p5), %s6855_s8, 0 }
  0xc3   : > { %808 = sbr.rel (%p8083_p5) target bundleno = 8117 (0x1fb5), region = 124 }
  0xca   : > { %6650 = dma.done.wait (%p8084_p0), [#allocation3], 2048   ;;  %p8085_p10 = pmov %p8084_p0 }
  0xcb   : > { %p8086_p2 = pmov %p8084_p0 }
  0xcc   : > { %6652 = vsyncadd (%p8085_p10), [#allocation3], 4294965248 }
  0xcd   : > { %6654 = dma.done.wait (%p8086_p2), [#allocation6], 2080   ;;  %p8087_p3 = pmov %p8084_p0 }
  0xce   : > { %p8088_p4 = pmov %p8084_p0 }
  0xcf   : > { %6656 = vsyncadd (%p8087_p3), [#allocation6], 4294965216 }
  0xd0   : > { %6658 = dma.done.wait (%p8088_p4), [#allocation9], 2080   ;;  %p8089_p12 = pmov %p8084_p0 }
  0xd1   : > { %p8090_p7 = pmov %p8084_p0 }
  0xd2   : > { %6660 = vsyncadd (%p8089_p12), [#allocation9], 4294965216 }
  0xd3   : > { %6662 = dma.done.wait (%p8090_p7), [#allocation12], 2048   ;;  %p8091_p8 = pmov %p8084_p0 }
  0xd4   : > { %v6695_v0 = vmov 0   ;;  %v6696_v1 = vmov 0.0   ;;  %s8092_s4 = sld [smem:[#allocation31_spill]]  ;;  %p908_p11 = scmp.lt.s32.totalorder %s6855_s8, 1  ;;  %vm6697_vm0 = vmmov 0   ;;  %v924_v30 = vlaneseq }
  0xd5   : > { %6664 = vsyncadd (%p8091_p8), [#allocation12], 4294965248  ;;  %1171 = vmatprep.mubr.bf16.mxu0 %v6695_v0  ;;  %5552 = vmatprep.subr.bf16.mxu1 %v6696_v1  ;;  %s8093_s15 = sld [smem:[#allocation27_spill]]  ;;  %s8094_s7 = sld [smem:[#allocation29_spill]]  ;;  %vm1470_vm12 = vcmask 1043456  }
  0xd6   : > { %6159 = vset.pattern.permute.xlu0 %v6695_v0  ;;  %s7082_s30 = scalar_select %p908_p11, %s6855_s8, 1  ;;  %5568 = vmatprep.mubr.msk.bf16.mxu1 %vm6697_vm0, %v6696_v1  ;;  %v7166_v31 = vshrl.u32 %v924_v30, 7  ;;  %v7177_v35 = vand.u32 127, %v924_v30 }
  0xd7   : > { %s8095_s29 = sld [smem:[#allocation32_spill]]  ;;  %s8098_s3 = sld [smem:[#allocation33_spill]] }
  0xd8   : > { %s5077_s28 = sshll.u32 %s7082_s30, 3  ;;  %v7169_v32 = vsub.s32 1, %v7166_v31  ;;  %v7175_v34 = vsub.s32 0, %v7166_v31  ;;  %vm927_vm2 = vcmp.lt.s32.totalorder %v7177_v35, 8  ;;  %vm931_vm3 = vcmp.ge.s32.totalorder %v7177_v35, 8  ;;  %s8100_s27 = sld [smem:[#allocation34_spill]] }
  0xd9   : > { %v7183_v45 = vsel %vm927_vm2, 1.0, %v6696_v1  ;;  %vm932_vm4 = vcmp.lt.s32.totalorder %v7177_v35, 16  ;;  %vm936_vm6 = vcmp.ge.s32.totalorder %v7177_v35, 16  ;;  %vm937_vm7 = vcmp.lt.s32.totalorder %v7177_v35, 24  ;;  %s5078_s24 = sshll.u32 %s7082_s30, 2  ;;  %s8105_s10 = sld [smem:[#allocation36_spill]] }
  0xda   : > { %v6160_v2 = vld [vmem:[%s8092_s4 + $0x4] ss:$12 sps:$4 sm:$0xff]   ;;  %v6162_v3 = vld [vmem:[%s8092_s4] ss:$12 sps:$4 sm:$0xff]   ;;  %v6163_v4 = vld [vmem:[%s8092_s4 + $0x1c] ss:$12 sps:$4 sm:$0xff]   ;;  %vm952_vm13 = vcmp.le.s32.totalorder %v7177_v35, %v7166_v31 }
  0xdb   : > { %1139 = vmatprep.subr.bf16.mxu0 %v6160_v2  ;;  %v6165_v5 = vld [vmem:[%s8092_s4 + $0x18] ss:$12 sps:$4 sm:$0xff]   ;;  %v6166_v6 = vld [vmem:[%s8092_s4 + $0x34] ss:$12 sps:$4 sm:$0xff]   ;;  %v6168_v7 = vld [vmem:[%s8092_s4 + $0x30] ss:$12 sps:$4 sm:$0xff]   ;;  %s911_s23 = scalar_lea.vmem %s8093_s15, %s5077_s28  ;;  %s919_s11 = scalar_lea.vmem %s8094_s7, %s5077_s28 }
  0xdc   : > { %1140 = vmatpush1.bf16.msra.mxu0 %v6162_v3  ;;  %v6169_v8 = vld [vmem:[%s8092_s4 + $0x4c] ss:$12 sps:$4 sm:$0xff]   ;;  %v6171_v9 = vld [vmem:[%s8092_s4 + $0x48] ss:$12 sps:$4 sm:$0xff]   ;;  %v6172_v10 = vld [vmem:[%s8092_s4 + $0x64] ss:$12 sps:$4 sm:$0xff]  }
  0xdd   : > { %1141 = vmatprep.subr.bf16.mxu0 %v6163_v4  ;;  %v6184_v11 = vld [vmem:[%s8092_s4 + $0x8] ss:$12 sps:$4 sm:$0xff]   ;;  %v6185_v12 = vld [vmem:[%s8092_s4 + $0x20] ss:$12 sps:$4 sm:$0xff]   ;;  %v6177_v15 = vld [vmem:[%s8092_s4 + $0x78] ss:$12 sps:$4 sm:$0xff]   ;;  %s8099_s6 = smov %s8098_s3 }
  0xde   : > { %5553 = vmatpush3.bf16.msra.mxu1 %v6184_v11  ;;  %v6174_v13 = vld [vmem:[%s8092_s4 + $0x60] ss:$12 sps:$4 sm:$0xff]   ;;  %v6175_v14 = vld [vmem:[%s8092_s4 + $0x7c] ss:$12 sps:$4 sm:$0xff]   ;;  %v6186_v16 = vld [vmem:[%s8092_s4 + $0x38] ss:$12 sps:$4 sm:$0xff]   ;;  %s8101_s1 = smov %s8100_s27 }
  0xdf   : > { %5554 = vmatprep.subr.bf16.mxu1 %v6696_v1  ;;  %v6178_v17 = vld [vmem:[%s8092_s4 + $0x94] ss:$12 sps:$4 sm:$0xff]   ;;  %v6187_v18 = vld [vmem:[%s8092_s4 + $0x50] ss:$12 sps:$4 sm:$0xff]   ;;  %v6181_v20 = vld [vmem:[%s8092_s4 + $0xac] ss:$12 sps:$4 sm:$0xff]  }
  0xe0   : > { %1142 = vmatpush1.bf16.msra.mxu0 %v6165_v5  ;;  %v6180_v19 = vld [vmem:[%s8092_s4 + $0x90] ss:$12 sps:$4 sm:$0xff]   ;;  %v6188_v21 = vld [vmem:[%s8092_s4 + $0x68] ss:$12 sps:$4 sm:$0xff]   ;;  %v7135_v23 = vld [vmem:[%s911_s23] sm:$0xff]  ;;  %vm941_vm9 = vcmp.ge.s32.totalorder %v7177_v35, 24 }
  0xe1   : > { %1143 = vmatprep.subr.bf16.mxu0 %v6166_v6  ;;  %v6183_v22 = vld [vmem:[%s8092_s4 + $0xa8] ss:$12 sps:$4 sm:$0xff]   ;;  %v6189_v24 = vld [vmem:[%s8092_s4 + $0x80] ss:$12 sps:$4 sm:$0xff]   ;;  %v961_v25 = vpack.c.bf16 %v7135_v23, %v7135_v23  ;;  %v6190_v26 = vld [vmem:[%s8092_s4 + $0x98] ss:$12 sps:$4 sm:$0xff]  }
  0xe2   : > { %5555 = vmatpush3.bf16.msra.mxu1 %v6185_v12  ;;  %v6191_v27 = vld [vmem:[%s8092_s4 + $0xb0] ss:$12 sps:$4 sm:$0xff]   ;;  %v948_v28 = vld [vmem:[%s919_s11] sm:$0xff]  ;;  %vm933_vm5 = vmand %vm931_vm3, %vm932_vm4  ;;  %vm942_vm10 = vcmp.lt.s32.totalorder %v7177_v35, 32  ;;  %v1006_v57 = vsub.s32 2, %v7166_v31  ;;  %s8102_s15 = sld [smem:[#allocation28_spill]] }
  0xe3   : > { %5556 = vmatprep.subr.bf16.mxu1 %v6696_v1  ;;  %vm949_vm1 = vcmp.gt.f32.partialorder %v948_v28, 0.5  ;;  %v994_v33 = vld [vmem:[%s8095_s29] sm:$0x7]  ;;  %v7190_v48 = vsel %vm933_vm5, 1.0, %v6696_v1  ;;  %vm938_vm8 = vmand %vm936_vm6, %vm937_vm7  ;;  %v6221_v35 = vld [vmem:[#allocation2 + $0x18] sm:$0xff]   ;;  %s8106_s11 = sld [smem:[#allocation30_spill]] }
  0xe4   : > { %1144 = vmatpush1.bf16.msra.mxu0 %v6168_v7  ;;  %v953_v29 = vsel %vm949_vm1, 1, %v6695_v0  ;;  %v1003_v36 = vrot.slane %v994_v33, %v7169_v32  ;;  %v999_v37 = vrot.slane %v994_v33, %v7175_v34  ;;  %v7199_v51 = vsel %vm938_vm8, 1.0, %v6696_v1  ;;  %vm943_vm11 = vmand %vm941_vm9, %vm942_vm10  ;;  %s8110_s28 = sld [smem:[#allocation41_spill]]  ;;  %s8112_s9 = sld [smem:[#allocation20_spill]] }
  0xe5   : > { %1145 = vmatprep.subr.bf16.mxu0 %v6169_v8  ;;  %955 = vperm.xlu0 %6159, %v953_v29   ;;  %v7210_v54 = vsel %vm943_vm11, 1.0, %v6696_v1  ;;  %v1007_v58 = vrot.slane %v994_v33, %v1006_v57  ;;  %vm1416_vm1 = vcmask 64512   ;;  %s8114_s26 = sld [smem:[#allocation25_spill]] }
  0xe6   : > { %5557 = vmatpush3.bf16.msra.mxu1 %v6186_v16 }
  0xe7   : > { %5558 = vmatprep.subr.bf16.mxu1 %v6696_v1 }
  0xe8   : > { %1146 = vmatpush1.bf16.msra.mxu0 %v6171_v9  ;;  %s7377_s23 = scalar_lea.vmem %s8102_s15, %s5078_s24 }
  0xe9   : > { %1147 = vmatprep.subr.bf16.mxu0 %v6172_v10  ;;  %s922_s15 = scalar_lea.vmem %s8106_s11, %s7082_s30  ;;  %s8109_s30 = sld [smem:[#allocation40_spill]] }
  0xea   : > { %5559 = vmatpush3.bf16.msra.mxu1 %v6187_v18  ;;  %s8111_s25 = smov %s8110_s28  ;;  %s8115_s11 = sld [smem:[#allocation43_spill]] }
  0xeb   : > { %5560 = vmatprep.subr.bf16.mxu1 %v6696_v1  ;;  %p8116_p1 = scmp.ne.s32.totalorder %s8114_s26, 0 }
  0xec   : > { %1148 = vmatpush1.bf16.msra.mxu0 %v6174_v13 }
  0xed   : > { %1149 = vmatprep.subr.bf16.mxu0 %v6175_v14 }
  0xee   : > { %5561 = vmatpush3.bf16.msra.mxu1 %v6188_v21 }
  0xef   : > { %5562 = vmatprep.subr.bf16.mxu1 %v6696_v1 }
  0xf0   : > { %1150 = vmatpush1.bf16.msra.mxu0 %v6177_v15 }
  0xf1   : > { %1151 = vmatprep.subr.bf16.mxu0 %v6178_v17 }
  0xf2   : > { %5563 = vmatpush3.bf16.msra.mxu1 %v6189_v24 }
  0xf3   : > { %5564 = vmatprep.subr.bf16.mxu1 %v6696_v1 }
  0xf4   : > { %1152 = vmatpush1.bf16.msra.mxu0 %v6180_v19 }
  0xf5   : > { %1153 = vmatprep.subr.bf16.mxu0 %v6181_v20 }
  0xf6   : > { %5565 = vmatpush3.bf16.msra.mxu1 %v6190_v26 }
  0xf7   : > { %5566 = vmatprep.subr.bf16.mxu1 %v6696_v1 }
  0xf8   : > { %1154 = vmatpush1.bf16.msra.mxu0 %v6183_v22 }
  0xf9   : > { %5596 = vmatprep.subr.bf16.mxu0 %v6696_v1 }
  0xfa   : > { %5567 = vmatpush3.bf16.msra.mxu1 %v6191_v27 }
  0xfb   : > { %1172 = vmatmul.mubr.bf16.vlgmr.msra.gmra.mrb[0].mxu0 %v961_v25  ;;  %5572 = vmatprep.subr.bf16.mxu1 %v6696_v1 }
  0xfc   : > { %5598 = vmatprep.mubr.msk.bf16.mxu0 %vm6697_vm0, %v6696_v1 }
  0xfd   : > { %5569 = vmatmul.mubr.bf16.vlgmr.msra.gmra.mrb[0].mxu1 %v961_v25 }
  0xfe   : > { %5574 = vmatprep.mubr.msk.bf16.mxu1 %vm6697_vm0, %v6696_v1 }
 0x164   : > { %v956_v5 = vpop.permute.xlu0 %955 }
 0x165   : > { %vm957_vm14 = vcmp.eq.s32.totalorder %v956_v5, 1  ;;  %v6193_v5 = vld [vmem:[%s8099_s6 + $0x8] sm:$0xff]  }
 0x166   : > { %vm7229_vm15 = vmand %vm957_vm14, %vm952_vm13 }
 0x1ce   : > { %v1173_v38 = vpop.f32.mrb[0].mxu0 }
 0x1cf   : > { %v1175_v39 = vpop.f32.mrb[1].mxu0  ;;  %v1174_v42 = vadd.f32 %v1173_v38, %v999_v37 }
 0x1d0   : > { %v1176_v40 = vadd.f32 %v1175_v39, %v1003_v36  ;;  %v1177_v41 = vpop.f32.mrb[2].mxu0  ;;  %v1214_v59 = vpop.f32.mrb[0].mxu1 }
 0x1d1   : > { %v1178_v43 = vpop.f32.mrb[3].mxu0  ;;  %v1238_v46 = vmul.f32 %v7183_v45, %v1174_v42  ;;  %v1281_v49 = vmul.f32 %v7190_v48, %v1174_v42  ;;  %v1324_v52 = vmul.f32 %v7199_v51, %v1174_v42  ;;  %v1367_v55 = vmul.f32 %v7210_v54, %v1174_v42  ;;  %v5570_v60 = vpop.f32.mrb[1].mxu1 }
 0x1d2   : > { %v1237_v44 = vpack.c.bf16 %v1176_v40, %v1176_v40  ;;  %v7221_v61 = vadd.f32 %v1214_v59, %v1007_v58  ;;  %v1217_v62 = vpop.f32.mrb[2].mxu1 }
 0x1d3   : > { %v1239_v47 = vpack.c.bf16 %v1238_v46, %v1238_v46  ;;  %v1282_v50 = vpack.c.bf16 %v1281_v49, %v1281_v49  ;;  %v1325_v53 = vpack.c.bf16 %v1324_v52, %v1324_v52  ;;  %v1368_v56 = vpack.c.bf16 %v1367_v55, %v1367_v55  ;;  %v5571_v63 = vpop.f32.mrb[3].mxu1 }
 0x1d4   : > { %5573 = vmatpush3.bf16.xpose.msra.mxu1 %v1237_v44  ;;  %v1464_v2 = vmul.f32 %v7190_v48, %v7221_v61 }
 0x1d5   : > { %5578 = vmatprep.subr.bf16.mxu1 %v6696_v1 }
 0x1d6   : > { %v1465_v3 = vpack.c.bf16 %v1464_v2, %v1464_v2 }
 0x1d8   : > { %v1472_v4 = vsel %vm1470_vm12, %v1465_v3, 0 }
 0x1d9   : > { %5597 = vmatpush3.bf16.msra.mxu0 %v1472_v4  ;;  %v6192_v4 = vld [vmem:[%s8098_s3] sm:$0xff]   ;;  %s8103_s3 = sld [smem:[#allocation35_spill]] }
 0x1da   : > { %5602 = vmatprep.subr.bf16.mxu0 %v6696_v1 }
 0x1db   : > { %5575 = vmatmul.mubr.bf16.vlgmr.msra.gmra.mrb[4].mxu1 %v1239_v47 }
 0x1dc   : > { %5579 = vmatpush3.bf16.xpose.msra.mxu1 %v1237_v44  ;;  %5580 = vmatprep.mubr.msk.bf16.mxu1 %vm6697_vm0, %v6696_v1 }
 0x1dd   : > { %5584 = vmatprep.subr.bf16.mxu1 %v6696_v1 }
 0x1df   : > { %s8104_s0 = smov %s8103_s3 }
 0x1e3   : > { %5581 = vmatmul.mubr.bf16.vlgmr.msra.gmra.mrb[8].mxu1 %v1282_v50 }
 0x1e4   : > { %5585 = vmatpush3.bf16.xpose.msra.mxu1 %v1237_v44  ;;  %5586 = vmatprep.mubr.msk.bf16.mxu1 %vm6697_vm0, %v6696_v1 }
 0x1e5   : > { %5590 = vmatprep.subr.bf16.mxu1 %v6696_v1 }
 0x1eb   : > { %5587 = vmatmul.mubr.bf16.vlgmr.msra.gmra.mrb[12].mxu1 %v1325_v53 }
 0x1ec   : > { %5591 = vmatpush3.bf16.xpose.msra.mxu1 %v1237_v44  ;;  %5592 = vmatprep.mubr.msk.bf16.mxu1 %vm6697_vm0, %v6696_v1 }
 0x1ed   : > { %5620 = vmatprep.subr.bf16.mxu1 %v6696_v1 }
 0x1f3   : > { %5593 = vmatmul.mubr.bf16.vlgmr.msra.gmra.mrb[16].mxu1 %v1368_v56 }
 0x1f4   : > { %5636 = vmatprep.mubr.msk.bf16.mxu1 %vm6697_vm0, %v6696_v1  ;;  %5621 = vmatpush3.bf16.msra.mxu1 %v6192_v4  ;;  %v6206_v4 = vld [vmem:[%s8010_s12 + $0x20] ss:$8 sps:$4 sm:$0xff]  }
 0x1f5   : > { %5622 = vmatprep.subr.bf16.mxu1 %v6696_v1 }
 0x1f8   : > { %5623 = vmatpush3.bf16.msra.mxu1 %v6193_v5  ;;  %v6212_v5 = vld [vmem:[%s8010_s12 + $0x34] ss:$8 sps:$4 sm:$0xff]  }
 0x1f9   : > { %5624 = vmatprep.subr.bf16.mxu1 %v6696_v1 }
 0x2ae   : > { %v1274_v7 = vpop.f32.mrb[4].mxu1 }
 0x2af   : > { %v1280_v8 = vmul.f32 0.35355338, %v1274_v7  ;;  %v5576_v9 = vpop.f32.mrb[5].mxu1  ;;  %v6194_v7 = vld [vmem:[%s8099_s6 + $0x10] sm:$0xff]  }
 0x2b0   : > { %v1277_v10 = vpop.f32.mrb[6].mxu1  ;;  %5625 = vmatpush3.bf16.msra.mxu1 %v6194_v7  ;;  %v6196_v9 = vld [vmem:[%s8099_s6 + $0x20] sm:$0xff]   ;;  %v6210_v7 = vld [vmem:[%s8010_s12 + $0x30] ss:$8 sps:$4 sm:$0xff]  }
 0x2b1   : > { %v5577_v11 = vpop.f32.mrb[7].mxu1  ;;  %v1412_v12 = vsel %vm7229_vm15, %v1280_v8, -10000.0  ;;  %v6195_v8 = vld [vmem:[%s8099_s6 + $0x18] sm:$0xff]   ;;  %5626 = vmatprep.subr.bf16.mxu1 %v6696_v1  ;;  %v6197_v10 = vld [vmem:[%s8099_s6 + $0x28] sm:$0xff]  }
 0x2b2   : > { %v1417_v13 = vsel %vm1416_vm1, %v1412_v12, -inf  ;;  %v6198_v11 = vld [vmem:[%s8099_s6 + $0x30] sm:$0xff]  }
 0x2b3   : > { %1418 = vmax.xlane.f32.xlu1 %v1417_v13 }
 0x2b4   : > { %5627 = vmatpush3.bf16.msra.mxu1 %v6195_v8  ;;  %v6216_v8 = vld [vmem:[%s8010_s12 + $0x44] ss:$8 sps:$4 sm:$0xff]  }
 0x2b5   : > { %5628 = vmatprep.subr.bf16.mxu1 %v6696_v1 }
 0x2b6   : > { %v1317_v14 = vpop.f32.mrb[8].mxu1 }
 0x2b7   : > { %v1323_v15 = vmul.f32 0.35355338, %v1317_v14  ;;  %v5582_v16 = vpop.f32.mrb[9].mxu1  ;;  %v1461_v14 = vmul.f32 %v7183_v45, %v7221_v61 }
 0x2b8   : > { %v1320_v17 = vpop.f32.mrb[10].mxu1  ;;  %5629 = vmatpush3.bf16.msra.mxu1 %v6196_v9  ;;  %v6214_v9 = vld [vmem:[%s8010_s12 + $0x40] ss:$8 sps:$4 sm:$0xff]  }
 0x2b9   : > { %v5583_v18 = vpop.f32.mrb[11].mxu1  ;;  %v1413_v19 = vsel %vm7229_vm15, %v1323_v15, -10000.0  ;;  %5630 = vmatprep.subr.bf16.mxu1 %v6696_v1  ;;  %v1462_v17 = vpack.c.bf16 %v1461_v14, %v1461_v14 }
 0x2ba   : > { %v1420_v20 = vsel %vm1416_vm1, %v1413_v19, -inf }
 0x2bb   : > { %1421 = vmax.xlane.f32.xlu0 %v1420_v20 }
 0x2bc   : > { %5631 = vmatpush3.bf16.msra.mxu1 %v6197_v10 }
 0x2bd   : > { %5632 = vmatprep.subr.bf16.mxu1 %v6696_v1 }
 0x2be   : > { %v1360_v21 = vpop.f32.mrb[12].mxu1 }
 0x2bf   : > { %v1366_v22 = vmul.f32 0.35355338, %v1360_v21  ;;  %v5588_v24 = vpop.f32.mrb[13].mxu1 }
 0x2c0   : > { %v1363_v25 = vpop.f32.mrb[14].mxu1  ;;  %5633 = vmatpush3.bf16.msra.mxu1 %v6198_v11 }
 0x2c1   : > { %v5589_v26 = vpop.f32.mrb[15].mxu1  ;;  %v1414_v27 = vsel %vm7229_vm15, %v1366_v22, -10000.0  ;;  %5634 = vmatprep.subr.bf16.mxu1 %v6696_v1  ;;  %v1560_v22 = vmul.f32 %v7199_v51, %v7221_v61 }
 0x2c2   : > { %v1423_v28 = vsel %vm1416_vm1, %v1414_v27, -inf }
 0x2c3   : > { %1424 = vmax.xlane.f32.xlu1 %v1423_v28  ;;  %v1561_v25 = vpack.c.bf16 %v1560_v22, %v1560_v22  ;;  %v6228_v22 = vld [vmem:[%s8010_s12 + $0x74] ss:$8 sps:$4 sm:$0xff]  }
 0x2c6   : > { %v1403_v29 = vpop.f32.mrb[16].mxu1 }
 0x2c7   : > { %v1409_v30 = vmul.f32 0.35355338, %v1403_v29  ;;  %v5594_v33 = vpop.f32.mrb[17].mxu1 }
 0x2c8   : > { %v1406_v36 = vpop.f32.mrb[18].mxu1 }
 0x2c9   : > { %v5595_v37 = vpop.f32.mrb[19].mxu1  ;;  %v1415_v38 = vsel %vm7229_vm15, %v1409_v30, -10000.0  ;;  %v1610_v30 = vmul.f32 %v7210_v54, %v7221_v61  ;;  %v6199_v61 = vld [vmem:[%s8099_s6 + $0x38] sm:$0xff]  }
 0x2ca   : > { %v1426_v39 = vsel %vm1416_vm1, %v1415_v38, -inf  ;;  %5635 = vmatpush3.bf16.msra.mxu1 %v6199_v61 }
 0x2cb   : > { %1427 = vmax.xlane.f32.xlu1 %v1426_v39  ;;  %v1611_v36 = vpack.c.bf16 %v1610_v30, %v1610_v30 }
 0x340   : > { %v1419_v40 = vpop.xlane.xlu1 %1418 }
 0x341   : > { %v1429_v41 = vsub.f32 %v1412_v12, %v1419_v40 }
 0x343   : > { %v1433_v44 = vmul.f32 1.442695, %v1429_v41 }
 0x348   : > { %v1422_v42 = vpop.xlane.xlu0 %1421 }
 0x349   : > { %v1430_v43 = vsub.f32 %v1413_v19, %v1422_v42  ;;  %v1518_v19 = vsel %vm1470_vm12, %v1462_v17, 0  ;;  %v6220_v17 = vld [vmem:[%s8010_s12 + $0x54] ss:$8 sps:$4 sm:$0xff]  }
 0x34b   : > { %v1435_v46 = vmul.f32 1.442695, %v1430_v43 }
 0x34d   : > { %6360 = vpow2.f32 %v1435_v46 }
 0x34e   : > { %6362 = vpow2.f32 %v1433_v44 }
 0x350   : > { %v1425_v47 = vpop.xlane.xlu1 %1424 }
 0x351   : > { %v1431_v49 = vsub.f32 %v1414_v27, %v1425_v47  ;;  %v1567_v27 = vsel %vm1470_vm12, %v1561_v25, 0  ;;  %v6229_v25 = vld [vmem:[#allocation2 + $0x28] sm:$0xff]  }
 0x353   : > { %v1437_v50 = vmul.f32 1.442695, %v1431_v49  ;;  %v5112_v49 = vld [vmem:[%s8100_s27] ss:$0 sm:$0xff]  ;;  %s8113_s27 = sld [smem:[#allocation42_spill]] }
 0x355   : > { %6364 = vpow2.f32 %v1437_v50 }
 0x357   : > { %v6361_v52 = vpop.eup %6360 }
 0x358   : > { %v1428_v53 = vpop.xlane.xlu1 %1427  ;;  %v1444_v55 = vsel %vm1416_vm1, %v6361_v52, 0.0  ;;  %v6363_v56 = vpop.eup %6362 }
 0x359   : > { %v1432_v58 = vsub.f32 %v1415_v38, %v1428_v53  ;;  %1445 = vadd.xlane.f32.xlu1 %v1444_v55  ;;  %v1441_v60 = vsel %vm1416_vm1, %v6363_v56, 0.0  ;;  %v1617_v38 = vsel %vm1470_vm12, %v1611_v36, 0 }
 0x35b   : > { %v1439_v59 = vmul.f32 1.442695, %v1432_v58 }
 0x35d   : > { %6366 = vpow2.f32 %v1439_v59  ;;  %1442 = vadd.xlane.f32.xlu1 %v1441_v60  ;;  %v6200_v59 = vld [vmem:[%s8010_s12] ss:$8 sps:$4 sm:$0xff]   ;;  %v6202_v60 = vld [vmem:[%s8010_s12 + $0x4] ss:$8 sps:$4 sm:$0xff]  }
 0x35e   : > { %2006 = vmatprep.subr.bf16.mxu1 %v6202_v60 }
 0x35f   : > { %v6365_v62 = vpop.eup %6364 }
 0x360   : > { %v1447_v63 = vsel %vm1416_vm1, %v6365_v62, 0.0 }
 0x361   : > { %1448 = vadd.xlane.f32.xlu1 %v1447_v63  ;;  %v6209_v63 = vld [vmem:[#allocation2] sm:$0xff]  }
 0x367   : > { %v7248_v2 = vpop.eup %6366 }
 0x368   : > { %v1450_v3 = vsel %vm1416_vm1, %v7248_v2, 0.0 }
 0x369   : > { %1451 = vadd.xlane.f32.xlu1 %v1450_v3  ;;  %v6213_v3 = vld [vmem:[#allocation2 + $0x8] sm:$0xff]  }
 0x3e6   : > { %v1446_v12 = vpop.xlane.xlu1 %1445 }
 0x3e7   : > { %6368 = vrcp.f32 %v1446_v12  ;;  %v7348_v12 = vsel %vm942_vm10, 1.0, %v6696_v1 }
 0x3ea   : > { %v1443_v13 = vpop.xlane.xlu1 %1442 }
 0x3eb   : > { %6370 = vrcp.f32 %v1443_v13 }
 0x3ee   : > { %v1449_v20 = vpop.xlane.xlu1 %1448 }
 0x3ef   : > { %6372 = vrcp.f32 %v1449_v20  ;;  %v6222_v20 = vld [vmem:[%s8010_s12 + $0x60] ss:$8 sps:$4 sm:$0xff]  }
 0x3f1   : > { %v6369_v15 = vpop.eup %6368 }
 0x3f2   : > { %v1456_v16 = vmul.f32 %v6369_v15, %v6361_v52 }
 0x3f4   : > { %v1466_v18 = vpack.c.bf16 %v1456_v16, %v1456_v16  ;;  %v6217_v16 = vld [vmem:[#allocation2 + $0x10] sm:$0xff]  }
 0x3f5   : > { %v6371_v21 = vpop.eup %6370 }
 0x3f6   : > { %5599 = vmatmul.mubr.msk.bf16.vlgmr.msra.gmra.mrb[4].mxu0 %vm1416_vm1, %v1466_v18  ;;  %v1454_v24 = vmul.f32 %v6371_v21, %v6363_v56  ;;  %v1452_v28 = vpop.xlane.xlu1 %1451  ;;  %v6218_v18 = vld [vmem:[%s8010_s12 + $0x50] ss:$8 sps:$4 sm:$0xff]   ;;  %v6225_v21 = vld [vmem:[#allocation2 + $0x20] sm:$0xff]  }
 0x3f7   : > { %5603 = vmatpush3.bf16.msra.mxu0 %v1518_v19  ;;  %5604 = vmatprep.mubr.msk.bf16.mxu0 %vm6697_vm0, %v6696_v1  ;;  %6374 = vrcp.f32 %v1452_v28  ;;  %v6224_v19 = vld [vmem:[%s8010_s12 + $0x64] ss:$8 sps:$4 sm:$0xff]   ;;  %v6231_v28 = vld [vmem:[#allocation2 + $0x38] sm:$0xff]  }
 0x3f8   : > { %5608 = vmatprep.subr.bf16.mxu0 %v6696_v1  ;;  %v1463_v26 = vpack.c.bf16 %v1454_v24, %v1454_v24  ;;  %v6226_v24 = vld [vmem:[%s8010_s12 + $0x70] ss:$8 sps:$4 sm:$0xff]  }
 0x3f9   : > { %v6373_v29 = vpop.eup %6372 }
 0x3fa   : > { %v1458_v33 = vmul.f32 %v6373_v29, %v6365_v62  ;;  %v6205_v62 = vld [vmem:[%s8010_s12 + $0x14] ss:$8 sps:$4 sm:$0xff]  }
 0x3fc   : > { %v1562_v37 = vpack.c.bf16 %v1458_v33, %v1458_v33 }
 0x401   : > { %v6375_v39 = vpop.eup %6374 }
 0x402   : > { %5605 = vmatmul.mubr.msk.bf16.vlgmr.msra.gmra.mrb[4].mxu0 %vm1416_vm1, %v1463_v26  ;;  %v1460_v40 = vmul.f32 %v6375_v39, %v7248_v2  ;;  %v6208_v2 = vld [vmem:[%s8010_s12 + $0x24] ss:$8 sps:$4 sm:$0xff]   ;;  %v947_v26 = vld [vmem:[%s7377_s23] sm:$0xf] }
 0x403   : > { %5609 = vmatpush3.bf16.msra.mxu0 %v1567_v27  ;;  %5610 = vmatprep.mubr.msk.bf16.mxu0 %vm6697_vm0, %v6696_v1  ;;  %v6230_v27 = vld [vmem:[#allocation2 + $0x30] sm:$0xff]   ;;  %v5123_v39 = vld [vmem:[%s8105_s10] ss:$0 sm:$0xff] }
 0x404   : > { %5614 = vmatprep.subr.bf16.mxu0 %v6696_v1  ;;  %v1612_v41 = vpack.c.bf16 %v1460_v40, %v1460_v40 }
 0x40e   : > { %5611 = vmatmul.mubr.msk.bf16.vlgmr.msra.gmra.mrb[4].mxu0 %vm1416_vm1, %v1562_v37  ;;  %v5122_v37 = vld [vmem:[%s8103_s3] ss:$0 sm:$0xff] }
 0x40f   : > { %5615 = vmatpush3.bf16.msra.mxu0 %v1617_v38  ;;  %5616 = vmatprep.mubr.msk.bf16.mxu0 %vm6697_vm0, %v6696_v1 }
 0x410   : > { %5640 = vmatprep.subr.bf16.mxu0 %v6696_v1 }
 0x41a   : > { %5617 = vmatmul.mubr.msk.bf16.vlgmr.msra.gmra.mrb[4].mxu0 %vm1416_vm1, %v1612_v41 }
 0x41b   : > { %5656 = vmatprep.mubr.msk.bf16.mxu0 %vm6697_vm0, %v6696_v1  ;;  %5641 = vmatpush3.bf16.msra.mxu0 %v6209_v63 }
 0x41c   : > { %5642 = vmatprep.subr.bf16.mxu0 %v6696_v1 }
 0x41f   : > { %5643 = vmatpush3.bf16.msra.mxu0 %v6213_v3 }
 0x420   : > { %5644 = vmatprep.subr.bf16.mxu0 %v6696_v1 }
 0x423   : > { %5645 = vmatpush3.bf16.msra.mxu0 %v6217_v16 }
 0x424   : > { %5646 = vmatprep.subr.bf16.mxu0 %v6696_v1 }
 0x427   : > { %5647 = vmatpush3.bf16.msra.mxu0 %v6221_v35 }
 0x428   : > { %5648 = vmatprep.subr.bf16.mxu0 %v6696_v1 }
 0x42b   : > { %5649 = vmatpush3.bf16.msra.mxu0 %v6225_v21 }
 0x42c   : > { %5650 = vmatprep.subr.bf16.mxu0 %v6696_v1 }
 0x42f   : > { %5651 = vmatpush3.bf16.msra.mxu0 %v6229_v25 }
 0x430   : > { %5652 = vmatprep.subr.bf16.mxu0 %v6696_v1 }
 0x433   : > { %5653 = vmatpush3.bf16.msra.mxu0 %v6230_v27 }
 0x434   : > { %5654 = vmatprep.subr.bf16.mxu0 %v6696_v1 }
 0x437   : > { %5655 = vmatpush3.bf16.msra.mxu0 %v6231_v28 }
 0x438   : > { %5660 = vmatprep.subr.bf16.mxu0 %v6696_v1 }
 0x4ed   : > { %v1653_v42 = vpop.f32.mrb[4].mxu0 }
 0x4ee   : > { %v1660_v43 = vpack.c.bf16 %v1653_v42, %v1653_v42  ;;  %v5618_v44 = vpop.f32.mrb[5].mxu0  ;;  %v1914_v42 = vld [vmem:[%s8011_s13] sm:$0x3] }
 0x4ef   : > { %v1656_v46 = vpop.f32.mrb[6].mxu0 }
 0x4f0   : > { %v5619_v47 = vpop.f32.mrb[7].mxu0  ;;  %5637 = vmatmul.mubr.bf16.vlgmr.msra.gmra.mrb[20].mxu1 %v1660_v43  ;;  %v1919_v43 = vrot.slane %v1914_v42, %v7175_v34 }
 0x4f1   : > { %2038 = vmatprep.mubr.bf16.mxu1 %v6695_v0  ;;  %2007 = vmatpush1.bf16.msra.mxu1 %v6200_v59 }
 0x4f2   : > { %2008 = vmatprep.subr.bf16.mxu1 %v6205_v62 }
 0x5c3   : > { %v1749_v50 = vpop.f32.mrb[20].mxu1 }
 0x5c4   : > { %v1750_v52 = vadd.f32 %v5112_v49, %v1749_v50  ;;  %v5638_v53 = vpop.f32.mrb[21].mxu1 }
 0x5c5   : > { %v1752_v55 = vpop.f32.mrb[22].mxu1  ;;  %v5124_v53 = vld [vmem:[#allocation5] ss:$0 sm:$0xff] }
 0x5c6   : > { %v5639_v56 = vpop.f32.mrb[23].mxu1  ;;  %v1757_v58 = vadd.f32 %v1750_v52, %v7135_v23  ;;  %v6203_v23 = vld [vmem:[%s8010_s12 + $0x10] ss:$8 sps:$4 sm:$0xff]   ;;  %v1923_v55 = vrot.slane %v1914_v42, %v7169_v32 }
 0x5c7   : > { %2009 = vmatpush1.bf16.msra.mxu1 %v6203_v23 }
 0x5c8   : > { %1760 = vadd.xlane.f32.xlu1 %v1757_v58  ;;  %2010 = vmatprep.subr.bf16.mxu1 %v6208_v2 }
 0x5cb   : > { %2011 = vmatpush1.bf16.msra.mxu1 %v6206_v4 }
 0x5cc   : > { %2012 = vmatprep.subr.bf16.mxu1 %v6212_v5 }
 0x5cf   : > { %2013 = vmatpush1.bf16.msra.mxu1 %v6210_v7 }
 0x5d0   : > { %2014 = vmatprep.subr.bf16.mxu1 %v6216_v8 }
 0x5d3   : > { %2015 = vmatpush1.bf16.msra.mxu1 %v6214_v9 }
 0x5d4   : > { %2016 = vmatprep.subr.bf16.mxu1 %v6220_v17 }
 0x5d7   : > { %2017 = vmatpush1.bf16.msra.mxu1 %v6218_v18 }
 0x5d8   : > { %2018 = vmatprep.subr.bf16.mxu1 %v6224_v19 }
 0x5db   : > { %2019 = vmatpush1.bf16.msra.mxu1 %v6222_v20 }
 0x5dc   : > { %2020 = vmatprep.subr.bf16.mxu1 %v6228_v22 }
 0x5df   : > { %2021 = vmatpush1.bf16.msra.mxu1 %v6226_v24 }
 0x5e0   : > { %5666 = vmatprep.subr.bf16.mxu1 %v6696_v1 }
 0x5e2   : > { %2039 = vmatmul.mubr.bf16.vlgmr.msra.gmra.mrb[24].mxu1 %v947_v26 }
 0x5e3   : > { %5668 = vmatprep.mubr.msk.bf16.mxu1 %vm6697_vm0, %v6696_v1 }
 0x655   : > { %v1761_v10 = vpop.xlane.xlu1 %1760 }
 0x656   : > { %v1762_v11 = vmul.f32 0.03125, %v1761_v10 }
 0x658   : > { %v1763_v13 = vsub.f32 %v1757_v58, %v1762_v11 }
 0x65a   : > { %v1764_v14 = vmul.f32 %v7348_v12, %v1763_v13 }
 0x65c   : > { %v1765_v15 = vmul.f32 %v1764_v14, %v1764_v14 }
 0x65e   : > { %1766 = vadd.xlane.f32.xlu1 %v1765_v15 }
 0x6b5   : > { %v2040_v44 = vpop.f32.mrb[24].mxu1 }
 0x6b6   : > { %v2041_v46 = vadd.f32 %v2040_v44, %v1919_v43  ;;  %v2042_v47 = vpop.f32.mrb[25].mxu1 }
 0x6b7   : > { %v2044_v49 = vpop.f32.mrb[26].mxu1  ;;  %v7404_v62 = vadd.f32 %v2042_v47, %v1923_v55 }
 0x6b8   : > { %v2064_v50 = vpack.c.bf16 %v2041_v46, %v2041_v46  ;;  %v2045_v52 = vpop.f32.mrb[27].mxu1 }
 0x6b9   : > { %v2294_v5 = vmul.f32 %v7190_v48, %v7404_v62 }
 0x6ba   : > { %5667 = vmatpush3.bf16.xpose.msra.mxu1 %v2064_v50 }
 0x6bb   : > { %5678 = vmatprep.subr.bf16.mxu1 %v6696_v1  ;;  %v2295_v9 = vpack.c.bf16 %v2294_v5, %v2294_v5 }
 0x6bd   : > { %v2301_v13 = vsel %vm1470_vm12, %v2295_v9, 0 }
 0x6eb   : > { %v1767_v29 = vpop.xlane.xlu1 %1766 }
 0x6ec   : > { %v1768_v30 = vmul.f32 0.03125, %v1767_v29 }
 0x6ee   : > { %v1769_v33 = vadd.f32 1e-12, %v1768_v30 }
 0x6f0   : > { %6376 = vrsqrt.f32 %v1769_v33 }
 0x6fa   : > { %v6377_v36 = vpop.eup %6376 }
 0x6fb   : > { %v1771_v38 = vmul.f32 %v6377_v36, %v1764_v14  ;;  %v959_v14 = vld [vmem:[%s922_s15] sm:$0x1] }
 0x6fc   : > { %vm960_vm2 = vcmp.gt.f32.partialorder %v959_v14, 0.5 }
 0x6fd   : > { %v1778_v40 = vmul.f32 %v5122_v37, %v1771_v38  ;;  %v2237_v15 = vsel %vm960_vm2, 1, %v6695_v0 }
 0x6fe   : > { %v2241_v16 = vrot.slane %v2237_v15, %v7175_v34 }
 0x6ff   : > { %v7391_v41 = vadd.f32 %v5123_v39, %v1778_v40 }
 0x700   : > { %vm7430_vm3 = vcmp.eq.s32.totalorder %v2241_v16, 1  ;;  %v6232_v16 = vld [vmem:[#allocation7] sm:$0xff]  }
 0x701   : > { %v1786_v61 = vpack.c.bf16 %v7391_v41, %v7391_v41 }
 0x703   : > { %5657 = vmatmul.mubr.bf16.vlgmr.msra.gmra.mrb[8].mxu0 %v1786_v61 }
 0x704   : > { %5662 = vmatprep.mubr.msk.bf16.mxu0 %vm6697_vm0, %v6696_v1  ;;  %5661 = vmatpush3.bf16.xpose.msra.mxu0 %v2064_v50 }
 0x705   : > { %5672 = vmatprep.subr.bf16.mxu0 %v6696_v1 }
 0x7d6   : > { %v1892_v56 = vpop.f32.mrb[8].mxu0 }
 0x7d7   : > { %v1893_v58 = vadd.f32 %v5124_v53, %v1892_v56  ;;  %v5658_v59 = vpop.f32.mrb[9].mxu0 }
 0x7d8   : > { %v1895_v60 = vpop.f32.mrb[10].mxu0 }
 0x7d9   : > { %v5659_v63 = vpop.f32.mrb[11].mxu0  ;;  %v2065_v23 = vmul.f32 %v7183_v45, %v1893_v58  ;;  %v2108_v2 = vmul.f32 %v7190_v48, %v1893_v58  ;;  %v2151_v7 = vmul.f32 %v7199_v51, %v1893_v58  ;;  %v2194_v8 = vmul.f32 %v7210_v54, %v1893_v58 }
 0x7db   : > { %v2066_v3 = vpack.c.bf16 %v2065_v23, %v2065_v23  ;;  %v2109_v4 = vpack.c.bf16 %v2108_v2, %v2108_v2  ;;  %v2152_v10 = vpack.c.bf16 %v2151_v7, %v2151_v7  ;;  %v2195_v11 = vpack.c.bf16 %v2194_v8, %v2194_v8 }
 0x7dd   : > { %5663 = vmatmul.mubr.bf16.vlgmr.msra.gmra.mrb[12].mxu0 %v2066_v3  ;;  %5669 = vmatmul.mubr.bf16.vlgmr.msra.gmra.mrb[28].mxu1 %v2109_v4 }
 0x7de   : > { %5673 = vmatpush3.bf16.xpose.msra.mxu0 %v2064_v50  ;;  %5679 = vmatpush3.bf16.xpose.msra.mxu1 %v2064_v50 }
 0x7df   : > { %5674 = vmatprep.mubr.msk.bf16.mxu0 %vm6697_vm0, %v6696_v1  ;;  %5680 = vmatprep.mubr.msk.bf16.mxu1 %vm6697_vm0, %v6696_v1 }
 0x7e0   : > { %5684 = vmatprep.subr.bf16.mxu0 %v6696_v1  ;;  %5708 = vmatprep.subr.bf16.mxu1 %v6696_v1 }
 0x7e5   : > { %5675 = vmatmul.mubr.bf16.vlgmr.msra.gmra.mrb[16].mxu0 %v2152_v10  ;;  %5681 = vmatmul.mubr.bf16.vlgmr.msra.gmra.mrb[32].mxu1 %v2195_v11 }
 0x7e6   : > { %5685 = vmatpush3.bf16.msra.mxu0 %v2301_v13  ;;  %5686 = vmatprep.mubr.msk.bf16.mxu0 %vm6697_vm0, %v6696_v1 }
 0x7e7   : > { %5690 = vmatprep.subr.bf16.mxu0 %v6696_v1  ;;  %5724 = vmatprep.mubr.msk.bf16.mxu1 %vm6697_vm0, %v6696_v1 }
 0x7e8   : > { %5709 = vmatpush3.bf16.msra.mxu1 %v6232_v16 }
 0x7e9   : > { %5710 = vmatprep.subr.bf16.mxu1 %v6696_v1 }
 0x8b0   : > { %v2101_v17 = vpop.f32.mrb[12].mxu0  ;;  %v2144_v18 = vpop.f32.mrb[28].mxu1 }
 0x8b1   : > { %v2107_v19 = vmul.f32 0.35355338, %v2101_v17  ;;  %v2150_v20 = vmul.f32 0.35355338, %v2144_v18  ;;  %v5664_v21 = vpop.f32.mrb[13].mxu0  ;;  %v5670_v22 = vpop.f32.mrb[29].mxu1 }
 0x8b2   : > { %v2104_v24 = vpop.f32.mrb[14].mxu0  ;;  %v2147_v25 = vpop.f32.mrb[30].mxu1  ;;  %v6233_v17 = vld [vmem:[#allocation7 + $0x8] sm:$0xff]   ;;  %v6234_v18 = vld [vmem:[#allocation7 + $0x10] sm:$0xff]  }
 0x8b3   : > { %v5665_v26 = vpop.f32.mrb[15].mxu0  ;;  %v5671_v27 = vpop.f32.mrb[31].mxu1  ;;  %v2244_v28 = vsel %vm7430_vm3, %v2150_v20, -10000.0  ;;  %v2243_v29 = vsel %vm7430_vm3, %v2107_v19, -10000.0  ;;  %5711 = vmatpush3.bf16.msra.mxu1 %v6233_v17  ;;  %v6235_v19 = vld [vmem:[#allocation7 + $0x18] sm:$0xff]   ;;  %v6236_v20 = vld [vmem:[#allocation7 + $0x20] sm:$0xff]  }
 0x8b4   : > { %v2250_v30 = vsel %vm1416_vm1, %v2244_v28, -inf  ;;  %v2247_v33 = vsel %vm1416_vm1, %v2243_v29, -inf  ;;  %5712 = vmatprep.subr.bf16.mxu1 %v6696_v1  ;;  %v6237_v21 = vld [vmem:[#allocation7 + $0x28] sm:$0xff]   ;;  %v6238_v22 = vld [vmem:[#allocation7 + $0x30] sm:$0xff]   ;;  %v2291_v26 = vmul.f32 %v7183_v45, %v7404_v62 }
 0x8b5   : > { %2251 = vmax.xlane.f32.xlu0 %v2250_v30  ;;  %2248 = vmax.xlane.f32.xlu1 %v2247_v33 }
 0x8b7   : > { %5713 = vmatpush3.bf16.msra.mxu1 %v6234_v18  ;;  %v6242_v18 = vld [vmem:[#allocation10 + $0x10] sm:$0xff]  }
 0x8b8   : > { %v2187_v36 = vpop.f32.mrb[16].mxu0  ;;  %v2230_v37 = vpop.f32.mrb[32].mxu1  ;;  %5714 = vmatprep.subr.bf16.mxu1 %v6696_v1 }
 0x8b9   : > { %v2193_v38 = vmul.f32 0.35355338, %v2187_v36  ;;  %v2236_v39 = vmul.f32 0.35355338, %v2230_v37  ;;  %v5676_v40 = vpop.f32.mrb[17].mxu0  ;;  %v5682_v61 = vpop.f32.mrb[33].mxu1 }
 0x8ba   : > { %v2190_v42 = vpop.f32.mrb[18].mxu0  ;;  %v2233_v43 = vpop.f32.mrb[34].mxu1 }
 0x8bb   : > { %v5677_v44 = vpop.f32.mrb[19].mxu0  ;;  %v5683_v46 = vpop.f32.mrb[35].mxu1  ;;  %v2246_v47 = vsel %vm7430_vm3, %v2236_v39, -10000.0  ;;  %v2245_v49 = vsel %vm7430_vm3, %v2193_v38, -10000.0  ;;  %5715 = vmatpush3.bf16.msra.mxu1 %v6235_v19  ;;  %v2389_v38 = vmul.f32 %v7199_v51, %v7404_v62  ;;  %v6244_v19 = vld [vmem:[#allocation10 + $0x20] sm:$0xff]  }
 0x8bc   : > { %v2256_v50 = vsel %vm1416_vm1, %v2246_v47, -inf  ;;  %v2253_v52 = vsel %vm1416_vm1, %v2245_v49, -inf  ;;  %5716 = vmatprep.subr.bf16.mxu1 %v6696_v1  ;;  %v2439_v46 = vmul.f32 %v7210_v54, %v7404_v62  ;;  %v6239_v62 = vld [vmem:[#allocation7 + $0x38] sm:$0xff]  }
 0x8bd   : > { %2257 = vmax.xlane.f32.xlu1 %v2256_v50  ;;  %2254 = vmax.xlane.f32.xlu0 %v2253_v52  ;;  %v2390_v40 = vpack.c.bf16 %v2389_v38, %v2389_v38  ;;  %v5162_v38 = vld [vmem:[%s8014_s16] ss:$0 sm:$0xff] }
 0x8bf   : > { %5717 = vmatpush3.bf16.msra.mxu1 %v6236_v20  ;;  %v2396_v42 = vsel %vm1470_vm12, %v2390_v40, 0  ;;  %v6245_v20 = vld [vmem:[#allocation10 + $0x28] sm:$0xff]   ;;  %v5163_v40 = vld [vmem:[%s8015_s17] ss:$0 sm:$0xff] }
 0x8c0   : > { %5718 = vmatprep.subr.bf16.mxu1 %v6696_v1 }
 0x8c3   : > { %5719 = vmatpush3.bf16.msra.mxu1 %v6237_v21  ;;  %v6246_v21 = vld [vmem:[#allocation10 + $0x30] sm:$0xff]  }
 0x8c4   : > { %5720 = vmatprep.subr.bf16.mxu1 %v6696_v1 }
 0x8c7   : > { %5721 = vmatpush3.bf16.msra.mxu1 %v6238_v22  ;;  %v6247_v22 = vld [vmem:[#allocation10 + $0x38] sm:$0xff]  }
 0x8c8   : > { %5722 = vmatprep.subr.bf16.mxu1 %v6696_v1 }
 0x8cb   : > { %5723 = vmatpush3.bf16.msra.mxu1 %v6239_v62 }
 0x8cc   : > { %5748 = vmatprep.subr.bf16.mxu1 %v6696_v1 }
 0x942   : > { %v2252_v53 = vpop.xlane.xlu0 %2251  ;;  %v2249_v55 = vpop.xlane.xlu1 %2248 }
 0x943   : > { %v2260_v56 = vsub.f32 %v2244_v28, %v2252_v53  ;;  %v2259_v58 = vsub.f32 %v2243_v29, %v2249_v55  ;;  %v2292_v29 = vpack.c.bf16 %v2291_v26, %v2291_v26  ;;  %v6250_v26 = vld [vmem:[#allocation11 + $0x10] sm:$0xff]  }
 0x945   : > { %v2265_v59 = vmul.f32 1.442695, %v2260_v56  ;;  %v2263_v60 = vmul.f32 1.442695, %v2259_v58  ;;  %v2347_v33 = vsel %vm1470_vm12, %v2292_v29, 0  ;;  %v6253_v29 = vld [vmem:[#allocation11 + $0x28] sm:$0xff]  }
 0x947   : > { %6378 = vpow2.f32 %v2265_v59 }
 0x948   : > { %6380 = vpow2.f32 %v2263_v60 }
 0x94a   : > { %v2258_v63 = vpop.xlane.xlu1 %2257  ;;  %v2255_v23 = vpop.xlane.xlu0 %2254 }
 0x94b   : > { %v2262_v2 = vsub.f32 %v2246_v47, %v2258_v63  ;;  %v2261_v3 = vsub.f32 %v2245_v49, %v2255_v23  ;;  %v2440_v49 = vpack.c.bf16 %v2439_v46, %v2439_v46  ;;  %v6255_v46 = vld [vmem:[#allocation11 + $0x38] sm:$0xff]  }
 0x94d   : > { %v2269_v4 = vmul.f32 1.442695, %v2262_v2  ;;  %v2267_v5 = vmul.f32 1.442695, %v2261_v3  ;;  %v2446_v52 = vsel %vm1470_vm12, %v2440_v49, 0 }
 0x94e   : > { %v5153_v2 = vld [vmem:[#allocation8] ss:$0 sm:$0xff] }
 0x94f   : > { %6382 = vpow2.f32 %v2269_v4 }
 0x950   : > { %6384 = vpow2.f32 %v2267_v5 }
 0x951   : > { %v6379_v7 = vpop.eup %6378 }
 0x952   : > { %v6381_v8 = vpop.eup %6380  ;;  %v2274_v9 = vsel %vm1416_vm1, %v6379_v7, 0.0 }
 0x953   : > { %v2271_v10 = vsel %vm1416_vm1, %v6381_v8, 0.0  ;;  %2275 = vadd.xlane.f32.xlu0 %v2274_v9 }
 0x954   : > { %2272 = vadd.xlane.f32.xlu1 %v2271_v10  ;;  %v6240_v10 = vld [vmem:[#allocation10] sm:$0xff]  }
 0x959   : > { %v7448_v11 = vpop.eup %6382 }
 0x95a   : > { %v6385_v13 = vpop.eup %6384  ;;  %v2280_v14 = vsel %vm1416_vm1, %v7448_v11, 0.0 }
 0x95b   : > { %2281 = vadd.xlane.f32.xlu1 %v2280_v14  ;;  %v2277_v15 = vsel %vm1416_vm1, %v6385_v13, 0.0 }
 0x95c   : > { %2278 = vadd.xlane.f32.xlu0 %v2277_v15 }
 0x9e0   : > { %v2276_v24 = vpop.xlane.xlu0 %2275 }
 0x9e1   : > { %6386 = vrcp.f32 %v2276_v24  ;;  %v2273_v25 = vpop.xlane.xlu1 %2272  ;;  %v6248_v24 = vld [vmem:[#allocation11] sm:$0xff]  }
 0x9e2   : > { %6388 = vrcp.f32 %v2273_v25  ;;  %v6249_v25 = vld [vmem:[#allocation11 + $0x8] sm:$0xff]  }
 0x9e8   : > { %v2282_v43 = vpop.xlane.xlu1 %2281 }
 0x9e9   : > { %v2279_v36 = vpop.xlane.xlu0 %2278 }
 0x9ea   : > { %6390 = vrcp.f32 %v2279_v36 }
 0x9eb   : > { %v6387_v27 = vpop.eup %6386  ;;  %6392 = vrcp.f32 %v2282_v43 }
 0x9ec   : > { %v2286_v28 = vmul.f32 %v6387_v27, %v6379_v7  ;;  %v6389_v37 = vpop.eup %6388  ;;  %v6251_v27 = vld [vmem:[#allocation11 + $0x18] sm:$0xff]  }
 0x9ed   : > { %v2284_v39 = vmul.f32 %v6389_v37, %v6381_v8 }
 0x9ee   : > { %v2296_v30 = vpack.c.bf16 %v2286_v28, %v2286_v28  ;;  %v6252_v28 = vld [vmem:[#allocation11 + $0x20] sm:$0xff]  }
 0x9ef   : > { %v2293_v61 = vpack.c.bf16 %v2284_v39, %v2284_v39 }
 0x9f0   : > { %5687 = vmatmul.mubr.msk.bf16.vlgmr.msra.gmra.mrb[20].mxu0 %vm1416_vm1, %v2296_v30 }
 0x9f1   : > { %5691 = vmatpush3.bf16.msra.mxu0 %v2347_v33  ;;  %5692 = vmatprep.mubr.msk.bf16.mxu0 %vm6697_vm0, %v6696_v1 }
 0x9f2   : > { %5696 = vmatprep.subr.bf16.mxu0 %v6696_v1 }
 0x9f4   : > { %v6391_v44 = vpop.eup %6390 }
 0x9f5   : > { %v2288_v47 = vmul.f32 %v6391_v44, %v6385_v13  ;;  %v6393_v53 = vpop.eup %6392  ;;  %v6254_v44 = vld [vmem:[#allocation11 + $0x30] sm:$0xff]  }
 0x9f6   : > { %v2290_v55 = vmul.f32 %v6393_v53, %v7448_v11  ;;  %v6241_v11 = vld [vmem:[#allocation10 + $0x8] sm:$0xff]  }
 0x9f7   : > { %v2391_v50 = vpack.c.bf16 %v2288_v47, %v2288_v47  ;;  %v5164_v47 = vld [vmem:[%s8017_s19] ss:$0 sm:$0xff] }
 0x9f8   : > { %v2441_v56 = vpack.c.bf16 %v2290_v55, %v2290_v55 }
 0x9fc   : > { %5693 = vmatmul.mubr.msk.bf16.vlgmr.msra.gmra.mrb[20].mxu0 %vm1416_vm1, %v2293_v61 }
 0x9fd   : > { %5697 = vmatpush3.bf16.msra.mxu0 %v2396_v42  ;;  %5698 = vmatprep.mubr.msk.bf16.mxu0 %vm6697_vm0, %v6696_v1 }
 0x9fe   : > { %5702 = vmatprep.subr.bf16.mxu0 %v6696_v1 }
 0xa08   : > { %5699 = vmatmul.mubr.msk.bf16.vlgmr.msra.gmra.mrb[20].mxu0 %vm1416_vm1, %v2391_v50 }
 0xa09   : > { %5703 = vmatpush3.bf16.msra.mxu0 %v2446_v52  ;;  %5704 = vmatprep.mubr.msk.bf16.mxu0 %vm6697_vm0, %v6696_v1 }
 0xa0a   : > { %5728 = vmatprep.subr.bf16.mxu0 %v6696_v1 }
 0xa14   : > { %5705 = vmatmul.mubr.msk.bf16.vlgmr.msra.gmra.mrb[20].mxu0 %vm1416_vm1, %v2441_v56 }
 0xa15   : > { %5744 = vmatprep.mubr.msk.bf16.mxu0 %vm6697_vm0, %v6696_v1  ;;  %5729 = vmatpush3.bf16.msra.mxu0 %v6240_v10  ;;  %v6260_v10 = vld [vmem:[%s8092_s4 + $0xd8] ss:$12 sps:$4 sm:$0xff]  }
 0xa16   : > { %5730 = vmatprep.subr.bf16.mxu0 %v6696_v1 }
 0xa19   : > { %5731 = vmatpush3.bf16.msra.mxu0 %v6241_v11  ;;  %v6266_v11 = vld [vmem:[%s8092_s4 + $0xf4] ss:$12 sps:$4 sm:$0xff]  }
 0xa1a   : > { %5732 = vmatprep.subr.bf16.mxu0 %v6696_v1 }
 0xa1d   : > { %5733 = vmatpush3.bf16.msra.mxu0 %v6242_v18 }
 0xa1e   : > { %5734 = vmatprep.subr.bf16.mxu0 %v6696_v1 }
 0xae7   : > { %v2482_v58 = vpop.f32.mrb[20].mxu0 }
 0xae8   : > { %v2489_v59 = vpack.c.bf16 %v2482_v58, %v2482_v58  ;;  %v5706_v60 = vpop.f32.mrb[21].mxu0  ;;  %v5173_v58 = vld [vmem:[%s8019_s21] ss:$0 sm:$0xff] }
 0xae9   : > { %v2485_v63 = vpop.f32.mrb[22].mxu0 }
 0xaea   : > { %v5707_v23 = vpop.f32.mrb[23].mxu0  ;;  %5725 = vmatmul.mubr.bf16.vlgmr.msra.gmra.mrb[36].mxu1 %v2489_v59 }
 0xaeb   : > { %5764 = vmatprep.mubr.msk.bf16.mxu1 %vm6697_vm0, %v6696_v1  ;;  %5749 = vmatpush3.bf16.msra.mxu1 %v6248_v24  ;;  %v6272_v24 = vld [vmem:[%s8092_s4 + $0x120] ss:$12 sps:$4 sm:$0xff]  }
 0xaec   : > { %5750 = vmatprep.subr.bf16.mxu1 %v6696_v1 }
 0xaef   : > { %5751 = vmatpush3.bf16.msra.mxu1 %v6249_v25  ;;  %v6275_v25 = vld [vmem:[%s8092_s4 + $0x128] ss:$12 sps:$4 sm:$0xff]  }
 0xaf0   : > { %5752 = vmatprep.subr.bf16.mxu1 %v6696_v1 }
 0xaf3   : > { %5753 = vmatpush3.bf16.msra.mxu1 %v6250_v26  ;;  %v6278_v26 = vld [vmem:[%s8092_s4 + $0x13c] ss:$12 sps:$4 sm:$0xff]  }
 0xaf4   : > { %5754 = vmatprep.subr.bf16.mxu1 %v6696_v1 }
 0xaf7   : > { %5755 = vmatpush3.bf16.msra.mxu1 %v6251_v27  ;;  %v6276_v27 = vld [vmem:[%s8092_s4 + $0x138] ss:$12 sps:$4 sm:$0xff]  }
 0xaf8   : > { %5756 = vmatprep.subr.bf16.mxu1 %v6696_v1 }
 0xafb   : > { %5757 = vmatpush3.bf16.msra.mxu1 %v6252_v28  ;;  %v6279_v28 = vld [vmem:[%s8092_s4 + $0x140] ss:$12 sps:$4 sm:$0xff]  }
 0xafc   : > { %5758 = vmatprep.subr.bf16.mxu1 %v6696_v1 }
 0xaff   : > { %5759 = vmatpush3.bf16.msra.mxu1 %v6253_v29  ;;  %v6282_v29 = vld [vmem:[%s8092_s4 + $0x154] ss:$12 sps:$4 sm:$0xff]  }
 0xb00   : > { %5760 = vmatprep.subr.bf16.mxu1 %v6696_v1 }
 0xb03   : > { %5761 = vmatpush3.bf16.msra.mxu1 %v6254_v44 }
 0xb04   : > { %5762 = vmatprep.subr.bf16.mxu1 %v6696_v1 }
 0xb07   : > { %5763 = vmatpush3.bf16.msra.mxu1 %v6255_v46  ;;  %v5183_v46 = vld [vmem:[%s8109_s30] ss:$0 sm:$0xff] }
 0xb08   : > { %5768 = vmatprep.subr.bf16.mxu1 %v6696_v1 }
 0xbbd   : > { %v2578_v3 = vpop.f32.mrb[36].mxu1 }
 0xbbe   : > { %v2579_v4 = vadd.f32 %v5153_v2, %v2578_v3  ;;  %v5726_v5 = vpop.f32.mrb[37].mxu1 }
 0xbbf   : > { %v2581_v7 = vpop.f32.mrb[38].mxu1  ;;  %v6258_v5 = vld [vmem:[%s8092_s4 + $0xc4] ss:$12 sps:$4 sm:$0xff]  }
 0xbc0   : > { %v5727_v8 = vpop.f32.mrb[39].mxu1  ;;  %v2586_v9 = vadd.f32 %v2579_v4, %v7391_v41  ;;  %v6243_v41 = vld [vmem:[#allocation10 + $0x18] sm:$0xff]   ;;  %v6259_v7 = vld [vmem:[%s8092_s4 + $0xc8] ss:$12 sps:$4 sm:$0xff]  }
 0xbc1   : > { %5735 = vmatpush3.bf16.msra.mxu0 %v6243_v41  ;;  %v6256_v4 = vld [vmem:[%s8092_s4 + $0xc0] ss:$12 sps:$4 sm:$0xff]   ;;  %v6262_v8 = vld [vmem:[%s8092_s4 + $0xdc] ss:$12 sps:$4 sm:$0xff]   ;;  %v6267_v41 = vld [vmem:[%s8092_s4 + $0xf8] ss:$12 sps:$4 sm:$0xff]  }
 0xbc2   : > { %2587 = vadd.xlane.f32.xlu0 %v2586_v9  ;;  %5736 = vmatprep.subr.bf16.mxu0 %v6696_v1 }
 0xbc5   : > { %5737 = vmatpush3.bf16.msra.mxu0 %v6244_v19  ;;  %v6270_v19 = vld [vmem:[%s8092_s4 + $0x10c] ss:$12 sps:$4 sm:$0xff]  }
 0xbc6   : > { %5738 = vmatprep.subr.bf16.mxu0 %v6696_v1 }
 0xbc9   : > { %5739 = vmatpush3.bf16.msra.mxu0 %v6245_v20  ;;  %v6268_v20 = vld [vmem:[%s8092_s4 + $0x108] ss:$12 sps:$4 sm:$0xff]  }
 0xbca   : > { %5740 = vmatprep.subr.bf16.mxu0 %v6696_v1 }
 0xbcd   : > { %5741 = vmatpush3.bf16.msra.mxu0 %v6246_v21  ;;  %v6271_v21 = vld [vmem:[%s8092_s4 + $0x110] ss:$12 sps:$4 sm:$0xff]  }
 0xbce   : > { %5742 = vmatprep.subr.bf16.mxu0 %v6696_v1 }
 0xbd1   : > { %5743 = vmatpush3.bf16.msra.mxu0 %v6247_v22  ;;  %v6274_v22 = vld [vmem:[%s8092_s4 + $0x124] ss:$12 sps:$4 sm:$0xff]  }
 0xbd2   : > { %3047 = vmatprep.subr.bf16.mxu0 %v6258_v5 }
 0xc4f   : > { %v2588_v13 = vpop.xlane.xlu0 %2587 }
 0xc50   : > { %v2589_v14 = vmul.f32 0.03125, %v2588_v13  ;;  %v6264_v13 = vld [vmem:[%s8092_s4 + $0xf0] ss:$12 sps:$4 sm:$0xff]  }
 0xc52   : > { %v2590_v15 = vsub.f32 %v2586_v9, %v2589_v14  ;;  %v6263_v9 = vld [vmem:[%s8092_s4 + $0xe0] ss:$12 sps:$4 sm:$0xff]  }
 0xc54   : > { %v2591_v16 = vmul.f32 %v7348_v12, %v2590_v15 }
 0xc56   : > { %v2592_v17 = vmul.f32 %v2591_v16, %v2591_v16 }
 0xc58   : > { %2593 = vadd.xlane.f32.xlu1 %v2592_v17 }
 0xce5   : > { %v2594_v30 = vpop.xlane.xlu1 %2593 }
 0xce6   : > { %v2595_v33 = vmul.f32 0.03125, %v2594_v30  ;;  %v6280_v30 = vld [vmem:[%s8092_s4 + $0x150] ss:$12 sps:$4 sm:$0xff]  }
 0xce8   : > { %v2596_v36 = vadd.f32 1e-12, %v2595_v33  ;;  %v6283_v33 = vld [vmem:[%s8092_s4 + $0x158] ss:$12 sps:$4 sm:$0xff]  }
 0xcea   : > { %6394 = vrsqrt.f32 %v2596_v36  ;;  %v6286_v36 = vld [vmem:[%s8092_s4 + $0x16c] ss:$12 sps:$4 sm:$0xff]  }
 0xcf4   : > { %v6395_v37 = vpop.eup %6394 }
 0xcf5   : > { %v2598_v39 = vmul.f32 %v6395_v37, %v2591_v16  ;;  %v6284_v37 = vld [vmem:[%s8092_s4 + $0x168] ss:$12 sps:$4 sm:$0xff]  }
 0xcf7   : > { %v2605_v61 = vmul.f32 %v5162_v38, %v2598_v39  ;;  %v6287_v38 = vld [vmem:[%s8092_s4 + $0x170] ss:$12 sps:$4 sm:$0xff]  }
 0xcf9   : > { %v2612_v42 = vadd.f32 %v5163_v40, %v2605_v61 }
 0xcfb   : > { %v2613_v43 = vpack.c.bf16 %v2612_v42, %v2612_v42 }
 0xcfd   : > { %5745 = vmatmul.mubr.bf16.vlgmr.msra.gmra.mrb[24].mxu0 %v2613_v43  ;;  %v5182_v43 = vld [vmem:[%s8020_s22] ss:$0 sm:$0xff] }
 0xcfe   : > { %3079 = vmatprep.mubr.bf16.mxu0 %v6695_v0  ;;  %3048 = vmatpush1.bf16.msra.mxu0 %v6256_v4 }
 0xcff   : > { %3049 = vmatprep.subr.bf16.mxu0 %v6262_v8 }
 0xd02   : > { %3050 = vmatpush1.bf16.msra.mxu0 %v6260_v10 }
 0xd03   : > { %3051 = vmatprep.subr.bf16.mxu0 %v6266_v11 }
 0xd06   : > { %3052 = vmatpush1.bf16.msra.mxu0 %v6264_v13 }
 0xd07   : > { %3053 = vmatprep.subr.bf16.mxu0 %v6270_v19 }
 0xd0a   : > { %3054 = vmatpush1.bf16.msra.mxu0 %v6268_v20 }
 0xd0b   : > { %3055 = vmatprep.subr.bf16.mxu0 %v6274_v22 }
 0xd0e   : > { %3056 = vmatpush1.bf16.msra.mxu0 %v6272_v24 }
 0xd0f   : > { %3057 = vmatprep.subr.bf16.mxu0 %v6278_v26 }
 0xd12   : > { %3058 = vmatpush1.bf16.msra.mxu0 %v6276_v27 }
 0xd13   : > { %3059 = vmatprep.subr.bf16.mxu0 %v6282_v29 }
 0xd16   : > { %3060 = vmatpush1.bf16.msra.mxu0 %v6280_v30 }
 0xd17   : > { %3061 = vmatprep.subr.bf16.mxu0 %v6286_v36 }
 0xd1a   : > { %3062 = vmatpush1.bf16.msra.mxu0 %v6284_v37 }
 0xd1b   : > { %5788 = vmatprep.subr.bf16.mxu0 %v6696_v1 }
 0xdd0   : > { %v2719_v49 = vpop.f32.mrb[24].mxu0 }
 0xdd1   : > { %v2720_v50 = vadd.f32 %v5164_v47, %v2719_v49  ;;  %v5746_v52 = vpop.f32.mrb[25].mxu0 }
 0xdd2   : > { %v2722_v53 = vpop.f32.mrb[26].mxu0  ;;  %v5216_v52 = vld [vmem:[%s8095_s29 + $0x3] sm:$0x7] }
 0xdd3   : > { %v2725_v55 = vmax.f32 %v2720_v50, 0.0  ;;  %v5747_v56 = vpop.f32.mrb[27].mxu0  ;;  %v2911_v53 = vrot.slane %v5216_v52, %v7169_v32 }
 0xdd5   : > { %v2726_v62 = vpack.c.bf16 %v2725_v55, %v2725_v55  ;;  %v2907_v55 = vrot.slane %v5216_v52, %v7175_v34 }
 0xdd7   : > { %5765 = vmatmul.mubr.bf16.vlgmr.msra.gmra.mrb[40].mxu1 %v2726_v62 }
 0xdd8   : > { %5784 = vmatprep.mubr.msk.bf16.mxu1 %vm6697_vm0, %v6696_v1  ;;  %5769 = vmatpush3.bf16.msra.mxu1 %v6259_v7  ;;  %v2915_v7 = vrot.slane %v5216_v52, %v1006_v57 }
 0xdd9   : > { %5770 = vmatprep.subr.bf16.mxu1 %v6696_v1 }
 0xddc   : > { %5771 = vmatpush3.bf16.msra.mxu1 %v6263_v9 }
 0xddd   : > { %5772 = vmatprep.subr.bf16.mxu1 %v6696_v1 }
 0xde0   : > { %5773 = vmatpush3.bf16.msra.mxu1 %v6267_v41 }
 0xde1   : > { %5774 = vmatprep.subr.bf16.mxu1 %v6696_v1 }
 0xde4   : > { %5775 = vmatpush3.bf16.msra.mxu1 %v6271_v21 }
 0xde5   : > { %5776 = vmatprep.subr.bf16.mxu1 %v6696_v1 }
 0xde8   : > { %5777 = vmatpush3.bf16.msra.mxu1 %v6275_v25 }
 0xde9   : > { %5778 = vmatprep.subr.bf16.mxu1 %v6696_v1 }
 0xdec   : > { %5779 = vmatpush3.bf16.msra.mxu1 %v6279_v28 }
 0xded   : > { %5780 = vmatprep.subr.bf16.mxu1 %v6696_v1 }
 0xdf0   : > { %5781 = vmatpush3.bf16.msra.mxu1 %v6283_v33 }
 0xdf1   : > { %5782 = vmatprep.subr.bf16.mxu1 %v6696_v1 }
 0xdf4   : > { %5783 = vmatpush3.bf16.msra.mxu1 %v6287_v38 }
 0xdf5   : > { %5794 = vmatprep.subr.bf16.mxu1 %v6696_v1 }
 0xeaa   : > { %v2832_v59 = vpop.f32.mrb[40].mxu1 }
 0xeab   : > { %v2833_v60 = vadd.f32 %v5173_v58, %v2832_v59  ;;  %v5766_v63 = vpop.f32.mrb[41].mxu1 }
 0xeac   : > { %v2835_v23 = vpop.f32.mrb[42].mxu1 }
 0xead   : > { %v5767_v2 = vpop.f32.mrb[43].mxu1  ;;  %v2840_v3 = vadd.f32 %v2833_v60, %v2612_v42 }
 0xeaf   : > { %2841 = vadd.xlane.f32.xlu0 %v2840_v3 }
 0xf3c   : > { %v2842_v14 = vpop.xlane.xlu0 %2841 }
 0xf3d   : > { %v2843_v15 = vmul.f32 0.03125, %v2842_v14 }
 0xf3f   : > { %v2844_v16 = vsub.f32 %v2840_v3, %v2843_v15 }
 0xf41   : > { %v2845_v17 = vmul.f32 %v7348_v12, %v2844_v16 }
 0xf43   : > { %v2846_v18 = vmul.f32 %v2845_v17, %v2845_v17 }
 0xf45   : > { %2847 = vadd.xlane.f32.xlu1 %v2846_v18 }
 0xfd2   : > { %v2848_v39 = vpop.xlane.xlu1 %2847 }
 0xfd3   : > { %v2849_v40 = vmul.f32 0.03125, %v2848_v39 }
 0xfd5   : > { %v2850_v61 = vadd.f32 1e-12, %v2849_v40 }
 0xfd7   : > { %6396 = vrsqrt.f32 %v2850_v61 }
 0xfe1   : > { %v6397_v42 = vpop.eup %6396 }
 0xfe2   : > { %v2852_v44 = vmul.f32 %v6397_v42, %v2845_v17 }
 0xfe4   : > { %v2859_v47 = vmul.f32 %v5182_v43, %v2852_v44 }
 0xfe6   : > { %v7608_v49 = vadd.f32 %v5183_v46, %v2859_v47 }
 0xfe8   : > { %v2867_v50 = vpack.c.bf16 %v7608_v49, %v7608_v49 }
 0xfea   : > { %3080 = vmatmul.mubr.bf16.vlgmr.msra.gmra.mrb[28].mxu0 %v2867_v50  ;;  %5785 = vmatmul.mubr.bf16.vlgmr.msra.gmra.mrb[44].mxu1 %v2867_v50 }
 0xfeb   : > { %5790 = vmatprep.mubr.msk.bf16.mxu0 %vm6697_vm0, %v6696_v1  ;;  %5796 = vmatprep.mubr.msk.bf16.mxu1 %vm6697_vm0, %v6696_v1 }
0x10bd   : > { %v3081_v56 = vpop.f32.mrb[28].mxu0  ;;  %v3122_v62 = vpop.f32.mrb[44].mxu1 }
0x10be   : > { %v3083_v58 = vpop.f32.mrb[29].mxu0  ;;  %v5786_v59 = vpop.f32.mrb[45].mxu1  ;;  %v3082_v2 = vadd.f32 %v3081_v56, %v2907_v55  ;;  %v7627_v10 = vadd.f32 %v3122_v62, %v2915_v7 }
0x10bf   : > { %v3084_v60 = vadd.f32 %v3083_v58, %v2911_v53  ;;  %v3085_v63 = vpop.f32.mrb[30].mxu0  ;;  %v3125_v23 = vpop.f32.mrb[46].mxu1 }
0x10c0   : > { %v3086_v3 = vpop.f32.mrb[31].mxu0  ;;  %v5787_v4 = vpop.f32.mrb[47].mxu1  ;;  %v3148_v8 = vmul.f32 %v7183_v45, %v3082_v2  ;;  %v3191_v9 = vmul.f32 %v7190_v48, %v3082_v2  ;;  %v3371_v31 = vmul.f32 %v7190_v48, %v7627_v10  ;;  %v3234_v57 = vmul.f32 %v7199_v51, %v3082_v2 }
0x10c1   : > { %v3147_v5 = vpack.c.bf16 %v3084_v60, %v3084_v60  ;;  %v3277_v14 = vmul.f32 %v7210_v54, %v3082_v2 }
0x10c2   : > { %v3149_v11 = vpack.c.bf16 %v3148_v8, %v3148_v8  ;;  %v3192_v13 = vpack.c.bf16 %v3191_v9, %v3191_v9  ;;  %v3372_v15 = vpack.c.bf16 %v3371_v31, %v3371_v31  ;;  %v3235_v16 = vpack.c.bf16 %v3234_v57, %v3234_v57 }
0x10c3   : > { %5789 = vmatpush3.bf16.xpose.msra.mxu0 %v3147_v5  ;;  %5795 = vmatpush3.bf16.xpose.msra.mxu1 %v3147_v5  ;;  %v3278_v17 = vpack.c.bf16 %v3277_v14, %v3277_v14 }
0x10c4   : > { %5800 = vmatprep.subr.bf16.mxu0 %v6696_v1  ;;  %5806 = vmatprep.subr.bf16.mxu1 %v6696_v1  ;;  %v3378_v18 = vsel %vm1470_vm12, %v3372_v15, 0  ;;  %v6288_v15 = vld [vmem:[%s8099_s6 + $0x40] sm:$0xff]  }
0x10ca   : > { %5791 = vmatmul.mubr.bf16.vlgmr.msra.gmra.mrb[32].mxu0 %v3149_v11  ;;  %5797 = vmatmul.mubr.bf16.vlgmr.msra.gmra.mrb[48].mxu1 %v3192_v13 }
0x10cb   : > { %5801 = vmatpush3.bf16.xpose.msra.mxu0 %v3147_v5  ;;  %5807 = vmatpush3.bf16.xpose.msra.mxu1 %v3147_v5 }
0x10cc   : > { %5802 = vmatprep.mubr.msk.bf16.mxu0 %vm6697_vm0, %v6696_v1  ;;  %5808 = vmatprep.mubr.msk.bf16.mxu1 %vm6697_vm0, %v6696_v1 }
0x10cd   : > { %5812 = vmatprep.subr.bf16.mxu0 %v6696_v1  ;;  %5836 = vmatprep.subr.bf16.mxu1 %v6696_v1 }
0x10d2   : > { %5803 = vmatmul.mubr.bf16.vlgmr.msra.gmra.mrb[36].mxu0 %v3235_v16  ;;  %5809 = vmatmul.mubr.bf16.vlgmr.msra.gmra.mrb[52].mxu1 %v3278_v17  ;;  %v6289_v16 = vld [vmem:[%s8099_s6 + $0x48] sm:$0xff]   ;;  %v6290_v17 = vld [vmem:[%s8099_s6 + $0x50] sm:$0xff]  }
0x10d3   : > { %5813 = vmatpush3.bf16.msra.mxu0 %v3378_v18  ;;  %5814 = vmatprep.mubr.msk.bf16.mxu0 %vm6697_vm0, %v6696_v1  ;;  %v6291_v18 = vld [vmem:[%s8099_s6 + $0x58] sm:$0xff]  }
0x10d4   : > { %5818 = vmatprep.subr.bf16.mxu0 %v6696_v1  ;;  %5852 = vmatprep.mubr.msk.bf16.mxu1 %vm6697_vm0, %v6696_v1 }
0x10d5   : > { %5837 = vmatpush3.bf16.msra.mxu1 %v6288_v15  ;;  %v6312_v15 = vld [vmem:[%s8010_s12 + $0xc4] ss:$8 sps:$4 sm:$0xff]  }
0x10d6   : > { %5838 = vmatprep.subr.bf16.mxu1 %v6696_v1 }
0x10d9   : > { %5839 = vmatpush3.bf16.msra.mxu1 %v6289_v16  ;;  %v6310_v16 = vld [vmem:[%s8010_s12 + $0xc0] ss:$8 sps:$4 sm:$0xff]  }
0x10da   : > { %5840 = vmatprep.subr.bf16.mxu1 %v6696_v1 }
0x10dd   : > { %5841 = vmatpush3.bf16.msra.mxu1 %v6290_v17 }
0x10de   : > { %5842 = vmatprep.subr.bf16.mxu1 %v6696_v1 }
0x10e1   : > { %5843 = vmatpush3.bf16.msra.mxu1 %v6291_v18 }
0x10e2   : > { %5844 = vmatprep.subr.bf16.mxu1 %v6696_v1 }
0x119d   : > { %v3184_v41 = vpop.f32.mrb[32].mxu0  ;;  %v3227_v19 = vpop.f32.mrb[48].mxu1 }
0x119e   : > { %v3190_v20 = vmul.f32 0.35355338, %v3184_v41  ;;  %v3233_v21 = vmul.f32 0.35355338, %v3227_v19  ;;  %v5792_v22 = vpop.f32.mrb[33].mxu0  ;;  %v5798_v24 = vpop.f32.mrb[49].mxu1 }
0x119f   : > { %v3187_v25 = vpop.f32.mrb[34].mxu0  ;;  %v3230_v26 = vpop.f32.mrb[50].mxu1  ;;  %v6292_v41 = vld [vmem:[%s8099_s6 + $0x60] sm:$0xff]   ;;  %v6293_v19 = vld [vmem:[%s8099_s6 + $0x68] sm:$0xff]   ;;  %v3368_v24 = vmul.f32 %v7183_v45, %v7627_v10 }
0x11a0   : > { %v5793_v27 = vpop.f32.mrb[35].mxu0  ;;  %v5799_v28 = vpop.f32.mrb[51].mxu1  ;;  %v3321_v29 = vsel %vm7229_vm15, %v3233_v21, -10000.0  ;;  %v3320_v30 = vsel %vm7229_vm15, %v3190_v20, -10000.0  ;;  %5845 = vmatpush3.bf16.msra.mxu1 %v6292_v41  ;;  %v6294_v20 = vld [vmem:[%s8099_s6 + $0x70] sm:$0xff]  }
0x11a1   : > { %v3327_v33 = vsel %vm1416_vm1, %v3321_v29, -inf  ;;  %v3324_v36 = vsel %vm1416_vm1, %v3320_v30, -inf  ;;  %5846 = vmatprep.subr.bf16.mxu1 %v6696_v1  ;;  %v3369_v27 = vpack.c.bf16 %v3368_v24, %v3368_v24  ;;  %v6314_v24 = vld [vmem:[%s8010_s12 + $0xd0] ss:$8 sps:$4 sm:$0xff]  }
0x11a2   : > { %3328 = vmax.xlane.f32.xlu0 %v3327_v33  ;;  %3325 = vmax.xlane.f32.xlu1 %v3324_v36  ;;  %v3466_v36 = vmul.f32 %v7199_v51, %v7627_v10 }
0x11a4   : > { %5847 = vmatpush3.bf16.msra.mxu1 %v6293_v19 }
0x11a5   : > { %v3270_v37 = vpop.f32.mrb[36].mxu0  ;;  %v3313_v38 = vpop.f32.mrb[52].mxu1  ;;  %5848 = vmatprep.subr.bf16.mxu1 %v6696_v1 }
0x11a6   : > { %v3276_v39 = vmul.f32 0.35355338, %v3270_v37  ;;  %v3319_v40 = vmul.f32 0.35355338, %v3313_v38  ;;  %v5804_v61 = vpop.f32.mrb[37].mxu0  ;;  %v5810_v42 = vpop.f32.mrb[53].mxu1  ;;  %v3467_v38 = vpack.c.bf16 %v3466_v36, %v3466_v36 }
0x11a7   : > { %v3273_v43 = vpop.f32.mrb[38].mxu0  ;;  %v3316_v44 = vpop.f32.mrb[54].mxu1  ;;  %v6326_v36 = vld [vmem:[#allocation2 + $0x70] sm:$0xff]  }
0x11a8   : > { %v5805_v46 = vpop.f32.mrb[39].mxu0  ;;  %v5811_v47 = vpop.f32.mrb[55].mxu1  ;;  %v3323_v50 = vsel %vm7229_vm15, %v3319_v40, -10000.0  ;;  %v3322_v52 = vsel %vm7229_vm15, %v3276_v39, -10000.0  ;;  %5849 = vmatpush3.bf16.msra.mxu1 %v6294_v20  ;;  %v3473_v40 = vsel %vm1470_vm12, %v3467_v38, 0  ;;  %v3516_v43 = vmul.f32 %v7210_v54, %v7627_v10  ;;  %v6295_v10 = vld [vmem:[%s8099_s6 + $0x78] sm:$0xff]  }
0x11a9   : > { %v3333_v53 = vsel %vm1416_vm1, %v3323_v50, -inf  ;;  %v3330_v55 = vsel %vm1416_vm1, %v3322_v52, -inf  ;;  %5850 = vmatprep.subr.bf16.mxu1 %v6696_v1  ;;  %v6327_v38 = vld [vmem:[#allocation2 + $0x78] sm:$0xff]  }
0x11aa   : > { %3334 = vmax.xlane.f32.xlu1 %v3333_v53  ;;  %3331 = vmax.xlane.f32.xlu0 %v3330_v55  ;;  %v3517_v46 = vpack.c.bf16 %v3516_v43, %v3516_v43  ;;  %v5273_v43 = vld [vmem:[%s8104_s0 + $0x1] ss:$0 sm:$0xff]  ;;  %s5368_s0 = sshll.u32 %s6855_s8, 7 }
0x11ab   : > { %s7956_s4 = scalar_lea.hbm %s8115_s11, %s5368_s0 }
0x11ac   : > { %5851 = vmatpush3.bf16.msra.mxu1 %v6295_v10 }
0x122f   : > { %v3329_v56 = vpop.xlane.xlu0 %3328  ;;  %v3326_v62 = vpop.xlane.xlu1 %3325 }
0x1230   : > { %v3337_v58 = vsub.f32 %v3321_v29, %v3329_v56  ;;  %v3336_v59 = vsub.f32 %v3320_v30, %v3326_v62  ;;  %v3424_v29 = vsel %vm1470_vm12, %v3369_v27, 0  ;;  %v6318_v27 = vld [vmem:[%s8010_s12 + $0xe0] ss:$8 sps:$4 sm:$0xff]  }
0x1232   : > { %v3342_v60 = vmul.f32 1.442695, %v3337_v58  ;;  %v3340_v63 = vmul.f32 1.442695, %v3336_v59 }
0x1234   : > { %6398 = vpow2.f32 %v3342_v60 }
0x1235   : > { %6400 = vpow2.f32 %v3340_v63  ;;  %v5262_v63 = vld [vmem:[%s8101_s1 + $0x1] ss:$0 sm:$0xff] }
0x1237   : > { %v3335_v23 = vpop.xlane.xlu1 %3334  ;;  %v3332_v2 = vpop.xlane.xlu0 %3331 }
0x1238   : > { %v3339_v3 = vsub.f32 %v3323_v50, %v3335_v23  ;;  %v3338_v4 = vsub.f32 %v3322_v52, %v3332_v2  ;;  %v3523_v50 = vsel %vm1470_vm12, %v3517_v46, 0  ;;  %v5274_v46 = vld [vmem:[%s8105_s10 + $0x1] ss:$0 sm:$0xff] }
0x123a   : > { %v3346_v6 = vmul.f32 1.442695, %v3339_v3  ;;  %v3344_v5 = vmul.f32 1.442695, %v3338_v4 }
0x123c   : > { %6402 = vpow2.f32 %v3346_v6 }
0x123d   : > { %6404 = vpow2.f32 %v3344_v5 }
0x123e   : > { %v6399_v7 = vpop.eup %6398 }
0x123f   : > { %v6401_v8 = vpop.eup %6400  ;;  %v3351_v9 = vsel %vm1416_vm1, %v6399_v7, 0.0 }
0x1240   : > { %v3348_v11 = vsel %vm1416_vm1, %v6401_v8, 0.0  ;;  %3352 = vadd.xlane.f32.xlu0 %v3351_v9  ;;  %v6305_v9 = vld [vmem:[#allocation2 + $0x40] sm:$0xff]  }
0x1241   : > { %3349 = vadd.xlane.f32.xlu1 %v3348_v11  ;;  %v6304_v11 = vld [vmem:[%s8010_s12 + $0xa4] ss:$8 sps:$4 sm:$0xff]  }
0x1246   : > { %v7659_v13 = vpop.eup %6402 }
0x1247   : > { %v6405_v31 = vpop.eup %6404  ;;  %v3357_v57 = vsel %vm1416_vm1, %v7659_v13, 0.0 }
0x1248   : > { %3358 = vadd.xlane.f32.xlu1 %v3357_v57  ;;  %v3354_v14 = vsel %vm1416_vm1, %v6405_v31, 0.0  ;;  %v6308_v57 = vld [vmem:[%s8010_s12 + $0xb4] ss:$8 sps:$4 sm:$0xff]  }
0x1249   : > { %3355 = vadd.xlane.f32.xlu0 %v3354_v14  ;;  %v6306_v14 = vld [vmem:[%s8010_s12 + $0xb0] ss:$8 sps:$4 sm:$0xff]  }
0x12cd   : > { %v3353_v21 = vpop.xlane.xlu0 %3352 }
0x12ce   : > { %6406 = vrcp.f32 %v3353_v21  ;;  %v3350_v22 = vpop.xlane.xlu1 %3349  ;;  %v6313_v21 = vld [vmem:[#allocation2 + $0x50] sm:$0xff]  }
0x12cf   : > { %6408 = vrcp.f32 %v3350_v22  ;;  %v6316_v22 = vld [vmem:[%s8010_s12 + $0xd4] ss:$8 sps:$4 sm:$0xff]  }
0x12d5   : > { %v3359_v61 = vpop.xlane.xlu1 %3358 }
0x12d6   : > { %v3356_v30 = vpop.xlane.xlu0 %3355 }
0x12d7   : > { %6410 = vrcp.f32 %v3356_v30  ;;  %v6322_v30 = vld [vmem:[%s8010_s12 + $0xf0] ss:$8 sps:$4 sm:$0xff]  }
0x12d8   : > { %v6407_v25 = vpop.eup %6406  ;;  %6412 = vrcp.f32 %v3359_v61 }
0x12d9   : > { %v3363_v26 = vmul.f32 %v6407_v25, %v6399_v7  ;;  %v6409_v33 = vpop.eup %6408  ;;  %v6296_v7 = vld [vmem:[%s8010_s12 + $0x80] ss:$8 sps:$4 sm:$0xff]   ;;  %v6317_v25 = vld [vmem:[#allocation2 + $0x58] sm:$0xff]  }
0x12da   : > { %v3361_v37 = vmul.f32 %v6409_v33, %v6401_v8  ;;  %v6301_v8 = vld [vmem:[%s8010_s12 + $0x94] ss:$8 sps:$4 sm:$0xff]   ;;  %v6325_v33 = vld [vmem:[#allocation2 + $0x68] sm:$0xff]  }
0x12db   : > { %v3373_v28 = vpack.c.bf16 %v3363_v26, %v3363_v26  ;;  %v6320_v26 = vld [vmem:[%s8010_s12 + $0xe4] ss:$8 sps:$4 sm:$0xff]  }
0x12dc   : > { %v3370_v39 = vpack.c.bf16 %v3361_v37, %v3361_v37  ;;  %v6436_v37 = vld [vmem:[%s7377_s23] sm:$0xf]  ;;  %s905_s23 = sand.u32 1, %s8112_s9  }
0x12dd   : > { %5815 = vmatmul.mubr.msk.bf16.vlgmr.msra.gmra.mrb[40].mxu0 %vm1416_vm1, %v3373_v28  ;;  %v6321_v28 = vld [vmem:[#allocation2 + $0x60] sm:$0xff]   ;;  %s5076_s15 = sshll.u32 %s905_s23, 3  ;;  %s4895_s9 = scalar_lea.sflag [#allocation4], %s905_s23 }
0x12de   : > { %5819 = vmatpush3.bf16.msra.mxu0 %v3424_v29  ;;  %5820 = vmatprep.mubr.msk.bf16.mxu0 %vm6697_vm0, %v6696_v1  ;;  %v6324_v29 = vld [vmem:[%s8010_s12 + $0xf4] ss:$8 sps:$4 sm:$0xff]   ;;  %s907_s1 = scalar_lea.vmem [#allocation13], %s5076_s15  ;;  %s6698_s15 = smov [#allocation13]  }
0x12df   : > { %5824 = vmatprep.subr.bf16.mxu0 %v6696_v1  ;;  %s4908_s2 = sshll.u32 %s907_s1, 4  ;;  %s7958_s2 = int_to_ptr.vmem [resolvable:$true] %s4908_s2 }
0x12e0   : > { %s6605_s8 = scalar_lea.vmem %s7958_s2, 128 }
0x12e1   : > { %v6411_v42 = vpop.eup %6410  ;;  %p6606_p13 = scmp.ne.s32.totalorder %s7958_s2, %s6605_s8 }
0x12e2   : > { %v3365_v44 = vmul.f32 %v6411_v42, %v6405_v31  ;;  %v6413_v52 = vpop.eup %6412  ;;  %v6302_v31 = vld [vmem:[%s8010_s12 + $0xa0] ss:$8 sps:$4 sm:$0xff]  }
0x12e3   : > { %v3367_v53 = vmul.f32 %v6413_v52, %v7659_v13  ;;  %v6309_v13 = vld [vmem:[#allocation2 + $0x48] sm:$0xff]   ;;  %p6607_p6 = pnand %p6606_p13, %p8116_p1 }
0x12e4   : > { %v3468_v47 = vpack.c.bf16 %v3365_v44, %v3365_v44 }
0x12e5   : > { %v3518_v55 = vpack.c.bf16 %v3367_v53, %v3367_v53  ;;  %v5300_v53 = vld [vmem:[%s8011_s13 + $0x2] sm:$0x3]  ;;  %p6608_p9 = pneg %p6607_p6 }
0x12e9   : > { %5821 = vmatmul.mubr.msk.bf16.vlgmr.msra.gmra.mrb[40].mxu0 %vm1416_vm1, %v3370_v39 }
0x12ea   : > { %5825 = vmatpush3.bf16.msra.mxu0 %v3473_v40  ;;  %5826 = vmatprep.mubr.msk.bf16.mxu0 %vm6697_vm0, %v6696_v1 }
0x12eb   : > { %5830 = vmatprep.subr.bf16.mxu0 %v6696_v1 }
0x12f5   : > { %5827 = vmatmul.mubr.msk.bf16.vlgmr.msra.gmra.mrb[40].mxu0 %vm1416_vm1, %v3468_v47 }
0x12f6   : > { %5831 = vmatpush3.bf16.msra.mxu0 %v3523_v50  ;;  %5832 = vmatprep.mubr.msk.bf16.mxu0 %vm6697_vm0, %v6696_v1 }
0x12f7   : > { %5856 = vmatprep.subr.bf16.mxu0 %v6696_v1 }
0x1301   : > { %5833 = vmatmul.mubr.msk.bf16.vlgmr.msra.gmra.mrb[40].mxu0 %vm1416_vm1, %v3518_v55  ;;  %v3829_v55 = vrot.slane %v5300_v53, %v7175_v34 }
0x1302   : > { %5872 = vmatprep.mubr.msk.bf16.mxu0 %vm6697_vm0, %v6696_v1  ;;  %5857 = vmatpush3.bf16.msra.mxu0 %v6305_v9 }
0x1303   : > { %5858 = vmatprep.subr.bf16.mxu0 %v6696_v1 }
0x1306   : > { %5859 = vmatpush3.bf16.msra.mxu0 %v6309_v13 }
0x1307   : > { %5860 = vmatprep.subr.bf16.mxu0 %v6696_v1 }
0x130a   : > { %5861 = vmatpush3.bf16.msra.mxu0 %v6313_v21 }
0x130b   : > { %5862 = vmatprep.subr.bf16.mxu0 %v6696_v1 }
0x130e   : > { %5863 = vmatpush3.bf16.msra.mxu0 %v6317_v25 }
0x130f   : > { %5864 = vmatprep.subr.bf16.mxu0 %v6696_v1 }
0x1312   : > { %5865 = vmatpush3.bf16.msra.mxu0 %v6321_v28 }
0x1313   : > { %5866 = vmatprep.subr.bf16.mxu0 %v6696_v1 }
0x1316   : > { %5867 = vmatpush3.bf16.msra.mxu0 %v6325_v33 }
0x1317   : > { %5868 = vmatprep.subr.bf16.mxu0 %v6696_v1 }
0x131a   : > { %5869 = vmatpush3.bf16.msra.mxu0 %v6326_v36 }
0x131b   : > { %5870 = vmatprep.subr.bf16.mxu0 %v6696_v1 }
0x131e   : > { %5871 = vmatpush3.bf16.msra.mxu0 %v6327_v38 }
0x131f   : > { %5876 = vmatprep.subr.bf16.mxu0 %v6696_v1 }
0x13d4   : > { %v3559_v56 = vpop.f32.mrb[40].mxu0 }
0x13d5   : > { %v3566_v62 = vpack.c.bf16 %v3559_v56, %v3559_v56  ;;  %v5834_v58 = vpop.f32.mrb[41].mxu0 }
0x13d6   : > { %v3562_v59 = vpop.f32.mrb[42].mxu0 }
0x13d7   : > { %v5835_v60 = vpop.f32.mrb[43].mxu0  ;;  %5853 = vmatmul.mubr.bf16.vlgmr.msra.gmra.mrb[56].mxu1 %v3566_v62 }
0x13d8   : > { %3948 = vmatprep.mubr.bf16.mxu1 %v6695_v0  ;;  %v6298_v0 = vld [vmem:[%s8010_s12 + $0x84] ss:$8 sps:$4 sm:$0xff]  }
0x13d9   : > { %3916 = vmatprep.subr.bf16.mxu1 %v6298_v0 }
0x13da   : > { %3917 = vmatpush1.bf16.msra.mxu1 %v6296_v7 }
0x13db   : > { %3918 = vmatprep.subr.bf16.mxu1 %v6301_v8 }
0x14aa   : > { %v3655_v23 = vpop.f32.mrb[56].mxu1 }
0x14ab   : > { %v3656_v2 = vadd.f32 %v5262_v63, %v3655_v23  ;;  %v5854_v3 = vpop.f32.mrb[57].mxu1  ;;  %v5275_v63 = vld [vmem:[#allocation5 + $0x1] ss:$0 sm:$0xff]  ;;  %v3833_v23 = vrot.slane %v5300_v53, %v7169_v32 }
0x14ac   : > { %v3658_v4 = vpop.f32.mrb[58].mxu1 }
0x14ad   : > { %v5855_v6 = vpop.f32.mrb[59].mxu1  ;;  %v3665_v5 = vadd.f32 %v3656_v2, %v7608_v49  ;;  %v6299_v49 = vld [vmem:[%s8010_s12 + $0x90] ss:$8 sps:$4 sm:$0xff]  }
0x14ae   : > { %3919 = vmatpush1.bf16.msra.mxu1 %v6299_v49 }
0x14af   : > { %3666 = vadd.xlane.f32.xlu0 %v3665_v5  ;;  %3920 = vmatprep.subr.bf16.mxu1 %v6304_v11 }
0x14b2   : > { %3921 = vmatpush1.bf16.msra.mxu1 %v6302_v31 }
0x14b3   : > { %3922 = vmatprep.subr.bf16.mxu1 %v6308_v57 }
0x14b6   : > { %3923 = vmatpush1.bf16.msra.mxu1 %v6306_v14 }
0x14b7   : > { %3924 = vmatprep.subr.bf16.mxu1 %v6312_v15 }
0x14ba   : > { %3925 = vmatpush1.bf16.msra.mxu1 %v6310_v16 }
0x14bb   : > { %3926 = vmatprep.subr.bf16.mxu1 %v6316_v22 }
0x14be   : > { %3927 = vmatpush1.bf16.msra.mxu1 %v6314_v24 }
0x14bf   : > { %3928 = vmatprep.subr.bf16.mxu1 %v6320_v26 }
0x14c2   : > { %3929 = vmatpush1.bf16.msra.mxu1 %v6318_v27 }
0x14c3   : > { %3930 = vmatprep.subr.bf16.mxu1 %v6324_v29 }
0x14c6   : > { %3931 = vmatpush1.bf16.msra.mxu1 %v6322_v30 }
0x14c7   : > { %5882 = vmatprep.subr.bf16.mxu1 %v6696_v1 }
0x14c9   : > { %3949 = vmatmul.mubr.bf16.vlgmr.msra.gmra.mrb[60].mxu1 %v6436_v37 }
0x14ca   : > { %5884 = vmatprep.mubr.msk.bf16.mxu1 %vm6697_vm0, %v6696_v1 }
0x153c   : > { %v3667_v17 = vpop.xlane.xlu0 %3666 }
0x153d   : > { %v3668_v18 = vmul.f32 0.03125, %v3667_v17 }
0x153f   : > { %v3669_v41 = vsub.f32 %v3665_v5, %v3668_v18 }
0x1541   : > { %v3670_v19 = vmul.f32 %v7348_v12, %v3669_v41 }
0x1543   : > { %v3671_v20 = vmul.f32 %v3670_v19, %v3670_v19 }
0x1545   : > { %3672 = vadd.xlane.f32.xlu1 %v3671_v20 }
0x159c   : > { %v3950_v10 = vpop.f32.mrb[60].mxu1 }
0x159d   : > { %v3951_v56 = vadd.f32 %v3950_v10, %v3829_v55  ;;  %v3952_v62 = vpop.f32.mrb[61].mxu1 }
0x159e   : > { %v3954_v58 = vpop.f32.mrb[62].mxu1  ;;  %v7805_v34 = vadd.f32 %v3952_v62, %v3833_v23 }
0x159f   : > { %v3976_v59 = vpack.c.bf16 %v3951_v56, %v3951_v56  ;;  %v3955_v60 = vpop.f32.mrb[63].mxu1 }
0x15a0   : > { %v4200_v49 = vmul.f32 %v7190_v48, %v7805_v34 }
0x15a1   : > { %5883 = vmatpush3.bf16.xpose.msra.mxu1 %v3976_v59 }
0x15a2   : > { %5894 = vmatprep.subr.bf16.mxu1 %v6696_v1  ;;  %v4201_v13 = vpack.c.bf16 %v4200_v49, %v4200_v49  ;;  %v6330_v49 = vld [vmem:[#allocation7 + $0x50] sm:$0xff]  }
0x15d2   : > { %v3673_v39 = vpop.xlane.xlu1 %3672 }
0x15d3   : > { %v3674_v40 = vmul.f32 0.03125, %v3673_v39 }
0x15d5   : > { %v3675_v61 = vadd.f32 1e-12, %v3674_v40 }
0x15d7   : > { %6414 = vrsqrt.f32 %v3675_v61 }
0x15e1   : > { %v6415_v42 = vpop.eup %6414 }
0x15e2   : > { %v3677_v44 = vmul.f32 %v6415_v42, %v3670_v19 }
0x15e4   : > { %v3684_v47 = vmul.f32 %v5273_v43, %v3677_v44 }
0x15e6   : > { %v7792_v50 = vadd.f32 %v5274_v46, %v3684_v47 }
0x15e8   : > { %v3692_v52 = vpack.c.bf16 %v7792_v50, %v7792_v50 }
0x15ea   : > { %5873 = vmatmul.mubr.bf16.vlgmr.msra.gmra.mrb[44].mxu0 %v3692_v52 }
0x15eb   : > { %5878 = vmatprep.mubr.msk.bf16.mxu0 %vm6697_vm0, %v6696_v1  ;;  %5877 = vmatpush3.bf16.xpose.msra.mxu0 %v3976_v59 }
0x15ec   : > { %5888 = vmatprep.subr.bf16.mxu0 %v6696_v1 }
0x16bd   : > { %v3800_v2 = vpop.f32.mrb[44].mxu0 }
0x16be   : > { %v3801_v3 = vadd.f32 %v5275_v63, %v3800_v2  ;;  %v5874_v4 = vpop.f32.mrb[45].mxu0 }
0x16bf   : > { %v3803_v6 = vpop.f32.mrb[46].mxu0 }
0x16c0   : > { %v5875_v5 = vpop.f32.mrb[47].mxu0  ;;  %v3977_v7 = vmul.f32 %v7183_v45, %v3801_v3  ;;  %v4020_v0 = vmul.f32 %v7190_v48, %v3801_v3  ;;  %v4063_v32 = vmul.f32 %v7199_v51, %v3801_v3  ;;  %v4106_v11 = vmul.f32 %v7210_v54, %v3801_v3 }
0x16c1   : > { %v4207_v48 = vsel %vm1470_vm12, %v4201_v13, 0  ;;  %v6333_v13 = vld [vmem:[#allocation7 + $0x68] sm:$0xff]  }
0x16c2   : > { %v3978_v8 = vpack.c.bf16 %v3977_v7, %v3977_v7  ;;  %v4021_v9 = vpack.c.bf16 %v4020_v0, %v4020_v0  ;;  %v4064_v31 = vpack.c.bf16 %v4063_v32, %v4063_v32  ;;  %v4107_v57 = vpack.c.bf16 %v4106_v11, %v4106_v11  ;;  %v6331_v32 = vld [vmem:[#allocation7 + $0x58] sm:$0xff]   ;;  %v6332_v11 = vld [vmem:[#allocation7 + $0x60] sm:$0xff]  }
0x16c4   : > { %5879 = vmatmul.mubr.bf16.vlgmr.msra.gmra.mrb[48].mxu0 %v3978_v8  ;;  %5885 = vmatmul.mubr.bf16.vlgmr.msra.gmra.mrb[64].mxu1 %v4021_v9  ;;  %v6328_v8 = vld [vmem:[#allocation7 + $0x40] sm:$0xff]   ;;  %v6329_v9 = vld [vmem:[#allocation7 + $0x48] sm:$0xff]  }
0x16c5   : > { %5889 = vmatpush3.bf16.xpose.msra.mxu0 %v3976_v59  ;;  %5895 = vmatpush3.bf16.xpose.msra.mxu1 %v3976_v59 }
0x16c6   : > { %5890 = vmatprep.mubr.msk.bf16.mxu0 %vm6697_vm0, %v6696_v1  ;;  %5896 = vmatprep.mubr.msk.bf16.mxu1 %vm6697_vm0, %v6696_v1 }
0x16c7   : > { %5900 = vmatprep.subr.bf16.mxu0 %v6696_v1  ;;  %5924 = vmatprep.subr.bf16.mxu1 %v6696_v1 }
0x16cc   : > { %5891 = vmatmul.mubr.bf16.vlgmr.msra.gmra.mrb[52].mxu0 %v4064_v31  ;;  %5897 = vmatmul.mubr.bf16.vlgmr.msra.gmra.mrb[68].mxu1 %v4107_v57  ;;  %v6334_v31 = vld [vmem:[#allocation7 + $0x70] sm:$0xff]  }
0x16cd   : > { %5901 = vmatpush3.bf16.msra.mxu0 %v4207_v48  ;;  %5902 = vmatprep.mubr.msk.bf16.mxu0 %vm6697_vm0, %v6696_v1 }
0x16ce   : > { %5906 = vmatprep.subr.bf16.mxu0 %v6696_v1  ;;  %5940 = vmatprep.mubr.msk.bf16.mxu1 %vm6697_vm0, %v6696_v1 }
0x16cf   : > { %5925 = vmatpush3.bf16.msra.mxu1 %v6328_v8  ;;  %v6348_v8 = vld [vmem:[#allocation11 + $0x60] sm:$0xff]  }
0x16d0   : > { %5926 = vmatprep.subr.bf16.mxu1 %v6696_v1 }
0x16d3   : > { %5927 = vmatpush3.bf16.msra.mxu1 %v6329_v9  ;;  %v6349_v9 = vld [vmem:[#allocation11 + $0x68] sm:$0xff]  }
0x16d4   : > { %5928 = vmatprep.subr.bf16.mxu1 %v6696_v1 }
0x16d7   : > { %5929 = vmatpush3.bf16.msra.mxu1 %v6330_v49 }
0x16d8   : > { %5930 = vmatprep.subr.bf16.mxu1 %v6696_v1 }
0x16db   : > { %5931 = vmatpush3.bf16.msra.mxu1 %v6331_v32 }
0x16dc   : > { %5932 = vmatprep.subr.bf16.mxu1 %v6696_v1 }
0x16df   : > { %5933 = vmatpush3.bf16.msra.mxu1 %v6332_v11 }
0x16e0   : > { %5934 = vmatprep.subr.bf16.mxu1 %v6696_v1 }
0x16e3   : > { %5935 = vmatpush3.bf16.msra.mxu1 %v6333_v13 }
0x16e4   : > { %5936 = vmatprep.subr.bf16.mxu1 %v6696_v1 }
0x16e7   : > { %5937 = vmatpush3.bf16.msra.mxu1 %v6334_v31  ;;  %v5332_v31 = vld [vmem:[%s8014_s16 + $0x1] ss:$0 sm:$0xff] }
0x16e8   : > { %5938 = vmatprep.subr.bf16.mxu1 %v6696_v1 }
0x1797   : > { %v4013_v14 = vpop.f32.mrb[48].mxu0  ;;  %v4056_v15 = vpop.f32.mrb[64].mxu1 }
0x1798   : > { %v4019_v16 = vmul.f32 0.35355338, %v4013_v14  ;;  %v4062_v17 = vmul.f32 0.35355338, %v4056_v15  ;;  %v5880_v18 = vpop.f32.mrb[49].mxu0  ;;  %v5886_v41 = vpop.f32.mrb[65].mxu1  ;;  %v4197_v14 = vmul.f32 %v7183_v45, %v7805_v34  ;;  %v4295_v45 = vmul.f32 %v7199_v51, %v7805_v34 }
0x1799   : > { %v4016_v19 = vpop.f32.mrb[50].mxu0  ;;  %v4059_v20 = vpop.f32.mrb[66].mxu1 }
0x179a   : > { %v5881_v21 = vpop.f32.mrb[51].mxu0  ;;  %v5887_v22 = vpop.f32.mrb[67].mxu1  ;;  %v4150_v24 = vsel %vm7430_vm3, %v4062_v17, -10000.0  ;;  %v4149_v25 = vsel %vm7430_vm3, %v4019_v16, -10000.0  ;;  %v4198_v17 = vpack.c.bf16 %v4197_v14, %v4197_v14 }
0x179b   : > { %v4156_v26 = vsel %vm1416_vm1, %v4150_v24, -inf  ;;  %v4153_v27 = vsel %vm1416_vm1, %v4149_v25, -inf  ;;  %v4296_v22 = vpack.c.bf16 %v4295_v45, %v4295_v45 }
0x179c   : > { %4157 = vmax.xlane.f32.xlu0 %v4156_v26  ;;  %4154 = vmax.xlane.f32.xlu1 %v4153_v27  ;;  %v4253_v41 = vsel %vm1470_vm12, %v4198_v17, 0  ;;  %v6350_v17 = vld [vmem:[#allocation11 + $0x70] sm:$0xff]  }
0x179f   : > { %v4099_v28 = vpop.f32.mrb[52].mxu0  ;;  %v4142_v29 = vpop.f32.mrb[68].mxu1 }
0x17a0   : > { %v4105_v30 = vmul.f32 0.35355338, %v4099_v28  ;;  %v4148_v33 = vmul.f32 0.35355338, %v4142_v29  ;;  %v5892_v36 = vpop.f32.mrb[53].mxu0  ;;  %v5898_v37 = vpop.f32.mrb[69].mxu1  ;;  %v4345_v28 = vmul.f32 %v7210_v54, %v7805_v34 }
0x17a1   : > { %v4102_v38 = vpop.f32.mrb[54].mxu0  ;;  %v4145_v39 = vpop.f32.mrb[70].mxu1  ;;  %v6335_v54 = vld [vmem:[#allocation7 + $0x78] sm:$0xff]  }
0x17a2   : > { %v5893_v40 = vpop.f32.mrb[55].mxu0  ;;  %v5899_v61 = vpop.f32.mrb[71].mxu1  ;;  %v4152_v42 = vsel %vm7430_vm3, %v4148_v33, -10000.0  ;;  %v4151_v43 = vsel %vm7430_vm3, %v4105_v30, -10000.0  ;;  %v4346_v29 = vpack.c.bf16 %v4345_v28, %v4345_v28  ;;  %5939 = vmatpush3.bf16.msra.mxu1 %v6335_v54 }
0x17a3   : > { %v4162_v44 = vsel %vm1416_vm1, %v4152_v42, -inf  ;;  %v4159_v46 = vsel %vm1416_vm1, %v4151_v43, -inf  ;;  %5964 = vmatprep.subr.bf16.mxu1 %v6696_v1 }
0x17a4   : > { %4163 = vmax.xlane.f32.xlu1 %v4162_v44  ;;  %4160 = vmax.xlane.f32.xlu0 %v4159_v46  ;;  %v4352_v33 = vsel %vm1470_vm12, %v4346_v29, 0 }
0x1829   : > { %v4158_v47 = vpop.xlane.xlu0 %4157  ;;  %v4155_v52 = vpop.xlane.xlu1 %4154 }
0x182a   : > { %v4166_v53 = vsub.f32 %v4150_v24, %v4158_v47  ;;  %v4165_v55 = vsub.f32 %v4149_v25, %v4155_v52  ;;  %v4302_v25 = vsel %vm1470_vm12, %v4296_v22, 0 }
0x182c   : > { %v4171_v10 = vmul.f32 1.442695, %v4166_v53  ;;  %v4169_v56 = vmul.f32 1.442695, %v4165_v55 }
0x182e   : > { %6416 = vpow2.f32 %v4171_v10  ;;  %v6336_v10 = vld [vmem:[#allocation10 + $0x40] sm:$0xff]  }
0x182f   : > { %6418 = vpow2.f32 %v4169_v56  ;;  %v6337_v56 = vld [vmem:[#allocation10 + $0x48] sm:$0xff]  }
0x1831   : > { %v4164_v62 = vpop.xlane.xlu1 %4163  ;;  %v4161_v58 = vpop.xlane.xlu0 %4160 }
0x1832   : > { %v4168_v59 = vsub.f32 %v4152_v42, %v4164_v62  ;;  %v4167_v60 = vsub.f32 %v4151_v43, %v4161_v58  ;;  %v5321_v43 = vld [vmem:[#allocation8 + $0x1] ss:$0 sm:$0xff] }
0x1834   : > { %v4175_v35 = vmul.f32 1.442695, %v4168_v59  ;;  %v4173_v63 = vmul.f32 1.442695, %v4167_v60 }
0x1836   : > { %6420 = vpow2.f32 %v4175_v35 }
0x1837   : > { %6422 = vpow2.f32 %v4173_v63  ;;  %v6338_v63 = vld [vmem:[#allocation10 + $0x50] sm:$0xff]  }
0x1838   : > { %v6417_v23 = vpop.eup %6416 }
0x1839   : > { %v6419_v2 = vpop.eup %6418  ;;  %v4180_v3 = vsel %vm1416_vm1, %v6417_v23, 0.0 }
0x183a   : > { %v4177_v4 = vsel %vm1416_vm1, %v6419_v2, 0.0  ;;  %4181 = vadd.xlane.f32.xlu0 %v4180_v3  ;;  %v6342_v3 = vld [vmem:[#allocation10 + $0x70] sm:$0xff]  }
0x183b   : > { %4178 = vadd.xlane.f32.xlu1 %v4177_v4  ;;  %v6343_v4 = vld [vmem:[#allocation10 + $0x78] sm:$0xff]  }
0x1840   : > { %v7839_v6 = vpop.eup %6420 }
0x1841   : > { %v6423_v5 = vpop.eup %6422  ;;  %v4186_v7 = vsel %vm1416_vm1, %v7839_v6, 0.0 }
0x1842   : > { %4187 = vadd.xlane.f32.xlu1 %v4186_v7  ;;  %v4183_v0 = vsel %vm1416_vm1, %v6423_v5, 0.0  ;;  %v6346_v7 = vld [vmem:[#allocation11 + $0x50] sm:$0xff]  }
0x1843   : > { %4184 = vadd.xlane.f32.xlu0 %v4183_v0  ;;  %v6347_v0 = vld [vmem:[#allocation11 + $0x58] sm:$0xff]  }
0x18c7   : > { %v4182_v57 = vpop.xlane.xlu0 %4181 }
0x18c8   : > { %6424 = vrcp.f32 %v4182_v57  ;;  %v4179_v48 = vpop.xlane.xlu1 %4178 }
0x18c9   : > { %6426 = vrcp.f32 %v4179_v48  ;;  %v5333_v48 = vld [vmem:[%s8015_s17 + $0x1] ss:$0 sm:$0xff] }
0x18cf   : > { %v4188_v26 = vpop.xlane.xlu1 %4187 }
0x18d0   : > { %v4185_v19 = vpop.xlane.xlu0 %4184 }
0x18d1   : > { %6428 = vrcp.f32 %v4185_v19 }
0x18d2   : > { %v6425_v15 = vpop.eup %6424  ;;  %6430 = vrcp.f32 %v4188_v26  ;;  %v5345_v26 = vld [vmem:[%s8019_s21 + $0x1] ss:$0 sm:$0xff] }
0x18d3   : > { %v4192_v16 = vmul.f32 %v6425_v15, %v6417_v23  ;;  %v6427_v20 = vpop.eup %6426  ;;  %v6340_v23 = vld [vmem:[#allocation10 + $0x60] sm:$0xff]  }
0x18d4   : > { %v4190_v21 = vmul.f32 %v6427_v20, %v6419_v2  ;;  %v6341_v2 = vld [vmem:[#allocation10 + $0x68] sm:$0xff]  }
0x18d5   : > { %v4202_v18 = vpack.c.bf16 %v4192_v16, %v4192_v16 }
0x18d6   : > { %v4199_v24 = vpack.c.bf16 %v4190_v21, %v4190_v21 }
0x18d7   : > { %5903 = vmatmul.mubr.msk.bf16.vlgmr.msra.gmra.mrb[56].mxu0 %vm1416_vm1, %v4202_v18  ;;  %v6351_v18 = vld [vmem:[#allocation11 + $0x78] sm:$0xff]  }
0x18d8   : > { %5907 = vmatpush3.bf16.msra.mxu0 %v4253_v41  ;;  %5908 = vmatprep.mubr.msk.bf16.mxu0 %vm6697_vm0, %v6696_v1  ;;  %v5335_v41 = vld [vmem:[%s8017_s19 + $0x1] ss:$0 sm:$0xff] }
0x18d9   : > { %5912 = vmatprep.subr.bf16.mxu0 %v6696_v1 }
0x18db   : > { %v6429_v27 = vpop.eup %6428 }
0x18dc   : > { %v4194_v51 = vmul.f32 %v6429_v27, %v6423_v5  ;;  %v6431_v36 = vpop.eup %6430  ;;  %v6345_v5 = vld [vmem:[#allocation11 + $0x48] sm:$0xff]  }
0x18dd   : > { %v4196_v37 = vmul.f32 %v6431_v36, %v7839_v6  ;;  %v6344_v6 = vld [vmem:[#allocation11 + $0x40] sm:$0xff]  }
0x18de   : > { %v4297_v30 = vpack.c.bf16 %v4194_v51, %v4194_v51  ;;  %v6352_v36 = vld [vmem:[%s8110_s28] sm:$0xff]   ;;  %s6609_s28 = sshll.u32 %s6698_s15, 4  ;;  %s6610_s28 = int_to_ptr.vmem [resolvable:$false] %s6609_s28 }
0x18df   : > { %v4347_v38 = vpack.c.bf16 %v4196_v37, %v4196_v37  ;;  %v6353_v37 = vld [vmem:[%s8111_s25 + $0x8] sm:$0xff]   ;;  %s6611_s3 = scalar_lea.vmem %s6610_s28, 256  ;;  %p6612_p5 = scmp.lt.s32.totalorder %s7958_s2, %s6610_s28 }
0x18e0   : > { %p6613_p0 = scmp.lt.s32.totalorder %s6611_s3, %s6605_s8 }
0x18e2   : > { %p6614_p10 = por %p6613_p0, %p6612_p5 }
0x18e3   : > { %5909 = vmatmul.mubr.msk.bf16.vlgmr.msra.gmra.mrb[56].mxu0 %vm1416_vm1, %v4199_v24 }
0x18e4   : > { %5913 = vmatpush3.bf16.msra.mxu0 %v4302_v25  ;;  %5914 = vmatprep.mubr.msk.bf16.mxu0 %vm6697_vm0, %v6696_v1  ;;  %p6615_p2 = pnand %p6614_p10, %p6608_p9 }
0x18e5   : > { %5918 = vmatprep.subr.bf16.mxu0 %v6696_v1 }
0x18ef   : > { %5915 = vmatmul.mubr.msk.bf16.vlgmr.msra.gmra.mrb[56].mxu0 %vm1416_vm1, %v4297_v30 }
0x18f0   : > { %5919 = vmatpush3.bf16.msra.mxu0 %v4352_v33  ;;  %5920 = vmatprep.mubr.msk.bf16.mxu0 %vm6697_vm0, %v6696_v1 }
0x18f1   : > { %5944 = vmatprep.subr.bf16.mxu0 %v6696_v1 }
0x18fb   : > { %5921 = vmatmul.mubr.msk.bf16.vlgmr.msra.gmra.mrb[56].mxu0 %vm1416_vm1, %v4347_v38 }
0x18fc   : > { %5960 = vmatprep.mubr.msk.bf16.mxu0 %vm6697_vm0, %v6696_v1  ;;  %5945 = vmatpush3.bf16.msra.mxu0 %v6336_v10  ;;  %v5356_v10 = vld [vmem:[%s8020_s22 + $0x1] ss:$0 sm:$0xff] }
0x18fd   : > { %5946 = vmatprep.subr.bf16.mxu0 %v6696_v1 }
0x1900   : > { %5947 = vmatpush3.bf16.msra.mxu0 %v6337_v56 }
0x1901   : > { %5948 = vmatprep.subr.bf16.mxu0 %v6696_v1 }
0x1904   : > { %5949 = vmatpush3.bf16.msra.mxu0 %v6338_v63 }
0x1905   : > { %5950 = vmatprep.subr.bf16.mxu0 %v6696_v1 }
0x19ce   : > { %v4388_v34 = vpop.f32.mrb[56].mxu0 }
0x19cf   : > { %v4395_v39 = vpack.c.bf16 %v4388_v34, %v4388_v34  ;;  %v5922_v40 = vpop.f32.mrb[57].mxu0 }
0x19d0   : > { %v4391_v61 = vpop.f32.mrb[58].mxu0 }
0x19d1   : > { %v5923_v42 = vpop.f32.mrb[59].mxu0  ;;  %5941 = vmatmul.mubr.bf16.vlgmr.msra.gmra.mrb[72].mxu1 %v4395_v39  ;;  %v6354_v61 = vld [vmem:[%s8111_s25 + $0x10] sm:$0xff]  }
0x19d2   : > { %5980 = vmatprep.mubr.msk.bf16.mxu1 %vm6697_vm0, %v6696_v1  ;;  %5965 = vmatpush3.bf16.msra.mxu1 %v6344_v6  ;;  %v6355_v42 = vld [vmem:[%s8111_s25 + $0x18] sm:$0xff]  }
0x19d3   : > { %5966 = vmatprep.subr.bf16.mxu1 %v6696_v1 }
0x19d6   : > { %5967 = vmatpush3.bf16.msra.mxu1 %v6345_v5 }
0x19d7   : > { %5968 = vmatprep.subr.bf16.mxu1 %v6696_v1 }
0x19da   : > { %5969 = vmatpush3.bf16.msra.mxu1 %v6346_v7 }
0x19db   : > { %5970 = vmatprep.subr.bf16.mxu1 %v6696_v1 }
0x19de   : > { %5971 = vmatpush3.bf16.msra.mxu1 %v6347_v0 }
0x19df   : > { %5972 = vmatprep.subr.bf16.mxu1 %v6696_v1 }
0x19e2   : > { %5973 = vmatpush3.bf16.msra.mxu1 %v6348_v8 }
0x19e3   : > { %5974 = vmatprep.subr.bf16.mxu1 %v6696_v1 }
0x19e6   : > { %5975 = vmatpush3.bf16.msra.mxu1 %v6349_v9 }
0x19e7   : > { %5976 = vmatprep.subr.bf16.mxu1 %v6696_v1 }
0x19ea   : > { %5977 = vmatpush3.bf16.msra.mxu1 %v6350_v17 }
0x19eb   : > { %5978 = vmatprep.subr.bf16.mxu1 %v6696_v1 }
0x19ee   : > { %5979 = vmatpush3.bf16.msra.mxu1 %v6351_v18 }
0x1aa4   : > { %v4484_v44 = vpop.f32.mrb[72].mxu1 }
0x1aa5   : > { %v4485_v46 = vadd.f32 %v5321_v43, %v4484_v44  ;;  %v5942_v47 = vpop.f32.mrb[73].mxu1  ;;  %v6357_v43 = vld [vmem:[%s8111_s25 + $0x28] sm:$0xff]   ;;  %v6358_v44 = vld [vmem:[%s8111_s25 + $0x30] sm:$0xff]  }
0x1aa6   : > { %v4487_v52 = vpop.f32.mrb[74].mxu1 }
0x1aa7   : > { %v5943_v53 = vpop.f32.mrb[75].mxu1  ;;  %v4494_v55 = vadd.f32 %v4485_v46, %v7792_v50  ;;  %v6339_v50 = vld [vmem:[#allocation10 + $0x58] sm:$0xff]  }
0x1aa8   : > { %5951 = vmatpush3.bf16.msra.mxu0 %v6339_v50  ;;  %v6359_v46 = vld [vmem:[%s8111_s25 + $0x38] sm:$0xff]  }
0x1aa9   : > { %4495 = vadd.xlane.f32.xlu0 %v4494_v55  ;;  %5952 = vmatprep.subr.bf16.mxu0 %v6696_v1 }
0x1aac   : > { %5953 = vmatpush3.bf16.msra.mxu0 %v6340_v23 }
0x1aad   : > { %5954 = vmatprep.subr.bf16.mxu0 %v6696_v1 }
0x1ab0   : > { %5955 = vmatpush3.bf16.msra.mxu0 %v6341_v2 }
0x1ab1   : > { %5956 = vmatprep.subr.bf16.mxu0 %v6696_v1 }
0x1ab4   : > { %5957 = vmatpush3.bf16.msra.mxu0 %v6342_v3 }
0x1ab5   : > { %5958 = vmatprep.subr.bf16.mxu0 %v6696_v1 }
0x1ab8   : > { %5959 = vmatpush3.bf16.msra.mxu0 %v6343_v4 }
0x1ab9   : > { %5984 = vmatprep.subr.bf16.mxu0 %v6696_v1 }
0x1b36   : > { %v4496_v62 = vpop.xlane.xlu0 %4495 }
0x1b37   : > { %v4497_v58 = vmul.f32 0.03125, %v4496_v62  ;;  %v5357_v62 = vld [vmem:[%s8109_s30 + $0x1] ss:$0 sm:$0xff] }
0x1b39   : > { %v4498_v59 = vsub.f32 %v4494_v55, %v4497_v58 }
0x1b3b   : > { %v4499_v60 = vmul.f32 %v7348_v12, %v4498_v59 }
0x1b3d   : > { %v4500_v35 = vmul.f32 %v4499_v60, %v4499_v60 }
0x1b3f   : > { %4501 = vadd.xlane.f32.xlu1 %v4500_v35 }
0x1bcc   : > { %v4502_v49 = vpop.xlane.xlu1 %4501 }
0x1bcd   : > { %v4503_v32 = vmul.f32 0.03125, %v4502_v49 }
0x1bcf   : > { %v4504_v11 = vadd.f32 1e-12, %v4503_v32 }
0x1bd1   : > { %6432 = vrsqrt.f32 %v4504_v11 }
0x1bdb   : > { %v6433_v13 = vpop.eup %6432 }
0x1bdc   : > { %v4506_v57 = vmul.f32 %v6433_v13, %v4499_v60 }
0x1bde   : > { %v4513_v14 = vmul.f32 %v5332_v31, %v4506_v57 }
0x1be0   : > { %v4520_v15 = vadd.f32 %v5333_v48, %v4513_v14 }
0x1be2   : > { %v4521_v16 = vpack.c.bf16 %v4520_v15, %v4520_v15 }
0x1be4   : > { %5961 = vmatmul.mubr.bf16.vlgmr.msra.gmra.mrb[60].mxu0 %v4521_v16 }
0x1be5   : > { %6000 = vmatprep.mubr.msk.bf16.mxu0 %vm6697_vm0, %v6696_v1  ;;  %5985 = vmatpush3.bf16.msra.mxu0 %v6352_v36 }
0x1be6   : > { %5986 = vmatprep.subr.bf16.mxu0 %v6696_v1 }
0x1be9   : > { %5987 = vmatpush3.bf16.msra.mxu0 %v6353_v37 }
0x1bea   : > { %5988 = vmatprep.subr.bf16.mxu0 %v6696_v1 }
0x1bed   : > { %5989 = vmatpush3.bf16.msra.mxu0 %v6354_v61 }
0x1bee   : > { %5990 = vmatprep.subr.bf16.mxu0 %v6696_v1 }
0x1bf1   : > { %5991 = vmatpush3.bf16.msra.mxu0 %v6355_v42 }
0x1bf2   : > { %5992 = vmatprep.subr.bf16.mxu0 %v6696_v1 }
0x1cb7   : > { %v4629_v19 = vpop.f32.mrb[60].mxu0 }
0x1cb8   : > { %v4630_v20 = vadd.f32 %v5335_v41, %v4629_v19  ;;  %v5962_v45 = vpop.f32.mrb[61].mxu0 }
0x1cb9   : > { %v4632_v21 = vpop.f32.mrb[62].mxu0 }
0x1cba   : > { %v4635_v22 = vmax.f32 %v4630_v20, 0.0  ;;  %v5963_v24 = vpop.f32.mrb[63].mxu0 }
0x1cbc   : > { %v4636_v25 = vpack.c.bf16 %v4635_v22, %v4635_v22 }
0x1cbe   : > { %5981 = vmatmul.mubr.bf16.vlgmr.msra.gmra.mrb[76].mxu1 %v4636_v25 }
0x1d91   : > { %v4744_v27 = vpop.f32.mrb[76].mxu1 }
0x1d92   : > { %v4745_v28 = vadd.f32 %v5345_v26, %v4744_v27  ;;  %v5982_v51 = vpop.f32.mrb[77].mxu1 }
0x1d93   : > { %v4747_v29 = vpop.f32.mrb[78].mxu1 }
0x1d94   : > { %v5983_v30 = vpop.f32.mrb[79].mxu1  ;;  %v4754_v33 = vadd.f32 %v4745_v28, %v4520_v15 }
0x1d96   : > { %4755 = vadd.xlane.f32.xlu0 %v4754_v33 }
0x1e23   : > { %v4756_v38 = vpop.xlane.xlu0 %4755 }
0x1e24   : > { %v4757_v54 = vmul.f32 0.03125, %v4756_v38 }
0x1e26   : > { %v4758_v34 = vsub.f32 %v4754_v33, %v4757_v54 }
0x1e28   : > { %v4759_v39 = vmul.f32 %v7348_v12, %v4758_v34  ;;  %v6356_v12 = vld [vmem:[%s8111_s25 + $0x20] sm:$0xff]  }
0x1e29   : > { %5993 = vmatpush3.bf16.msra.mxu0 %v6356_v12 }
0x1e2a   : > { %v4760_v40 = vmul.f32 %v4759_v39, %v4759_v39  ;;  %5994 = vmatprep.subr.bf16.mxu0 %v6696_v1 }
0x1e2c   : > { %4761 = vadd.xlane.f32.xlu1 %v4760_v40 }
0x1e2d   : > { %5995 = vmatpush3.bf16.msra.mxu0 %v6357_v43 }
0x1e2e   : > { %5996 = vmatprep.subr.bf16.mxu0 %v6696_v1 }
0x1e31   : > { %5997 = vmatpush3.bf16.msra.mxu0 %v6358_v44 }
0x1e32   : > { %5998 = vmatprep.subr.bf16.mxu0 %v6696_v1  ;;  %v5358_v1 = vld [vmem:[%s8113_s27] ss:$0 sm:$0xff] }
0x1e35   : > { %5999 = vmatpush3.bf16.msra.mxu0 %v6359_v46 }
0x1eb9   : > { %v4762_v47 = vpop.xlane.xlu1 %4761 }
0x1eba   : > { %v4763_v52 = vmul.f32 0.03125, %v4762_v47 }
0x1ebc   : > { %v4764_v53 = vadd.f32 1e-12, %v4763_v52 }
0x1ebe   : > { %6434 = vrsqrt.f32 %v4764_v53 }
0x1ec8   : > { %v6435_v55 = vpop.eup %6434 }
0x1ec9   : > { %v4766_v56 = vmul.f32 %v6435_v55, %v4759_v39 }
0x1ecb   : > { %v4773_v58 = vmul.f32 %v5356_v10, %v4766_v56 }
0x1ecd   : > { %v4780_v59 = vadd.f32 %v5357_v62, %v4773_v58 }
0x1ecf   : > { %v4781_v60 = vpack.c.bf16 %v4780_v59, %v4780_v59 }
0x1ed1   : > { %6001 = vmatmul.mubr.bf16.vlgmr.msra.gmra.mrb[64].mxu0 %v4781_v60 }
0x1fa4   : > { %v4887_v35 = vpop.f32.mrb[64].mxu0 }
0x1fa5   : > { %v4888_v63 = vadd.f32 %v5358_v1, %v4887_v35  ;;  %v6002_v50 = vpop.f32.mrb[65].mxu0 }
0x1fa6   : > { %v4890_v23 = vpop.f32.mrb[66].mxu0 }
0x1fa7   : > { %4893 = vst [vmem:[%s907_s1] sm:$0xff] %v4888_v63  ;;  %v6003_v2 = vpop.f32.mrb[67].mxu0 }
0x1fa8   : > { %6618 = shalt.err (!%p6615_p2)
}
0x1fa9   : > { %s6619_s1 = scalar_lea.hbm %s7956_s4, 128  ;;  %s6623_s27 = scalar_lea.hbm %s8115_s11, 256 }
0x1faa   : > { %p6620_p3 = scmp.ne.s32.totalorder %s7956_s4, %s6619_s1  ;;  %p6624_p7 = scmp.lt.u32.totalorder %s7956_s4, %s8115_s11 }
0x1fab   : > { %p6625_p8 = scmp.lt.u32.totalorder %s6623_s27, %s6619_s1  ;;  %p6627_p13 = scmp.lt.u32.totalorder %s6619_s1, %s7956_s4 }
0x1fac   : > { %p6621_p4 = pnand %p6620_p3, %p8116_p1 }
0x1fad   : > { %p6626_p11 = por %p6625_p8, %p6624_p7 }
0x1fae   : > { %p6622_p12 = pneg %p6621_p4 }
0x1faf   : > { %p6628_p6 = por %p6627_p13, %p6626_p11 }
0x1fb1   : > { %p6629_p9 = pnand %p6628_p6, %p6622_p12 }
0x1fb3   : > { %6632 = shalt.err (!%p6629_p9)
}
0x1fb4   : > { %6076 = dma.vmem_to_hbm [thread:$0]  (%p8116_p1), %s7958_s2, 128, %s7956_s4, %s4895_s9  }
0x1fb5 PF: > { %s8117_s8 = sld [smem:[#allocation22_spill]]  ;;  %s8118_s15 = sld [smem:[#allocation19_spill]] }
0x1fb6   : > { %s8119_s28 = sld [smem:[#allocation26_spill]] }
0x1fbb   : > { %p6113_p5 = scmp.ge.s32.totalorder %s8117_s8, 2  ;;  %s4920_s3 = sand.u32 1, %s8118_s15  }
0x1fbc   : > { %p8120_p0 = scmp.ne.s32.totalorder %s8119_s28, 0  ;;  %s4921_s0 = scalar_lea.sflag [#allocation4], %s4920_s3 }
0x1fbe   : > { %p6098_p10 = pnand %p6113_p5, %p8120_p0 }
0x1fc0   : > { %6666 = dma.done.wait (!%p6098_p10), %s4921_s0, 128  }
0x1fc1   : > { %6668 = vsyncadd (!%p6098_p10), %s4921_s0, 4294967168  ;;  %s8121_s28 = sld [smem:[#allocation23_spill]]  ;;  %s8122_s27 = sld [smem:[#allocation20_spill]] }
0x1fc2   : > { %s8123_s3 = sld [smem:[#allocation21_spill]]  ;;  %s8124_s7 = sld [smem:[#allocation24_spill]] }
0x1fc7   : > { %p40_p2 = scmp.ge.s32.totalorder %s8121_s28, 4  }
0x1fc9   :  { %42 = sbr.rel (!%p40_p2) target bundleno = 25 (0x19), region = 213 }
0x1fd0   :  { %4926 = vsyncpa [#allocation3], 1 }
0x1fd1   :  { %4928 = vsyncpa [#allocation3 + $0x1], 1 }
0x1fd2   :  { %4929 = vsyncpa [#allocation6], 1 }
0x1fd3   :  { %4930 = vsyncpa [#allocation9], 1 }
0x1fd4   :  { %4931 = vsyncpa [#allocation12], 1 }
0x1fd5   :  { %4932 = vsyncpa [#allocation4], 1 }
0x1fd6   :  { %4934 = vsyncpa [#allocation4 + $0x1], 1 }

</bundles_post_ra>
